<compile_context>
chip_gen: v6e
topology: v6e:2x2x1
jax: 0.10.0
libtpu: 0.0.40
codegen_flags: <defaults>
</compile_context>

<pallas_src>
import functools

import jax
import jax.numpy as jnp
from jax.experimental import pallas as pl
from jax.experimental.pallas import tpu as pltpu

HIDDEN = 1200
HIDDEN_PAD = 1280  # 10 * 128 -> clean MXU / vreg tiles


def _round_up(x, m):
    return (x + m - 1) // m * m


def _choose_batch_tile(B, block_b=256):
    """Pick (tb, b_pad): prefer >=2 tiles when B allows (v7x megacore) and
    minimize padded-row waste vs per-grid-step overhead."""
    B = max(int(B), 1)
    cands = [t for t in (256, 128, 64, 32, 16, 8) if t <= block_b]
    if B >= 16:
        multi = [t for t in cands if _round_up(B, t) // t >= 2]
        if multi:
            cands = multi
    best = None
    for t in cands:
        b_pad = _round_up(B, t)
        n_tiles = b_pad // t
        # ~16 padded rows of MXU work ~= one grid-step overhead (~0.35 us).
        cost = (b_pad - B) + 16 * n_tiles
        key = (cost, -t)
        if best is None or key < best[0]:
            best = (key, t, b_pad)
    return best[1], best[2]


# ----------------------------------------------------------------------------
# Kernel A (grid == 1, latency regime): manual DMA overlap for later layers.
# ----------------------------------------------------------------------------
def _encoder_overlap_kernel(x_ref, w1_ref, b1_ref,
                            w2_hbm, b2_hbm, w3_hbm, b3_hbm, wh_hbm, bh_hbm,
                            head_ref,
                            w2_v, b2_v, w3_v, b3_v, wh_v, bh_v, sems):
    # Kick off fc2/fc3/head weight DMAs; they stream in under fc1/fc2 compute.
    cp_w2 = pltpu.make_async_copy(w2_hbm, w2_v, sems.at[0])
    cp_b2 = pltpu.make_async_copy(b2_hbm, b2_v, sems.at[1])
    cp_w3 = pltpu.make_async_copy(w3_hbm, w3_v, sems.at[2])
    cp_b3 = pltpu.make_async_copy(b3_hbm, b3_v, sems.at[3])
    cp_wh = pltpu.make_async_copy(wh_hbm, wh_v, sems.at[4])
    cp_bh = pltpu.make_async_copy(bh_hbm, bh_v, sems.at[5])
    cp_w2.start(); cp_b2.start()
    cp_w3.start(); cp_b3.start()
    cp_wh.start(); cp_bh.start()

    # fc1 + ReLU (x / w1 already in VMEM via the normal pipeline prologue).
    h = jnp.dot(x_ref[...], w1_ref[...], preferred_element_type=jnp.float32)
    h = jnp.maximum(h + b1_ref[...], 0.0).astype(jnp.bfloat16)

    # fc2 + ReLU
    cp_w2.wait(); cp_b2.wait()
    h = jnp.dot(h, w2_v[...], preferred_element_type=jnp.float32)
    h = jnp.maximum(h + b2_v[...], 0.0).astype(jnp.bfloat16)

    # fc3 + ReLU
    cp_w3.wait(); cp_b3.wait()
    h = jnp.dot(h, w3_v[...], preferred_element_type=jnp.float32)
    h = jnp.maximum(h + b3_v[...], 0.0).astype(jnp.bfloat16)

    # fused (mean | logvar) head -> single lane-dense store
    cp_wh.wait(); cp_bh.wait()
    head_ref[...] = (jnp.dot(h, wh_v[...], preferred_element_type=jnp.float32)
                     + bh_v[...]).astype(head_ref.dtype)


# ----------------------------------------------------------------------------
# Kernel B (grid >= 2, throughput regime): VMEM-resident (single-buffered)
# weights, batch tiles shardable across TensorCores.
# ----------------------------------------------------------------------------
def _encoder_resident_kernel(x_ref, w1_ref, b1_ref, w2_ref, b2_ref,
                             w3_ref, b3_ref, wh_ref, bh_ref, head_ref):
    h = jnp.dot(x_ref[...], w1_ref[...], preferred_element_type=jnp.float32)
    h = jnp.maximum(h + b1_ref[...], 0.0).astype(jnp.bfloat16)
    h = jnp.dot(h, w2_ref[...], preferred_element_type=jnp.float32)
    h = jnp.maximum(h + b2_ref[...], 0.0).astype(jnp.bfloat16)
    h = jnp.dot(h, w3_ref[...], preferred_element_type=jnp.float32)
    h = jnp.maximum(h + b3_ref[...], 0.0).astype(jnp.bfloat16)
    head_ref[...] = (jnp.dot(h, wh_ref[...], preferred_element_type=jnp.float32)
                     + bh_ref[...]).astype(head_ref.dtype)


# ----------------------------------------------------------------------------
# Parameter packing: pad to lane-aligned widths, fuse heads, cast to bf16.
# Zero-padding keeps the math identical (ReLU(0)=0, zero rows contribute 0).
# ----------------------------------------------------------------------------
def pack_params(params, n_dims_in):
    w1, b1, w2, b2, w3, b3, wm, bm, wl, bl = params
    n_latent = wm.shape[1]
    d_in_pad = _round_up(n_dims_in, 128)
    head_pad = _round_up(2 * n_latent, 128)

    def pad_w(w, rows, cols):
        return jnp.pad(w, ((0, rows - w.shape[0]), (0, cols - w.shape[1])))

    def pad_b(b, cols):
        return jnp.pad(b, ((0, 0), (0, cols - b.shape[1])))

    wh = jnp.concatenate([wm, wl], axis=1)
    bh = jnp.concatenate([bm, bl], axis=1)

    return (
        pad_w(w1, d_in_pad, HIDDEN_PAD).astype(jnp.bfloat16),
        pad_b(b1, HIDDEN_PAD),
        pad_w(w2, HIDDEN_PAD, HIDDEN_PAD).astype(jnp.bfloat16),
        pad_b(b2, HIDDEN_PAD),
        pad_w(w3, HIDDEN_PAD, HIDDEN_PAD).astype(jnp.bfloat16),
        pad_b(b3, HIDDEN_PAD),
        pad_w(wh, HIDDEN_PAD, head_pad).astype(jnp.bfloat16),
        pad_b(bh, head_pad),
    )


# ----------------------------------------------------------------------------
# Forward wrapper.
# ----------------------------------------------------------------------------
def dfve_forward(x, packed, *, n_latent, block_b=256):
    """x: (B, C, H, W) float32. Returns (z_mean, z_logvar), each (B, n_latent)."""
    B = x.shape[0]
    n_dims_in = x.shape[1] * x.shape[2] * x.shape[3]
    w1, b1, w2, b2, w3, b3, wh, bh = packed
    d_in_pad = w1.shape[0]
    head_pad = wh.shape[1]

    tb, b_pad = _choose_batch_tile(B, block_b)
    n_tiles = b_pad // tb

    # Flatten (row-major, same as torch .reshape), cast to bf16 (half the HBM
    # stream), pad only when actually needed.
    xf = x.reshape(B, n_dims_in).astype(jnp.bfloat16)
    if (b_pad, d_in_pad) != (B, n_dims_in):
        xf = jnp.pad(xf, ((0, b_pad - B), (0, d_in_pad - n_dims_in)))

    weight_bytes = sum(int(a.size) * a.dtype.itemsize for a in packed)
    flops = 2 * b_pad * (d_in_pad * HIDDEN_PAD
                         + 2 * HIDDEN_PAD * HIDDEN_PAD
                         + HIDDEN_PAD * head_pad)
    bytes_accessed = int(xf.size) * 2 + weight_bytes + b_pad * head_pad * 4
    cost = pl.CostEstimate(flops=flops, transcendentals=0,
                           bytes_accessed=bytes_accessed)

    # VMEM budget: weights single-buffered (resident or manual-DMA scratch),
    # x / out batch tiles double-buffered, plus f32-intermediate scratch and
    # fixed headroom.  Cap at 75% of physical VMEM (v7x has only 64 MiB).
    io_bytes = 2 * (tb * d_in_pad * 2 + tb * head_pad * 4)
    interm_bytes = 4 * tb * HIDDEN_PAD * 4
    needed = weight_bytes + io_bytes + interm_bytes + (8 << 20)
    try:
        vmem_cap = int(pltpu.get_tpu_info().vmem_capacity_bytes)
    except Exception:
        vmem_cap = 64 * 1024 * 1024  # conservative (v7x-sized) fallback
    vmem_limit = min(needed, int(vmem_cap * 0.75))

    x_spec = pl.BlockSpec((tb, d_in_pad), lambda i: (i, 0))
    out_spec = pl.BlockSpec((tb, head_pad), lambda i: (i, 0))
    vmem_full = pl.BlockSpec(memory_space=pltpu.MemorySpace.VMEM)
    any_spec = pl.BlockSpec(memory_space=pl.ANY)
    out_shape = jax.ShapeDtypeStruct((b_pad, head_pad), jnp.float32)

    if n_tiles == 1:
        # Latency path: overlap fc2/fc3/head weight DMA behind fc1/fc2 compute.
        head = pl.pallas_call(
            _encoder_overlap_kernel,
            out_shape=out_shape,
            grid=(1,),
            in_specs=[x_spec, vmem_full, vmem_full,
                      any_spec, any_spec, any_spec, any_spec, any_spec, any_spec],
            out_specs=out_spec,
            scratch_shapes=[
                pltpu.VMEM((HIDDEN_PAD, HIDDEN_PAD), jnp.bfloat16),  # w2
                pltpu.VMEM((1, HIDDEN_PAD), jnp.float32),            # b2
                pltpu.VMEM((HIDDEN_PAD, HIDDEN_PAD), jnp.bfloat16),  # w3
                pltpu.VMEM((1, HIDDEN_PAD), jnp.float32),            # b3
                pltpu.VMEM((HIDDEN_PAD, head_pad), jnp.bfloat16),    # wh
                pltpu.VMEM((1, head_pad), jnp.float32),              # bh
                pltpu.SemaphoreType.DMA((6,)),
            ],
            compiler_params=pltpu.CompilerParams(
                dimension_semantics=("arbitrary",),
                vmem_limit_bytes=vmem_limit),
            cost_estimate=cost,
        )(xf, *packed)
    else:
        # Throughput path: weights fully VMEM-resident (single copy), batch
        # tiles marked parallel so v7x megacore can split them across cores.
        head = pl.pallas_call(
            _encoder_resident_kernel,
            out_shape=out_shape,
            grid=(n_tiles,),
            in_specs=[x_spec] + [vmem_full] * 8,
            out_specs=out_spec,
            compiler_params=pltpu.CompilerParams(
                dimension_semantics=("parallel",),
                vmem_limit_bytes=vmem_limit),
            cost_estimate=cost,
        )(xf, *packed)

    z_mean = head[:B, :n_latent]
    z_logvar = head[:B, n_latent:2 * n_latent]
    return z_mean, z_logvar


# ----------------------------------------------------------------------------
# PyTorch-style initialization (weights stored transposed: (in, out)).
# ----------------------------------------------------------------------------
def init_linear(key, fan_in, fan_out):
    kw, kb = jax.random.split(key)
    bound = 1.0 / jnp.sqrt(float(fan_in))
    w = jax.random.uniform(kw, (fan_in, fan_out), jnp.float32, -bound, bound)
    b = jax.random.uniform(kb, (1, fan_out), jnp.float32, -bound, bound)
    return w, b


def init_params(key, image_channels, image_size, n_latent):
    n_dims_in = image_channels * image_size * image_size
    keys = jax.random.split(key, 5)
    w1, b1 = init_linear(keys[0], n_dims_in, HIDDEN)
    w2, b2 = init_linear(keys[1], HIDDEN, HIDDEN)
    w3, b3 = init_linear(keys[2], HIDDEN, HIDDEN)
    wm, bm = init_linear(keys[3], HIDDEN, n_latent)
    wl, bl = init_linear(keys[4], HIDDEN, n_latent)
    return (w1, b1, w2, b2, w3, b3, wm, bm, wl, bl)


if __name__ == "__main__":
    # DFVE(image_channels=4, image_size=16, n_latent=32)
    C, H, W = 4, 16, 16
    n_latent = 32

    key = jax.random.PRNGKey(0)
    kx, kp = jax.random.split(key)
    params = init_params(kp, C, H, n_latent)
    n_dims_in = C * H * W
    packed = jax.tree_util.tree_map(jax.device_put, pack_params(params, n_dims_in))

    fwd = jax.jit(functools.partial(dfve_forward, n_latent=n_latent))

    # Plain-JAX reference using the same bf16-input / f32-accumulation recipe.
    def ref_forward(x):
        (w1, b1, w2, b2, w3, b3, wm, bm, wl, bl) = params
        xf = x.reshape(x.shape[0], -1)

        def layer(h, w, b):
            y = jnp.dot(h.astype(jnp.bfloat16), w.astype(jnp.bfloat16),
                        preferred_element_type=jnp.float32) + b
            return jnp.maximum(y, 0.0)

        h = layer(xf, w1, b1)
        h = layer(h, w2, b2)
        h = layer(h, w3, b3)
        mean = jnp.dot(h.astype(jnp.bfloat16), wm.astype(jnp.bfloat16),
                       preferred_element_type=jnp.float32) + bm
        logvar = jnp.dot(h.astype(jnp.bfloat16), wl.astype(jnp.bfloat16),
                         preferred_element_type=jnp.float32) + bl
        return mean, logvar

    # B=2 exercises the single-tile latency path (manual DMA overlap kernel);
    # B=40 exercises the multi-tile path (VMEM-resident weights, 2 batch tiles).
    for B in (2, 40):
        x = jax.random.normal(jax.random.fold_in(kx, B), (B, C, H, W), jnp.float32)
        z_mean, z_logvar = fwd(x, packed)
        jax.block_until_ready((z_mean, z_logvar))
        ref_mean, ref_logvar = ref_forward(x)
        assert z_mean.shape == (B, n_latent) and z_logvar.shape == (B, n_latent)
        assert jnp.allclose(z_mean, ref_mean, atol=1e-2, rtol=1e-2)
        assert jnp.allclose(z_logvar, ref_logvar, atol=1e-2, rtol=1e-2)

    print("KERNEL_OK")
</pallas_src>

<mosaic_0001>
module attributes {stable_mosaic.version = 11 : i64} {
  func.func @_encoder_overlap_kernel(%arg0: i32, %arg1: memref<8x1024xbf16, #tpu.memory_space<vmem>>, %arg2: memref<1024x1280xbf16, #tpu.memory_space<vmem>>, %arg3: memref<1x1280xf32, #tpu.memory_space<vmem>>, %arg4: memref<1280x1280xbf16, #tpu.memory_space<any>>, %arg5: memref<1x1280xf32, #tpu.memory_space<any>>, %arg6: memref<1280x1280xbf16, #tpu.memory_space<any>>, %arg7: memref<1x1280xf32, #tpu.memory_space<any>>, %arg8: memref<1280x128xbf16, #tpu.memory_space<any>>, %arg9: memref<1x128xf32, #tpu.memory_space<any>>, %arg10: memref<8x128xf32, #tpu.memory_space<vmem>>, %arg11: memref<1280x1280xbf16, #tpu.memory_space<vmem>>, %arg12: memref<1x1280xf32, #tpu.memory_space<vmem>>, %arg13: memref<1280x1280xbf16, #tpu.memory_space<vmem>>, %arg14: memref<1x1280xf32, #tpu.memory_space<vmem>>, %arg15: memref<1280x128xbf16, #tpu.memory_space<vmem>>, %arg16: memref<1x128xf32, #tpu.memory_space<vmem>>, %arg17: memref<6x!tpu.dma_semaphore, #tpu.memory_space<semaphore_mem>>) attributes {dimension_semantics = [#tpu.dimension_semantics<arbitrary>], iteration_bounds = array<i64: 1>, scalar_prefetch = 0 : i64, scratch_operands = 7 : i64, tpu.core_type = #tpu.core_type<tc>, window_params = [{transform_indices = @transform_0, window_bounds = array<i64: 8, 1024>}, {pipeline_mode = #tpu.pipeline_mode<synchronous>, transform_indices = @transform_1, window_bounds = array<i64: 1024, 1280>}, {pipeline_mode = #tpu.pipeline_mode<synchronous>, transform_indices = @transform_2, window_bounds = array<i64: 1, 1280>}, {}, {}, {}, {}, {}, {}, {transform_indices = @transform_9, window_bounds = array<i64: 8, 128>}]} {
    %c0_i32 = arith.constant 0 : i32
    %0 = tpu.memref_slice %arg17[%c0_i32] : memref<6x!tpu.dma_semaphore, #tpu.memory_space<semaphore_mem>> -> memref<1x!tpu.dma_semaphore, #tpu.memory_space<semaphore_mem>>
    %1 = tpu.memref_squeeze %0 : memref<1x!tpu.dma_semaphore, #tpu.memory_space<semaphore_mem>> -> memref<!tpu.dma_semaphore, #tpu.memory_space<semaphore_mem>>
    tpu.enqueue_dma source(%arg4 : memref<1280x1280xbf16, #tpu.memory_space<any>>) target(%arg11 : memref<1280x1280xbf16, #tpu.memory_space<vmem>>) target_semaphore(%1 : memref<!tpu.dma_semaphore, #tpu.memory_space<semaphore_mem>>)
    %c1_i32 = arith.constant 1 : i32
    %2 = tpu.memref_slice %arg17[%c1_i32] : memref<6x!tpu.dma_semaphore, #tpu.memory_space<semaphore_mem>> -> memref<1x!tpu.dma_semaphore, #tpu.memory_space<semaphore_mem>>
    %3 = tpu.memref_squeeze %2 : memref<1x!tpu.dma_semaphore, #tpu.memory_space<semaphore_mem>> -> memref<!tpu.dma_semaphore, #tpu.memory_space<semaphore_mem>>
    tpu.enqueue_dma source(%arg5 : memref<1x1280xf32, #tpu.memory_space<any>>) target(%arg12 : memref<1x1280xf32, #tpu.memory_space<vmem>>) target_semaphore(%3 : memref<!tpu.dma_semaphore, #tpu.memory_space<semaphore_mem>>)
    %c2_i32 = arith.constant 2 : i32
    %4 = tpu.memref_slice %arg17[%c2_i32] : memref<6x!tpu.dma_semaphore, #tpu.memory_space<semaphore_mem>> -> memref<1x!tpu.dma_semaphore, #tpu.memory_space<semaphore_mem>>
    %5 = tpu.memref_squeeze %4 : memref<1x!tpu.dma_semaphore, #tpu.memory_space<semaphore_mem>> -> memref<!tpu.dma_semaphore, #tpu.memory_space<semaphore_mem>>
    tpu.enqueue_dma source(%arg6 : memref<1280x1280xbf16, #tpu.memory_space<any>>) target(%arg13 : memref<1280x1280xbf16, #tpu.memory_space<vmem>>) target_semaphore(%5 : memref<!tpu.dma_semaphore, #tpu.memory_space<semaphore_mem>>)
    %c3_i32 = arith.constant 3 : i32
    %6 = tpu.memref_slice %arg17[%c3_i32] : memref<6x!tpu.dma_semaphore, #tpu.memory_space<semaphore_mem>> -> memref<1x!tpu.dma_semaphore, #tpu.memory_space<semaphore_mem>>
    %7 = tpu.memref_squeeze %6 : memref<1x!tpu.dma_semaphore, #tpu.memory_space<semaphore_mem>> -> memref<!tpu.dma_semaphore, #tpu.memory_space<semaphore_mem>>
    tpu.enqueue_dma source(%arg7 : memref<1x1280xf32, #tpu.memory_space<any>>) target(%arg14 : memref<1x1280xf32, #tpu.memory_space<vmem>>) target_semaphore(%7 : memref<!tpu.dma_semaphore, #tpu.memory_space<semaphore_mem>>)
    %c4_i32 = arith.constant 4 : i32
    %8 = tpu.memref_slice %arg17[%c4_i32] : memref<6x!tpu.dma_semaphore, #tpu.memory_space<semaphore_mem>> -> memref<1x!tpu.dma_semaphore, #tpu.memory_space<semaphore_mem>>
    %9 = tpu.memref_squeeze %8 : memref<1x!tpu.dma_semaphore, #tpu.memory_space<semaphore_mem>> -> memref<!tpu.dma_semaphore, #tpu.memory_space<semaphore_mem>>
    tpu.enqueue_dma source(%arg8 : memref<1280x128xbf16, #tpu.memory_space<any>>) target(%arg15 : memref<1280x128xbf16, #tpu.memory_space<vmem>>) target_semaphore(%9 : memref<!tpu.dma_semaphore, #tpu.memory_space<semaphore_mem>>)
    %c5_i32 = arith.constant 5 : i32
    %10 = tpu.memref_slice %arg17[%c5_i32] : memref<6x!tpu.dma_semaphore, #tpu.memory_space<semaphore_mem>> -> memref<1x!tpu.dma_semaphore, #tpu.memory_space<semaphore_mem>>
    %11 = tpu.memref_squeeze %10 : memref<1x!tpu.dma_semaphore, #tpu.memory_space<semaphore_mem>> -> memref<!tpu.dma_semaphore, #tpu.memory_space<semaphore_mem>>
    tpu.enqueue_dma source(%arg9 : memref<1x128xf32, #tpu.memory_space<any>>) target(%arg16 : memref<1x128xf32, #tpu.memory_space<vmem>>) target_semaphore(%11 : memref<!tpu.dma_semaphore, #tpu.memory_space<semaphore_mem>>)
    %c0 = arith.constant 0 : index
    %c0_0 = arith.constant 0 : index
    %12 = vector.load %arg1[%c0, %c0_0] : memref<8x1024xbf16, #tpu.memory_space<vmem>>, vector<8x1024xbf16>
    %c0_1 = arith.constant 0 : index
    %c0_2 = arith.constant 0 : index
    %13 = vector.load %arg2[%c0_1, %c0_2] : memref<1024x1280xbf16, #tpu.memory_space<vmem>>, vector<1024x1280xbf16>
    %cst = arith.constant dense<0.000000e+00> : vector<8x1280xf32>
    %14 = tpu.matmul %12, %13, %cst {dimension_numbers = #tpu.dot_dimension_numbers<[1], [0], [0], [1], [0, 0, 1, 1], [], []>} : vector<8x1024xbf16>, vector<1024x1280xbf16>, vector<8x1280xf32> -> vector<8x1280xf32>
    %c0_3 = arith.constant 0 : index
    %c0_4 = arith.constant 0 : index
    %15 = vector.load %arg3[%c0_3, %c0_4] : memref<1x1280xf32, #tpu.memory_space<vmem>>, vector<1x1280xf32>
    %16 = vector.broadcast %15 : vector<1x1280xf32> to vector<8x1280xf32>
    %17 = arith.addf %14, %16 : vector<8x1280xf32>
    %cst_5 = arith.constant 0.000000e+00 : f32
    %18 = vector.broadcast %cst_5 : f32 to vector<8x1280xf32>
    %19 = arith.maximumf %17, %18 : vector<8x1280xf32>
    %20 = arith.truncf %19 : vector<8x1280xf32> to vector<8x1280xbf16>
    %c0_i32_6 = arith.constant 0 : i32
    %21 = tpu.memref_slice %arg17[%c0_i32_6] : memref<6x!tpu.dma_semaphore, #tpu.memory_space<semaphore_mem>> -> memref<1x!tpu.dma_semaphore, #tpu.memory_space<semaphore_mem>>
    %22 = tpu.memref_squeeze %21 : memref<1x!tpu.dma_semaphore, #tpu.memory_space<semaphore_mem>> -> memref<!tpu.dma_semaphore, #tpu.memory_space<semaphore_mem>>
    tpu.wait_dma2 semaphore(%22 : memref<!tpu.dma_semaphore, #tpu.memory_space<semaphore_mem>>) src(%arg4 : memref<1280x1280xbf16, #tpu.memory_space<any>>) dst(%arg11 : memref<1280x1280xbf16, #tpu.memory_space<vmem>>)
    %c1_i32_7 = arith.constant 1 : i32
    %23 = tpu.memref_slice %arg17[%c1_i32_7] : memref<6x!tpu.dma_semaphore, #tpu.memory_space<semaphore_mem>> -> memref<1x!tpu.dma_semaphore, #tpu.memory_space<semaphore_mem>>
    %24 = tpu.memref_squeeze %23 : memref<1x!tpu.dma_semaphore, #tpu.memory_space<semaphore_mem>> -> memref<!tpu.dma_semaphore, #tpu.memory_space<semaphore_mem>>
    tpu.wait_dma2 semaphore(%24 : memref<!tpu.dma_semaphore, #tpu.memory_space<semaphore_mem>>) src(%arg5 : memref<1x1280xf32, #tpu.memory_space<any>>) dst(%arg12 : memref<1x1280xf32, #tpu.memory_space<vmem>>)
    %c0_8 = arith.constant 0 : index
    %c0_9 = arith.constant 0 : index
    %25 = vector.load %arg11[%c0_8, %c0_9] : memref<1280x1280xbf16, #tpu.memory_space<vmem>>, vector<1280x1280xbf16>
    %cst_10 = arith.constant dense<0.000000e+00> : vector<8x1280xf32>
    %26 = tpu.matmul %20, %25, %cst_10 {dimension_numbers = #tpu.dot_dimension_numbers<[1], [0], [0], [1], [0, 0, 1, 1], [], []>} : vector<8x1280xbf16>, vector<1280x1280xbf16>, vector<8x1280xf32> -> vector<8x1280xf32>
    %c0_11 = arith.constant 0 : index
    %c0_12 = arith.constant 0 : index
    %27 = vector.load %arg12[%c0_11, %c0_12] : memref<1x1280xf32, #tpu.memory_space<vmem>>, vector<1x1280xf32>
    %28 = vector.broadcast %27 : vector<1x1280xf32> to vector<8x1280xf32>
    %29 = arith.addf %26, %28 : vector<8x1280xf32>
    %cst_13 = arith.constant 0.000000e+00 : f32
    %30 = vector.broadcast %cst_13 : f32 to vector<8x1280xf32>
    %31 = arith.maximumf %29, %30 : vector<8x1280xf32>
    %32 = arith.truncf %31 : vector<8x1280xf32> to vector<8x1280xbf16>
    %c2_i32_14 = arith.constant 2 : i32
    %33 = tpu.memref_slice %arg17[%c2_i32_14] : memref<6x!tpu.dma_semaphore, #tpu.memory_space<semaphore_mem>> -> memref<1x!tpu.dma_semaphore, #tpu.memory_space<semaphore_mem>>
    %34 = tpu.memref_squeeze %33 : memref<1x!tpu.dma_semaphore, #tpu.memory_space<semaphore_mem>> -> memref<!tpu.dma_semaphore, #tpu.memory_space<semaphore_mem>>
    tpu.wait_dma2 semaphore(%34 : memref<!tpu.dma_semaphore, #tpu.memory_space<semaphore_mem>>) src(%arg6 : memref<1280x1280xbf16, #tpu.memory_space<any>>) dst(%arg13 : memref<1280x1280xbf16, #tpu.memory_space<vmem>>)
    %c3_i32_15 = arith.constant 3 : i32
    %35 = tpu.memref_slice %arg17[%c3_i32_15] : memref<6x!tpu.dma_semaphore, #tpu.memory_space<semaphore_mem>> -> memref<1x!tpu.dma_semaphore, #tpu.memory_space<semaphore_mem>>
    %36 = tpu.memref_squeeze %35 : memref<1x!tpu.dma_semaphore, #tpu.memory_space<semaphore_mem>> -> memref<!tpu.dma_semaphore, #tpu.memory_space<semaphore_mem>>
    tpu.wait_dma2 semaphore(%36 : memref<!tpu.dma_semaphore, #tpu.memory_space<semaphore_mem>>) src(%arg7 : memref<1x1280xf32, #tpu.memory_space<any>>) dst(%arg14 : memref<1x1280xf32, #tpu.memory_space<vmem>>)
    %c0_16 = arith.constant 0 : index
    %c0_17 = arith.constant 0 : index
    %37 = vector.load %arg13[%c0_16, %c0_17] : memref<1280x1280xbf16, #tpu.memory_space<vmem>>, vector<1280x1280xbf16>
    %cst_18 = arith.constant dense<0.000000e+00> : vector<8x1280xf32>
    %38 = tpu.matmul %32, %37, %cst_18 {dimension_numbers = #tpu.dot_dimension_numbers<[1], [0], [0], [1], [0, 0, 1, 1], [], []>} : vector<8x1280xbf16>, vector<1280x1280xbf16>, vector<8x1280xf32> -> vector<8x1280xf32>
    %c0_19 = arith.constant 0 : index
    %c0_20 = arith.constant 0 : index
    %39 = vector.load %arg14[%c0_19, %c0_20] : memref<1x1280xf32, #tpu.memory_space<vmem>>, vector<1x1280xf32>
    %40 = vector.broadcast %39 : vector<1x1280xf32> to vector<8x1280xf32>
    %41 = arith.addf %38, %40 : vector<8x1280xf32>
    %cst_21 = arith.constant 0.000000e+00 : f32
    %42 = vector.broadcast %cst_21 : f32 to vector<8x1280xf32>
    %43 = arith.maximumf %41, %42 : vector<8x1280xf32>
    %44 = arith.truncf %43 : vector<8x1280xf32> to vector<8x1280xbf16>
    %c4_i32_22 = arith.constant 4 : i32
    %45 = tpu.memref_slice %arg17[%c4_i32_22] : memref<6x!tpu.dma_semaphore, #tpu.memory_space<semaphore_mem>> -> memref<1x!tpu.dma_semaphore, #tpu.memory_space<semaphore_mem>>
    %46 = tpu.memref_squeeze %45 : memref<1x!tpu.dma_semaphore, #tpu.memory_space<semaphore_mem>> -> memref<!tpu.dma_semaphore, #tpu.memory_space<semaphore_mem>>
    tpu.wait_dma2 semaphore(%46 : memref<!tpu.dma_semaphore, #tpu.memory_space<semaphore_mem>>) src(%arg8 : memref<1280x128xbf16, #tpu.memory_space<any>>) dst(%arg15 : memref<1280x128xbf16, #tpu.memory_space<vmem>>)
    %c5_i32_23 = arith.constant 5 : i32
    %47 = tpu.memref_slice %arg17[%c5_i32_23] : memref<6x!tpu.dma_semaphore, #tpu.memory_space<semaphore_mem>> -> memref<1x!tpu.dma_semaphore, #tpu.memory_space<semaphore_mem>>
    %48 = tpu.memref_squeeze %47 : memref<1x!tpu.dma_semaphore, #tpu.memory_space<semaphore_mem>> -> memref<!tpu.dma_semaphore, #tpu.memory_space<semaphore_mem>>
    tpu.wait_dma2 semaphore(%48 : memref<!tpu.dma_semaphore, #tpu.memory_space<semaphore_mem>>) src(%arg9 : memref<1x128xf32, #tpu.memory_space<any>>) dst(%arg16 : memref<1x128xf32, #tpu.memory_space<vmem>>)
    %c0_24 = arith.constant 0 : index
    %c0_25 = arith.constant 0 : index
    %49 = vector.load %arg15[%c0_24, %c0_25] : memref<1280x128xbf16, #tpu.memory_space<vmem>>, vector<1280x128xbf16>
    %cst_26 = arith.constant dense<0.000000e+00> : vector<8x128xf32>
    %50 = tpu.matmul %44, %49, %cst_26 {dimension_numbers = #tpu.dot_dimension_numbers<[1], [0], [0], [1], [0, 0, 1, 1], [], []>} : vector<8x1280xbf16>, vector<1280x128xbf16>, vector<8x128xf32> -> vector<8x128xf32>
    %c0_27 = arith.constant 0 : index
    %c0_28 = arith.constant 0 : index
    %51 = vector.load %arg16[%c0_27, %c0_28] : memref<1x128xf32, #tpu.memory_space<vmem>>, vector<1x128xf32>
    %52 = vector.broadcast %51 : vector<1x128xf32> to vector<8x128xf32>
    %53 = arith.addf %50, %52 : vector<8x128xf32>
    %c0_29 = arith.constant 0 : index
    %c0_30 = arith.constant 0 : index
    %54 = vector.load %arg10[%c0_29, %c0_30] : memref<8x128xf32, #tpu.memory_space<vmem>>, vector<8x128xf32>
    tpu.vector_store %arg10[%c0_29, %c0_30], %53 {strides = array<i32>} : memref<8x128xf32, #tpu.memory_space<vmem>>, vector<8x128xf32>,
    return
  }
  func.func @transform_0(%arg0: i32) -> (i32, i32) {
    %c0_i32 = arith.constant 0 : i32
    %c0_i32_0 = arith.constant 0 : i32
    return %arg0, %c0_i32 : i32, i32
  }
  func.func @transform_1(%arg0: i32) -> (i32, i32) {
    %c0_i32 = arith.constant 0 : i32
    %c0_i32_0 = arith.constant 0 : i32
    %c0_i32_1 = arith.constant 0 : i32
    return %c0_i32, %c0_i32_0 : i32, i32
  }
  func.func @transform_2(%arg0: i32) -> (i32, i32) {
    %c0_i32 = arith.constant 0 : i32
    %c0_i32_0 = arith.constant 0 : i32
    %c0_i32_1 = arith.constant 0 : i32
    return %c0_i32, %c0_i32_0 : i32, i32
  }
  func.func @transform_9(%arg0: i32) -> (i32, i32) {
    %c0_i32 = arith.constant 0 : i32
    %c0_i32_0 = arith.constant 0 : i32
    return %arg0, %c0_i32 : i32, i32
  }
}

</mosaic_0001>

<bundles_post_ra>
// kernel: dfve_forward.1
= control target key start
LH: loop header
LB: loop body
LE: loop exit
PB: predicated region body
PF: predicated region fallthrough
CT: control target
= control target key end

     0   :  { %14 = vsyncpa [#allocation10], 0  ;;  %s24204_s0 = inlined_call_operand.vmem [shape: bf16[8,1024], index: 0, kind: input, shape index: {}]   ;;  %s24205_s1 = inlined_call_operand.hbm [shape: bf16[1024,1280], index: 1, kind: input, shape index: {}]   ;;  %s24206_s2 = inlined_call_operand.hbm [shape: f32[1,1280], index: 2, kind: input, shape index: {}]   ;;  %s24207_s3 = inlined_call_operand.hbm [shape: bf16[1280,1280], index: 3, kind: input, shape index: {}]   ;;  %s24208_s4 = inlined_call_operand.hbm [shape: f32[1,1280], index: 4, kind: input, shape index: {}]   ;;  %s24209_s5 = inlined_call_operand.hbm [shape: bf16[1280,1280], index: 5, kind: input, shape index: {}]   ;;  %s24210_s6 = inlined_call_operand.hbm [shape: f32[1,1280], index: 6, kind: input, shape index: {}]   ;;  %s24211_s7 = inlined_call_operand.hbm [shape: bf16[1280,128], index: 7, kind: input, shape index: {}]   ;;  %s24212_s8 = inlined_call_operand.hbm [shape: f32[1,128], index: 8, kind: input, shape index: {}]   ;;  %s24213_s9 = inlined_call_operand.vmem [shape: f32[8,128], index: 9, kind: output, shape index: {}]  }
   0x1   :  { %15 = vsyncpa [#allocation12], 0  ;;  %s23679_s30 = smov [#allocation9]  }
   0x2   :  { %s23_s10 = sshll.u32 %s23679_s30, 4  ;;  %s24_s10 = int_to_ptr.vmem [resolvable:$true] %s23_s10 }
   0x3   :  { %s23511_s11 = scalar_lea.vmem %s24_s10, 81920  ;;  %p23516_p1 = scmp.lt.s32.totalorder %s24_s10, %s24_s10 }
   0x4   :  { %p23512_p0 = scmp.ne.s32.totalorder %s24_s10, %s23511_s11  ;;  %p23517_p2 = scmp.lt.s32.totalorder %s23511_s11, %s23511_s11 }
   0x6   :  { %p23518_p3 = por %p23517_p2, %p23516_p1 }
   0x8   :  { %p23519_p4 = pnand %p23518_p3, %p23512_p0 }
   0xa   :  { %23522 = shalt.err (!%p23519_p4)
}
   0xb   :  { %s23680_s12 = smov 640   ;;  %s23681_s13 = smov 40  }
   0xc   :  { %29 = dma.hbm_to_vmem [thread:$0]  %s24205_s1, 81920, %s24_s10, [#allocation10], %s23680_s12, %s23680_s12, %s23681_s13  }
   0xd   :  { %s23682_s16 = smov [#allocation11]  }
   0xe   :  { %s36_s17 = sshll.u32 %s23682_s16, 4  ;;  %s37_s17 = int_to_ptr.vmem [resolvable:$true] %s36_s17 }
   0xf   :  { %s23531_s18 = scalar_lea.vmem %s37_s17, 160  ;;  %p23536_p6 = scmp.lt.s32.totalorder %s37_s17, %s37_s17 }
  0x10   :  { %p23532_p5 = scmp.ne.s32.totalorder %s37_s17, %s23531_s18  ;;  %p23537_p7 = scmp.lt.s32.totalorder %s23531_s18, %s23531_s18 }
  0x12   :  { %p23538_p8 = por %p23537_p7, %p23536_p6 }
  0x14   :  { %p23539_p9 = pnand %p23538_p8, %p23532_p5 }
  0x16   :  { %23542 = shalt.err (!%p23539_p9)
}
  0x17   :  { %39 = dma.hbm_to_vmem [thread:$0]  %s24206_s2, 160, %s37_s17, [#allocation12]  }
  0x18   :  { %23663 = dma.done.wait [#allocation10], 81920  }
  0x19   :  { %23664 = vsyncadd [#allocation10], 4294885376 }
  0x1a   :  { %23665 = dma.done.wait [#allocation12], 160  }
  0x1b   :  { %23666 = vsyncadd [#allocation12], 4294967136  ;;  %v20049_v0 = vld [vmem:[#allocation9 + $0x234] ss:$40 sps:$4 sm:$0xff]   ;;  %v20053_v2 = vld [vmem:[#allocation9 + $0x230] ss:$40 sps:$4 sm:$0xff]  }
  0x1c   :  { %v20051_v1 = vld [vmem:[#allocation9 + $0x734] ss:$40 sps:$4 sm:$0xff]   ;;  %4044 = vmatprep.subr.bf16.mxu0 %v20049_v0  ;;  %v20054_v3 = vld [vmem:[#allocation9 + $0x730] ss:$40 sps:$4 sm:$0xff]   ;;  %v20055_v4 = vld [vmem:[#allocation9 + $0x1e4] ss:$40 sps:$4 sm:$0xff]  }
  0x1d   :  { %4085 = vmatprep.subr.bf16.mxu1 %v20051_v1  ;;  %4045 = vmatpush1.bf16.msra.mxu0 %v20053_v2  ;;  %v20057_v5 = vld [vmem:[#allocation9 + $0x6e4] ss:$40 sps:$4 sm:$0xff]   ;;  %v20059_v6 = vld [vmem:[#allocation9 + $0x1e0] ss:$40 sps:$4 sm:$0xff]   ;;  %v20061_v8 = vld [vmem:[#allocation9 + $0x194] ss:$40 sps:$4 sm:$0xff]  }
  0x1e   :  { %4086 = vmatpush1.bf16.msra.mxu1 %v20054_v3  ;;  %4046 = vmatprep.subr.bf16.mxu0 %v20055_v4  ;;  %v20060_v7 = vld [vmem:[#allocation9 + $0x6e0] ss:$40 sps:$4 sm:$0xff]   ;;  %v20063_v9 = vld [vmem:[#allocation9 + $0x694] ss:$40 sps:$4 sm:$0xff]   ;;  %v20065_v10 = vld [vmem:[#allocation9 + $0x190] ss:$40 sps:$4 sm:$0xff]  }
  0x1f   :  { %4087 = vmatprep.subr.bf16.mxu1 %v20057_v5  ;;  %v20066_v11 = vld [vmem:[#allocation9 + $0x690] ss:$40 sps:$4 sm:$0xff]   ;;  %v20067_v12 = vld [vmem:[#allocation9 + $0x144] ss:$40 sps:$4 sm:$0xff]   ;;  %v20071_v14 = vld [vmem:[#allocation9 + $0x140] ss:$40 sps:$4 sm:$0xff]  }
  0x20   :  { %v20069_v13 = vld [vmem:[#allocation9 + $0x644] ss:$40 sps:$4 sm:$0xff]   ;;  %v20072_v15 = vld [vmem:[#allocation9 + $0x640] ss:$40 sps:$4 sm:$0xff]   ;;  %v20073_v16 = vld [vmem:[#allocation9 + $0xf4] ss:$40 sps:$4 sm:$0xff]  }
  0x21   :  { %4047 = vmatpush1.bf16.msra.mxu0 %v20059_v6  ;;  %v20075_v17 = vld [vmem:[#allocation9 + $0x5f4] ss:$40 sps:$4 sm:$0xff]   ;;  %v20077_v18 = vld [vmem:[#allocation9 + $0xf0] ss:$40 sps:$4 sm:$0xff]   ;;  %v20079_v20 = vld [vmem:[#allocation9 + $0xa4] ss:$40 sps:$4 sm:$0xff]  }
  0x22   :  { %4088 = vmatpush1.bf16.msra.mxu1 %v20060_v7  ;;  %4048 = vmatprep.subr.bf16.mxu0 %v20061_v8  ;;  %v20078_v19 = vld [vmem:[#allocation9 + $0x5f0] ss:$40 sps:$4 sm:$0xff]   ;;  %v20081_v21 = vld [vmem:[#allocation9 + $0x5a4] ss:$40 sps:$4 sm:$0xff]   ;;  %v20083_v22 = vld [vmem:[#allocation9 + $0xa0] ss:$40 sps:$4 sm:$0xff]  }
  0x23   :  { %4089 = vmatprep.subr.bf16.mxu1 %v20063_v9  ;;  %v20084_v23 = vld [vmem:[#allocation9 + $0x5a0] ss:$40 sps:$4 sm:$0xff]   ;;  %v20085_v24 = vld [vmem:[#allocation9 + $0x54] ss:$40 sps:$4 sm:$0xff]   ;;  %v20089_v26 = vld [vmem:[#allocation9 + $0x50] ss:$40 sps:$4 sm:$0xff]  }
  0x24   :  { %v20087_v25 = vld [vmem:[#allocation9 + $0x554] ss:$40 sps:$4 sm:$0xff]   ;;  %v20090_v27 = vld [vmem:[#allocation9 + $0x550] ss:$40 sps:$4 sm:$0xff]   ;;  %v20091_v28 = vld [vmem:[#allocation9 + $0x4] ss:$40 sps:$4 sm:$0xff]  }
  0x25   :  { %4049 = vmatpush1.bf16.msra.mxu0 %v20065_v10  ;;  %v20093_v29 = vld [vmem:[#allocation9 + $0x504] ss:$40 sps:$4 sm:$0xff]   ;;  %v20095_v30 = vld [vmem:[#allocation9] ss:$40 sps:$4 sm:$0xff]   ;;  %v20097_v32 = vld [vmem:[#allocation9 + $0x4b4] ss:$40 sps:$4 sm:$0xff]  }
  0x26   :  { %4090 = vmatpush1.bf16.msra.mxu1 %v20066_v11  ;;  %4050 = vmatprep.subr.bf16.mxu0 %v20067_v12  ;;  %v20096_v31 = vld [vmem:[#allocation9 + $0x500] ss:$40 sps:$4 sm:$0xff]   ;;  %v20099_v33 = vld [vmem:[#allocation9 + $0x9b4] ss:$40 sps:$4 sm:$0xff]   ;;  %v20101_v34 = vld [vmem:[#allocation9 + $0x4b0] ss:$40 sps:$4 sm:$0xff]  }
  0x27   :  { %4091 = vmatprep.subr.bf16.mxu1 %v20069_v13  ;;  %v20102_v35 = vld [vmem:[#allocation9 + $0x9b0] ss:$40 sps:$4 sm:$0xff]   ;;  %v20103_v36 = vld [vmem:[#allocation9 + $0x464] ss:$40 sps:$4 sm:$0xff]   ;;  %v20107_v38 = vld [vmem:[#allocation9 + $0x460] ss:$40 sps:$4 sm:$0xff]  }
  0x28   :  { %v20105_v37 = vld [vmem:[#allocation9 + $0x964] ss:$40 sps:$4 sm:$0xff]   ;;  %v20108_v39 = vld [vmem:[#allocation9 + $0x960] ss:$40 sps:$4 sm:$0xff]   ;;  %v20109_v40 = vld [vmem:[#allocation9 + $0x414] ss:$40 sps:$4 sm:$0xff]  }
  0x29   :  { %4051 = vmatpush1.bf16.msra.mxu0 %v20071_v14  ;;  %v20111_v41 = vld [vmem:[#allocation9 + $0x914] ss:$40 sps:$4 sm:$0xff]   ;;  %v20113_v42 = vld [vmem:[#allocation9 + $0x410] ss:$40 sps:$4 sm:$0xff]   ;;  %v20115_v44 = vld [vmem:[#allocation9 + $0x3c4] ss:$40 sps:$4 sm:$0xff]  }
  0x2a   :  { %4092 = vmatpush1.bf16.msra.mxu1 %v20072_v15  ;;  %4052 = vmatprep.subr.bf16.mxu0 %v20073_v16  ;;  %v20114_v43 = vld [vmem:[#allocation9 + $0x910] ss:$40 sps:$4 sm:$0xff]   ;;  %v20117_v45 = vld [vmem:[#allocation9 + $0x8c4] ss:$40 sps:$4 sm:$0xff]   ;;  %v20119_v49 = vld [vmem:[#allocation9 + $0x3c0] ss:$40 sps:$4 sm:$0xff]  }
  0x2b   :  { %4093 = vmatprep.subr.bf16.mxu1 %v20075_v17  ;;  %v118_v46 = vld [vmem:[%s24204_s0] sm:$0xff]  ;;  %v119_v48 = vld [vmem:[%s24204_s0 + $0x8] sm:$0xff]  ;;  %s23684_s28 = smov [#allocation3]  }
  0x2c   :  { %v23748_v47 = vcombine.high %v118_v46, %v118_v46  ;;  %v20120_v50 = vld [vmem:[#allocation9 + $0x8c0] ss:$40 sps:$4 sm:$0xff]   ;;  %v23753_v51 = vcombine.high %v119_v48, %v119_v48  ;;  %v20121_v52 = vld [vmem:[#allocation9 + $0x374] ss:$40 sps:$4 sm:$0xff]   ;;  %v20125_v54 = vld [vmem:[#allocation9 + $0x370] ss:$40 sps:$4 sm:$0xff]   ;;  %v23757_v6 = vcombine.low %v118_v46, %v118_v46  ;;  %v23759_v7 = vcombine.low %v119_v48, %v119_v48 }
  0x2d   :  { %4053 = vmatpush1.bf16.msra.mxu0 %v20077_v18  ;;  %v20123_v53 = vld [vmem:[#allocation9 + $0x874] ss:$40 sps:$4 sm:$0xff]   ;;  %v20126_v55 = vld [vmem:[#allocation9 + $0x870] ss:$40 sps:$4 sm:$0xff]   ;;  %v20127_v56 = vld [vmem:[#allocation9 + $0x324] ss:$40 sps:$4 sm:$0xff]  }
  0x2e   :  { %4094 = vmatpush1.bf16.msra.mxu1 %v20078_v19  ;;  %4054 = vmatprep.subr.bf16.mxu0 %v20079_v20  ;;  %v20129_v57 = vld [vmem:[#allocation9 + $0x824] ss:$40 sps:$4 sm:$0xff]   ;;  %v20131_v58 = vld [vmem:[#allocation9 + $0x320] ss:$40 sps:$4 sm:$0xff]   ;;  %v20133_v60 = vld [vmem:[#allocation9 + $0x2d4] ss:$40 sps:$4 sm:$0xff]  }
  0x2f   :  { %4095 = vmatprep.subr.bf16.mxu1 %v20081_v21  ;;  %4076 = vmatprep.mubr.bf16.mxu0 %v23748_v47  ;;  %v20132_v59 = vld [vmem:[#allocation9 + $0x820] ss:$40 sps:$4 sm:$0xff]   ;;  %v20135_v61 = vld [vmem:[#allocation9 + $0x7d4] ss:$40 sps:$4 sm:$0xff]   ;;  %v20137_v62 = vld [vmem:[#allocation9 + $0x2d0] ss:$40 sps:$4 sm:$0xff]  }
  0x30   :  { %4117 = vmatprep.mubr.bf16.mxu1 %v23753_v51  ;;  %v20138_v63 = vld [vmem:[#allocation9 + $0x7d0] ss:$40 sps:$4 sm:$0xff]   ;;  %v20139_v0 = vld [vmem:[#allocation9 + $0x284] ss:$40 sps:$4 sm:$0xff]   ;;  %v20143_v2 = vld [vmem:[#allocation9 + $0x280] ss:$40 sps:$4 sm:$0xff]  }
  0x31   :  { %4055 = vmatpush1.bf16.msra.mxu0 %v20083_v22  ;;  %v20141_v1 = vld [vmem:[#allocation9 + $0x784] ss:$40 sps:$4 sm:$0xff]   ;;  %v20144_v3 = vld [vmem:[#allocation9 + $0x780] ss:$40 sps:$4 sm:$0xff]   ;;  %v20151_v4 = vld [vmem:[#allocation9 + $0xc34] ss:$40 sps:$4 sm:$0xff]  }
  0x32   :  { %4096 = vmatpush1.bf16.msra.mxu1 %v20084_v23  ;;  %4056 = vmatprep.subr.bf16.mxu0 %v20085_v24  ;;  %v20154_v5 = vld [vmem:[#allocation9 + $0x1134] ss:$40 sps:$4 sm:$0xff]   ;;  %v20149_v8 = vld [vmem:[#allocation9 + $0xc30] ss:$40 sps:$4 sm:$0xff]   ;;  %v20157_v10 = vld [vmem:[#allocation9 + $0xbe4] ss:$40 sps:$4 sm:$0xff]  }
  0x33   :  { %4097 = vmatprep.subr.bf16.mxu1 %v20087_v25  ;;  %v20152_v9 = vld [vmem:[#allocation9 + $0x1130] ss:$40 sps:$4 sm:$0xff]   ;;  %v20160_v11 = vld [vmem:[#allocation9 + $0x10e4] ss:$40 sps:$4 sm:$0xff]   ;;  %v20155_v12 = vld [vmem:[#allocation9 + $0xbe0] ss:$40 sps:$4 sm:$0xff]  }
  0x34   :  { %v20158_v13 = vld [vmem:[#allocation9 + $0x10e0] ss:$40 sps:$4 sm:$0xff]   ;;  %v20163_v14 = vld [vmem:[#allocation9 + $0xb94] ss:$40 sps:$4 sm:$0xff]   ;;  %v20161_v16 = vld [vmem:[#allocation9 + $0xb90] ss:$40 sps:$4 sm:$0xff]  }
  0x35   :  { %4057 = vmatpush1.bf16.msra.mxu0 %v20089_v26  ;;  %v20166_v15 = vld [vmem:[#allocation9 + $0x1094] ss:$40 sps:$4 sm:$0xff]   ;;  %v20164_v17 = vld [vmem:[#allocation9 + $0x1090] ss:$40 sps:$4 sm:$0xff]   ;;  %v20169_v18 = vld [vmem:[#allocation9 + $0xb44] ss:$40 sps:$4 sm:$0xff]  }
  0x36   :  { %4098 = vmatpush1.bf16.msra.mxu1 %v20090_v27  ;;  %4058 = vmatprep.subr.bf16.mxu0 %v20091_v28  ;;  %v20172_v19 = vld [vmem:[#allocation9 + $0x1044] ss:$40 sps:$4 sm:$0xff]   ;;  %v20167_v20 = vld [vmem:[#allocation9 + $0xb40] ss:$40 sps:$4 sm:$0xff]   ;;  %v20175_v22 = vld [vmem:[#allocation9 + $0xaf4] ss:$40 sps:$4 sm:$0xff]  }
  0x37   :  { %4099 = vmatprep.subr.bf16.mxu1 %v20093_v29  ;;  %v20170_v21 = vld [vmem:[#allocation9 + $0x1040] ss:$40 sps:$4 sm:$0xff]   ;;  %v20178_v23 = vld [vmem:[#allocation9 + $0xff4] ss:$40 sps:$4 sm:$0xff]   ;;  %v20173_v24 = vld [vmem:[#allocation9 + $0xaf0] ss:$40 sps:$4 sm:$0xff]  }
  0x38   :  { %v20176_v25 = vld [vmem:[#allocation9 + $0xff0] ss:$40 sps:$4 sm:$0xff]   ;;  %v20181_v26 = vld [vmem:[#allocation9 + $0xaa4] ss:$40 sps:$4 sm:$0xff]   ;;  %v20179_v28 = vld [vmem:[#allocation9 + $0xaa0] ss:$40 sps:$4 sm:$0xff]  }
  0x39   :  { %4059 = vmatpush1.bf16.msra.mxu0 %v20095_v30  ;;  %v20184_v27 = vld [vmem:[#allocation9 + $0xfa4] ss:$40 sps:$4 sm:$0xff]   ;;  %v20182_v29 = vld [vmem:[#allocation9 + $0xfa0] ss:$40 sps:$4 sm:$0xff]   ;;  %v20187_v30 = vld [vmem:[#allocation9 + $0xa54] ss:$40 sps:$4 sm:$0xff]  }
  0x3a   :  { %4100 = vmatpush1.bf16.msra.mxu1 %v20096_v31  ;;  %4060 = vmatprep.subr.bf16.mxu0 %v20097_v32  ;;  %v20190_v31 = vld [vmem:[#allocation9 + $0xf54] ss:$40 sps:$4 sm:$0xff]   ;;  %v20205_v46 = vld [vmem:[#allocation9 + $0xe64] ss:$40 sps:$4 sm:$0xff]   ;;  %s66_s29 = sshll.u32 %s23684_s28, 4  ;;  %s67_s29 = int_to_ptr.vmem [resolvable:$true] %s66_s29 }
  0x3b   :  { %4101 = vmatprep.subr.bf16.mxu1 %v20099_v33  ;;  %v23766_v32 = vld [vmem:[%s24204_s0 + $0x10] sm:$0xff]  ;;  %v23771_v33 = vld [vmem:[%s24204_s0 + $0x18] sm:$0xff]  ;;  %s23683_s0 = smov [#allocation2]  }
  0x3c   :  { %v20208_v48 = vld [vmem:[#allocation9 + $0x1364] ss:$40 sps:$4 sm:$0xff]   ;;  %s54_s27 = sshll.u32 %s23683_s0, 4  ;;  %s55_s27 = int_to_ptr.vmem [resolvable:$true] %s54_s27 }
  0x3d   :  { %4061 = vmatpush2.bf16.msra.mxu0 %v20101_v34  ;;  %v20185_v34 = vld [vmem:[#allocation9 + $0xa50] ss:$40 sps:$4 sm:$0xff]   ;;  %s23551_s30 = scalar_lea.vmem %s55_s27, 102400  ;;  %p23556_p11 = scmp.lt.s32.totalorder %s55_s27, %s55_s27 }
  0x3e   :  { %4102 = vmatpush2.bf16.msra.mxu1 %v20102_v35  ;;  %4062 = vmatprep.subr.bf16.mxu0 %v20103_v36  ;;  %v20188_v35 = vld [vmem:[#allocation9 + $0xf50] ss:$40 sps:$4 sm:$0xff]   ;;  %v23775_v36 = vcombine.high %v23766_v32, %v23766_v32  ;;  %p23552_p10 = scmp.ne.s32.totalorder %s55_s27, %s23551_s30  ;;  %p23557_p12 = scmp.lt.s32.totalorder %s23551_s30, %s23551_s30 }
  0x3f   :  { %4103 = vmatprep.subr.bf16.mxu1 %v20105_v37  ;;  %v23779_v37 = vcombine.high %v23771_v33, %v23771_v33 }
  0x40   :  { %p23558_p13 = por %p23557_p12, %p23556_p11 }
  0x41   :  { %4063 = vmatpush2.bf16.msra.mxu0 %v20107_v38  ;;  %v20193_v38 = vld [vmem:[#allocation9 + $0xa04] ss:$40 sps:$4 sm:$0xff]  }
  0x42   :  { %4104 = vmatpush2.bf16.msra.mxu1 %v20108_v39  ;;  %4064 = vmatprep.subr.bf16.mxu0 %v20109_v40  ;;  %v20196_v39 = vld [vmem:[#allocation9 + $0xf04] ss:$40 sps:$4 sm:$0xff]   ;;  %v20191_v40 = vld [vmem:[#allocation9 + $0xa00] ss:$40 sps:$4 sm:$0xff]   ;;  %p23559_p0 = pnand %p23558_p13, %p23552_p10 }
  0x43   :  { %4105 = vmatprep.subr.bf16.mxu1 %v20111_v41  ;;  %v20194_v41 = vld [vmem:[#allocation9 + $0xf00] ss:$40 sps:$4 sm:$0xff]  }
  0x45   :  { %4065 = vmatpush2.bf16.msra.mxu0 %v20113_v42  ;;  %v20199_v42 = vld [vmem:[#allocation9 + $0xeb4] ss:$40 sps:$4 sm:$0xff]  }
  0x46   :  { %4106 = vmatpush2.bf16.msra.mxu1 %v20114_v43  ;;  %4066 = vmatprep.subr.bf16.mxu0 %v20115_v44  ;;  %v20202_v43 = vld [vmem:[#allocation9 + $0x13b4] ss:$40 sps:$4 sm:$0xff]   ;;  %v20197_v44 = vld [vmem:[#allocation9 + $0xeb0] ss:$40 sps:$4 sm:$0xff]  }
  0x47   :  { %4107 = vmatprep.subr.bf16.mxu1 %v20117_v45  ;;  %v20200_v45 = vld [vmem:[#allocation9 + $0x13b0] ss:$40 sps:$4 sm:$0xff]  }
  0x49   :  { %4067 = vmatpush2.bf16.msra.mxu0 %v20119_v49  ;;  %v20203_v49 = vld [vmem:[#allocation9 + $0xe60] ss:$40 sps:$4 sm:$0xff]  }
  0x4a   :  { %4108 = vmatpush2.bf16.msra.mxu1 %v20120_v50  ;;  %4068 = vmatprep.subr.bf16.mxu0 %v20121_v52  ;;  %v20206_v50 = vld [vmem:[#allocation9 + $0x1360] ss:$40 sps:$4 sm:$0xff]   ;;  %v20211_v52 = vld [vmem:[#allocation9 + $0xe14] ss:$40 sps:$4 sm:$0xff]  }
  0x4b   :  { %4109 = vmatprep.subr.bf16.mxu1 %v20123_v53  ;;  %v20214_v53 = vld [vmem:[#allocation9 + $0x1314] ss:$40 sps:$4 sm:$0xff]  }
  0x4d   :  { %4069 = vmatpush2.bf16.msra.mxu0 %v20125_v54  ;;  %v20209_v54 = vld [vmem:[#allocation9 + $0xe10] ss:$40 sps:$4 sm:$0xff]  }
  0x4e   :  { %4110 = vmatpush2.bf16.msra.mxu1 %v20126_v55  ;;  %4070 = vmatprep.subr.bf16.mxu0 %v20127_v56  ;;  %v20212_v55 = vld [vmem:[#allocation9 + $0x1310] ss:$40 sps:$4 sm:$0xff]   ;;  %v20217_v56 = vld [vmem:[#allocation9 + $0xdc4] ss:$40 sps:$4 sm:$0xff]  }
  0x4f   :  { %4111 = vmatprep.subr.bf16.mxu1 %v20129_v57  ;;  %v20220_v57 = vld [vmem:[#allocation9 + $0x12c4] ss:$40 sps:$4 sm:$0xff]  }
  0x51   :  { %4071 = vmatpush2.bf16.msra.mxu0 %v20131_v58  ;;  %v20215_v58 = vld [vmem:[#allocation9 + $0xdc0] ss:$40 sps:$4 sm:$0xff]  }
  0x52   :  { %4112 = vmatpush2.bf16.msra.mxu1 %v20132_v59  ;;  %4072 = vmatprep.subr.bf16.mxu0 %v20133_v60  ;;  %v20218_v59 = vld [vmem:[#allocation9 + $0x12c0] ss:$40 sps:$4 sm:$0xff]   ;;  %v20223_v60 = vld [vmem:[#allocation9 + $0xd74] ss:$40 sps:$4 sm:$0xff]  }
  0x53   :  { %4113 = vmatprep.subr.bf16.mxu1 %v20135_v61  ;;  %v20226_v61 = vld [vmem:[#allocation9 + $0x1274] ss:$40 sps:$4 sm:$0xff]  }
  0x55   :  { %4073 = vmatpush2.bf16.msra.mxu0 %v20137_v62  ;;  %v20221_v62 = vld [vmem:[#allocation9 + $0xd70] ss:$40 sps:$4 sm:$0xff]  }
  0x56   :  { %4114 = vmatpush2.bf16.msra.mxu1 %v20138_v63  ;;  %4074 = vmatprep.subr.bf16.mxu0 %v20139_v0  ;;  %v20224_v63 = vld [vmem:[#allocation9 + $0x1270] ss:$40 sps:$4 sm:$0xff]   ;;  %v20229_v0 = vld [vmem:[#allocation9 + $0xd24] ss:$40 sps:$4 sm:$0xff]  }
  0x57   :  { %4115 = vmatprep.subr.bf16.mxu1 %v20141_v1  ;;  %v20232_v1 = vld [vmem:[#allocation9 + $0x1224] ss:$40 sps:$4 sm:$0xff]  }
  0x59   :  { %4075 = vmatpush2.bf16.msra.mxu0 %v20143_v2  ;;  %v20227_v2 = vld [vmem:[#allocation9 + $0xd20] ss:$40 sps:$4 sm:$0xff]  }
  0x5a   :  { %4116 = vmatpush2.bf16.msra.mxu1 %v20144_v3  ;;  %4126 = vmatprep.subr.bf16.mxu0 %v20151_v4  ;;  %v20230_v3 = vld [vmem:[#allocation9 + $0x1220] ss:$40 sps:$4 sm:$0xff]   ;;  %v20235_v4 = vld [vmem:[#allocation9 + $0xcd4] ss:$40 sps:$4 sm:$0xff]  }
  0x5b   :  { %4167 = vmatprep.subr.bf16.mxu1 %v20154_v5  ;;  %v20238_v5 = vld [vmem:[#allocation9 + $0x11d4] ss:$40 sps:$4 sm:$0xff]  }
  0x5c   :  { %4077 = vmatmul.mubr.bf16.vlgmr.msra.gmra.mxu0 %v23757_v6 }
  0x5d   :  { %4118 = vmatmul.mubr.bf16.vlgmr.msra.gmra.mxu1 %v23759_v7  ;;  %4127 = vmatpush1.bf16.msra.mxu0 %v20149_v8  ;;  %v20233_v8 = vld [vmem:[#allocation9 + $0xcd0] ss:$40 sps:$4 sm:$0xff]  }
  0x5e   :  { %4168 = vmatpush1.bf16.msra.mxu1 %v20152_v9  ;;  %4128 = vmatprep.subr.bf16.mxu0 %v20157_v10  ;;  %v20236_v9 = vld [vmem:[#allocation9 + $0x11d0] ss:$40 sps:$4 sm:$0xff]   ;;  %v20241_v10 = vld [vmem:[#allocation9 + $0xc84] ss:$40 sps:$4 sm:$0xff]  }
  0x5f   :  { %4169 = vmatprep.subr.bf16.mxu1 %v20160_v11  ;;  %4158 = vmatprep.mubr.bf16.mxu0 %v23775_v36  ;;  %v20244_v11 = vld [vmem:[#allocation9 + $0x1184] ss:$40 sps:$4 sm:$0xff]  }
  0x60   :  { %4199 = vmatprep.mubr.bf16.mxu1 %v23779_v37 }
  0x61   :  { %4129 = vmatpush1.bf16.msra.mxu0 %v20155_v12  ;;  %v20239_v12 = vld [vmem:[#allocation9 + $0xc80] ss:$40 sps:$4 sm:$0xff]  }
  0x62   :  { %4170 = vmatpush1.bf16.msra.mxu1 %v20158_v13  ;;  %4130 = vmatprep.subr.bf16.mxu0 %v20163_v14  ;;  %v20242_v13 = vld [vmem:[#allocation9 + $0x1180] ss:$40 sps:$4 sm:$0xff]   ;;  %v20251_v14 = vld [vmem:[#allocation9 + $0x23c] ss:$40 sps:$4 sm:$0xff]  }
  0x63   :  { %4171 = vmatprep.subr.bf16.mxu1 %v20166_v15  ;;  %v20254_v15 = vld [vmem:[#allocation9 + $0x73c] ss:$40 sps:$4 sm:$0xff]  }
  0x65   :  { %4131 = vmatpush1.bf16.msra.mxu0 %v20161_v16  ;;  %v23785_v16 = vcombine.low %v23766_v32, %v23766_v32  ;;  %v20275_v32 = vld [vmem:[#allocation9 + $0xfc] ss:$40 sps:$4 sm:$0xff]  }
  0x66   :  { %4172 = vmatpush1.bf16.msra.mxu1 %v20164_v17  ;;  %4132 = vmatprep.subr.bf16.mxu0 %v20169_v18  ;;  %v23789_v17 = vcombine.low %v23771_v33, %v23771_v33  ;;  %v20249_v18 = vld [vmem:[#allocation9 + $0x238] ss:$40 sps:$4 sm:$0xff]   ;;  %v20278_v33 = vld [vmem:[#allocation9 + $0x5fc] ss:$40 sps:$4 sm:$0xff]  }
  0x67   :  { %4173 = vmatprep.subr.bf16.mxu1 %v20172_v19  ;;  %v20252_v19 = vld [vmem:[#allocation9 + $0x738] ss:$40 sps:$4 sm:$0xff]  }
  0x69   :  { %4133 = vmatpush1.bf16.msra.mxu0 %v20167_v20  ;;  %v20257_v20 = vld [vmem:[#allocation9 + $0x1ec] ss:$40 sps:$4 sm:$0xff]  }
  0x6a   :  { %4174 = vmatpush1.bf16.msra.mxu1 %v20170_v21  ;;  %4134 = vmatprep.subr.bf16.mxu0 %v20175_v22  ;;  %v20260_v21 = vld [vmem:[#allocation9 + $0x6ec] ss:$40 sps:$4 sm:$0xff]   ;;  %v20255_v22 = vld [vmem:[#allocation9 + $0x1e8] ss:$40 sps:$4 sm:$0xff]  }
  0x6b   :  { %4175 = vmatprep.subr.bf16.mxu1 %v20178_v23  ;;  %v20258_v23 = vld [vmem:[#allocation9 + $0x6e8] ss:$40 sps:$4 sm:$0xff]  }
  0x6d   :  { %4135 = vmatpush1.bf16.msra.mxu0 %v20173_v24  ;;  %v20263_v24 = vld [vmem:[#allocation9 + $0x19c] ss:$40 sps:$4 sm:$0xff]  }
  0x6e   :  { %4176 = vmatpush1.bf16.msra.mxu1 %v20176_v25  ;;  %4136 = vmatprep.subr.bf16.mxu0 %v20181_v26  ;;  %v20266_v25 = vld [vmem:[#allocation9 + $0x69c] ss:$40 sps:$4 sm:$0xff]   ;;  %v20261_v26 = vld [vmem:[#allocation9 + $0x198] ss:$40 sps:$4 sm:$0xff]  }
  0x6f   :  { %4177 = vmatprep.subr.bf16.mxu1 %v20184_v27  ;;  %v20264_v27 = vld [vmem:[#allocation9 + $0x698] ss:$40 sps:$4 sm:$0xff]  }
  0x71   :  { %4137 = vmatpush1.bf16.msra.mxu0 %v20179_v28  ;;  %v20269_v28 = vld [vmem:[#allocation9 + $0x14c] ss:$40 sps:$4 sm:$0xff]  }
  0x72   :  { %4178 = vmatpush1.bf16.msra.mxu1 %v20182_v29  ;;  %4138 = vmatprep.subr.bf16.mxu0 %v20187_v30  ;;  %v20272_v29 = vld [vmem:[#allocation9 + $0x64c] ss:$40 sps:$4 sm:$0xff]   ;;  %v20267_v30 = vld [vmem:[#allocation9 + $0x148] ss:$40 sps:$4 sm:$0xff]  }
  0x73   :  { %4179 = vmatprep.subr.bf16.mxu1 %v20190_v31  ;;  %v20270_v31 = vld [vmem:[#allocation9 + $0x648] ss:$40 sps:$4 sm:$0xff]  }
  0x75   :  { %4139 = vmatpush1.bf16.msra.mxu0 %v20185_v34  ;;  %v20273_v34 = vld [vmem:[#allocation9 + $0xf8] ss:$40 sps:$4 sm:$0xff]  }
  0x76   :  { %4180 = vmatpush1.bf16.msra.mxu1 %v20188_v35  ;;  %4140 = vmatprep.subr.bf16.mxu0 %v20193_v38  ;;  %v20276_v35 = vld [vmem:[#allocation9 + $0x5f8] ss:$40 sps:$4 sm:$0xff]   ;;  %v20281_v38 = vld [vmem:[#allocation9 + $0xac] ss:$40 sps:$4 sm:$0xff]  }
  0x77   :  { %4181 = vmatprep.subr.bf16.mxu1 %v20196_v39  ;;  %v20284_v39 = vld [vmem:[#allocation9 + $0x5ac] ss:$40 sps:$4 sm:$0xff]  }
  0x79   :  { %4141 = vmatpush1.bf16.msra.mxu0 %v20191_v40  ;;  %v20279_v40 = vld [vmem:[#allocation9 + $0xa8] ss:$40 sps:$4 sm:$0xff]  }
  0x7a   :  { %4182 = vmatpush1.bf16.msra.mxu1 %v20194_v41  ;;  %4142 = vmatprep.subr.bf16.mxu0 %v20199_v42  ;;  %v20282_v41 = vld [vmem:[#allocation9 + $0x5a8] ss:$40 sps:$4 sm:$0xff]   ;;  %v20287_v42 = vld [vmem:[#allocation9 + $0x5c] ss:$40 sps:$4 sm:$0xff]  }
  0x7b   :  { %4183 = vmatprep.subr.bf16.mxu1 %v20202_v43  ;;  %v20290_v43 = vld [vmem:[#allocation9 + $0x55c] ss:$40 sps:$4 sm:$0xff]  }
  0x7d   :  { %4143 = vmatpush2.bf16.msra.mxu0 %v20197_v44  ;;  %v20285_v44 = vld [vmem:[#allocation9 + $0x58] ss:$40 sps:$4 sm:$0xff]  }
  0x7e   :  { %4184 = vmatpush2.bf16.msra.mxu1 %v20200_v45  ;;  %4144 = vmatprep.subr.bf16.mxu0 %v20205_v46  ;;  %v20288_v45 = vld [vmem:[#allocation9 + $0x558] ss:$40 sps:$4 sm:$0xff]   ;;  %v20293_v46 = vld [vmem:[#allocation9 + $0xc] ss:$40 sps:$4 sm:$0xff]  }
  0x7f   :  { %4185 = vmatprep.subr.bf16.mxu1 %v20208_v48  ;;  %v20296_v48 = vld [vmem:[#allocation9 + $0x50c] ss:$40 sps:$4 sm:$0xff]  }
  0x81   :  { %4145 = vmatpush2.bf16.msra.mxu0 %v20203_v49  ;;  %v20291_v49 = vld [vmem:[#allocation9 + $0x8] ss:$40 sps:$4 sm:$0xff]  }
  0x82   :  { %4186 = vmatpush2.bf16.msra.mxu1 %v20206_v50  ;;  %4146 = vmatprep.subr.bf16.mxu0 %v20211_v52  ;;  %v20294_v50 = vld [vmem:[#allocation9 + $0x508] ss:$40 sps:$4 sm:$0xff]   ;;  %v20299_v52 = vld [vmem:[#allocation9 + $0x4bc] ss:$40 sps:$4 sm:$0xff]  }
  0x83   :  { %4187 = vmatprep.subr.bf16.mxu1 %v20214_v53  ;;  %v20302_v53 = vld [vmem:[#allocation9 + $0x9bc] ss:$40 sps:$4 sm:$0xff]  }
  0x85   :  { %4147 = vmatpush2.bf16.msra.mxu0 %v20209_v54  ;;  %v20297_v54 = vld [vmem:[#allocation9 + $0x4b8] ss:$40 sps:$4 sm:$0xff]  }
  0x86   :  { %4188 = vmatpush2.bf16.msra.mxu1 %v20212_v55  ;;  %4148 = vmatprep.subr.bf16.mxu0 %v20217_v56  ;;  %v20300_v55 = vld [vmem:[#allocation9 + $0x9b8] ss:$40 sps:$4 sm:$0xff]   ;;  %v20305_v56 = vld [vmem:[#allocation9 + $0x46c] ss:$40 sps:$4 sm:$0xff]  }
  0x87   :  { %4189 = vmatprep.subr.bf16.mxu1 %v20220_v57  ;;  %v20308_v57 = vld [vmem:[#allocation9 + $0x96c] ss:$40 sps:$4 sm:$0xff]  }
  0x89   :  { %4149 = vmatpush2.bf16.msra.mxu0 %v20215_v58  ;;  %v20303_v58 = vld [vmem:[#allocation9 + $0x468] ss:$40 sps:$4 sm:$0xff]  }
  0x8a   :  { %4190 = vmatpush2.bf16.msra.mxu1 %v20218_v59  ;;  %4150 = vmatprep.subr.bf16.mxu0 %v20223_v60  ;;  %v20306_v59 = vld [vmem:[#allocation9 + $0x968] ss:$40 sps:$4 sm:$0xff]   ;;  %v20311_v60 = vld [vmem:[#allocation9 + $0x41c] ss:$40 sps:$4 sm:$0xff]  }
  0x8b   :  { %4191 = vmatprep.subr.bf16.mxu1 %v20226_v61  ;;  %v20314_v61 = vld [vmem:[#allocation9 + $0x91c] ss:$40 sps:$4 sm:$0xff]  }
  0x8d   :  { %4151 = vmatpush2.bf16.msra.mxu0 %v20221_v62  ;;  %v20309_v62 = vld [vmem:[#allocation9 + $0x418] ss:$40 sps:$4 sm:$0xff]  }
  0x8e   :  { %4192 = vmatpush2.bf16.msra.mxu1 %v20224_v63  ;;  %4152 = vmatprep.subr.bf16.mxu0 %v20229_v0  ;;  %v20312_v63 = vld [vmem:[#allocation9 + $0x918] ss:$40 sps:$4 sm:$0xff]   ;;  %v20317_v0 = vld [vmem:[#allocation9 + $0x3cc] ss:$40 sps:$4 sm:$0xff]  }
  0x8f   :  { %4193 = vmatprep.subr.bf16.mxu1 %v20232_v1  ;;  %v20320_v1 = vld [vmem:[#allocation9 + $0x8cc] ss:$40 sps:$4 sm:$0xff]  }
  0x91   :  { %4153 = vmatpush2.bf16.msra.mxu0 %v20227_v2  ;;  %v20315_v2 = vld [vmem:[#allocation9 + $0x3c8] ss:$40 sps:$4 sm:$0xff]  }
  0x92   :  { %4194 = vmatpush2.bf16.msra.mxu1 %v20230_v3  ;;  %4154 = vmatprep.subr.bf16.mxu0 %v20235_v4  ;;  %v20318_v3 = vld [vmem:[#allocation9 + $0x8c8] ss:$40 sps:$4 sm:$0xff]   ;;  %v20323_v4 = vld [vmem:[#allocation9 + $0x37c] ss:$40 sps:$4 sm:$0xff]  }
  0x93   :  { %4195 = vmatprep.subr.bf16.mxu1 %v20238_v5  ;;  %v20326_v5 = vld [vmem:[#allocation9 + $0x87c] ss:$40 sps:$4 sm:$0xff]  }
  0x95   :  { %4155 = vmatpush2.bf16.msra.mxu0 %v20233_v8  ;;  %v20321_v8 = vld [vmem:[#allocation9 + $0x378] ss:$40 sps:$4 sm:$0xff]  }
  0x96   :  { %4196 = vmatpush2.bf16.msra.mxu1 %v20236_v9  ;;  %4156 = vmatprep.subr.bf16.mxu0 %v20241_v10  ;;  %v20324_v9 = vld [vmem:[#allocation9 + $0x878] ss:$40 sps:$4 sm:$0xff]   ;;  %v20329_v10 = vld [vmem:[#allocation9 + $0x32c] ss:$40 sps:$4 sm:$0xff]  }
  0x97   :  { %4197 = vmatprep.subr.bf16.mxu1 %v20244_v11  ;;  %v20332_v11 = vld [vmem:[#allocation9 + $0x82c] ss:$40 sps:$4 sm:$0xff]  }
  0x99   :  { %4157 = vmatpush2.bf16.msra.mxu0 %v20239_v12  ;;  %v20327_v12 = vld [vmem:[#allocation9 + $0x328] ss:$40 sps:$4 sm:$0xff]  }
  0x9a   :  { %4198 = vmatpush2.bf16.msra.mxu1 %v20242_v13  ;;  %4208 = vmatprep.subr.bf16.mxu0 %v20251_v14  ;;  %v20330_v13 = vld [vmem:[#allocation9 + $0x828] ss:$40 sps:$4 sm:$0xff]   ;;  %v20335_v14 = vld [vmem:[#allocation9 + $0x2dc] ss:$40 sps:$4 sm:$0xff]  }
  0x9b   :  { %4249 = vmatprep.subr.bf16.mxu1 %v20254_v15  ;;  %v20338_v15 = vld [vmem:[#allocation9 + $0x7dc] ss:$40 sps:$4 sm:$0xff]  }
  0x9c   :  { %4159 = vmatmul.mubr.bf16.vlgmr.msra.gmra.mxu0 %v23785_v16 }
  0x9d   :  { %4200 = vmatmul.mubr.bf16.vlgmr.msra.gmra.mxu1 %v23789_v17  ;;  %4209 = vmatpush1.bf16.msra.mxu0 %v20249_v18  ;;  %v20333_v18 = vld [vmem:[#allocation9 + $0x2d8] ss:$40 sps:$4 sm:$0xff]  }
  0x9e   :  { %4250 = vmatpush1.bf16.msra.mxu1 %v20252_v19  ;;  %4210 = vmatprep.subr.bf16.mxu0 %v20257_v20  ;;  %v20336_v19 = vld [vmem:[#allocation9 + $0x7d8] ss:$40 sps:$4 sm:$0xff]   ;;  %v20341_v20 = vld [vmem:[#allocation9 + $0x28c] ss:$40 sps:$4 sm:$0xff]  }
  0x9f   :  { %4251 = vmatprep.subr.bf16.mxu1 %v20260_v21  ;;  %4240 = vmatprep.mubr.bf16.mxu0 %v23748_v47  ;;  %v20344_v21 = vld [vmem:[#allocation9 + $0x78c] ss:$40 sps:$4 sm:$0xff]  }
  0xa0   :  { %4281 = vmatprep.mubr.bf16.mxu1 %v23753_v51 }
  0xa1   :  { %4211 = vmatpush1.bf16.msra.mxu0 %v20255_v22  ;;  %v20339_v22 = vld [vmem:[#allocation9 + $0x288] ss:$40 sps:$4 sm:$0xff]  }
  0xa2   :  { %4252 = vmatpush1.bf16.msra.mxu1 %v20258_v23  ;;  %4212 = vmatprep.subr.bf16.mxu0 %v20263_v24  ;;  %v20342_v23 = vld [vmem:[#allocation9 + $0x788] ss:$40 sps:$4 sm:$0xff]   ;;  %v20347_v24 = vld [vmem:[#allocation9 + $0xc3c] ss:$40 sps:$4 sm:$0xff]  }
  0xa3   :  { %4253 = vmatprep.subr.bf16.mxu1 %v20266_v25  ;;  %v20350_v25 = vld [vmem:[#allocation9 + $0x113c] ss:$40 sps:$4 sm:$0xff]  }
  0xa5   :  { %4213 = vmatpush1.bf16.msra.mxu0 %v20261_v26  ;;  %v20345_v26 = vld [vmem:[#allocation9 + $0xc38] ss:$40 sps:$4 sm:$0xff]  }
  0xa6   :  { %4254 = vmatpush1.bf16.msra.mxu1 %v20264_v27  ;;  %4214 = vmatprep.subr.bf16.mxu0 %v20269_v28  ;;  %v20348_v27 = vld [vmem:[#allocation9 + $0x1138] ss:$40 sps:$4 sm:$0xff]   ;;  %v20353_v28 = vld [vmem:[#allocation9 + $0xbec] ss:$40 sps:$4 sm:$0xff]  }
  0xa7   :  { %4255 = vmatprep.subr.bf16.mxu1 %v20272_v29  ;;  %v20356_v29 = vld [vmem:[#allocation9 + $0x10ec] ss:$40 sps:$4 sm:$0xff]  }
  0xa9   :  { %4215 = vmatpush1.bf16.msra.mxu0 %v20267_v30  ;;  %v20351_v30 = vld [vmem:[#allocation9 + $0xbe8] ss:$40 sps:$4 sm:$0xff]  }
  0xaa   :  { %4256 = vmatpush1.bf16.msra.mxu1 %v20270_v31  ;;  %4216 = vmatprep.subr.bf16.mxu0 %v20275_v32  ;;  %v20354_v31 = vld [vmem:[#allocation9 + $0x10e8] ss:$40 sps:$4 sm:$0xff]   ;;  %v20359_v32 = vld [vmem:[#allocation9 + $0xb9c] ss:$40 sps:$4 sm:$0xff]  }
  0xab   :  { %4257 = vmatprep.subr.bf16.mxu1 %v20278_v33  ;;  %v20362_v33 = vld [vmem:[#allocation9 + $0x109c] ss:$40 sps:$4 sm:$0xff]  }
  0xad   :  { %4217 = vmatpush1.bf16.msra.mxu0 %v20273_v34  ;;  %v20357_v34 = vld [vmem:[#allocation9 + $0xb98] ss:$40 sps:$4 sm:$0xff]  }
  0xae   :  { %4258 = vmatpush1.bf16.msra.mxu1 %v20276_v35  ;;  %4218 = vmatprep.subr.bf16.mxu0 %v20281_v38  ;;  %v20360_v35 = vld [vmem:[#allocation9 + $0x1098] ss:$40 sps:$4 sm:$0xff]   ;;  %v20365_v38 = vld [vmem:[#allocation9 + $0xb4c] ss:$40 sps:$4 sm:$0xff]  }
  0xaf   :  { %4259 = vmatprep.subr.bf16.mxu1 %v20284_v39  ;;  %v20368_v39 = vld [vmem:[#allocation9 + $0x104c] ss:$40 sps:$4 sm:$0xff]  }
  0xb1   :  { %4219 = vmatpush1.bf16.msra.mxu0 %v20279_v40  ;;  %v20363_v40 = vld [vmem:[#allocation9 + $0xb48] ss:$40 sps:$4 sm:$0xff]  }
  0xb2   :  { %4260 = vmatpush1.bf16.msra.mxu1 %v20282_v41  ;;  %4220 = vmatprep.subr.bf16.mxu0 %v20287_v42  ;;  %v20366_v41 = vld [vmem:[#allocation9 + $0x1048] ss:$40 sps:$4 sm:$0xff]   ;;  %v20371_v42 = vld [vmem:[#allocation9 + $0xafc] ss:$40 sps:$4 sm:$0xff]  }
  0xb3   :  { %4261 = vmatprep.subr.bf16.mxu1 %v20290_v43  ;;  %v20374_v43 = vld [vmem:[#allocation9 + $0xffc] ss:$40 sps:$4 sm:$0xff]  }
  0xb5   :  { %4221 = vmatpush1.bf16.msra.mxu0 %v20285_v44  ;;  %v20369_v44 = vld [vmem:[#allocation9 + $0xaf8] ss:$40 sps:$4 sm:$0xff]  }
  0xb6   :  { %4262 = vmatpush1.bf16.msra.mxu1 %v20288_v45  ;;  %4222 = vmatprep.subr.bf16.mxu0 %v20293_v46  ;;  %v20372_v45 = vld [vmem:[#allocation9 + $0xff8] ss:$40 sps:$4 sm:$0xff]   ;;  %v20377_v46 = vld [vmem:[#allocation9 + $0xaac] ss:$40 sps:$4 sm:$0xff]  }
  0xb7   :  { %4263 = vmatprep.subr.bf16.mxu1 %v20296_v48  ;;  %v20380_v48 = vld [vmem:[#allocation9 + $0xfac] ss:$40 sps:$4 sm:$0xff]  }
  0xb9   :  { %4223 = vmatpush1.bf16.msra.mxu0 %v20291_v49  ;;  %v20375_v49 = vld [vmem:[#allocation9 + $0xaa8] ss:$40 sps:$4 sm:$0xff]  }
  0xba   :  { %4264 = vmatpush1.bf16.msra.mxu1 %v20294_v50  ;;  %4224 = vmatprep.subr.bf16.mxu0 %v20299_v52  ;;  %v20378_v50 = vld [vmem:[#allocation9 + $0xfa8] ss:$40 sps:$4 sm:$0xff]   ;;  %v20383_v52 = vld [vmem:[#allocation9 + $0xa5c] ss:$40 sps:$4 sm:$0xff]  }
  0xbb   :  { %4265 = vmatprep.subr.bf16.mxu1 %v20302_v53  ;;  %v20386_v53 = vld [vmem:[#allocation9 + $0xf5c] ss:$40 sps:$4 sm:$0xff]  }
  0xbd   :  { %4225 = vmatpush2.bf16.msra.mxu0 %v20297_v54  ;;  %v20381_v54 = vld [vmem:[#allocation9 + $0xa58] ss:$40 sps:$4 sm:$0xff]  }
  0xbe   :  { %4266 = vmatpush2.bf16.msra.mxu1 %v20300_v55  ;;  %4226 = vmatprep.subr.bf16.mxu0 %v20305_v56  ;;  %v20384_v55 = vld [vmem:[#allocation9 + $0xf58] ss:$40 sps:$4 sm:$0xff]   ;;  %v20389_v56 = vld [vmem:[#allocation9 + $0xa0c] ss:$40 sps:$4 sm:$0xff]  }
  0xbf   :  { %4267 = vmatprep.subr.bf16.mxu1 %v20308_v57  ;;  %v20392_v57 = vld [vmem:[#allocation9 + $0xf0c] ss:$40 sps:$4 sm:$0xff]  }
  0xc1   :  { %4227 = vmatpush2.bf16.msra.mxu0 %v20303_v58  ;;  %v20387_v58 = vld [vmem:[#allocation9 + $0xa08] ss:$40 sps:$4 sm:$0xff]  }
  0xc2   :  { %4268 = vmatpush2.bf16.msra.mxu1 %v20306_v59  ;;  %4228 = vmatprep.subr.bf16.mxu0 %v20311_v60  ;;  %v20390_v59 = vld [vmem:[#allocation9 + $0xf08] ss:$40 sps:$4 sm:$0xff]   ;;  %v20395_v60 = vld [vmem:[#allocation9 + $0xebc] ss:$40 sps:$4 sm:$0xff]  }
  0xc3   :  { %4269 = vmatprep.subr.bf16.mxu1 %v20314_v61  ;;  %v20398_v61 = vld [vmem:[#allocation9 + $0x13bc] ss:$40 sps:$4 sm:$0xff]  }
  0xc5   :  { %4229 = vmatpush2.bf16.msra.mxu0 %v20309_v62  ;;  %v20393_v62 = vld [vmem:[#allocation9 + $0xeb8] ss:$40 sps:$4 sm:$0xff]  }
  0xc6   :  { %4270 = vmatpush2.bf16.msra.mxu1 %v20312_v63  ;;  %4230 = vmatprep.subr.bf16.mxu0 %v20317_v0  ;;  %v20396_v63 = vld [vmem:[#allocation9 + $0x13b8] ss:$40 sps:$4 sm:$0xff]   ;;  %v20401_v0 = vld [vmem:[#allocation9 + $0xe6c] ss:$40 sps:$4 sm:$0xff]  }
  0xc7   :  { %4271 = vmatprep.subr.bf16.mxu1 %v20320_v1  ;;  %v20404_v1 = vld [vmem:[#allocation9 + $0x136c] ss:$40 sps:$4 sm:$0xff]  }
  0xc9   :  { %4231 = vmatpush2.bf16.msra.mxu0 %v20315_v2  ;;  %v20399_v2 = vld [vmem:[#allocation9 + $0xe68] ss:$40 sps:$4 sm:$0xff]  }
  0xca   :  { %4272 = vmatpush2.bf16.msra.mxu1 %v20318_v3  ;;  %4232 = vmatprep.subr.bf16.mxu0 %v20323_v4  ;;  %v20402_v3 = vld [vmem:[#allocation9 + $0x1368] ss:$40 sps:$4 sm:$0xff]   ;;  %v20407_v4 = vld [vmem:[#allocation9 + $0xe1c] ss:$40 sps:$4 sm:$0xff]  }
  0xcb   :  { %4273 = vmatprep.subr.bf16.mxu1 %v20326_v5  ;;  %v20410_v5 = vld [vmem:[#allocation9 + $0x131c] ss:$40 sps:$4 sm:$0xff]  }
  0xcd   :  { %4233 = vmatpush2.bf16.msra.mxu0 %v20321_v8  ;;  %v20405_v8 = vld [vmem:[#allocation9 + $0xe18] ss:$40 sps:$4 sm:$0xff]  }
  0xce   :  { %4274 = vmatpush2.bf16.msra.mxu1 %v20324_v9  ;;  %4234 = vmatprep.subr.bf16.mxu0 %v20329_v10  ;;  %v20408_v9 = vld [vmem:[#allocation9 + $0x1318] ss:$40 sps:$4 sm:$0xff]   ;;  %v20413_v10 = vld [vmem:[#allocation9 + $0xdcc] ss:$40 sps:$4 sm:$0xff]  }
  0xcf   :  { %4275 = vmatprep.subr.bf16.mxu1 %v20332_v11  ;;  %v20416_v11 = vld [vmem:[#allocation9 + $0x12cc] ss:$40 sps:$4 sm:$0xff]  }
  0xd1   :  { %4235 = vmatpush2.bf16.msra.mxu0 %v20327_v12  ;;  %v20411_v12 = vld [vmem:[#allocation9 + $0xdc8] ss:$40 sps:$4 sm:$0xff]  }
  0xd2   :  { %4276 = vmatpush2.bf16.msra.mxu1 %v20330_v13  ;;  %4236 = vmatprep.subr.bf16.mxu0 %v20335_v14  ;;  %v20414_v13 = vld [vmem:[#allocation9 + $0x12c8] ss:$40 sps:$4 sm:$0xff]   ;;  %v20419_v14 = vld [vmem:[#allocation9 + $0xd7c] ss:$40 sps:$4 sm:$0xff]  }
  0xd3   :  { %4277 = vmatprep.subr.bf16.mxu1 %v20338_v15  ;;  %v20422_v15 = vld [vmem:[#allocation9 + $0x127c] ss:$40 sps:$4 sm:$0xff]  }
  0xd5   :  { %4237 = vmatpush2.bf16.msra.mxu0 %v20333_v18  ;;  %v20417_v18 = vld [vmem:[#allocation9 + $0xd78] ss:$40 sps:$4 sm:$0xff]  }
  0xd6   :  { %4278 = vmatpush2.bf16.msra.mxu1 %v20336_v19  ;;  %4238 = vmatprep.subr.bf16.mxu0 %v20341_v20  ;;  %v20420_v19 = vld [vmem:[#allocation9 + $0x1278] ss:$40 sps:$4 sm:$0xff]   ;;  %v20425_v20 = vld [vmem:[#allocation9 + $0xd2c] ss:$40 sps:$4 sm:$0xff]  }
  0xd7   :  { %4279 = vmatprep.subr.bf16.mxu1 %v20344_v21  ;;  %v20428_v21 = vld [vmem:[#allocation9 + $0x122c] ss:$40 sps:$4 sm:$0xff]  }
  0xd9   :  { %4239 = vmatpush2.bf16.msra.mxu0 %v20339_v22  ;;  %v20423_v22 = vld [vmem:[#allocation9 + $0xd28] ss:$40 sps:$4 sm:$0xff]  }
  0xda   :  { %4280 = vmatpush2.bf16.msra.mxu1 %v20342_v23  ;;  %4290 = vmatprep.subr.bf16.mxu0 %v20347_v24  ;;  %v20426_v23 = vld [vmem:[#allocation9 + $0x1228] ss:$40 sps:$4 sm:$0xff]   ;;  %v766_v24 = vlaneseq }
  0xdb   :  { %4331 = vmatprep.subr.bf16.mxu1 %v20350_v25  ;;  %v20431_v25 = vld [vmem:[#allocation9 + $0xcdc] ss:$40 sps:$4 sm:$0xff]  }
  0xdc   :  { %4241 = vmatmul.mubr.bf16.vlgmr.msra.gmra.mxu0 %v23757_v6 }
  0xdd   :  { %4282 = vmatmul.mubr.bf16.vlgmr.msra.gmra.mxu1 %v23759_v7  ;;  %4291 = vmatpush1.bf16.msra.mxu0 %v20345_v26  ;;  %v20434_v26 = vld [vmem:[#allocation9 + $0x11dc] ss:$40 sps:$4 sm:$0xff]  }
  0xde   :  { %4332 = vmatpush1.bf16.msra.mxu1 %v20348_v27  ;;  %4292 = vmatprep.subr.bf16.mxu0 %v20353_v28  ;;  %v20429_v27 = vld [vmem:[#allocation9 + $0xcd8] ss:$40 sps:$4 sm:$0xff]  }
  0xdf   :  { %4333 = vmatprep.subr.bf16.mxu1 %v20356_v29  ;;  %4322 = vmatprep.mubr.bf16.mxu0 %v23775_v36  ;;  %v20432_v28 = vld [vmem:[#allocation9 + $0x11d8] ss:$40 sps:$4 sm:$0xff]   ;;  %v23799_v29 = vshrl.u32 %v766_v24, 7  ;;  %v20488_v24 = vld [vmem:[#allocation9 + $0x514] ss:$40 sps:$4 sm:$0xff]  }
  0xe0   :  { %4363 = vmatprep.mubr.bf16.mxu1 %v23779_v37 }
  0xe1   :  { %4293 = vmatpush1.bf16.msra.mxu0 %v20351_v30  ;;  %v20437_v30 = vld [vmem:[#allocation9 + $0xc8c] ss:$40 sps:$4 sm:$0xff]  }
  0xe2   :  { %4334 = vmatpush1.bf16.msra.mxu1 %v20354_v31  ;;  %4294 = vmatprep.subr.bf16.mxu0 %v20359_v32  ;;  %v20440_v31 = vld [vmem:[#allocation9 + $0x118c] ss:$40 sps:$4 sm:$0xff]   ;;  %v20435_v32 = vld [vmem:[#allocation9 + $0xc88] ss:$40 sps:$4 sm:$0xff]  }
  0xe3   :  { %4335 = vmatprep.subr.bf16.mxu1 %v20362_v33  ;;  %v20438_v33 = vld [vmem:[#allocation9 + $0x1188] ss:$40 sps:$4 sm:$0xff]  }
  0xe5   :  { %4295 = vmatpush1.bf16.msra.mxu0 %v20357_v34  ;;  %v762_v34 = vld [vmem:[#allocation11] sm:$0xff] }
  0xe6   :  { %4336 = vmatpush1.bf16.msra.mxu1 %v20360_v35  ;;  %4296 = vmatprep.subr.bf16.mxu0 %v20365_v38  ;;  %v23802_v35 = vsub.s32 0, %v23799_v29  ;;  %v20443_v38 = vld [vmem:[#allocation9 + $0x244] ss:$40 sps:$4 sm:$0xff]  }
  0xe7   :  { %4337 = vmatprep.subr.bf16.mxu1 %v20368_v39  ;;  %v20446_v39 = vld [vmem:[#allocation9 + $0x744] ss:$40 sps:$4 sm:$0xff]  }
  0xe9   :  { %4297 = vmatpush1.bf16.msra.mxu0 %v20363_v40  ;;  %v23805_v40 = vsub.s32 1, %v23799_v29 }
  0xea   :  { %4338 = vmatpush1.bf16.msra.mxu1 %v20366_v41  ;;  %4298 = vmatprep.subr.bf16.mxu0 %v20371_v42  ;;  %v20441_v41 = vld [vmem:[#allocation9 + $0x240] ss:$40 sps:$4 sm:$0xff]   ;;  %v769_v42 = vrot.slane %v762_v34, %v23802_v35 }
  0xeb   :  { %4339 = vmatprep.subr.bf16.mxu1 %v20374_v43  ;;  %v20444_v43 = vld [vmem:[#allocation9 + $0x740] ss:$40 sps:$4 sm:$0xff]  }
  0xed   :  { %4299 = vmatpush1.bf16.msra.mxu0 %v20369_v44  ;;  %v20449_v44 = vld [vmem:[#allocation9 + $0x1f4] ss:$40 sps:$4 sm:$0xff]  }
  0xee   :  { %4340 = vmatpush1.bf16.msra.mxu1 %v20372_v45  ;;  %4300 = vmatprep.subr.bf16.mxu0 %v20377_v46  ;;  %v20452_v45 = vld [vmem:[#allocation9 + $0x6f4] ss:$40 sps:$4 sm:$0xff]   ;;  %v773_v46 = vrot.slane %v762_v34, %v23805_v40  ;;  %v20495_v34 = vld [vmem:[#allocation9 + $0x470] ss:$40 sps:$4 sm:$0xff]  }
  0xef   :  { %4341 = vmatprep.subr.bf16.mxu1 %v20380_v48  ;;  %v20447_v48 = vld [vmem:[#allocation9 + $0x1f0] ss:$40 sps:$4 sm:$0xff]  }
  0xf1   :  { %4301 = vmatpush1.bf16.msra.mxu0 %v20375_v49 }
  0xf2   :  { %4342 = vmatpush1.bf16.msra.mxu1 %v20378_v50  ;;  %4302 = vmatprep.subr.bf16.mxu0 %v20383_v52  ;;  %v20450_v52 = vld [vmem:[#allocation9 + $0x6f0] ss:$40 sps:$4 sm:$0xff]  }
  0xf3   :  { %4343 = vmatprep.subr.bf16.mxu1 %v20386_v53 }
  0xf5   :  { %4303 = vmatpush1.bf16.msra.mxu0 %v20381_v54  ;;  %v20455_v54 = vld [vmem:[#allocation9 + $0x1a4] ss:$40 sps:$4 sm:$0xff]  }
  0xf6   :  { %4344 = vmatpush1.bf16.msra.mxu1 %v20384_v55  ;;  %4304 = vmatprep.subr.bf16.mxu0 %v20389_v56 }
  0xf7   :  { %4345 = vmatprep.subr.bf16.mxu1 %v20392_v57  ;;  %v20458_v57 = vld [vmem:[#allocation9 + $0x6a4] ss:$40 sps:$4 sm:$0xff]  }
  0xf9   :  { %4305 = vmatpush1.bf16.msra.mxu0 %v20387_v58 }
  0xfa   :  { %4346 = vmatpush1.bf16.msra.mxu1 %v20390_v59  ;;  %4306 = vmatprep.subr.bf16.mxu0 %v20395_v60  ;;  %v20453_v60 = vld [vmem:[#allocation9 + $0x1a0] ss:$40 sps:$4 sm:$0xff]  }
  0xfb   :  { %4347 = vmatprep.subr.bf16.mxu1 %v20398_v61  ;;  %v20456_v61 = vld [vmem:[#allocation9 + $0x6a0] ss:$40 sps:$4 sm:$0xff]  }
  0xfd   :  { %4307 = vmatpush2.bf16.msra.mxu0 %v20393_v62 }
  0xfe   :  { %4348 = vmatpush2.bf16.msra.mxu1 %v20396_v63  ;;  %4308 = vmatprep.subr.bf16.mxu0 %v20401_v0 }
  0xff   :  { %4349 = vmatprep.subr.bf16.mxu1 %v20404_v1 }
 0x101   :  { %4309 = vmatpush2.bf16.msra.mxu0 %v20399_v2 }
 0x102   :  { %4350 = vmatpush2.bf16.msra.mxu1 %v20402_v3  ;;  %4310 = vmatprep.subr.bf16.mxu0 %v20407_v4  ;;  %v20461_v3 = vld [vmem:[#allocation9 + $0x154] ss:$40 sps:$4 sm:$0xff]  }
 0x103   :  { %4351 = vmatprep.subr.bf16.mxu1 %v20410_v5  ;;  %v20464_v4 = vld [vmem:[#allocation9 + $0x654] ss:$40 sps:$4 sm:$0xff]   ;;  %v20459_v5 = vld [vmem:[#allocation9 + $0x150] ss:$40 sps:$4 sm:$0xff]  }
 0x105   :  { %4311 = vmatpush2.bf16.msra.mxu0 %v20405_v8  ;;  %v20462_v8 = vld [vmem:[#allocation9 + $0x650] ss:$40 sps:$4 sm:$0xff]  }
 0x106   :  { %4352 = vmatpush2.bf16.msra.mxu1 %v20408_v9  ;;  %4312 = vmatprep.subr.bf16.mxu0 %v20413_v10  ;;  %v20467_v9 = vld [vmem:[#allocation9 + $0x104] ss:$40 sps:$4 sm:$0xff]  }
 0x107   :  { %4353 = vmatprep.subr.bf16.mxu1 %v20416_v11  ;;  %v20470_v10 = vld [vmem:[#allocation9 + $0x604] ss:$40 sps:$4 sm:$0xff]   ;;  %v20465_v11 = vld [vmem:[#allocation9 + $0x100] ss:$40 sps:$4 sm:$0xff]  }
 0x109   :  { %4313 = vmatpush2.bf16.msra.mxu0 %v20411_v12  ;;  %v20468_v12 = vld [vmem:[#allocation9 + $0x600] ss:$40 sps:$4 sm:$0xff]  }
 0x10a   :  { %4354 = vmatpush2.bf16.msra.mxu1 %v20414_v13  ;;  %4314 = vmatprep.subr.bf16.mxu0 %v20419_v14  ;;  %v20473_v13 = vld [vmem:[#allocation9 + $0xb4] ss:$40 sps:$4 sm:$0xff]  }
 0x10b   :  { %4355 = vmatprep.subr.bf16.mxu1 %v20422_v15  ;;  %v20476_v14 = vld [vmem:[#allocation9 + $0x5b4] ss:$40 sps:$4 sm:$0xff]   ;;  %v20471_v15 = vld [vmem:[#allocation9 + $0xb0] ss:$40 sps:$4 sm:$0xff]  }
 0x10d   :  { %4315 = vmatpush2.bf16.msra.mxu0 %v20417_v18  ;;  %v20474_v18 = vld [vmem:[#allocation9 + $0x5b0] ss:$40 sps:$4 sm:$0xff]  }
 0x10e   :  { %4356 = vmatpush2.bf16.msra.mxu1 %v20420_v19  ;;  %4316 = vmatprep.subr.bf16.mxu0 %v20425_v20  ;;  %v20479_v19 = vld [vmem:[#allocation9 + $0x64] ss:$40 sps:$4 sm:$0xff]  }
 0x10f   :  { %4357 = vmatprep.subr.bf16.mxu1 %v20428_v21  ;;  %v20482_v20 = vld [vmem:[#allocation9 + $0x564] ss:$40 sps:$4 sm:$0xff]   ;;  %v20477_v21 = vld [vmem:[#allocation9 + $0x60] ss:$40 sps:$4 sm:$0xff]  }
 0x111   :  { %4317 = vmatpush2.bf16.msra.mxu0 %v20423_v22  ;;  %v20480_v22 = vld [vmem:[#allocation9 + $0x560] ss:$40 sps:$4 sm:$0xff]  }
 0x112   :  { %4358 = vmatpush2.bf16.msra.mxu1 %v20426_v23  ;;  %4318 = vmatprep.subr.bf16.mxu0 %v20431_v25  ;;  %v20485_v23 = vld [vmem:[#allocation9 + $0x14] ss:$40 sps:$4 sm:$0xff]   ;;  %v20483_v25 = vld [vmem:[#allocation9 + $0x10] ss:$40 sps:$4 sm:$0xff]  }
 0x113   :  { %4359 = vmatprep.subr.bf16.mxu1 %v20434_v26  ;;  %v20486_v26 = vld [vmem:[#allocation9 + $0x510] ss:$40 sps:$4 sm:$0xff]  }
 0x115   :  { %4319 = vmatpush2.bf16.msra.mxu0 %v20429_v27  ;;  %v20491_v27 = vld [vmem:[#allocation9 + $0x4c4] ss:$40 sps:$4 sm:$0xff]  }
 0x116   :  { %4360 = vmatpush2.bf16.msra.mxu1 %v20432_v28  ;;  %4320 = vmatprep.subr.bf16.mxu0 %v20437_v30  ;;  %v20494_v28 = vld [vmem:[#allocation9 + $0x9c4] ss:$40 sps:$4 sm:$0xff]   ;;  %v20489_v30 = vld [vmem:[#allocation9 + $0x4c0] ss:$40 sps:$4 sm:$0xff]  }
 0x117   :  { %4361 = vmatprep.subr.bf16.mxu1 %v20440_v31  ;;  %v20492_v31 = vld [vmem:[#allocation9 + $0x9c0] ss:$40 sps:$4 sm:$0xff]  }
 0x119   :  { %4321 = vmatpush2.bf16.msra.mxu0 %v20435_v32  ;;  %v20497_v32 = vld [vmem:[#allocation9 + $0x474] ss:$40 sps:$4 sm:$0xff]  }
 0x11a   :  { %4362 = vmatpush2.bf16.msra.mxu1 %v20438_v33  ;;  %4372 = vmatprep.subr.bf16.mxu0 %v20443_v38  ;;  %v20500_v33 = vld [vmem:[#allocation9 + $0x974] ss:$40 sps:$4 sm:$0xff]   ;;  %v20498_v38 = vld [vmem:[#allocation9 + $0x970] ss:$40 sps:$4 sm:$0xff]  }
 0x11b   :  { %4413 = vmatprep.subr.bf16.mxu1 %v20446_v39  ;;  %v20503_v39 = vld [vmem:[#allocation9 + $0x424] ss:$40 sps:$4 sm:$0xff]  }
 0x11c   :  { %v4078_v49 = vpop.f32.mrf.mxu0  ;;  %4323 = vmatmul.mubr.bf16.vlgmr.msra.gmra.mxu0 %v23785_v16 }
 0x11d   :  { %v4119_v50 = vpop.f32.mrf.mxu1  ;;  %4364 = vmatmul.mubr.bf16.vlgmr.msra.gmra.mxu1 %v23789_v17  ;;  %v4079_v53 = vadd.f32 %v4078_v49, %v769_v42  ;;  %4373 = vmatpush1.bf16.msra.mxu0 %v20441_v41  ;;  %v20506_v41 = vld [vmem:[#allocation9 + $0x924] ss:$40 sps:$4 sm:$0xff]   ;;  %v20501_v42 = vld [vmem:[#allocation9 + $0x420] ss:$40 sps:$4 sm:$0xff]  }
 0x11e   :  { %4414 = vmatpush1.bf16.msra.mxu1 %v20444_v43  ;;  %v4080_v55 = vpop.f32.mrf.mxu0  ;;  %4374 = vmatprep.subr.bf16.mxu0 %v20449_v44  ;;  %v20504_v43 = vld [vmem:[#allocation9 + $0x920] ss:$40 sps:$4 sm:$0xff]   ;;  %v20509_v44 = vld [vmem:[#allocation9 + $0x3d4] ss:$40 sps:$4 sm:$0xff]   ;;  %v20515_v49 = vld [vmem:[#allocation9 + $0x384] ss:$40 sps:$4 sm:$0xff]  }
 0x11f   :  { %v4121_v56 = vpop.f32.mrf.mxu1  ;;  %4415 = vmatprep.subr.bf16.mxu1 %v20452_v45  ;;  %v23811_v58 = vadd.f32 %v4119_v50, %v4079_v53  ;;  %v4081_v59 = vadd.f32 %v4080_v55, %v773_v46  ;;  %4404 = vmatprep.mubr.bf16.mxu0 %v23748_v47  ;;  %v20512_v45 = vld [vmem:[#allocation9 + $0x8d4] ss:$40 sps:$4 sm:$0xff]   ;;  %v20507_v46 = vld [vmem:[#allocation9 + $0x3d0] ss:$40 sps:$4 sm:$0xff]   ;;  %v20518_v50 = vld [vmem:[#allocation9 + $0x884] ss:$40 sps:$4 sm:$0xff]  }
 0x120   :  { %4445 = vmatprep.mubr.bf16.mxu1 %v23753_v51  ;;  %v4082_v62 = vpop.f32.mrf.mxu0  ;;  %v20516_v53 = vld [vmem:[#allocation9 + $0x880] ss:$40 sps:$4 sm:$0xff]   ;;  %v20524_v55 = vld [vmem:[#allocation9 + $0x834] ss:$40 sps:$4 sm:$0xff]  }
 0x121   :  { %v4123_v63 = vpop.f32.mrf.mxu1  ;;  %v23815_v0 = vadd.f32 %v4121_v56, %v4081_v59  ;;  %4375 = vmatpush1.bf16.msra.mxu0 %v20447_v48  ;;  %v20510_v48 = vld [vmem:[#allocation9 + $0x8d0] ss:$40 sps:$4 sm:$0xff]   ;;  %v20527_v59 = vld [vmem:[#allocation9 + $0x2e4] ss:$40 sps:$4 sm:$0xff]   ;;  %v20528_v62 = vld [vmem:[#allocation9 + $0x7e0] ss:$40 sps:$4 sm:$0xff]  }
 0x122   :  { %4416 = vmatpush1.bf16.msra.mxu1 %v20450_v52  ;;  %v4083_v1 = vpop.f32.mrf.mxu0  ;;  %4376 = vmatprep.subr.bf16.mxu0 %v20455_v54  ;;  %v20513_v52 = vld [vmem:[#allocation9 + $0x380] ss:$40 sps:$4 sm:$0xff]   ;;  %v20521_v54 = vld [vmem:[#allocation9 + $0x334] ss:$40 sps:$4 sm:$0xff]   ;;  %v20519_v56 = vld [vmem:[#allocation9 + $0x330] ss:$40 sps:$4 sm:$0xff]  }
 0x123   :  { %v4124_v2 = vpop.f32.mrf.mxu1  ;;  %4417 = vmatprep.subr.bf16.mxu1 %v20458_v57  ;;  %v20522_v57 = vld [vmem:[#allocation9 + $0x830] ss:$40 sps:$4 sm:$0xff]   ;;  %v20533_v63 = vld [vmem:[#allocation9 + $0x294] ss:$40 sps:$4 sm:$0xff]  }
 0x124   :  { %v20536_v1 = vld [vmem:[#allocation9 + $0x794] ss:$40 sps:$4 sm:$0xff]   ;;  %v20531_v2 = vld [vmem:[#allocation9 + $0x290] ss:$40 sps:$4 sm:$0xff]  }
 0x125   :  { %4377 = vmatpush1.bf16.msra.mxu0 %v20453_v60  ;;  %v20530_v60 = vld [vmem:[#allocation9 + $0x7e4] ss:$40 sps:$4 sm:$0xff]  }
 0x126   :  { %4418 = vmatpush1.bf16.msra.mxu1 %v20456_v61  ;;  %4378 = vmatprep.subr.bf16.mxu0 %v20461_v3  ;;  %v20525_v61 = vld [vmem:[#allocation9 + $0x2e0] ss:$40 sps:$4 sm:$0xff]   ;;  %v20534_v3 = vld [vmem:[#allocation9 + $0x790] ss:$40 sps:$4 sm:$0xff]  }
 0x127   :  { %4419 = vmatprep.subr.bf16.mxu1 %v20464_v4  ;;  %v20539_v4 = vld [vmem:[#allocation9 + $0xc44] ss:$40 sps:$4 sm:$0xff]  }
 0x129   :  { %4379 = vmatpush1.bf16.msra.mxu0 %v20459_v5  ;;  %v20542_v5 = vld [vmem:[#allocation9 + $0x1144] ss:$40 sps:$4 sm:$0xff]  }
 0x12a   :  { %4420 = vmatpush1.bf16.msra.mxu1 %v20462_v8  ;;  %4380 = vmatprep.subr.bf16.mxu0 %v20467_v9  ;;  %v20537_v8 = vld [vmem:[#allocation9 + $0xc40] ss:$40 sps:$4 sm:$0xff]  }
 0x12b   :  { %4421 = vmatprep.subr.bf16.mxu1 %v20470_v10  ;;  %v20540_v9 = vld [vmem:[#allocation9 + $0x1140] ss:$40 sps:$4 sm:$0xff]   ;;  %v20545_v10 = vld [vmem:[#allocation9 + $0xbf4] ss:$40 sps:$4 sm:$0xff]  }
 0x12d   :  { %4381 = vmatpush1.bf16.msra.mxu0 %v20465_v11  ;;  %v20548_v11 = vld [vmem:[#allocation9 + $0x10f4] ss:$40 sps:$4 sm:$0xff]  }
 0x12e   :  { %4422 = vmatpush1.bf16.msra.mxu1 %v20468_v12  ;;  %4382 = vmatprep.subr.bf16.mxu0 %v20473_v13  ;;  %v20543_v12 = vld [vmem:[#allocation9 + $0xbf0] ss:$40 sps:$4 sm:$0xff]  }
 0x12f   :  { %4423 = vmatprep.subr.bf16.mxu1 %v20476_v14  ;;  %v20546_v13 = vld [vmem:[#allocation9 + $0x10f0] ss:$40 sps:$4 sm:$0xff]  }
 0x131   :  { %4383 = vmatpush1.bf16.msra.mxu0 %v20471_v15 }
 0x132   :  { %4424 = vmatpush1.bf16.msra.mxu1 %v20474_v18  ;;  %4384 = vmatprep.subr.bf16.mxu0 %v20479_v19 }
 0x133   :  { %4425 = vmatprep.subr.bf16.mxu1 %v20482_v20 }
 0x135   :  { %4385 = vmatpush1.bf16.msra.mxu0 %v20477_v21  ;;  %v20551_v21 = vld [vmem:[#allocation9 + $0xba4] ss:$40 sps:$4 sm:$0xff]  }
 0x136   :  { %4426 = vmatpush1.bf16.msra.mxu1 %v20480_v22  ;;  %4386 = vmatprep.subr.bf16.mxu0 %v20485_v23  ;;  %v20554_v22 = vld [vmem:[#allocation9 + $0x10a4] ss:$40 sps:$4 sm:$0xff]  }
 0x137   :  { %4427 = vmatprep.subr.bf16.mxu1 %v20488_v24 }
 0x139   :  { %4387 = vmatpush1.bf16.msra.mxu0 %v20483_v25  ;;  %v20549_v25 = vld [vmem:[#allocation9 + $0xba0] ss:$40 sps:$4 sm:$0xff]  }
 0x13a   :  { %4428 = vmatpush1.bf16.msra.mxu1 %v20486_v26  ;;  %4388 = vmatprep.subr.bf16.mxu0 %v20491_v27  ;;  %v20552_v26 = vld [vmem:[#allocation9 + $0x10a0] ss:$40 sps:$4 sm:$0xff]  }
 0x13b   :  { %4429 = vmatprep.subr.bf16.mxu1 %v20494_v28 }
 0x13d   :  { %4389 = vmatpush2.bf16.msra.mxu0 %v20489_v30 }
 0x13e   :  { %4430 = vmatpush2.bf16.msra.mxu1 %v20492_v31  ;;  %4390 = vmatprep.subr.bf16.mxu0 %v20497_v32 }
 0x13f   :  { %4431 = vmatprep.subr.bf16.mxu1 %v20500_v33  ;;  %v20557_v33 = vld [vmem:[#allocation9 + $0xb54] ss:$40 sps:$4 sm:$0xff]  }
 0x141   :  { %4391 = vmatpush2.bf16.msra.mxu0 %v20495_v34  ;;  %v20560_v34 = vld [vmem:[#allocation9 + $0x1054] ss:$40 sps:$4 sm:$0xff]  }
 0x142   :  { %4432 = vmatpush2.bf16.msra.mxu1 %v20498_v38  ;;  %4392 = vmatprep.subr.bf16.mxu0 %v20503_v39 }
 0x143   :  { %4433 = vmatprep.subr.bf16.mxu1 %v20506_v41  ;;  %v20555_v41 = vld [vmem:[#allocation9 + $0xb50] ss:$40 sps:$4 sm:$0xff]  }
 0x145   :  { %4393 = vmatpush2.bf16.msra.mxu0 %v20501_v42  ;;  %v20558_v42 = vld [vmem:[#allocation9 + $0x1050] ss:$40 sps:$4 sm:$0xff]  }
 0x146   :  { %4434 = vmatpush2.bf16.msra.mxu1 %v20504_v43  ;;  %4394 = vmatprep.subr.bf16.mxu0 %v20509_v44  ;;  %v20563_v43 = vld [vmem:[#allocation9 + $0xb04] ss:$40 sps:$4 sm:$0xff]  }
 0x147   :  { %4435 = vmatprep.subr.bf16.mxu1 %v20512_v45  ;;  %v20566_v44 = vld [vmem:[#allocation9 + $0x1004] ss:$40 sps:$4 sm:$0xff]   ;;  %v20561_v45 = vld [vmem:[#allocation9 + $0xb00] ss:$40 sps:$4 sm:$0xff]  }
 0x149   :  { %4395 = vmatpush2.bf16.msra.mxu0 %v20507_v46  ;;  %v20564_v46 = vld [vmem:[#allocation9 + $0x1000] ss:$40 sps:$4 sm:$0xff]  }
 0x14a   :  { %4436 = vmatpush2.bf16.msra.mxu1 %v20510_v48  ;;  %4396 = vmatprep.subr.bf16.mxu0 %v20515_v49  ;;  %v20569_v48 = vld [vmem:[#allocation9 + $0xab4] ss:$40 sps:$4 sm:$0xff]  }
 0x14b   :  { %4437 = vmatprep.subr.bf16.mxu1 %v20518_v50  ;;  %v20572_v49 = vld [vmem:[#allocation9 + $0xfb4] ss:$40 sps:$4 sm:$0xff]   ;;  %v20567_v50 = vld [vmem:[#allocation9 + $0xab0] ss:$40 sps:$4 sm:$0xff]  }
 0x14d   :  { %4397 = vmatpush2.bf16.msra.mxu0 %v20513_v52  ;;  %v20570_v52 = vld [vmem:[#allocation9 + $0xfb0] ss:$40 sps:$4 sm:$0xff]  }
 0x14e   :  { %4438 = vmatpush2.bf16.msra.mxu1 %v20516_v53  ;;  %4398 = vmatprep.subr.bf16.mxu0 %v20521_v54  ;;  %v20575_v53 = vld [vmem:[#allocation9 + $0xa64] ss:$40 sps:$4 sm:$0xff]  }
 0x14f   :  { %4439 = vmatprep.subr.bf16.mxu1 %v20524_v55  ;;  %v20578_v54 = vld [vmem:[#allocation9 + $0xf64] ss:$40 sps:$4 sm:$0xff]   ;;  %v20573_v55 = vld [vmem:[#allocation9 + $0xa60] ss:$40 sps:$4 sm:$0xff]  }
 0x151   :  { %4399 = vmatpush2.bf16.msra.mxu0 %v20519_v56  ;;  %v20576_v56 = vld [vmem:[#allocation9 + $0xf60] ss:$40 sps:$4 sm:$0xff]  }
 0x152   :  { %4440 = vmatpush2.bf16.msra.mxu1 %v20522_v57  ;;  %4400 = vmatprep.subr.bf16.mxu0 %v20527_v59  ;;  %v20581_v57 = vld [vmem:[#allocation9 + $0xa14] ss:$40 sps:$4 sm:$0xff]  }
 0x153   :  { %4441 = vmatprep.subr.bf16.mxu1 %v20530_v60  ;;  %v20584_v59 = vld [vmem:[#allocation9 + $0xf14] ss:$40 sps:$4 sm:$0xff]   ;;  %v20579_v60 = vld [vmem:[#allocation9 + $0xa10] ss:$40 sps:$4 sm:$0xff]  }
 0x155   :  { %4401 = vmatpush2.bf16.msra.mxu0 %v20525_v61  ;;  %v20582_v61 = vld [vmem:[#allocation9 + $0xf10] ss:$40 sps:$4 sm:$0xff]  }
 0x156   :  { %4442 = vmatpush2.bf16.msra.mxu1 %v20528_v62  ;;  %4402 = vmatprep.subr.bf16.mxu0 %v20533_v63  ;;  %v20587_v62 = vld [vmem:[#allocation9 + $0xec4] ss:$40 sps:$4 sm:$0xff]  }
 0x157   :  { %4443 = vmatprep.subr.bf16.mxu1 %v20536_v1  ;;  %v20590_v63 = vld [vmem:[#allocation9 + $0x13c4] ss:$40 sps:$4 sm:$0xff]   ;;  %v20585_v1 = vld [vmem:[#allocation9 + $0xec0] ss:$40 sps:$4 sm:$0xff]  }
 0x159   :  { %4403 = vmatpush2.bf16.msra.mxu0 %v20531_v2  ;;  %v20588_v2 = vld [vmem:[#allocation9 + $0x13c0] ss:$40 sps:$4 sm:$0xff]  }
 0x15a   :  { %4444 = vmatpush2.bf16.msra.mxu1 %v20534_v3  ;;  %4454 = vmatprep.subr.bf16.mxu0 %v20539_v4  ;;  %v20593_v3 = vld [vmem:[#allocation9 + $0xe74] ss:$40 sps:$4 sm:$0xff]  }
 0x15b   :  { %4495 = vmatprep.subr.bf16.mxu1 %v20542_v5  ;;  %v20596_v4 = vld [vmem:[#allocation9 + $0x1374] ss:$40 sps:$4 sm:$0xff]   ;;  %v20591_v5 = vld [vmem:[#allocation9 + $0xe70] ss:$40 sps:$4 sm:$0xff]  }
 0x15c   :  { %v4160_v14 = vpop.f32.mrf.mxu0  ;;  %4405 = vmatmul.mubr.bf16.vlgmr.msra.gmra.mxu0 %v23757_v6 }
 0x15d   :  { %v4201_v15 = vpop.f32.mrf.mxu1  ;;  %4446 = vmatmul.mubr.bf16.vlgmr.msra.gmra.mxu1 %v23759_v7  ;;  %v4161_v18 = vadd.f32 %v4160_v14, %v23811_v58  ;;  %4455 = vmatpush1.bf16.msra.mxu0 %v20537_v8  ;;  %v20594_v8 = vld [vmem:[#allocation9 + $0x1370] ss:$40 sps:$4 sm:$0xff]   ;;  %v20608_v14 = vld [vmem:[#allocation9 + $0x12d4] ss:$40 sps:$4 sm:$0xff]  }
 0x15e   :  { %4496 = vmatpush1.bf16.msra.mxu1 %v20540_v9  ;;  %v4162_v19 = vpop.f32.mrf.mxu0  ;;  %4456 = vmatprep.subr.bf16.mxu0 %v20545_v10  ;;  %v20599_v9 = vld [vmem:[#allocation9 + $0xe24] ss:$40 sps:$4 sm:$0xff]  }
 0x15f   :  { %v4203_v20 = vpop.f32.mrf.mxu1  ;;  %4497 = vmatprep.subr.bf16.mxu1 %v20548_v11  ;;  %v4202_v23 = vadd.f32 %v4201_v15, %v4161_v18  ;;  %v4163_v24 = vadd.f32 %v4162_v19, %v23815_v0  ;;  %4486 = vmatprep.mubr.bf16.mxu0 %v23775_v36  ;;  %v20602_v10 = vld [vmem:[#allocation9 + $0x1324] ss:$40 sps:$4 sm:$0xff]   ;;  %v20597_v11 = vld [vmem:[#allocation9 + $0xe20] ss:$40 sps:$4 sm:$0xff]   ;;  %v20603_v15 = vld [vmem:[#allocation9 + $0xdd0] ss:$40 sps:$4 sm:$0xff]  }
 0x160   :  { %4527 = vmatprep.mubr.bf16.mxu1 %v23779_v37  ;;  %v4164_v27 = vpop.f32.mrf.mxu0  ;;  %v20606_v18 = vld [vmem:[#allocation9 + $0x12d0] ss:$40 sps:$4 sm:$0xff]   ;;  %v20611_v19 = vld [vmem:[#allocation9 + $0xd84] ss:$40 sps:$4 sm:$0xff]  }
 0x161   :  { %v4205_v28 = vpop.f32.mrf.mxu1  ;;  %v4864_v58 = vmax.f32 %v4202_v23, 0.0  ;;  %v4204_v30 = vadd.f32 %v4203_v20, %v4163_v24  ;;  %4457 = vmatpush1.bf16.msra.mxu0 %v20543_v12  ;;  %v20600_v12 = vld [vmem:[#allocation9 + $0x1320] ss:$40 sps:$4 sm:$0xff]   ;;  %v20614_v20 = vld [vmem:[#allocation9 + $0x1284] ss:$40 sps:$4 sm:$0xff]  }
 0x162   :  { %4498 = vmatpush1.bf16.msra.mxu1 %v20546_v13  ;;  %v4165_v31 = vpop.f32.mrf.mxu0  ;;  %4458 = vmatprep.subr.bf16.mxu0 %v20551_v21  ;;  %v20605_v13 = vld [vmem:[#allocation9 + $0xdd4] ss:$40 sps:$4 sm:$0xff]   ;;  %v20609_v21 = vld [vmem:[#allocation9 + $0xd80] ss:$40 sps:$4 sm:$0xff]   ;;  %v20623_v27 = vld [vmem:[#allocation9 + $0xce4] ss:$40 sps:$4 sm:$0xff]  }
 0x163   :  { %v4206_v32 = vpop.f32.mrf.mxu1  ;;  %4499 = vmatprep.subr.bf16.mxu1 %v20554_v22  ;;  %v23823_v38 = vpack.c.bf16 %v4864_v58, %v4864_v58  ;;  %v4865_v0 = vmax.f32 %v4204_v30, 0.0  ;;  %v20612_v22 = vld [vmem:[#allocation9 + $0x1280] ss:$40 sps:$4 sm:$0xff]   ;;  %v20617_v23 = vld [vmem:[#allocation9 + $0xd34] ss:$40 sps:$4 sm:$0xff]  }
 0x164   :  { %v20620_v24 = vld [vmem:[#allocation9 + $0x1234] ss:$40 sps:$4 sm:$0xff]   ;;  %v20626_v28 = vld [vmem:[#allocation9 + $0x11e4] ss:$40 sps:$4 sm:$0xff]   ;;  %v20621_v58 = vld [vmem:[#allocation9 + $0xce0] ss:$40 sps:$4 sm:$0xff]  }
 0x165   :  { %v23825_v39 = vpack.c.bf16 %v4865_v0, %v4865_v0  ;;  %4459 = vmatpush1.bf16.msra.mxu0 %v20549_v25  ;;  %v20615_v25 = vld [vmem:[#allocation9 + $0xd30] ss:$40 sps:$4 sm:$0xff]   ;;  %v20624_v30 = vld [vmem:[#allocation9 + $0x11e0] ss:$40 sps:$4 sm:$0xff]   ;;  %v20629_v31 = vld [vmem:[#allocation9 + $0xc94] ss:$40 sps:$4 sm:$0xff]  }
 0x166   :  { %4500 = vmatpush1.bf16.msra.mxu1 %v20552_v26  ;;  %4460 = vmatprep.subr.bf16.mxu0 %v20557_v33  ;;  %v20618_v26 = vld [vmem:[#allocation9 + $0x1230] ss:$40 sps:$4 sm:$0xff]   ;;  %v20632_v32 = vld [vmem:[#allocation9 + $0x1194] ss:$40 sps:$4 sm:$0xff]   ;;  %v23828_v0 = vsub.s32 2, %v23799_v29 }
 0x167   :  { %4501 = vmatprep.subr.bf16.mxu1 %v20560_v34  ;;  %v20627_v33 = vld [vmem:[#allocation9 + $0xc90] ss:$40 sps:$4 sm:$0xff]  }
 0x168   :  { %v20630_v34 = vld [vmem:[#allocation9 + $0x1190] ss:$40 sps:$4 sm:$0xff]  }
 0x169   :  { %4461 = vmatpush1.bf16.msra.mxu0 %v20555_v41  ;;  %v20635_v41 = vld [vmem:[#allocation9 + $0x24c] ss:$40 sps:$4 sm:$0xff]  }
 0x16a   :  { %4502 = vmatpush1.bf16.msra.mxu1 %v20558_v42  ;;  %4462 = vmatprep.subr.bf16.mxu0 %v20563_v43  ;;  %v20638_v42 = vld [vmem:[#allocation9 + $0x74c] ss:$40 sps:$4 sm:$0xff]   ;;  %v20633_v43 = vld [vmem:[#allocation9 + $0x248] ss:$40 sps:$4 sm:$0xff]  }
 0x16b   :  { %4503 = vmatprep.subr.bf16.mxu1 %v20566_v44  ;;  %v20636_v44 = vld [vmem:[#allocation9 + $0x748] ss:$40 sps:$4 sm:$0xff]  }
 0x16d   :  { %4463 = vmatpush1.bf16.msra.mxu0 %v20561_v45  ;;  %v23831_v45 = vsub.s32 3, %v23799_v29 }
 0x16e   :  { %4504 = vmatpush1.bf16.msra.mxu1 %v20564_v46  ;;  %4464 = vmatprep.subr.bf16.mxu0 %v20569_v48  ;;  %v23833_v46 = vld [vmem:[#allocation11] sm:$0xff] }
 0x16f   :  { %4505 = vmatprep.subr.bf16.mxu1 %v20572_v49  ;;  %v777_v48 = vrot.slane %v23833_v46, %v23828_v0  ;;  %v20641_v49 = vld [vmem:[#allocation9 + $0x1fc] ss:$40 sps:$4 sm:$0xff]  }
 0x171   :  { %4465 = vmatpush1.bf16.msra.mxu0 %v20567_v50  ;;  %v20644_v50 = vld [vmem:[#allocation9 + $0x6fc] ss:$40 sps:$4 sm:$0xff]  }
 0x172   :  { %4506 = vmatpush1.bf16.msra.mxu1 %v20570_v52  ;;  %4466 = vmatprep.subr.bf16.mxu0 %v20575_v53  ;;  %v781_v52 = vrot.slane %v23833_v46, %v23831_v45 }
 0x173   :  { %4507 = vmatprep.subr.bf16.mxu1 %v20578_v54 }
 0x175   :  { %4467 = vmatpush1.bf16.msra.mxu0 %v20573_v55 }
 0x176   :  { %4508 = vmatpush1.bf16.msra.mxu1 %v20576_v56  ;;  %4468 = vmatprep.subr.bf16.mxu0 %v20581_v57  ;;  %v20639_v56 = vld [vmem:[#allocation9 + $0x1f8] ss:$40 sps:$4 sm:$0xff]  }
 0x177   :  { %4509 = vmatprep.subr.bf16.mxu1 %v20584_v59  ;;  %v20642_v57 = vld [vmem:[#allocation9 + $0x6f8] ss:$40 sps:$4 sm:$0xff]  }
 0x179   :  { %4469 = vmatpush1.bf16.msra.mxu0 %v20579_v60 }
 0x17a   :  { %4510 = vmatpush1.bf16.msra.mxu1 %v20582_v61  ;;  %4470 = vmatprep.subr.bf16.mxu0 %v20587_v62  ;;  %v20647_v61 = vld [vmem:[#allocation9 + $0x1ac] ss:$40 sps:$4 sm:$0xff]  }
 0x17b   :  { %4511 = vmatprep.subr.bf16.mxu1 %v20590_v63  ;;  %v20650_v62 = vld [vmem:[#allocation9 + $0x6ac] ss:$40 sps:$4 sm:$0xff]  }
 0x17d   :  { %4471 = vmatpush2.bf16.msra.mxu0 %v20585_v1 }
 0x17e   :  { %4512 = vmatpush2.bf16.msra.mxu1 %v20588_v2  ;;  %4472 = vmatprep.subr.bf16.mxu0 %v20593_v3 }
 0x17f   :  { %4513 = vmatprep.subr.bf16.mxu1 %v20596_v4 }
 0x181   :  { %4473 = vmatpush2.bf16.msra.mxu0 %v20591_v5  ;;  %v20645_v5 = vld [vmem:[#allocation9 + $0x1a8] ss:$40 sps:$4 sm:$0xff]  }
 0x182   :  { %4514 = vmatpush2.bf16.msra.mxu1 %v20594_v8  ;;  %4474 = vmatprep.subr.bf16.mxu0 %v20599_v9  ;;  %v20648_v8 = vld [vmem:[#allocation9 + $0x6a8] ss:$40 sps:$4 sm:$0xff]  }
 0x183   :  { %4515 = vmatprep.subr.bf16.mxu1 %v20602_v10 }
 0x185   :  { %4475 = vmatpush2.bf16.msra.mxu0 %v20597_v11  ;;  %v20653_v11 = vld [vmem:[#allocation9 + $0x15c] ss:$40 sps:$4 sm:$0xff]  }
 0x186   :  { %4516 = vmatpush2.bf16.msra.mxu1 %v20600_v12  ;;  %4476 = vmatprep.subr.bf16.mxu0 %v20605_v13  ;;  %v20656_v12 = vld [vmem:[#allocation9 + $0x65c] ss:$40 sps:$4 sm:$0xff]   ;;  %v20651_v13 = vld [vmem:[#allocation9 + $0x158] ss:$40 sps:$4 sm:$0xff]  }
 0x187   :  { %4517 = vmatprep.subr.bf16.mxu1 %v20608_v14  ;;  %v20654_v14 = vld [vmem:[#allocation9 + $0x658] ss:$40 sps:$4 sm:$0xff]  }
 0x189   :  { %4477 = vmatpush2.bf16.msra.mxu0 %v20603_v15  ;;  %v20659_v15 = vld [vmem:[#allocation9 + $0x10c] ss:$40 sps:$4 sm:$0xff]  }
 0x18a   :  { %4518 = vmatpush2.bf16.msra.mxu1 %v20606_v18  ;;  %4478 = vmatprep.subr.bf16.mxu0 %v20611_v19  ;;  %v20662_v18 = vld [vmem:[#allocation9 + $0x60c] ss:$40 sps:$4 sm:$0xff]   ;;  %v20657_v19 = vld [vmem:[#allocation9 + $0x108] ss:$40 sps:$4 sm:$0xff]  }
 0x18b   :  { %4519 = vmatprep.subr.bf16.mxu1 %v20614_v20  ;;  %v20660_v20 = vld [vmem:[#allocation9 + $0x608] ss:$40 sps:$4 sm:$0xff]  }
 0x18d   :  { %4479 = vmatpush2.bf16.msra.mxu0 %v20609_v21  ;;  %v20665_v21 = vld [vmem:[#allocation9 + $0xbc] ss:$40 sps:$4 sm:$0xff]  }
 0x18e   :  { %4520 = vmatpush2.bf16.msra.mxu1 %v20612_v22  ;;  %4480 = vmatprep.subr.bf16.mxu0 %v20617_v23  ;;  %v20668_v22 = vld [vmem:[#allocation9 + $0x5bc] ss:$40 sps:$4 sm:$0xff]   ;;  %v20663_v23 = vld [vmem:[#allocation9 + $0xb8] ss:$40 sps:$4 sm:$0xff]  }
 0x18f   :  { %4521 = vmatprep.subr.bf16.mxu1 %v20620_v24  ;;  %v20666_v24 = vld [vmem:[#allocation9 + $0x5b8] ss:$40 sps:$4 sm:$0xff]  }
 0x191   :  { %4481 = vmatpush2.bf16.msra.mxu0 %v20615_v25  ;;  %v20671_v25 = vld [vmem:[#allocation9 + $0x6c] ss:$40 sps:$4 sm:$0xff]  }
 0x192   :  { %4522 = vmatpush2.bf16.msra.mxu1 %v20618_v26  ;;  %4482 = vmatprep.subr.bf16.mxu0 %v20623_v27  ;;  %v20674_v26 = vld [vmem:[#allocation9 + $0x56c] ss:$40 sps:$4 sm:$0xff]   ;;  %v20669_v27 = vld [vmem:[#allocation9 + $0x68] ss:$40 sps:$4 sm:$0xff]  }
 0x193   :  { %4523 = vmatprep.subr.bf16.mxu1 %v20626_v28  ;;  %v20672_v28 = vld [vmem:[#allocation9 + $0x568] ss:$40 sps:$4 sm:$0xff]  }
 0x195   :  { %4483 = vmatpush2.bf16.msra.mxu0 %v20621_v58  ;;  %v20677_v58 = vld [vmem:[#allocation9 + $0x1c] ss:$40 sps:$4 sm:$0xff]  }
 0x196   :  { %4524 = vmatpush2.bf16.msra.mxu1 %v20624_v30  ;;  %4484 = vmatprep.subr.bf16.mxu0 %v20629_v31  ;;  %v20680_v30 = vld [vmem:[#allocation9 + $0x51c] ss:$40 sps:$4 sm:$0xff]   ;;  %v20675_v31 = vld [vmem:[#allocation9 + $0x18] ss:$40 sps:$4 sm:$0xff]  }
 0x197   :  { %4525 = vmatprep.subr.bf16.mxu1 %v20632_v32  ;;  %v20678_v32 = vld [vmem:[#allocation9 + $0x518] ss:$40 sps:$4 sm:$0xff]  }
 0x199   :  { %4485 = vmatpush2.bf16.msra.mxu0 %v20627_v33  ;;  %v20683_v33 = vld [vmem:[#allocation9 + $0x4cc] ss:$40 sps:$4 sm:$0xff]  }
 0x19a   :  { %4526 = vmatpush2.bf16.msra.mxu1 %v20630_v34  ;;  %4536 = vmatprep.subr.bf16.mxu0 %v20635_v41  ;;  %v20686_v34 = vld [vmem:[#allocation9 + $0x9cc] ss:$40 sps:$4 sm:$0xff]   ;;  %v20681_v41 = vld [vmem:[#allocation9 + $0x4c8] ss:$40 sps:$4 sm:$0xff]  }
 0x19b   :  { %4577 = vmatprep.subr.bf16.mxu1 %v20638_v42  ;;  %v20684_v42 = vld [vmem:[#allocation9 + $0x9c8] ss:$40 sps:$4 sm:$0xff]  }
 0x19c   :  { %v4242_v53 = vpop.f32.mrf.mxu0  ;;  %4487 = vmatmul.mubr.bf16.vlgmr.msra.gmra.mxu0 %v23785_v16 }
 0x19d   :  { %v4283_v54 = vpop.f32.mrf.mxu1  ;;  %4528 = vmatmul.mubr.bf16.vlgmr.msra.gmra.mxu1 %v23789_v17  ;;  %v4243_v55 = vadd.f32 %v4242_v53, %v777_v48  ;;  %4537 = vmatpush1.bf16.msra.mxu0 %v20633_v43  ;;  %v20689_v43 = vld [vmem:[#allocation9 + $0x47c] ss:$40 sps:$4 sm:$0xff]   ;;  %v20687_v48 = vld [vmem:[#allocation9 + $0x478] ss:$40 sps:$4 sm:$0xff]   ;;  %v20693_v53 = vld [vmem:[#allocation9 + $0x428] ss:$40 sps:$4 sm:$0xff]  }
 0x19e   :  { %4578 = vmatpush1.bf16.msra.mxu1 %v20636_v44  ;;  %v4244_v59 = vpop.f32.mrf.mxu0  ;;  %4538 = vmatprep.subr.bf16.mxu0 %v20641_v49  ;;  %v20692_v44 = vld [vmem:[#allocation9 + $0x97c] ss:$40 sps:$4 sm:$0xff]   ;;  %v20690_v49 = vld [vmem:[#allocation9 + $0x978] ss:$40 sps:$4 sm:$0xff]  }
 0x19f   :  { %v4285_v60 = vpop.f32.mrf.mxu1  ;;  %4579 = vmatprep.subr.bf16.mxu1 %v20644_v50  ;;  %v23841_v63 = vadd.f32 %v4283_v54, %v4243_v55  ;;  %v4245_v1 = vadd.f32 %v4244_v59, %v781_v52  ;;  %4568 = vmatprep.mubr.bf16.mxu0 %v23748_v47  ;;  %v20695_v50 = vld [vmem:[#allocation9 + $0x42c] ss:$40 sps:$4 sm:$0xff]   ;;  %v20696_v54 = vld [vmem:[#allocation9 + $0x928] ss:$40 sps:$4 sm:$0xff]   ;;  %v20701_v55 = vld [vmem:[#allocation9 + $0x3dc] ss:$40 sps:$4 sm:$0xff]  }
 0x1a0   :  { %4609 = vmatprep.mubr.bf16.mxu1 %v23753_v51  ;;  %v4246_v2 = vpop.f32.mrf.mxu0  ;;  %v20698_v52 = vld [vmem:[#allocation9 + $0x92c] ss:$40 sps:$4 sm:$0xff]   ;;  %v20702_v59 = vld [vmem:[#allocation9 + $0x8d8] ss:$40 sps:$4 sm:$0xff]  }
 0x1a1   :  { %v4287_v3 = vpop.f32.mrf.mxu1  ;;  %v23845_v4 = vadd.f32 %v4285_v60, %v4245_v1  ;;  %4539 = vmatpush1.bf16.msra.mxu0 %v20639_v56  ;;  %v20704_v56 = vld [vmem:[#allocation9 + $0x8dc] ss:$40 sps:$4 sm:$0xff]   ;;  %v20707_v60 = vld [vmem:[#allocation9 + $0x38c] ss:$40 sps:$4 sm:$0xff]   ;;  %v20708_v1 = vld [vmem:[#allocation9 + $0x888] ss:$40 sps:$4 sm:$0xff]  }
 0x1a2   :  { %4580 = vmatpush1.bf16.msra.mxu1 %v20642_v57  ;;  %v4247_v9 = vpop.f32.mrf.mxu0  ;;  %4540 = vmatprep.subr.bf16.mxu0 %v20647_v61  ;;  %v20699_v57 = vld [vmem:[#allocation9 + $0x3d8] ss:$40 sps:$4 sm:$0xff]   ;;  %v20710_v61 = vld [vmem:[#allocation9 + $0x88c] ss:$40 sps:$4 sm:$0xff]   ;;  %v20713_v2 = vld [vmem:[#allocation9 + $0x33c] ss:$40 sps:$4 sm:$0xff]  }
 0x1a3   :  { %v4288_v10 = vpop.f32.mrf.mxu1  ;;  %4581 = vmatprep.subr.bf16.mxu1 %v20650_v62  ;;  %v20705_v62 = vld [vmem:[#allocation9 + $0x388] ss:$40 sps:$4 sm:$0xff]   ;;  %v20716_v3 = vld [vmem:[#allocation9 + $0x83c] ss:$40 sps:$4 sm:$0xff]   ;;  %v20719_v9 = vld [vmem:[#allocation9 + $0x2ec] ss:$40 sps:$4 sm:$0xff]  }
 0x1a4   :  { %v20722_v10 = vld [vmem:[#allocation9 + $0x7ec] ss:$40 sps:$4 sm:$0xff]  }
 0x1a5   :  { %4541 = vmatpush1.bf16.msra.mxu0 %v20645_v5  ;;  %v20711_v5 = vld [vmem:[#allocation9 + $0x338] ss:$40 sps:$4 sm:$0xff]  }
 0x1a6   :  { %4582 = vmatpush1.bf16.msra.mxu1 %v20648_v8  ;;  %4542 = vmatprep.subr.bf16.mxu0 %v20653_v11  ;;  %v20714_v8 = vld [vmem:[#allocation9 + $0x838] ss:$40 sps:$4 sm:$0xff]   ;;  %v20717_v11 = vld [vmem:[#allocation9 + $0x2e8] ss:$40 sps:$4 sm:$0xff]  }
 0x1a7   :  { %4583 = vmatprep.subr.bf16.mxu1 %v20656_v12  ;;  %v20720_v12 = vld [vmem:[#allocation9 + $0x7e8] ss:$40 sps:$4 sm:$0xff]  }
 0x1a9   :  { %4543 = vmatpush1.bf16.msra.mxu0 %v20651_v13  ;;  %v20725_v13 = vld [vmem:[#allocation9 + $0x29c] ss:$40 sps:$4 sm:$0xff]  }
 0x1aa   :  { %4584 = vmatpush1.bf16.msra.mxu1 %v20654_v14  ;;  %4544 = vmatprep.subr.bf16.mxu0 %v20659_v15  ;;  %v20728_v14 = vld [vmem:[#allocation9 + $0x79c] ss:$40 sps:$4 sm:$0xff]   ;;  %v20723_v15 = vld [vmem:[#allocation9 + $0x298] ss:$40 sps:$4 sm:$0xff]  }
 0x1ab   :  { %4585 = vmatprep.subr.bf16.mxu1 %v20662_v18  ;;  %v20726_v18 = vld [vmem:[#allocation9 + $0x798] ss:$40 sps:$4 sm:$0xff]  }
 0x1ad   :  { %4545 = vmatpush1.bf16.msra.mxu0 %v20657_v19  ;;  %v20731_v19 = vld [vmem:[#allocation9 + $0xc4c] ss:$40 sps:$4 sm:$0xff]  }
 0x1ae   :  { %4586 = vmatpush1.bf16.msra.mxu1 %v20660_v20  ;;  %4546 = vmatprep.subr.bf16.mxu0 %v20665_v21  ;;  %v20734_v20 = vld [vmem:[#allocation9 + $0x114c] ss:$40 sps:$4 sm:$0xff]   ;;  %v20729_v21 = vld [vmem:[#allocation9 + $0xc48] ss:$40 sps:$4 sm:$0xff]  }
 0x1af   :  { %4587 = vmatprep.subr.bf16.mxu1 %v20668_v22  ;;  %v20732_v22 = vld [vmem:[#allocation9 + $0x1148] ss:$40 sps:$4 sm:$0xff]  }
 0x1b1   :  { %4547 = vmatpush1.bf16.msra.mxu0 %v20663_v23  ;;  %v20737_v23 = vld [vmem:[#allocation9 + $0xbfc] ss:$40 sps:$4 sm:$0xff]  }
 0x1b2   :  { %4588 = vmatpush1.bf16.msra.mxu1 %v20666_v24  ;;  %4548 = vmatprep.subr.bf16.mxu0 %v20671_v25  ;;  %v20740_v24 = vld [vmem:[#allocation9 + $0x10fc] ss:$40 sps:$4 sm:$0xff]  }
 0x1b3   :  { %4589 = vmatprep.subr.bf16.mxu1 %v20674_v26 }
 0x1b5   :  { %4549 = vmatpush1.bf16.msra.mxu0 %v20669_v27 }
 0x1b6   :  { %4590 = vmatpush1.bf16.msra.mxu1 %v20672_v28  ;;  %4550 = vmatprep.subr.bf16.mxu0 %v20677_v58  ;;  %v20735_v28 = vld [vmem:[#allocation9 + $0xbf8] ss:$40 sps:$4 sm:$0xff]  }
 0x1b7   :  { %4591 = vmatprep.subr.bf16.mxu1 %v20680_v30  ;;  %v20738_v58 = vld [vmem:[#allocation9 + $0x10f8] ss:$40 sps:$4 sm:$0xff]  }
 0x1b9   :  { %4551 = vmatpush1.bf16.msra.mxu0 %v20675_v31 }
 0x1ba   :  { %4592 = vmatpush1.bf16.msra.mxu1 %v20678_v32  ;;  %4552 = vmatprep.subr.bf16.mxu0 %v20683_v33  ;;  %v20743_v32 = vld [vmem:[#allocation9 + $0xbac] ss:$40 sps:$4 sm:$0xff]  }
 0x1bb   :  { %4593 = vmatprep.subr.bf16.mxu1 %v20686_v34  ;;  %v20746_v33 = vld [vmem:[#allocation9 + $0x10ac] ss:$40 sps:$4 sm:$0xff]  }
 0x1bd   :  { %4553 = vmatpush2.bf16.msra.mxu0 %v20681_v41 }
 0x1be   :  { %4594 = vmatpush2.bf16.msra.mxu1 %v20684_v42  ;;  %4554 = vmatprep.subr.bf16.mxu0 %v20689_v43 }
 0x1bf   :  { %4595 = vmatprep.subr.bf16.mxu1 %v20692_v44 }
 0x1c1   :  { %4555 = vmatpush2.bf16.msra.mxu0 %v20687_v48  ;;  %v20741_v48 = vld [vmem:[#allocation9 + $0xba8] ss:$40 sps:$4 sm:$0xff]  }
 0x1c2   :  { %4596 = vmatpush2.bf16.msra.mxu1 %v20690_v49  ;;  %4556 = vmatprep.subr.bf16.mxu0 %v20695_v50  ;;  %v20744_v49 = vld [vmem:[#allocation9 + $0x10a8] ss:$40 sps:$4 sm:$0xff]  }
 0x1c3   :  { %4597 = vmatprep.subr.bf16.mxu1 %v20698_v52 }
 0x1c5   :  { %4557 = vmatpush2.bf16.msra.mxu0 %v20693_v53  ;;  %v20749_v53 = vld [vmem:[#allocation9 + $0xb5c] ss:$40 sps:$4 sm:$0xff]  }
 0x1c6   :  { %4598 = vmatpush2.bf16.msra.mxu1 %v20696_v54  ;;  %4558 = vmatprep.subr.bf16.mxu0 %v20701_v55  ;;  %v20752_v54 = vld [vmem:[#allocation9 + $0x105c] ss:$40 sps:$4 sm:$0xff]  }
 0x1c7   :  { %4599 = vmatprep.subr.bf16.mxu1 %v20704_v56 }
 0x1c9   :  { %4559 = vmatpush2.bf16.msra.mxu0 %v20699_v57  ;;  %v20747_v57 = vld [vmem:[#allocation9 + $0xb58] ss:$40 sps:$4 sm:$0xff]  }
 0x1ca   :  { %4600 = vmatpush2.bf16.msra.mxu1 %v20702_v59  ;;  %4560 = vmatprep.subr.bf16.mxu0 %v20707_v60  ;;  %v20750_v59 = vld [vmem:[#allocation9 + $0x1058] ss:$40 sps:$4 sm:$0xff]   ;;  %v20755_v60 = vld [vmem:[#allocation9 + $0xb0c] ss:$40 sps:$4 sm:$0xff]  }
 0x1cb   :  { %4601 = vmatprep.subr.bf16.mxu1 %v20710_v61  ;;  %v20758_v61 = vld [vmem:[#allocation9 + $0x100c] ss:$40 sps:$4 sm:$0xff]  }
 0x1cd   :  { %4561 = vmatpush2.bf16.msra.mxu0 %v20705_v62  ;;  %v20753_v62 = vld [vmem:[#allocation9 + $0xb08] ss:$40 sps:$4 sm:$0xff]  }
 0x1ce   :  { %4602 = vmatpush2.bf16.msra.mxu1 %v20708_v1  ;;  %4562 = vmatprep.subr.bf16.mxu0 %v20713_v2  ;;  %v20756_v1 = vld [vmem:[#allocation9 + $0x1008] ss:$40 sps:$4 sm:$0xff]   ;;  %v20761_v2 = vld [vmem:[#allocation9 + $0xabc] ss:$40 sps:$4 sm:$0xff]  }
 0x1cf   :  { %4603 = vmatprep.subr.bf16.mxu1 %v20716_v3  ;;  %v20764_v3 = vld [vmem:[#allocation9 + $0xfbc] ss:$40 sps:$4 sm:$0xff]  }
 0x1d1   :  { %4563 = vmatpush2.bf16.msra.mxu0 %v20711_v5  ;;  %v20759_v5 = vld [vmem:[#allocation9 + $0xab8] ss:$40 sps:$4 sm:$0xff]  }
 0x1d2   :  { %4604 = vmatpush2.bf16.msra.mxu1 %v20714_v8  ;;  %4564 = vmatprep.subr.bf16.mxu0 %v20719_v9  ;;  %v20762_v8 = vld [vmem:[#allocation9 + $0xfb8] ss:$40 sps:$4 sm:$0xff]   ;;  %v20767_v9 = vld [vmem:[#allocation9 + $0xa6c] ss:$40 sps:$4 sm:$0xff]  }
 0x1d3   :  { %4605 = vmatprep.subr.bf16.mxu1 %v20722_v10  ;;  %v20770_v10 = vld [vmem:[#allocation9 + $0xf6c] ss:$40 sps:$4 sm:$0xff]  }
 0x1d5   :  { %4565 = vmatpush2.bf16.msra.mxu0 %v20717_v11  ;;  %v20765_v11 = vld [vmem:[#allocation9 + $0xa68] ss:$40 sps:$4 sm:$0xff]  }
 0x1d6   :  { %4606 = vmatpush2.bf16.msra.mxu1 %v20720_v12  ;;  %4566 = vmatprep.subr.bf16.mxu0 %v20725_v13  ;;  %v20768_v12 = vld [vmem:[#allocation9 + $0xf68] ss:$40 sps:$4 sm:$0xff]   ;;  %v20773_v13 = vld [vmem:[#allocation9 + $0xa1c] ss:$40 sps:$4 sm:$0xff]  }
 0x1d7   :  { %4607 = vmatprep.subr.bf16.mxu1 %v20728_v14  ;;  %v20776_v14 = vld [vmem:[#allocation9 + $0xf1c] ss:$40 sps:$4 sm:$0xff]  }
 0x1d9   :  { %4567 = vmatpush2.bf16.msra.mxu0 %v20723_v15  ;;  %v20771_v15 = vld [vmem:[#allocation9 + $0xa18] ss:$40 sps:$4 sm:$0xff]  }
 0x1da   :  { %4608 = vmatpush2.bf16.msra.mxu1 %v20726_v18  ;;  %4618 = vmatprep.subr.bf16.mxu0 %v20731_v19  ;;  %v20774_v18 = vld [vmem:[#allocation9 + $0xf18] ss:$40 sps:$4 sm:$0xff]   ;;  %v20779_v19 = vld [vmem:[#allocation9 + $0xecc] ss:$40 sps:$4 sm:$0xff]  }
 0x1db   :  { %4659 = vmatprep.subr.bf16.mxu1 %v20734_v20  ;;  %v20782_v20 = vld [vmem:[#allocation9 + $0x13cc] ss:$40 sps:$4 sm:$0xff]  }
 0x1dc   :  { %v4324_v25 = vpop.f32.mrf.mxu0  ;;  %4569 = vmatmul.mubr.bf16.vlgmr.msra.gmra.mxu0 %v23757_v6 }
 0x1dd   :  { %v4365_v26 = vpop.f32.mrf.mxu1  ;;  %4610 = vmatmul.mubr.bf16.vlgmr.msra.gmra.mxu1 %v23759_v7  ;;  %v4325_v27 = vadd.f32 %v4324_v25, %v23841_v63  ;;  %4619 = vmatpush1.bf16.msra.mxu0 %v20729_v21  ;;  %v20777_v21 = vld [vmem:[#allocation9 + $0xec8] ss:$40 sps:$4 sm:$0xff]   ;;  %v20783_v25 = vld [vmem:[#allocation9 + $0xe78] ss:$40 sps:$4 sm:$0xff]  }
 0x1de   :  { %4660 = vmatpush1.bf16.msra.mxu1 %v20732_v22  ;;  %v4326_v30 = vpop.f32.mrf.mxu0  ;;  %4620 = vmatprep.subr.bf16.mxu0 %v20737_v23  ;;  %v20780_v22 = vld [vmem:[#allocation9 + $0x13c8] ss:$40 sps:$4 sm:$0xff]   ;;  %v20785_v23 = vld [vmem:[#allocation9 + $0xe7c] ss:$40 sps:$4 sm:$0xff]  }
 0x1df   :  { %v4367_v31 = vpop.f32.mrf.mxu1  ;;  %4661 = vmatprep.subr.bf16.mxu1 %v20740_v24  ;;  %v4366_v34 = vadd.f32 %v4365_v26, %v4325_v27  ;;  %v4327_v41 = vadd.f32 %v4326_v30, %v23845_v4  ;;  %4650 = vmatprep.mubr.bf16.mxu0 %v23775_v36  ;;  %v20788_v24 = vld [vmem:[#allocation9 + $0x137c] ss:$40 sps:$4 sm:$0xff]   ;;  %v20786_v26 = vld [vmem:[#allocation9 + $0x1378] ss:$40 sps:$4 sm:$0xff]   ;;  %v20791_v27 = vld [vmem:[#allocation9 + $0xe2c] ss:$40 sps:$4 sm:$0xff]  }
 0x1e0   :  { %4691 = vmatprep.mubr.bf16.mxu1 %v23779_v37  ;;  %v4328_v42 = vpop.f32.mrf.mxu0  ;;  %v20792_v30 = vld [vmem:[#allocation9 + $0x1328] ss:$40 sps:$4 sm:$0xff]  }
 0x1e1   :  { %v4369_v43 = vpop.f32.mrf.mxu1  ;;  %v4866_v63 = vmax.f32 %v4366_v34, 0.0  ;;  %v4368_v44 = vadd.f32 %v4367_v31, %v4327_v41  ;;  %4621 = vmatpush1.bf16.msra.mxu0 %v20735_v28  ;;  %v20794_v28 = vld [vmem:[#allocation9 + $0x132c] ss:$40 sps:$4 sm:$0xff]   ;;  %v20797_v31 = vld [vmem:[#allocation9 + $0xddc] ss:$40 sps:$4 sm:$0xff]  }
 0x1e2   :  { %4662 = vmatpush1.bf16.msra.mxu1 %v20738_v58  ;;  %v4329_v50 = vpop.f32.mrf.mxu0  ;;  %4622 = vmatprep.subr.bf16.mxu0 %v20743_v32  ;;  %v20789_v58 = vld [vmem:[#allocation9 + $0xe28] ss:$40 sps:$4 sm:$0xff]   ;;  %v20800_v32 = vld [vmem:[#allocation9 + $0x12dc] ss:$40 sps:$4 sm:$0xff]   ;;  %v20798_v34 = vld [vmem:[#allocation9 + $0x12d8] ss:$40 sps:$4 sm:$0xff]  }
 0x1e3   :  { %v4370_v52 = vpop.f32.mrf.mxu1  ;;  %4663 = vmatprep.subr.bf16.mxu1 %v20746_v33  ;;  %v23853_v55 = vpack.c.bf16 %v4866_v63, %v4866_v63  ;;  %v4867_v4 = vmax.f32 %v4368_v44, 0.0  ;;  %v20795_v33 = vld [vmem:[#allocation9 + $0xdd8] ss:$40 sps:$4 sm:$0xff]   ;;  %v20803_v41 = vld [vmem:[#allocation9 + $0xd8c] ss:$40 sps:$4 sm:$0xff]  }
 0x1e4   :  { %v20806_v42 = vld [vmem:[#allocation9 + $0x128c] ss:$40 sps:$4 sm:$0xff]   ;;  %v20801_v43 = vld [vmem:[#allocation9 + $0xd88] ss:$40 sps:$4 sm:$0xff]   ;;  %v20809_v44 = vld [vmem:[#allocation9 + $0xd3c] ss:$40 sps:$4 sm:$0xff]  }
 0x1e5   :  { %v23855_v56 = vpack.c.bf16 %v4867_v4, %v4867_v4  ;;  %4623 = vmatpush1.bf16.msra.mxu0 %v20741_v48  ;;  %v20804_v63 = vld [vmem:[#allocation9 + $0x1288] ss:$40 sps:$4 sm:$0xff]   ;;  %v20812_v48 = vld [vmem:[#allocation9 + $0x123c] ss:$40 sps:$4 sm:$0xff]   ;;  %v20810_v50 = vld [vmem:[#allocation9 + $0x1238] ss:$40 sps:$4 sm:$0xff]  }
 0x1e6   :  { %4664 = vmatpush1.bf16.msra.mxu1 %v20744_v49  ;;  %4624 = vmatprep.subr.bf16.mxu0 %v20749_v53  ;;  %v20807_v49 = vld [vmem:[#allocation9 + $0xd38] ss:$40 sps:$4 sm:$0xff]   ;;  %v20815_v52 = vld [vmem:[#allocation9 + $0xcec] ss:$40 sps:$4 sm:$0xff]   ;;  %v20816_v4 = vld [vmem:[#allocation9 + $0x11e8] ss:$40 sps:$4 sm:$0xff]  }
 0x1e7   :  { %4665 = vmatprep.subr.bf16.mxu1 %v20752_v54  ;;  %v20818_v53 = vld [vmem:[#allocation9 + $0x11ec] ss:$40 sps:$4 sm:$0xff]   ;;  %v20813_v54 = vld [vmem:[#allocation9 + $0xce8] ss:$40 sps:$4 sm:$0xff]  }
 0x1e9   :  { %4625 = vmatpush1.bf16.msra.mxu0 %v20747_v57  ;;  %v20821_v57 = vld [vmem:[#allocation9 + $0xc9c] ss:$40 sps:$4 sm:$0xff]  }
 0x1ea   :  { %4666 = vmatpush1.bf16.msra.mxu1 %v20750_v59  ;;  %4626 = vmatprep.subr.bf16.mxu0 %v20755_v60  ;;  %v20824_v59 = vld [vmem:[#allocation9 + $0x119c] ss:$40 sps:$4 sm:$0xff]   ;;  %v20819_v60 = vld [vmem:[#allocation9 + $0xc98] ss:$40 sps:$4 sm:$0xff]  }
 0x1eb   :  { %4667 = vmatprep.subr.bf16.mxu1 %v20758_v61  ;;  %v20822_v61 = vld [vmem:[#allocation9 + $0x1198] ss:$40 sps:$4 sm:$0xff]  }
 0x1ed   :  { %4627 = vmatpush1.bf16.msra.mxu0 %v20753_v62  ;;  %v23858_v62 = vsub.s32 4, %v23799_v29 }
 0x1ee   :  { %4668 = vmatpush1.bf16.msra.mxu1 %v20756_v1  ;;  %4628 = vmatprep.subr.bf16.mxu0 %v20761_v2  ;;  %v20827_v1 = vld [vmem:[#allocation9 + $0x254] ss:$40 sps:$4 sm:$0xff]  }
 0x1ef   :  { %4669 = vmatprep.subr.bf16.mxu1 %v20764_v3  ;;  %v20830_v2 = vld [vmem:[#allocation9 + $0x754] ss:$40 sps:$4 sm:$0xff]   ;;  %v23861_v3 = vsub.s32 5, %v23799_v29 }
 0x1f1   :  { %4629 = vmatpush1.bf16.msra.mxu0 %v20759_v5  ;;  %v785_v5 = vrot.slane %v23833_v46, %v23858_v62 }
 0x1f2   :  { %4670 = vmatpush1.bf16.msra.mxu1 %v20762_v8  ;;  %4630 = vmatprep.subr.bf16.mxu0 %v20767_v9  ;;  %v20825_v8 = vld [vmem:[#allocation9 + $0x250] ss:$40 sps:$4 sm:$0xff]  }
 0x1f3   :  { %4671 = vmatprep.subr.bf16.mxu1 %v20770_v10  ;;  %v20828_v9 = vld [vmem:[#allocation9 + $0x750] ss:$40 sps:$4 sm:$0xff]   ;;  %v20833_v10 = vld [vmem:[#allocation9 + $0x204] ss:$40 sps:$4 sm:$0xff]  }
 0x1f5   :  { %4631 = vmatpush1.bf16.msra.mxu0 %v20765_v11  ;;  %v20836_v11 = vld [vmem:[#allocation9 + $0x704] ss:$40 sps:$4 sm:$0xff]  }
 0x1f6   :  { %4672 = vmatpush1.bf16.msra.mxu1 %v20768_v12  ;;  %4632 = vmatprep.subr.bf16.mxu0 %v20773_v13  ;;  %v789_v12 = vrot.slane %v23833_v46, %v23861_v3 }
 0x1f7   :  { %4673 = vmatprep.subr.bf16.mxu1 %v20776_v14 }
 0x1f9   :  { %4633 = vmatpush1.bf16.msra.mxu0 %v20771_v15 }
 0x1fa   :  { %4674 = vmatpush1.bf16.msra.mxu1 %v20774_v18  ;;  %4634 = vmatprep.subr.bf16.mxu0 %v20779_v19  ;;  %v20831_v18 = vld [vmem:[#allocation9 + $0x200] ss:$40 sps:$4 sm:$0xff]  }
 0x1fb   :  { %4675 = vmatprep.subr.bf16.mxu1 %v20782_v20  ;;  %v20834_v19 = vld [vmem:[#allocation9 + $0x700] ss:$40 sps:$4 sm:$0xff]  }
 0x1fd   :  { %4635 = vmatpush2.bf16.msra.mxu0 %v20777_v21 }
 0x1fe   :  { %4676 = vmatpush2.bf16.msra.mxu1 %v20780_v22  ;;  %4636 = vmatprep.subr.bf16.mxu0 %v20785_v23  ;;  %v20839_v22 = vld [vmem:[#allocation9 + $0x1b4] ss:$40 sps:$4 sm:$0xff]  }
 0x1ff   :  { %4677 = vmatprep.subr.bf16.mxu1 %v20788_v24  ;;  %v20842_v23 = vld [vmem:[#allocation9 + $0x6b4] ss:$40 sps:$4 sm:$0xff]  }
 0x201   :  { %4637 = vmatpush2.bf16.msra.mxu0 %v20783_v25 }
 0x202   :  { %4678 = vmatpush2.bf16.msra.mxu1 %v20786_v26  ;;  %4638 = vmatprep.subr.bf16.mxu0 %v20791_v27 }
 0x203   :  { %4679 = vmatprep.subr.bf16.mxu1 %v20794_v28  ;;  %v20837_v28 = vld [vmem:[#allocation9 + $0x1b0] ss:$40 sps:$4 sm:$0xff]  }
 0x205   :  { %4639 = vmatpush2.bf16.msra.mxu0 %v20789_v58  ;;  %v20840_v58 = vld [vmem:[#allocation9 + $0x6b0] ss:$40 sps:$4 sm:$0xff]  }
 0x206   :  { %4680 = vmatpush2.bf16.msra.mxu1 %v20792_v30  ;;  %4640 = vmatprep.subr.bf16.mxu0 %v20797_v31 }
 0x207   :  { %4681 = vmatprep.subr.bf16.mxu1 %v20800_v32  ;;  %v20845_v32 = vld [vmem:[#allocation9 + $0x164] ss:$40 sps:$4 sm:$0xff]  }
 0x209   :  { %4641 = vmatpush2.bf16.msra.mxu0 %v20795_v33  ;;  %v20848_v33 = vld [vmem:[#allocation9 + $0x664] ss:$40 sps:$4 sm:$0xff]  }
 0x20a   :  { %4682 = vmatpush2.bf16.msra.mxu1 %v20798_v34  ;;  %4642 = vmatprep.subr.bf16.mxu0 %v20803_v41  ;;  %v20843_v34 = vld [vmem:[#allocation9 + $0x160] ss:$40 sps:$4 sm:$0xff]   ;;  %v20854_v41 = vld [vmem:[#allocation9 + $0x614] ss:$40 sps:$4 sm:$0xff]  }
 0x20b   :  { %4683 = vmatprep.subr.bf16.mxu1 %v20806_v42  ;;  %v20849_v42 = vld [vmem:[#allocation9 + $0x110] ss:$40 sps:$4 sm:$0xff]  }
 0x20d   :  { %4643 = vmatpush2.bf16.msra.mxu0 %v20801_v43  ;;  %v20852_v43 = vld [vmem:[#allocation9 + $0x610] ss:$40 sps:$4 sm:$0xff]  }
 0x20e   :  { %4684 = vmatpush2.bf16.msra.mxu1 %v20804_v63  ;;  %4644 = vmatprep.subr.bf16.mxu0 %v20809_v44  ;;  %v20857_v63 = vld [vmem:[#allocation9 + $0xc4] ss:$40 sps:$4 sm:$0xff]  }
 0x20f   :  { %4685 = vmatprep.subr.bf16.mxu1 %v20812_v48  ;;  %v20860_v44 = vld [vmem:[#allocation9 + $0x5c4] ss:$40 sps:$4 sm:$0xff]   ;;  %v20855_v48 = vld [vmem:[#allocation9 + $0xc0] ss:$40 sps:$4 sm:$0xff]  }
 0x211   :  { %4645 = vmatpush2.bf16.msra.mxu0 %v20807_v49  ;;  %v20858_v49 = vld [vmem:[#allocation9 + $0x5c0] ss:$40 sps:$4 sm:$0xff]  }
 0x212   :  { %4686 = vmatpush2.bf16.msra.mxu1 %v20810_v50  ;;  %4646 = vmatprep.subr.bf16.mxu0 %v20815_v52  ;;  %v20863_v50 = vld [vmem:[#allocation9 + $0x74] ss:$40 sps:$4 sm:$0xff]  }
 0x213   :  { %4687 = vmatprep.subr.bf16.mxu1 %v20818_v53  ;;  %v20866_v52 = vld [vmem:[#allocation9 + $0x574] ss:$40 sps:$4 sm:$0xff]   ;;  %v20861_v53 = vld [vmem:[#allocation9 + $0x70] ss:$40 sps:$4 sm:$0xff]  }
 0x215   :  { %4647 = vmatpush2.bf16.msra.mxu0 %v20813_v54  ;;  %v20864_v54 = vld [vmem:[#allocation9 + $0x570] ss:$40 sps:$4 sm:$0xff]  }
 0x216   :  { %4688 = vmatpush2.bf16.msra.mxu1 %v20816_v4  ;;  %4648 = vmatprep.subr.bf16.mxu0 %v20821_v57  ;;  %v20869_v4 = vld [vmem:[#allocation9 + $0x24] ss:$40 sps:$4 sm:$0xff]  }
 0x217   :  { %4689 = vmatprep.subr.bf16.mxu1 %v20824_v59  ;;  %v20872_v57 = vld [vmem:[#allocation9 + $0x524] ss:$40 sps:$4 sm:$0xff]   ;;  %v20867_v59 = vld [vmem:[#allocation9 + $0x20] ss:$40 sps:$4 sm:$0xff]  }
 0x219   :  { %4649 = vmatpush2.bf16.msra.mxu0 %v20819_v60  ;;  %v20870_v60 = vld [vmem:[#allocation9 + $0x520] ss:$40 sps:$4 sm:$0xff]  }
 0x21a   :  { %4690 = vmatpush2.bf16.msra.mxu1 %v20822_v61  ;;  %4700 = vmatprep.subr.bf16.mxu0 %v20827_v1  ;;  %v20875_v61 = vld [vmem:[#allocation9 + $0x4d4] ss:$40 sps:$4 sm:$0xff]  }
 0x21b   :  { %4741 = vmatprep.subr.bf16.mxu1 %v20830_v2  ;;  %v20878_v1 = vld [vmem:[#allocation9 + $0x9d4] ss:$40 sps:$4 sm:$0xff]   ;;  %v20873_v2 = vld [vmem:[#allocation9 + $0x4d0] ss:$40 sps:$4 sm:$0xff]  }
 0x21c   :  { %v4406_v13 = vpop.f32.mrf.mxu0  ;;  %4651 = vmatmul.mubr.bf16.vlgmr.msra.gmra.mxu0 %v23785_v16 }
 0x21d   :  { %v4447_v14 = vpop.f32.mrf.mxu1  ;;  %4692 = vmatmul.mubr.bf16.vlgmr.msra.gmra.mxu1 %v23789_v17  ;;  %v4407_v15 = vadd.f32 %v4406_v13, %v785_v5  ;;  %4701 = vmatpush1.bf16.msra.mxu0 %v20825_v8  ;;  %v20876_v5 = vld [vmem:[#allocation9 + $0x9d0] ss:$40 sps:$4 sm:$0xff]   ;;  %v20881_v8 = vld [vmem:[#allocation9 + $0x484] ss:$40 sps:$4 sm:$0xff]   ;;  %v20890_v13 = vld [vmem:[#allocation9 + $0x934] ss:$40 sps:$4 sm:$0xff]  }
 0x21e   :  { %4742 = vmatpush1.bf16.msra.mxu1 %v20828_v9  ;;  %v4408_v20 = vpop.f32.mrf.mxu0  ;;  %4702 = vmatprep.subr.bf16.mxu0 %v20833_v10  ;;  %v20884_v9 = vld [vmem:[#allocation9 + $0x984] ss:$40 sps:$4 sm:$0xff]   ;;  %v20879_v10 = vld [vmem:[#allocation9 + $0x480] ss:$40 sps:$4 sm:$0xff]  }
 0x21f   :  { %v4449_v21 = vpop.f32.mrf.mxu1  ;;  %4743 = vmatprep.subr.bf16.mxu1 %v20836_v11  ;;  %v23869_v24 = vadd.f32 %v4447_v14, %v4407_v15  ;;  %v4409_v46 = vadd.f32 %v4408_v20, %v789_v12  ;;  %4732 = vmatprep.mubr.bf16.mxu0 %v23748_v47  ;;  %v20846_v47 = vld [vmem:[#allocation9 + $0x660] ss:$40 sps:$4 sm:$0xff]   ;;  %v20887_v12 = vld [vmem:[#allocation9 + $0x434] ss:$40 sps:$4 sm:$0xff]   ;;  %v20885_v14 = vld [vmem:[#allocation9 + $0x430] ss:$40 sps:$4 sm:$0xff]  }
 0x220   :  { %4773 = vmatprep.mubr.bf16.mxu1 %v23753_v51  ;;  %v4410_v25 = vpop.f32.mrf.mxu0  ;;  %v20851_v51 = vld [vmem:[#allocation9 + $0x114] ss:$40 sps:$4 sm:$0xff]   ;;  %v20882_v11 = vld [vmem:[#allocation9 + $0x980] ss:$40 sps:$4 sm:$0xff]   ;;  %v20888_v15 = vld [vmem:[#allocation9 + $0x930] ss:$40 sps:$4 sm:$0xff]  }
 0x221   :  { %v4451_v26 = vpop.f32.mrf.mxu1  ;;  %v23873_v27 = vadd.f32 %v4449_v21, %v4409_v46  ;;  %4703 = vmatpush1.bf16.msra.mxu0 %v20831_v18  ;;  %v20893_v18 = vld [vmem:[#allocation9 + $0x3e4] ss:$40 sps:$4 sm:$0xff]   ;;  %v20891_v20 = vld [vmem:[#allocation9 + $0x3e0] ss:$40 sps:$4 sm:$0xff]   ;;  %v20897_v46 = vld [vmem:[#allocation9 + $0x390] ss:$40 sps:$4 sm:$0xff]  }
 0x222   :  { %4744 = vmatpush1.bf16.msra.mxu1 %v20834_v19  ;;  %v4411_v30 = vpop.f32.mrf.mxu0  ;;  %4704 = vmatprep.subr.bf16.mxu0 %v20839_v22  ;;  %v20896_v19 = vld [vmem:[#allocation9 + $0x8e4] ss:$40 sps:$4 sm:$0xff]   ;;  %v20894_v21 = vld [vmem:[#allocation9 + $0x8e0] ss:$40 sps:$4 sm:$0xff]   ;;  %v20899_v22 = vld [vmem:[#allocation9 + $0x394] ss:$40 sps:$4 sm:$0xff]  }
 0x223   :  { %v4452_v31 = vpop.f32.mrf.mxu1  ;;  %4745 = vmatprep.subr.bf16.mxu1 %v20842_v23  ;;  %v20902_v23 = vld [vmem:[#allocation9 + $0x894] ss:$40 sps:$4 sm:$0xff]   ;;  %v20900_v25 = vld [vmem:[#allocation9 + $0x890] ss:$40 sps:$4 sm:$0xff]   ;;  %v20905_v26 = vld [vmem:[#allocation9 + $0x344] ss:$40 sps:$4 sm:$0xff]  }
 0x224   :  { %v20906_v30 = vld [vmem:[#allocation9 + $0x840] ss:$40 sps:$4 sm:$0xff]   ;;  %v20911_v31 = vld [vmem:[#allocation9 + $0x2f4] ss:$40 sps:$4 sm:$0xff]  }
 0x225   :  { %4705 = vmatpush1.bf16.msra.mxu0 %v20837_v28  ;;  %v20908_v28 = vld [vmem:[#allocation9 + $0x844] ss:$40 sps:$4 sm:$0xff]  }
 0x226   :  { %4746 = vmatpush1.bf16.msra.mxu1 %v20840_v58  ;;  %4706 = vmatprep.subr.bf16.mxu0 %v20845_v32  ;;  %v20903_v58 = vld [vmem:[#allocation9 + $0x340] ss:$40 sps:$4 sm:$0xff]   ;;  %v20914_v32 = vld [vmem:[#allocation9 + $0x7f4] ss:$40 sps:$4 sm:$0xff]  }
 0x227   :  { %4747 = vmatprep.subr.bf16.mxu1 %v20848_v33  ;;  %v20909_v33 = vld [vmem:[#allocation9 + $0x2f0] ss:$40 sps:$4 sm:$0xff]  }
 0x229   :  { %4707 = vmatpush1.bf16.msra.mxu0 %v20843_v34  ;;  %v20912_v34 = vld [vmem:[#allocation9 + $0x7f0] ss:$40 sps:$4 sm:$0xff]  }
 0x22a   :  { %4748 = vmatpush1.bf16.msra.mxu1 %v20846_v47  ;;  %4708 = vmatprep.subr.bf16.mxu0 %v20851_v51  ;;  %v20917_v47 = vld [vmem:[#allocation9 + $0x2a4] ss:$40 sps:$4 sm:$0xff]  }
 0x22b   :  { %4749 = vmatprep.subr.bf16.mxu1 %v20854_v41  ;;  %v20920_v51 = vld [vmem:[#allocation9 + $0x7a4] ss:$40 sps:$4 sm:$0xff]   ;;  %v20915_v41 = vld [vmem:[#allocation9 + $0x2a0] ss:$40 sps:$4 sm:$0xff]  }
 0x22d   :  { %4709 = vmatpush1.bf16.msra.mxu0 %v20849_v42  ;;  %v20918_v42 = vld [vmem:[#allocation9 + $0x7a0] ss:$40 sps:$4 sm:$0xff]  }
 0x22e   :  { %4750 = vmatpush1.bf16.msra.mxu1 %v20852_v43  ;;  %4710 = vmatprep.subr.bf16.mxu0 %v20857_v63  ;;  %v20923_v43 = vld [vmem:[#allocation9 + $0xc54] ss:$40 sps:$4 sm:$0xff]  }
 0x22f   :  { %4751 = vmatprep.subr.bf16.mxu1 %v20860_v44  ;;  %v20926_v63 = vld [vmem:[#allocation9 + $0x1154] ss:$40 sps:$4 sm:$0xff]   ;;  %v20921_v44 = vld [vmem:[#allocation9 + $0xc50] ss:$40 sps:$4 sm:$0xff]  }
 0x231   :  { %4711 = vmatpush1.bf16.msra.mxu0 %v20855_v48  ;;  %v20924_v48 = vld [vmem:[#allocation9 + $0x1150] ss:$40 sps:$4 sm:$0xff]  }
 0x232   :  { %4752 = vmatpush1.bf16.msra.mxu1 %v20858_v49  ;;  %4712 = vmatprep.subr.bf16.mxu0 %v20863_v50  ;;  %v20929_v49 = vld [vmem:[#allocation9 + $0xc04] ss:$40 sps:$4 sm:$0xff]  }
 0x233   :  { %4753 = vmatprep.subr.bf16.mxu1 %v20866_v52  ;;  %v20932_v50 = vld [vmem:[#allocation9 + $0x1104] ss:$40 sps:$4 sm:$0xff]  }
 0x235   :  { %4713 = vmatpush1.bf16.msra.mxu0 %v20861_v53 }
 0x236   :  { %4754 = vmatpush1.bf16.msra.mxu1 %v20864_v54  ;;  %4714 = vmatprep.subr.bf16.mxu0 %v20869_v4  ;;  %v20927_v4 = vld [vmem:[#allocation9 + $0xc00] ss:$40 sps:$4 sm:$0xff]  }
 0x237   :  { %4755 = vmatprep.subr.bf16.mxu1 %v20872_v57  ;;  %v20930_v57 = vld [vmem:[#allocation9 + $0x1100] ss:$40 sps:$4 sm:$0xff]  }
 0x239   :  { %4715 = vmatpush1.bf16.msra.mxu0 %v20867_v59 }
 0x23a   :  { %4756 = vmatpush1.bf16.msra.mxu1 %v20870_v60  ;;  %4716 = vmatprep.subr.bf16.mxu0 %v20875_v61  ;;  %v20935_v61 = vld [vmem:[#allocation9 + $0xbb4] ss:$40 sps:$4 sm:$0xff]  }
 0x23b   :  { %4757 = vmatprep.subr.bf16.mxu1 %v20878_v1  ;;  %v20938_v1 = vld [vmem:[#allocation9 + $0x10b4] ss:$40 sps:$4 sm:$0xff]  }
 0x23d   :  { %4717 = vmatpush2.bf16.msra.mxu0 %v20873_v2 }
 0x23e   :  { %4758 = vmatpush2.bf16.msra.mxu1 %v20876_v5  ;;  %4718 = vmatprep.subr.bf16.mxu0 %v20881_v8 }
 0x23f   :  { %4759 = vmatprep.subr.bf16.mxu1 %v20884_v9  ;;  %v20933_v9 = vld [vmem:[#allocation9 + $0xbb0] ss:$40 sps:$4 sm:$0xff]  }
 0x241   :  { %4719 = vmatpush2.bf16.msra.mxu0 %v20879_v10  ;;  %v20936_v10 = vld [vmem:[#allocation9 + $0x10b0] ss:$40 sps:$4 sm:$0xff]  }
 0x242   :  { %4760 = vmatpush2.bf16.msra.mxu1 %v20882_v11  ;;  %4720 = vmatprep.subr.bf16.mxu0 %v20887_v12 }
 0x243   :  { %4761 = vmatprep.subr.bf16.mxu1 %v20890_v13  ;;  %v20941_v13 = vld [vmem:[#allocation9 + $0xb64] ss:$40 sps:$4 sm:$0xff]  }
 0x245   :  { %4721 = vmatpush2.bf16.msra.mxu0 %v20885_v14  ;;  %v20944_v14 = vld [vmem:[#allocation9 + $0x1064] ss:$40 sps:$4 sm:$0xff]  }
 0x246   :  { %4762 = vmatpush2.bf16.msra.mxu1 %v20888_v15  ;;  %4722 = vmatprep.subr.bf16.mxu0 %v20893_v18  ;;  %v20942_v18 = vld [vmem:[#allocation9 + $0x1060] ss:$40 sps:$4 sm:$0xff]  }
 0x247   :  { %4763 = vmatprep.subr.bf16.mxu1 %v20896_v19  ;;  %v20947_v19 = vld [vmem:[#allocation9 + $0xb14] ss:$40 sps:$4 sm:$0xff]  }
 0x249   :  { %4723 = vmatpush2.bf16.msra.mxu0 %v20891_v20  ;;  %v20950_v20 = vld [vmem:[#allocation9 + $0x1014] ss:$40 sps:$4 sm:$0xff]  }
 0x24a   :  { %4764 = vmatpush2.bf16.msra.mxu1 %v20894_v21  ;;  %4724 = vmatprep.subr.bf16.mxu0 %v20899_v22  ;;  %v20945_v21 = vld [vmem:[#allocation9 + $0xb10] ss:$40 sps:$4 sm:$0xff]  }
 0x24b   :  { %4765 = vmatprep.subr.bf16.mxu1 %v20902_v23  ;;  %v20948_v22 = vld [vmem:[#allocation9 + $0x1010] ss:$40 sps:$4 sm:$0xff]   ;;  %v20953_v23 = vld [vmem:[#allocation9 + $0xac4] ss:$40 sps:$4 sm:$0xff]  }
 0x24d   :  { %4725 = vmatpush2.bf16.msra.mxu0 %v20897_v46  ;;  %v20956_v46 = vld [vmem:[#allocation9 + $0xfc4] ss:$40 sps:$4 sm:$0xff]  }
 0x24e   :  { %4766 = vmatpush2.bf16.msra.mxu1 %v20900_v25  ;;  %4726 = vmatprep.subr.bf16.mxu0 %v20905_v26  ;;  %v20951_v25 = vld [vmem:[#allocation9 + $0xac0] ss:$40 sps:$4 sm:$0xff]  }
 0x24f   :  { %4767 = vmatprep.subr.bf16.mxu1 %v20908_v28  ;;  %v20954_v26 = vld [vmem:[#allocation9 + $0xfc0] ss:$40 sps:$4 sm:$0xff]   ;;  %v20959_v28 = vld [vmem:[#allocation9 + $0xa74] ss:$40 sps:$4 sm:$0xff]  }
 0x251   :  { %4727 = vmatpush2.bf16.msra.mxu0 %v20903_v58  ;;  %v20962_v58 = vld [vmem:[#allocation9 + $0xf74] ss:$40 sps:$4 sm:$0xff]  }
 0x252   :  { %4768 = vmatpush2.bf16.msra.mxu1 %v20906_v30  ;;  %4728 = vmatprep.subr.bf16.mxu0 %v20911_v31  ;;  %v20957_v30 = vld [vmem:[#allocation9 + $0xa70] ss:$40 sps:$4 sm:$0xff]  }
 0x253   :  { %4769 = vmatprep.subr.bf16.mxu1 %v20914_v32  ;;  %v20960_v31 = vld [vmem:[#allocation9 + $0xf70] ss:$40 sps:$4 sm:$0xff]   ;;  %v20965_v32 = vld [vmem:[#allocation9 + $0xa24] ss:$40 sps:$4 sm:$0xff]  }
 0x255   :  { %4729 = vmatpush2.bf16.msra.mxu0 %v20909_v33  ;;  %v20968_v33 = vld [vmem:[#allocation9 + $0xf24] ss:$40 sps:$4 sm:$0xff]  }
 0x256   :  { %4770 = vmatpush2.bf16.msra.mxu1 %v20912_v34  ;;  %4730 = vmatprep.subr.bf16.mxu0 %v20917_v47  ;;  %v20963_v34 = vld [vmem:[#allocation9 + $0xa20] ss:$40 sps:$4 sm:$0xff]  }
 0x257   :  { %4771 = vmatprep.subr.bf16.mxu1 %v20920_v51  ;;  %v20966_v47 = vld [vmem:[#allocation9 + $0xf20] ss:$40 sps:$4 sm:$0xff]   ;;  %v20971_v51 = vld [vmem:[#allocation9 + $0xed4] ss:$40 sps:$4 sm:$0xff]  }
 0x259   :  { %4731 = vmatpush2.bf16.msra.mxu0 %v20915_v41  ;;  %v20974_v41 = vld [vmem:[#allocation9 + $0x13d4] ss:$40 sps:$4 sm:$0xff]  }
 0x25a   :  { %4772 = vmatpush2.bf16.msra.mxu1 %v20918_v42  ;;  %4782 = vmatprep.subr.bf16.mxu0 %v20923_v43  ;;  %v20969_v42 = vld [vmem:[#allocation9 + $0xed0] ss:$40 sps:$4 sm:$0xff]  }
 0x25b   :  { %4823 = vmatprep.subr.bf16.mxu1 %v20926_v63  ;;  %v20972_v43 = vld [vmem:[#allocation9 + $0x13d0] ss:$40 sps:$4 sm:$0xff]   ;;  %v20977_v63 = vld [vmem:[#allocation9 + $0xe84] ss:$40 sps:$4 sm:$0xff]  }
 0x25c   :  { %v4488_v52 = vpop.f32.mrf.mxu0  ;;  %4733 = vmatmul.mubr.bf16.vlgmr.msra.gmra.mxu0 %v23757_v6 }
 0x25d   :  { %v4529_v53 = vpop.f32.mrf.mxu1  ;;  %4774 = vmatmul.mubr.bf16.vlgmr.msra.gmra.mxu1 %v23759_v7  ;;  %v4489_v54 = vadd.f32 %v4488_v52, %v23869_v24  ;;  %4783 = vmatpush1.bf16.msra.mxu0 %v20921_v44  ;;  %v20980_v44 = vld [vmem:[#allocation9 + $0x1384] ss:$40 sps:$4 sm:$0xff]   ;;  %v20986_v52 = vld [vmem:[#allocation9 + $0x1334] ss:$40 sps:$4 sm:$0xff]  }
 0x25e   :  { %4824 = vmatpush1.bf16.msra.mxu1 %v20924_v48  ;;  %v4490_v59 = vpop.f32.mrf.mxu0  ;;  %4784 = vmatprep.subr.bf16.mxu0 %v20929_v49  ;;  %v20975_v48 = vld [vmem:[#allocation9 + $0xe80] ss:$40 sps:$4 sm:$0xff]  }
 0x25f   :  { %v4531_v60 = vpop.f32.mrf.mxu1  ;;  %4825 = vmatprep.subr.bf16.mxu1 %v20932_v50  ;;  %v4530_v2 = vadd.f32 %v4529_v53, %v4489_v54  ;;  %v4491_v5 = vadd.f32 %v4490_v59, %v23873_v27  ;;  %4814 = vmatprep.mubr.bf16.mxu0 %v23775_v36  ;;  %v20978_v49 = vld [vmem:[#allocation9 + $0x1380] ss:$40 sps:$4 sm:$0xff]   ;;  %v20983_v50 = vld [vmem:[#allocation9 + $0xe34] ss:$40 sps:$4 sm:$0xff]   ;;  %v20981_v53 = vld [vmem:[#allocation9 + $0xe30] ss:$40 sps:$4 sm:$0xff]  }
 0x260   :  { %4855 = vmatprep.mubr.bf16.mxu1 %v23779_v37  ;;  %v4492_v6 = vpop.f32.mrf.mxu0  ;;  %v20939_v37 = vld [vmem:[#allocation9 + $0xb60] ss:$40 sps:$4 sm:$0xff]   ;;  %v20984_v54 = vld [vmem:[#allocation9 + $0x1330] ss:$40 sps:$4 sm:$0xff]  }
 0x261   :  { %v4533_v7 = vpop.f32.mrf.mxu1  ;;  %v4868_v24 = vmax.f32 %v4530_v2, 0.0  ;;  %v4532_v8 = vadd.f32 %v4531_v60, %v4491_v5  ;;  %4785 = vmatpush1.bf16.msra.mxu0 %v20927_v4  ;;  %v20989_v4 = vld [vmem:[#allocation9 + $0xde4] ss:$40 sps:$4 sm:$0xff]   ;;  %v20987_v59 = vld [vmem:[#allocation9 + $0xde0] ss:$40 sps:$4 sm:$0xff]  }
 0x262   :  { %4826 = vmatpush1.bf16.msra.mxu1 %v20930_v57  ;;  %v4493_v11 = vpop.f32.mrf.mxu0  ;;  %4786 = vmatprep.subr.bf16.mxu0 %v20935_v61  ;;  %v20992_v57 = vld [vmem:[#allocation9 + $0x12e4] ss:$40 sps:$4 sm:$0xff]   ;;  %v20990_v60 = vld [vmem:[#allocation9 + $0x12e0] ss:$40 sps:$4 sm:$0xff]   ;;  %v20995_v61 = vld [vmem:[#allocation9 + $0xd94] ss:$40 sps:$4 sm:$0xff]  }
 0x263   :  { %v4534_v12 = vpop.f32.mrf.mxu1  ;;  %4827 = vmatprep.subr.bf16.mxu1 %v20938_v1  ;;  %v23881_v15 = vpack.c.bf16 %v4868_v24, %v4868_v24  ;;  %v4869_v27 = vmax.f32 %v4532_v8, 0.0  ;;  %v20998_v1 = vld [vmem:[#allocation9 + $0x1294] ss:$40 sps:$4 sm:$0xff]   ;;  %v20993_v2 = vld [vmem:[#allocation9 + $0xd90] ss:$40 sps:$4 sm:$0xff]  }
 0x264   :  { %v20996_v5 = vld [vmem:[#allocation9 + $0x1290] ss:$40 sps:$4 sm:$0xff]   ;;  %v21001_v6 = vld [vmem:[#allocation9 + $0xd44] ss:$40 sps:$4 sm:$0xff]   ;;  %v20999_v24 = vld [vmem:[#allocation9 + $0xd40] ss:$40 sps:$4 sm:$0xff]  }
 0x265   :  { %v23883_v36 = vpack.c.bf16 %v4869_v27, %v4869_v27  ;;  %4787 = vmatpush1.bf16.msra.mxu0 %v20933_v9  ;;  %v21004_v7 = vld [vmem:[#allocation9 + $0x1244] ss:$40 sps:$4 sm:$0xff]   ;;  %v21002_v8 = vld [vmem:[#allocation9 + $0x1240] ss:$40 sps:$4 sm:$0xff]   ;;  %v21007_v9 = vld [vmem:[#allocation9 + $0xcf4] ss:$40 sps:$4 sm:$0xff]  }
 0x266   :  { %4828 = vmatpush1.bf16.msra.mxu1 %v20936_v10  ;;  %4788 = vmatprep.subr.bf16.mxu0 %v20941_v13  ;;  %v21010_v10 = vld [vmem:[#allocation9 + $0x11f4] ss:$40 sps:$4 sm:$0xff]   ;;  %v21005_v11 = vld [vmem:[#allocation9 + $0xcf0] ss:$40 sps:$4 sm:$0xff]   ;;  %v21013_v13 = vld [vmem:[#allocation9 + $0xca4] ss:$40 sps:$4 sm:$0xff]  }
 0x267   :  { %4829 = vmatprep.subr.bf16.mxu1 %v20944_v14  ;;  %v21008_v12 = vld [vmem:[#allocation9 + $0x11f0] ss:$40 sps:$4 sm:$0xff]   ;;  %v21016_v14 = vld [vmem:[#allocation9 + $0x11a4] ss:$40 sps:$4 sm:$0xff]   ;;  %v21011_v27 = vld [vmem:[#allocation9 + $0xca0] ss:$40 sps:$4 sm:$0xff]  }
 0x269   :  { %4789 = vmatpush1.bf16.msra.mxu0 %v20939_v37  ;;  %v21014_v37 = vld [vmem:[#allocation9 + $0x11a0] ss:$40 sps:$4 sm:$0xff]  }
 0x26a   :  { %4830 = vmatpush1.bf16.msra.mxu1 %v20942_v18  ;;  %4790 = vmatprep.subr.bf16.mxu0 %v20947_v19  ;;  %v23886_v18 = vsub.s32 6, %v23799_v29  ;;  %v23889_v19 = vsub.s32 7, %v23799_v29 }
 0x26b   :  { %4831 = vmatprep.subr.bf16.mxu1 %v20950_v20  ;;  %v21018_v20 = vld [vmem:[#allocation11] sm:$0xff] }
 0x26d   :  { %4791 = vmatpush1.bf16.msra.mxu0 %v20945_v21  ;;  %v793_v21 = vrot.slane %v21018_v20, %v23886_v18 }
 0x26e   :  { %4832 = vmatpush1.bf16.msra.mxu1 %v20948_v22  ;;  %4792 = vmatprep.subr.bf16.mxu0 %v20953_v23  ;;  %v797_v22 = vrot.slane %v21018_v20, %v23889_v19 }
 0x26f   :  { %4833 = vmatprep.subr.bf16.mxu1 %v20956_v46 }
 0x271   :  { %4793 = vmatpush1.bf16.msra.mxu0 %v20951_v25 }
 0x272   :  { %4834 = vmatpush1.bf16.msra.mxu1 %v20954_v26  ;;  %4794 = vmatprep.subr.bf16.mxu0 %v20959_v28 }
 0x273   :  { %4835 = vmatprep.subr.bf16.mxu1 %v20962_v58 }
 0x275   :  { %4795 = vmatpush1.bf16.msra.mxu0 %v20957_v30 }
 0x276   :  { %4836 = vmatpush1.bf16.msra.mxu1 %v20960_v31  ;;  %4796 = vmatprep.subr.bf16.mxu0 %v20965_v32 }
 0x277   :  { %4837 = vmatprep.subr.bf16.mxu1 %v20968_v33 }
 0x279   :  { %4797 = vmatpush1.bf16.msra.mxu0 %v20963_v34 }
 0x27a   :  { %4838 = vmatpush1.bf16.msra.mxu1 %v20966_v47  ;;  %4798 = vmatprep.subr.bf16.mxu0 %v20971_v51 }
 0x27b   :  { %4839 = vmatprep.subr.bf16.mxu1 %v20974_v41 }
 0x27d   :  { %4799 = vmatpush2.bf16.msra.mxu0 %v20969_v42 }
 0x27e   :  { %4840 = vmatpush2.bf16.msra.mxu1 %v20972_v43  ;;  %4800 = vmatprep.subr.bf16.mxu0 %v20977_v63 }
 0x27f   :  { %4841 = vmatprep.subr.bf16.mxu1 %v20980_v44 }
 0x281   :  { %4801 = vmatpush2.bf16.msra.mxu0 %v20975_v48 }
 0x282   :  { %4842 = vmatpush2.bf16.msra.mxu1 %v20978_v49  ;;  %4802 = vmatprep.subr.bf16.mxu0 %v20983_v50 }
 0x283   :  { %4843 = vmatprep.subr.bf16.mxu1 %v20986_v52 }
 0x285   :  { %4803 = vmatpush2.bf16.msra.mxu0 %v20981_v53 }
 0x286   :  { %4844 = vmatpush2.bf16.msra.mxu1 %v20984_v54  ;;  %4804 = vmatprep.subr.bf16.mxu0 %v20989_v4 }
 0x287   :  { %4845 = vmatprep.subr.bf16.mxu1 %v20992_v57 }
 0x289   :  { %4805 = vmatpush2.bf16.msra.mxu0 %v20987_v59 }
 0x28a   :  { %4846 = vmatpush2.bf16.msra.mxu1 %v20990_v60  ;;  %4806 = vmatprep.subr.bf16.mxu0 %v20995_v61 }
 0x28b   :  { %4847 = vmatprep.subr.bf16.mxu1 %v20998_v1 }
 0x28d   :  { %4807 = vmatpush2.bf16.msra.mxu0 %v20993_v2 }
 0x28e   :  { %4848 = vmatpush2.bf16.msra.mxu1 %v20996_v5  ;;  %4808 = vmatprep.subr.bf16.mxu0 %v21001_v6 }
 0x28f   :  { %4849 = vmatprep.subr.bf16.mxu1 %v21004_v7 }
 0x291   :  { %4809 = vmatpush2.bf16.msra.mxu0 %v20999_v24 }
 0x292   :  { %4850 = vmatpush2.bf16.msra.mxu1 %v21002_v8  ;;  %4810 = vmatprep.subr.bf16.mxu0 %v21007_v9 }
 0x293   :  { %4851 = vmatprep.subr.bf16.mxu1 %v21010_v10 }
 0x295   :  { %4811 = vmatpush2.bf16.msra.mxu0 %v21005_v11 }
 0x296   :  { %4852 = vmatpush2.bf16.msra.mxu1 %v21008_v12  ;;  %4812 = vmatprep.subr.bf16.mxu0 %v21013_v13 }
 0x297   :  { %4853 = vmatprep.subr.bf16.mxu1 %v21016_v14 }
 0x299   :  { %4813 = vmatpush2.bf16.msra.mxu0 %v21011_v27 }
 0x29a   :  { %4854 = vmatpush2.bf16.msra.mxu1 %v21014_v37 }
 0x29c   :  { %v4570_v23 = vpop.f32.mrf.mxu0  ;;  %4815 = vmatmul.mubr.bf16.vlgmr.msra.gmra.mxu0 %v23785_v16 }
 0x29d   :  { %v4611_v46 = vpop.f32.mrf.mxu1  ;;  %4856 = vmatmul.mubr.bf16.vlgmr.msra.gmra.mxu1 %v23789_v17  ;;  %v4571_v25 = vadd.f32 %v4570_v23, %v793_v21 }
 0x29e   :  { %v4572_v26 = vpop.f32.mrf.mxu0 }
 0x29f   :  { %v4613_v28 = vpop.f32.mrf.mxu1  ;;  %v4612_v58 = vadd.f32 %v4611_v46, %v4571_v25  ;;  %v4573_v30 = vadd.f32 %v4572_v26, %v797_v22 }
 0x2a0   :  { %v4574_v29 = vpop.f32.mrf.mxu0 }
 0x2a1   :  { %v4615_v31 = vpop.f32.mrf.mxu1  ;;  %v4614_v32 = vadd.f32 %v4613_v28, %v4573_v30 }
 0x2a2   :  { %v4575_v33 = vpop.f32.mrf.mxu0 }
 0x2a3   :  { %v4616_v34 = vpop.f32.mrf.mxu1 }
 0x2dc   :  { %v4652_v47 = vpop.f32.mrf.mxu0 }
 0x2dd   :  { %v4693_v51 = vpop.f32.mrf.mxu1  ;;  %v4653_v41 = vadd.f32 %v4652_v47, %v4612_v58 }
 0x2de   :  { %v4654_v42 = vpop.f32.mrf.mxu0 }
 0x2df   :  { %v4695_v43 = vpop.f32.mrf.mxu1  ;;  %v4694_v16 = vadd.f32 %v4693_v51, %v4653_v41  ;;  %v4655_v63 = vadd.f32 %v4654_v42, %v4614_v32 }
 0x2e0   :  { %v4656_v17 = vpop.f32.mrf.mxu0 }
 0x2e1   :  { %v4697_v44 = vpop.f32.mrf.mxu1 }
 0x2e2   :  { %23562 = shalt.err (!%p23559_p0)  }
 0x2e3   :  { %57 = dma.hbm_to_vmem [thread:$0]  %s24207_s3, 102400, %s55_s27, [#allocation8]  ;;  %v4870_v48 = vmax.f32 %v4694_v16, 0.0  ;;  %v4696_v49 = vadd.f32 %v4695_v43, %v4655_v63  ;;  %v4657_v50 = vpop.f32.mrf.mxu0  ;;  %v4698_v52 = vpop.f32.mrf.mxu1 }
 0x2e4   :  { %s23571_s12 = scalar_lea.vmem %s67_s29, 160  ;;  %p23576_p2 = scmp.lt.s32.totalorder %s67_s29, %s67_s29 }
 0x2e5   :  { %p23572_p1 = scmp.ne.s32.totalorder %s67_s29, %s23571_s12  ;;  %p23577_p3 = scmp.lt.s32.totalorder %s23571_s12, %s23571_s12 }
 0x2e7   :  { %p23578_p4 = por %p23577_p3, %p23576_p2 }
 0x2e9   :  { %p23579_p5 = pnand %p23578_p4, %p23572_p1 }
 0x2eb   :  { %23582 = shalt.err (!%p23579_p5)  }
 0x2ec   :  { %69 = dma.hbm_to_vmem [thread:$0]  %s24208_s4, 160, %s67_s29, [#allocation8 + $0x1]  ;;  %v23901_v53 = vpack.c.bf16 %v4870_v48, %v4870_v48  ;;  %v4871_v54 = vmax.f32 %v4696_v49, 0.0 }
 0x2ed   :  { %s23685_s3 = smov [#allocation4]   ;;  %s23686_s16 = smov [#allocation5]  }
 0x2ee   :  { %s78_s15 = sshll.u32 %s23685_s3, 4  ;;  %s90_s17 = sshll.u32 %s23686_s16, 4  ;;  %v23903_v4 = vpack.c.bf16 %v4871_v54, %v4871_v54  ;;  %s79_s15 = int_to_ptr.vmem [resolvable:$true] %s78_s15  ;;  %s91_s17 = int_to_ptr.vmem [resolvable:$true] %s90_s17 }
 0x2ef   :  { %s23591_s18 = scalar_lea.vmem %s79_s15, 102400  ;;  %p23596_p7 = scmp.lt.s32.totalorder %s79_s15, %s79_s15 }
 0x2f0   :  { %p23592_p6 = scmp.ne.s32.totalorder %s79_s15, %s23591_s18  ;;  %p23597_p8 = scmp.lt.s32.totalorder %s23591_s18, %s23591_s18 }
 0x2f2   :  { %p23598_p9 = por %p23597_p8, %p23596_p7 }
 0x2f4   :  { %p23599_p10 = pnand %p23598_p9, %p23592_p6 }
 0x2f6   :  { %23602 = shalt.err (!%p23599_p10)  }
 0x2f7   :  { %81 = dma.hbm_to_vmem [thread:$0]  %s24209_s5, 102400, %s79_s15, [#allocation8 + $0x2] }
 0x2f8   :  { %s23611_s4 = scalar_lea.vmem %s91_s17, 160  ;;  %p23616_p12 = scmp.lt.s32.totalorder %s91_s17, %s91_s17 }
 0x2f9   :  { %p23612_p11 = scmp.ne.s32.totalorder %s91_s17, %s23611_s4  ;;  %p23617_p13 = scmp.lt.s32.totalorder %s23611_s4, %s23611_s4 }
 0x2fb   :  { %p23618_p0 = por %p23617_p13, %p23616_p12 }
 0x2fd   :  { %p23619_p1 = pnand %p23618_p0, %p23612_p11 }
 0x2ff   :  { %23622 = shalt.err (!%p23619_p1)  }
 0x300   :  { %93 = dma.hbm_to_vmem [thread:$0]  %s24210_s6, 160, %s91_s17, [#allocation8 + $0x3] }
 0x301   :  { %s23687_s21 = smov [#allocation6]   ;;  %s23688_s23 = smov [#allocation7]  }
 0x302   :  { %s102_s22 = sshll.u32 %s23687_s21, 4  ;;  %s114_s24 = sshll.u32 %s23688_s23, 4  ;;  %s103_s22 = int_to_ptr.vmem [resolvable:$true] %s102_s22  ;;  %s115_s24 = int_to_ptr.vmem [resolvable:$true] %s114_s24 }
 0x303   :  { %s23631_s25 = scalar_lea.vmem %s103_s22, 10240  ;;  %p23636_p3 = scmp.lt.s32.totalorder %s103_s22, %s103_s22 }
 0x304   :  { %p23632_p2 = scmp.ne.s32.totalorder %s103_s22, %s23631_s25  ;;  %p23637_p4 = scmp.lt.s32.totalorder %s23631_s25, %s23631_s25 }
 0x306   :  { %p23638_p5 = por %p23637_p4, %p23636_p3 }
 0x308   :  { %p23639_p6 = pnand %p23638_p5, %p23632_p2 }
 0x30a   :  { %23642 = shalt.err (!%p23639_p6)  }
 0x30b   :  { %105 = dma.hbm_to_vmem [thread:$0]  %s24211_s7, 10240, %s103_s22, [#allocation8 + $0x4] }
 0x30c   :  { %s23651_s0 = scalar_lea.vmem %s115_s24, 16  ;;  %p23656_p8 = scmp.lt.s32.totalorder %s115_s24, %s115_s24 }
 0x30d   :  { %p23652_p7 = scmp.ne.s32.totalorder %s115_s24, %s23651_s0  ;;  %p23657_p9 = scmp.lt.s32.totalorder %s23651_s0, %s23651_s0 }
 0x30f   :  { %p23658_p10 = por %p23657_p9, %p23656_p8 }
 0x311   :  { %p23659_p11 = pnand %p23658_p10, %p23652_p7 }
 0x313   :  { %23662 = shalt.err (!%p23659_p11)  }
 0x314   :  { %117 = dma.hbm_to_vmem [thread:$0]  %s24212_s8, 16, %s115_s24, [#allocation8 + $0x5]  ;;  %v763_v7 = vld [vmem:[#allocation11 + $0x8] sm:$0x3] }
 0x315   :  { %v801_v24 = vrot.slane %v763_v7, %v23802_v35  ;;  %v805_v8 = vrot.slane %v763_v7, %v23805_v40 }
 0x31c   :  { %v4734_v57 = vpop.f32.mrf.mxu0 }
 0x31d   :  { %v4775_v59 = vpop.f32.mrf.mxu1  ;;  %v4735_v9 = vadd.f32 %v4734_v57, %v801_v24 }
 0x31e   :  { %v4736_v60 = vpop.f32.mrf.mxu0 }
 0x31f   :  { %v4777_v61 = vpop.f32.mrf.mxu1  ;;  %v4737_v10 = vadd.f32 %v4736_v60, %v805_v8  ;;  %v4776_v11 = vadd.f32 %v4775_v59, %v4735_v9 }
 0x320   :  { %v4738_v1 = vpop.f32.mrf.mxu0 }
 0x321   :  { %v4779_v2 = vpop.f32.mrf.mxu1  ;;  %v4778_v14 = vadd.f32 %v4777_v61, %v4737_v10 }
 0x322   :  { %v4739_v5 = vpop.f32.mrf.mxu0 }
 0x323   :  { %v4780_v6 = vpop.f32.mrf.mxu1 }
 0x35c   :  { %v4816_v12 = vpop.f32.mrf.mxu0 }
 0x35d   :  { %v4857_v13 = vpop.f32.mrf.mxu1  ;;  %v4817_v27 = vadd.f32 %v4816_v12, %v4776_v11 }
 0x35e   :  { %v4818_v37 = vpop.f32.mrf.mxu0 }
 0x35f   :  { %v4859_v20 = vpop.f32.mrf.mxu1  ;;  %v4858_v21 = vadd.f32 %v4857_v13, %v4817_v27  ;;  %v4819_v22 = vadd.f32 %v4818_v37, %v4778_v14 }
 0x360   :  { %v4820_v23 = vpop.f32.mrf.mxu0 }
 0x361   :  { %v4861_v46 = vpop.f32.mrf.mxu1  ;;  %v4872_v25 = vmax.f32 %v4858_v21, 0.0  ;;  %v4860_v26 = vadd.f32 %v4859_v20, %v4819_v22 }
 0x362   :  { %v4821_v28 = vpop.f32.mrf.mxu0 }
 0x363   :  { %v4862_v58 = vpop.f32.mrf.mxu1  ;;  %v23919_v30 = vpack.c.bf16 %v4872_v25, %v4872_v25  ;;  %v4873_v29 = vmax.f32 %v4860_v26, 0.0 }
 0x365   :  { %v23921_v31 = vpack.c.bf16 %v4873_v29, %v4873_v29 }
 0x366   :  { %23667 = dma.done.wait [#allocation8], 102400 }
 0x367   :  { %23668 = vsyncadd [#allocation8], 4294864896 }
 0x368   :  { %23669 = dma.done.wait [#allocation8 + $0x1], 160 }
 0x369   :  { %23670 = vsyncadd [#allocation8 + $0x1], 4294967136  ;;  %9777 = vmatprep.mubr.bf16.mxu0 %v23825_v39  ;;  %9818 = vmatprep.mubr.bf16.mxu1 %v23855_v56  ;;  %v21019_v32 = vld [vmem:[#allocation2 + $0x234] ss:$40 sps:$4 sm:$0xff]   ;;  %v21021_v33 = vld [vmem:[#allocation2 + $0x230] ss:$40 sps:$4 sm:$0xff]  }
 0x36a   :  { %9745 = vmatprep.subr.bf16.mxu0 %v21019_v32  ;;  %v21022_v34 = vld [vmem:[#allocation2 + $0x734] ss:$40 sps:$4 sm:$0xff]   ;;  %v21024_v47 = vld [vmem:[#allocation2 + $0x730] ss:$40 sps:$4 sm:$0xff]   ;;  %v21025_v51 = vld [vmem:[#allocation2 + $0x1e4] ss:$40 sps:$4 sm:$0xff]  }
 0x36b   :  { %9746 = vmatpush1.bf16.msra.mxu0 %v21021_v33  ;;  %v21027_v41 = vld [vmem:[#allocation2 + $0x1e0] ss:$40 sps:$4 sm:$0xff]   ;;  %9786 = vmatprep.subr.bf16.mxu1 %v21022_v34  ;;  %v21028_v42 = vld [vmem:[#allocation2 + $0x6e4] ss:$40 sps:$4 sm:$0xff]   ;;  %v21031_v16 = vld [vmem:[#allocation2 + $0x194] ss:$40 sps:$4 sm:$0xff]  }
 0x36c   :  { %9787 = vmatpush1.bf16.msra.mxu1 %v21024_v47  ;;  %9747 = vmatprep.subr.bf16.mxu0 %v21025_v51  ;;  %v21030_v43 = vld [vmem:[#allocation2 + $0x6e0] ss:$40 sps:$4 sm:$0xff]   ;;  %v21033_v63 = vld [vmem:[#allocation2 + $0x190] ss:$40 sps:$4 sm:$0xff]   ;;  %v21034_v17 = vld [vmem:[#allocation2 + $0x694] ss:$40 sps:$4 sm:$0xff]  }
 0x36d   :  { %9788 = vmatprep.subr.bf16.mxu1 %v21028_v42  ;;  %v21037_v44 = vld [vmem:[#allocation2 + $0x144] ss:$40 sps:$4 sm:$0xff]   ;;  %v21036_v48 = vld [vmem:[#allocation2 + $0x690] ss:$40 sps:$4 sm:$0xff]   ;;  %v21039_v50 = vld [vmem:[#allocation2 + $0x140] ss:$40 sps:$4 sm:$0xff]  }
 0x36e   :  { %v21040_v49 = vld [vmem:[#allocation2 + $0x644] ss:$40 sps:$4 sm:$0xff]   ;;  %v21043_v52 = vld [vmem:[#allocation2 + $0xf4] ss:$40 sps:$4 sm:$0xff]   ;;  %v21042_v54 = vld [vmem:[#allocation2 + $0x640] ss:$40 sps:$4 sm:$0xff]  }
 0x36f   :  { %9748 = vmatpush1.bf16.msra.mxu0 %v21027_v41  ;;  %v21046_v57 = vld [vmem:[#allocation2 + $0x5f4] ss:$40 sps:$4 sm:$0xff]   ;;  %v21045_v59 = vld [vmem:[#allocation2 + $0xf0] ss:$40 sps:$4 sm:$0xff]   ;;  %v21049_v60 = vld [vmem:[#allocation2 + $0xa4] ss:$40 sps:$4 sm:$0xff]  }
 0x370   :  { %9749 = vmatprep.subr.bf16.mxu0 %v21031_v16  ;;  %9789 = vmatpush1.bf16.msra.mxu1 %v21030_v43  ;;  %v21048_v61 = vld [vmem:[#allocation2 + $0x5f0] ss:$40 sps:$4 sm:$0xff]   ;;  %v21052_v1 = vld [vmem:[#allocation2 + $0x5a4] ss:$40 sps:$4 sm:$0xff]   ;;  %v21051_v2 = vld [vmem:[#allocation2 + $0xa0] ss:$40 sps:$4 sm:$0xff]  }
 0x371   :  { %9790 = vmatprep.subr.bf16.mxu1 %v21034_v17  ;;  %v21055_v5 = vld [vmem:[#allocation2 + $0x54] ss:$40 sps:$4 sm:$0xff]   ;;  %v21054_v6 = vld [vmem:[#allocation2 + $0x5a0] ss:$40 sps:$4 sm:$0xff]   ;;  %v21057_v24 = vld [vmem:[#allocation2 + $0x50] ss:$40 sps:$4 sm:$0xff]  }
 0x372   :  { %v21058_v7 = vld [vmem:[#allocation2 + $0x554] ss:$40 sps:$4 sm:$0xff]   ;;  %v21061_v8 = vld [vmem:[#allocation2 + $0x4] ss:$40 sps:$4 sm:$0xff]   ;;  %v21060_v9 = vld [vmem:[#allocation2 + $0x550] ss:$40 sps:$4 sm:$0xff]  }
 0x373   :  { %9750 = vmatpush1.bf16.msra.mxu0 %v21033_v63  ;;  %v21064_v10 = vld [vmem:[#allocation2 + $0x504] ss:$40 sps:$4 sm:$0xff]   ;;  %v21063_v11 = vld [vmem:[#allocation2] ss:$40 sps:$4 sm:$0xff]   ;;  %v21067_v12 = vld [vmem:[#allocation2 + $0x4b4] ss:$40 sps:$4 sm:$0xff]  }
 0x374   :  { %9751 = vmatprep.subr.bf16.mxu0 %v21037_v44  ;;  %9791 = vmatpush1.bf16.msra.mxu1 %v21036_v48  ;;  %v21066_v13 = vld [vmem:[#allocation2 + $0x500] ss:$40 sps:$4 sm:$0xff]   ;;  %v21070_v14 = vld [vmem:[#allocation2 + $0x9b4] ss:$40 sps:$4 sm:$0xff]   ;;  %v21069_v27 = vld [vmem:[#allocation2 + $0x4b0] ss:$40 sps:$4 sm:$0xff]  }
 0x375   :  { %9792 = vmatprep.subr.bf16.mxu1 %v21040_v49  ;;  %v21073_v37 = vld [vmem:[#allocation2 + $0x464] ss:$40 sps:$4 sm:$0xff]   ;;  %v21072_v20 = vld [vmem:[#allocation2 + $0x9b0] ss:$40 sps:$4 sm:$0xff]   ;;  %v21075_v22 = vld [vmem:[#allocation2 + $0x460] ss:$40 sps:$4 sm:$0xff]  }
 0x376   :  { %v21076_v21 = vld [vmem:[#allocation2 + $0x964] ss:$40 sps:$4 sm:$0xff]   ;;  %v21079_v23 = vld [vmem:[#allocation2 + $0x414] ss:$40 sps:$4 sm:$0xff]   ;;  %v21078_v46 = vld [vmem:[#allocation2 + $0x960] ss:$40 sps:$4 sm:$0xff]  }
 0x377   :  { %9752 = vmatpush1.bf16.msra.mxu0 %v21039_v50  ;;  %v21082_v25 = vld [vmem:[#allocation2 + $0x914] ss:$40 sps:$4 sm:$0xff]   ;;  %v21081_v26 = vld [vmem:[#allocation2 + $0x410] ss:$40 sps:$4 sm:$0xff]   ;;  %v21085_v28 = vld [vmem:[#allocation2 + $0x3c4] ss:$40 sps:$4 sm:$0xff]  }
 0x378   :  { %9753 = vmatprep.subr.bf16.mxu0 %v21043_v52  ;;  %9793 = vmatpush1.bf16.msra.mxu1 %v21042_v54  ;;  %v21084_v58 = vld [vmem:[#allocation2 + $0x910] ss:$40 sps:$4 sm:$0xff]   ;;  %v21088_v29 = vld [vmem:[#allocation2 + $0x8c4] ss:$40 sps:$4 sm:$0xff]   ;;  %v21087_v32 = vld [vmem:[#allocation2 + $0x3c0] ss:$40 sps:$4 sm:$0xff]  }
 0x379   :  { %9794 = vmatprep.subr.bf16.mxu1 %v21046_v57  ;;  %v21091_v33 = vld [vmem:[#allocation2 + $0x374] ss:$40 sps:$4 sm:$0xff]   ;;  %v21090_v34 = vld [vmem:[#allocation2 + $0x8c0] ss:$40 sps:$4 sm:$0xff]   ;;  %v21093_v51 = vld [vmem:[#allocation2 + $0x370] ss:$40 sps:$4 sm:$0xff]  }
 0x37a   :  { %v21094_v47 = vld [vmem:[#allocation2 + $0x874] ss:$40 sps:$4 sm:$0xff]   ;;  %v21097_v41 = vld [vmem:[#allocation2 + $0x324] ss:$40 sps:$4 sm:$0xff]   ;;  %v21096_v42 = vld [vmem:[#allocation2 + $0x870] ss:$40 sps:$4 sm:$0xff]  }
 0x37b   :  { %9754 = vmatpush1.bf16.msra.mxu0 %v21045_v59  ;;  %v21100_v43 = vld [vmem:[#allocation2 + $0x824] ss:$40 sps:$4 sm:$0xff]   ;;  %v21099_v16 = vld [vmem:[#allocation2 + $0x320] ss:$40 sps:$4 sm:$0xff]   ;;  %v21103_v63 = vld [vmem:[#allocation2 + $0x2d4] ss:$40 sps:$4 sm:$0xff]  }
 0x37c   :  { %9755 = vmatprep.subr.bf16.mxu0 %v21049_v60  ;;  %9795 = vmatpush1.bf16.msra.mxu1 %v21048_v61  ;;  %v21102_v17 = vld [vmem:[#allocation2 + $0x820] ss:$40 sps:$4 sm:$0xff]   ;;  %v21106_v44 = vld [vmem:[#allocation2 + $0x7d4] ss:$40 sps:$4 sm:$0xff]   ;;  %v21105_v48 = vld [vmem:[#allocation2 + $0x2d0] ss:$40 sps:$4 sm:$0xff]  }
 0x37d   :  { %9796 = vmatprep.subr.bf16.mxu1 %v21052_v1  ;;  %v21109_v49 = vld [vmem:[#allocation2 + $0x284] ss:$40 sps:$4 sm:$0xff]   ;;  %v21108_v50 = vld [vmem:[#allocation2 + $0x7d0] ss:$40 sps:$4 sm:$0xff]   ;;  %v21111_v54 = vld [vmem:[#allocation2 + $0x280] ss:$40 sps:$4 sm:$0xff]  }
 0x37e   :  { %v21112_v52 = vld [vmem:[#allocation2 + $0x784] ss:$40 sps:$4 sm:$0xff]   ;;  %v21117_v57 = vld [vmem:[#allocation2 + $0xc34] ss:$40 sps:$4 sm:$0xff]   ;;  %v21114_v59 = vld [vmem:[#allocation2 + $0x780] ss:$40 sps:$4 sm:$0xff]  }
 0x37f   :  { %9756 = vmatpush1.bf16.msra.mxu0 %v21051_v2  ;;  %v21120_v60 = vld [vmem:[#allocation2 + $0x1134] ss:$40 sps:$4 sm:$0xff]   ;;  %v21115_v61 = vld [vmem:[#allocation2 + $0xc30] ss:$40 sps:$4 sm:$0xff]   ;;  %v21123_v1 = vld [vmem:[#allocation2 + $0xbe4] ss:$40 sps:$4 sm:$0xff]  }
 0x380   :  { %9757 = vmatprep.subr.bf16.mxu0 %v21055_v5  ;;  %9797 = vmatpush1.bf16.msra.mxu1 %v21054_v6  ;;  %v21118_v2 = vld [vmem:[#allocation2 + $0x1130] ss:$40 sps:$4 sm:$0xff]   ;;  %v21126_v5 = vld [vmem:[#allocation2 + $0x10e4] ss:$40 sps:$4 sm:$0xff]   ;;  %v21121_v6 = vld [vmem:[#allocation2 + $0xbe0] ss:$40 sps:$4 sm:$0xff]  }
 0x381   :  { %9798 = vmatprep.subr.bf16.mxu1 %v21058_v7  ;;  %v21129_v7 = vld [vmem:[#allocation2 + $0xb94] ss:$40 sps:$4 sm:$0xff]  }
 0x383   :  { %9758 = vmatpush1.bf16.msra.mxu0 %v21057_v24  ;;  %v21124_v24 = vld [vmem:[#allocation2 + $0x10e0] ss:$40 sps:$4 sm:$0xff]  }
 0x384   :  { %9759 = vmatprep.subr.bf16.mxu0 %v21061_v8  ;;  %9799 = vmatpush1.bf16.msra.mxu1 %v21060_v9  ;;  %v21132_v8 = vld [vmem:[#allocation2 + $0x1094] ss:$40 sps:$4 sm:$0xff]   ;;  %v21127_v9 = vld [vmem:[#allocation2 + $0xb90] ss:$40 sps:$4 sm:$0xff]  }
 0x385   :  { %9800 = vmatprep.subr.bf16.mxu1 %v21064_v10  ;;  %v21135_v10 = vld [vmem:[#allocation2 + $0xb44] ss:$40 sps:$4 sm:$0xff]  }
 0x387   :  { %9760 = vmatpush1.bf16.msra.mxu0 %v21063_v11  ;;  %v21130_v11 = vld [vmem:[#allocation2 + $0x1090] ss:$40 sps:$4 sm:$0xff]  }
 0x388   :  { %9761 = vmatprep.subr.bf16.mxu0 %v21067_v12  ;;  %9801 = vmatpush1.bf16.msra.mxu1 %v21066_v13  ;;  %v21138_v12 = vld [vmem:[#allocation2 + $0x1044] ss:$40 sps:$4 sm:$0xff]   ;;  %v21133_v13 = vld [vmem:[#allocation2 + $0xb40] ss:$40 sps:$4 sm:$0xff]  }
 0x389   :  { %9802 = vmatprep.subr.bf16.mxu1 %v21070_v14  ;;  %v21141_v14 = vld [vmem:[#allocation2 + $0xaf4] ss:$40 sps:$4 sm:$0xff]  }
 0x38b   :  { %9762 = vmatpush2.bf16.msra.mxu0 %v21069_v27  ;;  %v21136_v27 = vld [vmem:[#allocation2 + $0x1040] ss:$40 sps:$4 sm:$0xff]  }
 0x38c   :  { %9763 = vmatprep.subr.bf16.mxu0 %v21073_v37  ;;  %9803 = vmatpush2.bf16.msra.mxu1 %v21072_v20  ;;  %v21144_v37 = vld [vmem:[#allocation2 + $0xff4] ss:$40 sps:$4 sm:$0xff]   ;;  %v21139_v20 = vld [vmem:[#allocation2 + $0xaf0] ss:$40 sps:$4 sm:$0xff]  }
 0x38d   :  { %9804 = vmatprep.subr.bf16.mxu1 %v21076_v21  ;;  %v21147_v21 = vld [vmem:[#allocation2 + $0xaa4] ss:$40 sps:$4 sm:$0xff]  }
 0x38f   :  { %9764 = vmatpush2.bf16.msra.mxu0 %v21075_v22  ;;  %v21142_v22 = vld [vmem:[#allocation2 + $0xff0] ss:$40 sps:$4 sm:$0xff]  }
 0x390   :  { %9765 = vmatprep.subr.bf16.mxu0 %v21079_v23  ;;  %9805 = vmatpush2.bf16.msra.mxu1 %v21078_v46  ;;  %v21150_v23 = vld [vmem:[#allocation2 + $0xfa4] ss:$40 sps:$4 sm:$0xff]   ;;  %v21145_v46 = vld [vmem:[#allocation2 + $0xaa0] ss:$40 sps:$4 sm:$0xff]  }
 0x391   :  { %9806 = vmatprep.subr.bf16.mxu1 %v21082_v25  ;;  %v21153_v25 = vld [vmem:[#allocation2 + $0xa54] ss:$40 sps:$4 sm:$0xff]  }
 0x393   :  { %9766 = vmatpush2.bf16.msra.mxu0 %v21081_v26  ;;  %v21148_v26 = vld [vmem:[#allocation2 + $0xfa0] ss:$40 sps:$4 sm:$0xff]  }
 0x394   :  { %9767 = vmatprep.subr.bf16.mxu0 %v21085_v28  ;;  %9807 = vmatpush2.bf16.msra.mxu1 %v21084_v58  ;;  %v21156_v28 = vld [vmem:[#allocation2 + $0xf54] ss:$40 sps:$4 sm:$0xff]   ;;  %v21151_v58 = vld [vmem:[#allocation2 + $0xa50] ss:$40 sps:$4 sm:$0xff]  }
 0x395   :  { %9808 = vmatprep.subr.bf16.mxu1 %v21088_v29  ;;  %v21159_v29 = vld [vmem:[#allocation2 + $0xa04] ss:$40 sps:$4 sm:$0xff]  }
 0x397   :  { %9768 = vmatpush2.bf16.msra.mxu0 %v21087_v32  ;;  %v21154_v32 = vld [vmem:[#allocation2 + $0xf50] ss:$40 sps:$4 sm:$0xff]  }
 0x398   :  { %9769 = vmatprep.subr.bf16.mxu0 %v21091_v33  ;;  %9809 = vmatpush2.bf16.msra.mxu1 %v21090_v34  ;;  %v21162_v33 = vld [vmem:[#allocation2 + $0xf04] ss:$40 sps:$4 sm:$0xff]   ;;  %v21157_v34 = vld [vmem:[#allocation2 + $0xa00] ss:$40 sps:$4 sm:$0xff]  }
 0x399   :  { %9810 = vmatprep.subr.bf16.mxu1 %v21094_v47  ;;  %v21165_v47 = vld [vmem:[#allocation2 + $0xeb4] ss:$40 sps:$4 sm:$0xff]  }
 0x39b   :  { %9770 = vmatpush2.bf16.msra.mxu0 %v21093_v51  ;;  %v21160_v51 = vld [vmem:[#allocation2 + $0xf00] ss:$40 sps:$4 sm:$0xff]  }
 0x39c   :  { %9771 = vmatprep.subr.bf16.mxu0 %v21097_v41  ;;  %9811 = vmatpush2.bf16.msra.mxu1 %v21096_v42  ;;  %v21168_v41 = vld [vmem:[#allocation2 + $0x13b4] ss:$40 sps:$4 sm:$0xff]   ;;  %v21163_v42 = vld [vmem:[#allocation2 + $0xeb0] ss:$40 sps:$4 sm:$0xff]  }
 0x39d   :  { %9812 = vmatprep.subr.bf16.mxu1 %v21100_v43  ;;  %v21171_v43 = vld [vmem:[#allocation2 + $0xe64] ss:$40 sps:$4 sm:$0xff]  }
 0x39f   :  { %9772 = vmatpush2.bf16.msra.mxu0 %v21099_v16  ;;  %v21166_v16 = vld [vmem:[#allocation2 + $0x13b0] ss:$40 sps:$4 sm:$0xff]  }
 0x3a0   :  { %9773 = vmatprep.subr.bf16.mxu0 %v21103_v63  ;;  %9813 = vmatpush2.bf16.msra.mxu1 %v21102_v17  ;;  %v21174_v63 = vld [vmem:[#allocation2 + $0x1364] ss:$40 sps:$4 sm:$0xff]   ;;  %v21169_v17 = vld [vmem:[#allocation2 + $0xe60] ss:$40 sps:$4 sm:$0xff]  }
 0x3a1   :  { %9814 = vmatprep.subr.bf16.mxu1 %v21106_v44  ;;  %v21177_v44 = vld [vmem:[#allocation2 + $0xe14] ss:$40 sps:$4 sm:$0xff]  }
 0x3a3   :  { %9774 = vmatpush2.bf16.msra.mxu0 %v21105_v48  ;;  %v21172_v48 = vld [vmem:[#allocation2 + $0x1360] ss:$40 sps:$4 sm:$0xff]  }
 0x3a4   :  { %9775 = vmatprep.subr.bf16.mxu0 %v21109_v49  ;;  %9815 = vmatpush2.bf16.msra.mxu1 %v21108_v50  ;;  %v21180_v49 = vld [vmem:[#allocation2 + $0x1314] ss:$40 sps:$4 sm:$0xff]   ;;  %v21175_v50 = vld [vmem:[#allocation2 + $0xe10] ss:$40 sps:$4 sm:$0xff]  }
 0x3a5   :  { %9816 = vmatprep.subr.bf16.mxu1 %v21112_v52  ;;  %v21183_v52 = vld [vmem:[#allocation2 + $0xdc4] ss:$40 sps:$4 sm:$0xff]  }
 0x3a7   :  { %9776 = vmatpush2.bf16.msra.mxu0 %v21111_v54  ;;  %v21178_v54 = vld [vmem:[#allocation2 + $0x1310] ss:$40 sps:$4 sm:$0xff]  }
 0x3a8   :  { %9827 = vmatprep.subr.bf16.mxu0 %v21117_v57  ;;  %9817 = vmatpush2.bf16.msra.mxu1 %v21114_v59  ;;  %v21186_v57 = vld [vmem:[#allocation2 + $0x12c4] ss:$40 sps:$4 sm:$0xff]   ;;  %v21181_v59 = vld [vmem:[#allocation2 + $0xdc0] ss:$40 sps:$4 sm:$0xff]  }
 0x3a9   :  { %9868 = vmatprep.subr.bf16.mxu1 %v21120_v60  ;;  %v21189_v60 = vld [vmem:[#allocation2 + $0xd74] ss:$40 sps:$4 sm:$0xff]  }
 0x3aa   :  { %9778 = vmatmul.mubr.bf16.vlgmr.msra.gmra.mxu0 %v23823_v38 }
 0x3ab   :  { %9828 = vmatpush1.bf16.msra.mxu0 %v21115_v61  ;;  %9859 = vmatprep.mubr.bf16.mxu0 %v23883_v36  ;;  %v21184_v61 = vld [vmem:[#allocation2 + $0x12c0] ss:$40 sps:$4 sm:$0xff]  }
 0x3ac   :  { %9819 = vmatmul.mubr.bf16.vlgmr.msra.gmra.mxu1 %v23853_v55  ;;  %9829 = vmatprep.subr.bf16.mxu0 %v21123_v1  ;;  %v21192_v1 = vld [vmem:[#allocation2 + $0x1274] ss:$40 sps:$4 sm:$0xff]  }
 0x3ad   :  { %9869 = vmatpush1.bf16.msra.mxu1 %v21118_v2  ;;  %9900 = vmatprep.mubr.bf16.mxu1 %v23903_v4  ;;  %v21187_v2 = vld [vmem:[#allocation2 + $0xd70] ss:$40 sps:$4 sm:$0xff]  }
 0x3ae   :  { %9870 = vmatprep.subr.bf16.mxu1 %v21126_v5  ;;  %v21195_v5 = vld [vmem:[#allocation2 + $0xd24] ss:$40 sps:$4 sm:$0xff]  }
 0x3af   :  { %9830 = vmatpush1.bf16.msra.mxu0 %v21121_v6  ;;  %v21190_v6 = vld [vmem:[#allocation2 + $0x1270] ss:$40 sps:$4 sm:$0xff]  }
 0x3b0   :  { %9831 = vmatprep.subr.bf16.mxu0 %v21129_v7  ;;  %v21198_v7 = vld [vmem:[#allocation2 + $0x1224] ss:$40 sps:$4 sm:$0xff]  }
 0x3b1   :  { %9871 = vmatpush1.bf16.msra.mxu1 %v21124_v24  ;;  %v21193_v24 = vld [vmem:[#allocation2 + $0xd20] ss:$40 sps:$4 sm:$0xff]  }
 0x3b2   :  { %9872 = vmatprep.subr.bf16.mxu1 %v21132_v8  ;;  %v21201_v8 = vld [vmem:[#allocation2 + $0xcd4] ss:$40 sps:$4 sm:$0xff]  }
 0x3b3   :  { %9832 = vmatpush1.bf16.msra.mxu0 %v21127_v9  ;;  %v21196_v9 = vld [vmem:[#allocation2 + $0x1220] ss:$40 sps:$4 sm:$0xff]  }
 0x3b4   :  { %9833 = vmatprep.subr.bf16.mxu0 %v21135_v10  ;;  %v21204_v10 = vld [vmem:[#allocation2 + $0x11d4] ss:$40 sps:$4 sm:$0xff]  }
 0x3b5   :  { %9873 = vmatpush1.bf16.msra.mxu1 %v21130_v11  ;;  %v21199_v11 = vld [vmem:[#allocation2 + $0xcd0] ss:$40 sps:$4 sm:$0xff]  }
 0x3b6   :  { %9874 = vmatprep.subr.bf16.mxu1 %v21138_v12  ;;  %v21207_v12 = vld [vmem:[#allocation2 + $0xc84] ss:$40 sps:$4 sm:$0xff]  }
 0x3b7   :  { %9834 = vmatpush1.bf16.msra.mxu0 %v21133_v13  ;;  %v21202_v13 = vld [vmem:[#allocation2 + $0x11d0] ss:$40 sps:$4 sm:$0xff]  }
 0x3b8   :  { %9835 = vmatprep.subr.bf16.mxu0 %v21141_v14  ;;  %v21210_v14 = vld [vmem:[#allocation2 + $0x1184] ss:$40 sps:$4 sm:$0xff]  }
 0x3b9   :  { %9875 = vmatpush1.bf16.msra.mxu1 %v21136_v27  ;;  %v21205_v27 = vld [vmem:[#allocation2 + $0xc80] ss:$40 sps:$4 sm:$0xff]  }
 0x3ba   :  { %9876 = vmatprep.subr.bf16.mxu1 %v21144_v37  ;;  %v21213_v37 = vld [vmem:[#allocation2 + $0x1634] ss:$40 sps:$4 sm:$0xff]  }
 0x3bb   :  { %9836 = vmatpush1.bf16.msra.mxu0 %v21139_v20  ;;  %v21208_v20 = vld [vmem:[#allocation2 + $0x1180] ss:$40 sps:$4 sm:$0xff]  }
 0x3bc   :  { %9837 = vmatprep.subr.bf16.mxu0 %v21147_v21  ;;  %v21216_v21 = vld [vmem:[#allocation2 + $0x23c] ss:$40 sps:$4 sm:$0xff]  }
 0x3bd   :  { %9877 = vmatpush1.bf16.msra.mxu1 %v21142_v22  ;;  %v21211_v22 = vld [vmem:[#allocation2 + $0x1630] ss:$40 sps:$4 sm:$0xff]  }
 0x3be   :  { %9878 = vmatprep.subr.bf16.mxu1 %v21150_v23  ;;  %v21219_v23 = vld [vmem:[#allocation2 + $0x15e4] ss:$40 sps:$4 sm:$0xff]  }
 0x3bf   :  { %9838 = vmatpush1.bf16.msra.mxu0 %v21145_v46  ;;  %v21214_v46 = vld [vmem:[#allocation2 + $0x238] ss:$40 sps:$4 sm:$0xff]  }
 0x3c0   :  { %9839 = vmatprep.subr.bf16.mxu0 %v21153_v25  ;;  %v21222_v25 = vld [vmem:[#allocation2 + $0x1ec] ss:$40 sps:$4 sm:$0xff]  }
 0x3c1   :  { %9879 = vmatpush1.bf16.msra.mxu1 %v21148_v26  ;;  %v21217_v26 = vld [vmem:[#allocation2 + $0x15e0] ss:$40 sps:$4 sm:$0xff]  }
 0x3c2   :  { %9880 = vmatprep.subr.bf16.mxu1 %v21156_v28  ;;  %v21225_v28 = vld [vmem:[#allocation2 + $0x1594] ss:$40 sps:$4 sm:$0xff]  }
 0x3c3   :  { %9840 = vmatpush1.bf16.msra.mxu0 %v21151_v58  ;;  %v21220_v58 = vld [vmem:[#allocation2 + $0x1e8] ss:$40 sps:$4 sm:$0xff]  }
 0x3c4   :  { %9841 = vmatprep.subr.bf16.mxu0 %v21159_v29  ;;  %v21228_v29 = vld [vmem:[#allocation2 + $0x19c] ss:$40 sps:$4 sm:$0xff]  }
 0x3c5   :  { %9881 = vmatpush1.bf16.msra.mxu1 %v21154_v32  ;;  %v21223_v32 = vld [vmem:[#allocation2 + $0x1590] ss:$40 sps:$4 sm:$0xff]  }
 0x3c6   :  { %9882 = vmatprep.subr.bf16.mxu1 %v21162_v33  ;;  %v21231_v33 = vld [vmem:[#allocation2 + $0x1544] ss:$40 sps:$4 sm:$0xff]  }
 0x3c7   :  { %9842 = vmatpush1.bf16.msra.mxu0 %v21157_v34  ;;  %v21226_v34 = vld [vmem:[#allocation2 + $0x198] ss:$40 sps:$4 sm:$0xff]  }
 0x3c8   :  { %9843 = vmatprep.subr.bf16.mxu0 %v21165_v47  ;;  %v21234_v47 = vld [vmem:[#allocation2 + $0x14c] ss:$40 sps:$4 sm:$0xff]  }
 0x3c9   :  { %9883 = vmatpush1.bf16.msra.mxu1 %v21160_v51  ;;  %v21229_v51 = vld [vmem:[#allocation2 + $0x1540] ss:$40 sps:$4 sm:$0xff]  }
 0x3ca   :  { %9884 = vmatprep.subr.bf16.mxu1 %v21168_v41  ;;  %v21237_v41 = vld [vmem:[#allocation2 + $0x14f4] ss:$40 sps:$4 sm:$0xff]  }
 0x3cb   :  { %9844 = vmatpush2.bf16.msra.mxu0 %v21163_v42  ;;  %v21232_v42 = vld [vmem:[#allocation2 + $0x148] ss:$40 sps:$4 sm:$0xff]  }
 0x3cc   :  { %9845 = vmatprep.subr.bf16.mxu0 %v21171_v43  ;;  %v21240_v43 = vld [vmem:[#allocation2 + $0xfc] ss:$40 sps:$4 sm:$0xff]  }
 0x3cd   :  { %9885 = vmatpush2.bf16.msra.mxu1 %v21166_v16  ;;  %v21235_v16 = vld [vmem:[#allocation2 + $0x14f0] ss:$40 sps:$4 sm:$0xff]  }
 0x3ce   :  { %9886 = vmatprep.subr.bf16.mxu1 %v21174_v63  ;;  %v21243_v63 = vld [vmem:[#allocation2 + $0x14a4] ss:$40 sps:$4 sm:$0xff]  }
 0x3cf   :  { %9846 = vmatpush2.bf16.msra.mxu0 %v21169_v17  ;;  %v21238_v17 = vld [vmem:[#allocation2 + $0xf8] ss:$40 sps:$4 sm:$0xff]  }
 0x3d0   :  { %9847 = vmatprep.subr.bf16.mxu0 %v21177_v44  ;;  %v21246_v44 = vld [vmem:[#allocation2 + $0xac] ss:$40 sps:$4 sm:$0xff]  }
 0x3d1   :  { %9887 = vmatpush2.bf16.msra.mxu1 %v21172_v48  ;;  %v21241_v48 = vld [vmem:[#allocation2 + $0x14a0] ss:$40 sps:$4 sm:$0xff]  }
 0x3d2   :  { %9888 = vmatprep.subr.bf16.mxu1 %v21180_v49  ;;  %v21249_v49 = vld [vmem:[#allocation2 + $0x1454] ss:$40 sps:$4 sm:$0xff]  }
 0x3d3   :  { %9848 = vmatpush2.bf16.msra.mxu0 %v21175_v50  ;;  %v21244_v50 = vld [vmem:[#allocation2 + $0xa8] ss:$40 sps:$4 sm:$0xff]  }
 0x3d4   :  { %9849 = vmatprep.subr.bf16.mxu0 %v21183_v52  ;;  %v21252_v52 = vld [vmem:[#allocation2 + $0x5c] ss:$40 sps:$4 sm:$0xff]  }
 0x3d5   :  { %9889 = vmatpush2.bf16.msra.mxu1 %v21178_v54  ;;  %v21247_v54 = vld [vmem:[#allocation2 + $0x1450] ss:$40 sps:$4 sm:$0xff]  }
 0x3d6   :  { %9890 = vmatprep.subr.bf16.mxu1 %v21186_v57  ;;  %v21255_v57 = vld [vmem:[#allocation2 + $0x1404] ss:$40 sps:$4 sm:$0xff]  }
 0x3d7   :  { %9850 = vmatpush2.bf16.msra.mxu0 %v21181_v59  ;;  %v21250_v59 = vld [vmem:[#allocation2 + $0x58] ss:$40 sps:$4 sm:$0xff]  }
 0x3d8   :  { %9851 = vmatprep.subr.bf16.mxu0 %v21189_v60  ;;  %v21258_v60 = vld [vmem:[#allocation2 + $0xc] ss:$40 sps:$4 sm:$0xff]  }
 0x3d9   :  { %9891 = vmatpush2.bf16.msra.mxu1 %v21184_v61  ;;  %v21253_v61 = vld [vmem:[#allocation2 + $0x1400] ss:$40 sps:$4 sm:$0xff]  }
 0x3da   :  { %9892 = vmatprep.subr.bf16.mxu1 %v21192_v1  ;;  %v21261_v1 = vld [vmem:[#allocation2 + $0x18b4] ss:$40 sps:$4 sm:$0xff]  }
 0x3db   :  { %9852 = vmatpush2.bf16.msra.mxu0 %v21187_v2  ;;  %v21256_v2 = vld [vmem:[#allocation2 + $0x8] ss:$40 sps:$4 sm:$0xff]  }
 0x3dc   :  { %9853 = vmatprep.subr.bf16.mxu0 %v21195_v5  ;;  %v21264_v5 = vld [vmem:[#allocation2 + $0x4bc] ss:$40 sps:$4 sm:$0xff]  }
 0x3dd   :  { %9893 = vmatpush2.bf16.msra.mxu1 %v21190_v6  ;;  %v21259_v6 = vld [vmem:[#allocation2 + $0x18b0] ss:$40 sps:$4 sm:$0xff]  }
 0x3de   :  { %9894 = vmatprep.subr.bf16.mxu1 %v21198_v7  ;;  %v21267_v7 = vld [vmem:[#allocation2 + $0x1864] ss:$40 sps:$4 sm:$0xff]  }
 0x3df   :  { %9854 = vmatpush2.bf16.msra.mxu0 %v21193_v24  ;;  %v21262_v24 = vld [vmem:[#allocation2 + $0x4b8] ss:$40 sps:$4 sm:$0xff]  }
 0x3e0   :  { %9855 = vmatprep.subr.bf16.mxu0 %v21201_v8  ;;  %v21270_v8 = vld [vmem:[#allocation2 + $0x46c] ss:$40 sps:$4 sm:$0xff]  }
 0x3e1   :  { %9895 = vmatpush2.bf16.msra.mxu1 %v21196_v9  ;;  %v21265_v9 = vld [vmem:[#allocation2 + $0x1860] ss:$40 sps:$4 sm:$0xff]  }
 0x3e2   :  { %9896 = vmatprep.subr.bf16.mxu1 %v21204_v10  ;;  %v21273_v10 = vld [vmem:[#allocation2 + $0x1814] ss:$40 sps:$4 sm:$0xff]  }
 0x3e3   :  { %9856 = vmatpush2.bf16.msra.mxu0 %v21199_v11  ;;  %v21268_v11 = vld [vmem:[#allocation2 + $0x468] ss:$40 sps:$4 sm:$0xff]  }
 0x3e4   :  { %9857 = vmatprep.subr.bf16.mxu0 %v21207_v12  ;;  %v21276_v12 = vld [vmem:[#allocation2 + $0x41c] ss:$40 sps:$4 sm:$0xff]  }
 0x3e5   :  { %9897 = vmatpush2.bf16.msra.mxu1 %v21202_v13  ;;  %v21271_v13 = vld [vmem:[#allocation2 + $0x1810] ss:$40 sps:$4 sm:$0xff]  }
 0x3e6   :  { %9898 = vmatprep.subr.bf16.mxu1 %v21210_v14  ;;  %v21279_v14 = vld [vmem:[#allocation2 + $0x17c4] ss:$40 sps:$4 sm:$0xff]  }
 0x3e7   :  { %9858 = vmatpush2.bf16.msra.mxu0 %v21205_v27  ;;  %v21274_v27 = vld [vmem:[#allocation2 + $0x418] ss:$40 sps:$4 sm:$0xff]  }
 0x3e8   :  { %9909 = vmatprep.subr.bf16.mxu0 %v21213_v37  ;;  %v21282_v37 = vld [vmem:[#allocation2 + $0x3cc] ss:$40 sps:$4 sm:$0xff]  }
 0x3e9   :  { %9899 = vmatpush2.bf16.msra.mxu1 %v21208_v20  ;;  %v21277_v20 = vld [vmem:[#allocation2 + $0x17c0] ss:$40 sps:$4 sm:$0xff]  }
 0x3ea   :  { %9860 = vmatmul.mubr.bf16.vlgmr.msra.gmra.mxu0 %v23881_v15  ;;  %9950 = vmatprep.subr.bf16.mxu1 %v21216_v21  ;;  %v21285_v21 = vld [vmem:[#allocation2 + $0x1774] ss:$40 sps:$4 sm:$0xff]  }
 0x3eb   :  { %9910 = vmatpush1.bf16.msra.mxu0 %v21211_v22  ;;  %9941 = vmatprep.mubr.bf16.mxu0 %v23921_v31  ;;  %v21280_v22 = vld [vmem:[#allocation2 + $0x3c8] ss:$40 sps:$4 sm:$0xff]  }
 0x3ec   :  { %9901 = vmatmul.mubr.bf16.vlgmr.msra.gmra.mxu1 %v23901_v53  ;;  %9911 = vmatprep.subr.bf16.mxu0 %v21219_v23  ;;  %v21288_v23 = vld [vmem:[#allocation2 + $0x37c] ss:$40 sps:$4 sm:$0xff]  }
 0x3ed   :  { %9951 = vmatpush1.bf16.msra.mxu1 %v21214_v46  ;;  %9982 = vmatprep.mubr.bf16.mxu1 %v23825_v39  ;;  %v21283_v46 = vld [vmem:[#allocation2 + $0x1770] ss:$40 sps:$4 sm:$0xff]  }
 0x3ee   :  { %9952 = vmatprep.subr.bf16.mxu1 %v21222_v25  ;;  %v21291_v25 = vld [vmem:[#allocation2 + $0x1724] ss:$40 sps:$4 sm:$0xff]  }
 0x3ef   :  { %9912 = vmatpush1.bf16.msra.mxu0 %v21217_v26  ;;  %v21286_v26 = vld [vmem:[#allocation2 + $0x378] ss:$40 sps:$4 sm:$0xff]  }
 0x3f0   :  { %9913 = vmatprep.subr.bf16.mxu0 %v21225_v28  ;;  %v21294_v28 = vld [vmem:[#allocation2 + $0x32c] ss:$40 sps:$4 sm:$0xff]  }
 0x3f1   :  { %9953 = vmatpush1.bf16.msra.mxu1 %v21220_v58  ;;  %v21289_v58 = vld [vmem:[#allocation2 + $0x1720] ss:$40 sps:$4 sm:$0xff]  }
 0x3f2   :  { %9954 = vmatprep.subr.bf16.mxu1 %v21228_v29  ;;  %v21297_v29 = vld [vmem:[#allocation2 + $0x16d4] ss:$40 sps:$4 sm:$0xff]  }
 0x3f3   :  { %9914 = vmatpush1.bf16.msra.mxu0 %v21223_v32  ;;  %v21292_v32 = vld [vmem:[#allocation2 + $0x328] ss:$40 sps:$4 sm:$0xff]  }
 0x3f4   :  { %9915 = vmatprep.subr.bf16.mxu0 %v21231_v33  ;;  %v21300_v33 = vld [vmem:[#allocation2 + $0x2dc] ss:$40 sps:$4 sm:$0xff]  }
 0x3f5   :  { %9955 = vmatpush1.bf16.msra.mxu1 %v21226_v34  ;;  %v21295_v34 = vld [vmem:[#allocation2 + $0x16d0] ss:$40 sps:$4 sm:$0xff]  }
 0x3f6   :  { %9956 = vmatprep.subr.bf16.mxu1 %v21234_v47  ;;  %v21303_v47 = vld [vmem:[#allocation2 + $0x1684] ss:$40 sps:$4 sm:$0xff]  }
 0x3f7   :  { %9916 = vmatpush1.bf16.msra.mxu0 %v21229_v51  ;;  %v21298_v51 = vld [vmem:[#allocation2 + $0x2d8] ss:$40 sps:$4 sm:$0xff]  }
 0x3f8   :  { %9917 = vmatprep.subr.bf16.mxu0 %v21237_v41  ;;  %v21306_v41 = vld [vmem:[#allocation2 + $0x28c] ss:$40 sps:$4 sm:$0xff]  }
 0x3f9   :  { %9957 = vmatpush1.bf16.msra.mxu1 %v21232_v42  ;;  %v21301_v42 = vld [vmem:[#allocation2 + $0x1680] ss:$40 sps:$4 sm:$0xff]  }
 0x3fa   :  { %9958 = vmatprep.subr.bf16.mxu1 %v21240_v43  ;;  %v21309_v43 = vld [vmem:[#allocation2 + $0x73c] ss:$40 sps:$4 sm:$0xff]  }
 0x3fb   :  { %9918 = vmatpush1.bf16.msra.mxu0 %v21235_v16  ;;  %v21304_v16 = vld [vmem:[#allocation2 + $0x288] ss:$40 sps:$4 sm:$0xff]  }
 0x3fc   :  { %9919 = vmatprep.subr.bf16.mxu0 %v21243_v63  ;;  %v21312_v63 = vld [vmem:[#allocation2 + $0xc3c] ss:$40 sps:$4 sm:$0xff]  }
 0x3fd   :  { %9959 = vmatpush1.bf16.msra.mxu1 %v21238_v17  ;;  %v21307_v17 = vld [vmem:[#allocation2 + $0x738] ss:$40 sps:$4 sm:$0xff]  }
 0x3fe   :  { %9960 = vmatprep.subr.bf16.mxu1 %v21246_v44  ;;  %v21315_v44 = vld [vmem:[#allocation2 + $0x6ec] ss:$40 sps:$4 sm:$0xff]  }
 0x3ff   :  { %9920 = vmatpush1.bf16.msra.mxu0 %v21241_v48  ;;  %v21310_v48 = vld [vmem:[#allocation2 + $0xc38] ss:$40 sps:$4 sm:$0xff]  }
 0x400   :  { %9921 = vmatprep.subr.bf16.mxu0 %v21249_v49  ;;  %v21318_v49 = vld [vmem:[#allocation2 + $0xbec] ss:$40 sps:$4 sm:$0xff]  }
 0x401   :  { %9961 = vmatpush1.bf16.msra.mxu1 %v21244_v50  ;;  %v21313_v50 = vld [vmem:[#allocation2 + $0x6e8] ss:$40 sps:$4 sm:$0xff]  }
 0x402   :  { %9962 = vmatprep.subr.bf16.mxu1 %v21252_v52  ;;  %v21321_v52 = vld [vmem:[#allocation2 + $0x69c] ss:$40 sps:$4 sm:$0xff]  }
 0x403   :  { %9922 = vmatpush1.bf16.msra.mxu0 %v21247_v54  ;;  %v21316_v54 = vld [vmem:[#allocation2 + $0xbe8] ss:$40 sps:$4 sm:$0xff]  }
 0x404   :  { %9923 = vmatprep.subr.bf16.mxu0 %v21255_v57  ;;  %v21324_v57 = vld [vmem:[#allocation2 + $0xb9c] ss:$40 sps:$4 sm:$0xff]  }
 0x405   :  { %9963 = vmatpush1.bf16.msra.mxu1 %v21250_v59  ;;  %v21319_v59 = vld [vmem:[#allocation2 + $0x698] ss:$40 sps:$4 sm:$0xff]  }
 0x406   :  { %9964 = vmatprep.subr.bf16.mxu1 %v21258_v60  ;;  %v21327_v60 = vld [vmem:[#allocation2 + $0x64c] ss:$40 sps:$4 sm:$0xff]  }
 0x407   :  { %9924 = vmatpush1.bf16.msra.mxu0 %v21253_v61  ;;  %v21322_v61 = vld [vmem:[#allocation2 + $0xb98] ss:$40 sps:$4 sm:$0xff]  }
 0x408   :  { %9925 = vmatprep.subr.bf16.mxu0 %v21261_v1  ;;  %v21330_v1 = vld [vmem:[#allocation2 + $0xb4c] ss:$40 sps:$4 sm:$0xff]  }
 0x409   :  { %9965 = vmatpush1.bf16.msra.mxu1 %v21256_v2  ;;  %v21325_v2 = vld [vmem:[#allocation2 + $0x648] ss:$40 sps:$4 sm:$0xff]  }
 0x40a   :  { %9966 = vmatprep.subr.bf16.mxu1 %v21264_v5  ;;  %v21333_v5 = vld [vmem:[#allocation2 + $0x5fc] ss:$40 sps:$4 sm:$0xff]  }
 0x40b   :  { %9926 = vmatpush2.bf16.msra.mxu0 %v21259_v6  ;;  %v21328_v6 = vld [vmem:[#allocation2 + $0xb48] ss:$40 sps:$4 sm:$0xff]  }
 0x40c   :  { %9927 = vmatprep.subr.bf16.mxu0 %v21267_v7  ;;  %v21336_v7 = vld [vmem:[#allocation2 + $0xafc] ss:$40 sps:$4 sm:$0xff]  }
 0x40d   :  { %9967 = vmatpush2.bf16.msra.mxu1 %v21262_v24  ;;  %v21331_v24 = vld [vmem:[#allocation2 + $0x5f8] ss:$40 sps:$4 sm:$0xff]  }
 0x40e   :  { %9968 = vmatprep.subr.bf16.mxu1 %v21270_v8  ;;  %v21339_v8 = vld [vmem:[#allocation2 + $0x5ac] ss:$40 sps:$4 sm:$0xff]  }
 0x40f   :  { %9928 = vmatpush2.bf16.msra.mxu0 %v21265_v9  ;;  %v21334_v9 = vld [vmem:[#allocation2 + $0xaf8] ss:$40 sps:$4 sm:$0xff]  }
 0x410   :  { %9929 = vmatprep.subr.bf16.mxu0 %v21273_v10  ;;  %v21342_v10 = vld [vmem:[#allocation2 + $0xaac] ss:$40 sps:$4 sm:$0xff]  }
 0x411   :  { %9969 = vmatpush2.bf16.msra.mxu1 %v21268_v11  ;;  %v21337_v11 = vld [vmem:[#allocation2 + $0x5a8] ss:$40 sps:$4 sm:$0xff]  }
 0x412   :  { %9970 = vmatprep.subr.bf16.mxu1 %v21276_v12  ;;  %v21345_v12 = vld [vmem:[#allocation2 + $0x55c] ss:$40 sps:$4 sm:$0xff]  }
 0x413   :  { %9930 = vmatpush2.bf16.msra.mxu0 %v21271_v13  ;;  %v21340_v13 = vld [vmem:[#allocation2 + $0xaa8] ss:$40 sps:$4 sm:$0xff]  }
 0x414   :  { %9931 = vmatprep.subr.bf16.mxu0 %v21279_v14  ;;  %v21348_v14 = vld [vmem:[#allocation2 + $0xa5c] ss:$40 sps:$4 sm:$0xff]  }
 0x415   :  { %9971 = vmatpush2.bf16.msra.mxu1 %v21274_v27  ;;  %v21343_v27 = vld [vmem:[#allocation2 + $0x558] ss:$40 sps:$4 sm:$0xff]  }
 0x416   :  { %9972 = vmatprep.subr.bf16.mxu1 %v21282_v37  ;;  %v21351_v37 = vld [vmem:[#allocation2 + $0x50c] ss:$40 sps:$4 sm:$0xff]  }
 0x417   :  { %9932 = vmatpush2.bf16.msra.mxu0 %v21277_v20  ;;  %v21346_v20 = vld [vmem:[#allocation2 + $0xa58] ss:$40 sps:$4 sm:$0xff]  }
 0x418   :  { %9933 = vmatprep.subr.bf16.mxu0 %v21285_v21  ;;  %v21354_v21 = vld [vmem:[#allocation2 + $0xa0c] ss:$40 sps:$4 sm:$0xff]  }
 0x419   :  { %9973 = vmatpush2.bf16.msra.mxu1 %v21280_v22  ;;  %v21349_v22 = vld [vmem:[#allocation2 + $0x508] ss:$40 sps:$4 sm:$0xff]  }
 0x41a   :  { %9974 = vmatprep.subr.bf16.mxu1 %v21288_v23  ;;  %v21357_v23 = vld [vmem:[#allocation2 + $0x9bc] ss:$40 sps:$4 sm:$0xff]  }
 0x41b   :  { %9934 = vmatpush2.bf16.msra.mxu0 %v21283_v46  ;;  %v21352_v46 = vld [vmem:[#allocation2 + $0xa08] ss:$40 sps:$4 sm:$0xff]  }
 0x41c   :  { %9935 = vmatprep.subr.bf16.mxu0 %v21291_v25  ;;  %v21360_v25 = vld [vmem:[#allocation2 + $0xebc] ss:$40 sps:$4 sm:$0xff]  }
 0x41d   :  { %9975 = vmatpush2.bf16.msra.mxu1 %v21286_v26  ;;  %v21355_v26 = vld [vmem:[#allocation2 + $0x9b8] ss:$40 sps:$4 sm:$0xff]  }
 0x41e   :  { %9976 = vmatprep.subr.bf16.mxu1 %v21294_v28  ;;  %v21363_v28 = vld [vmem:[#allocation2 + $0x96c] ss:$40 sps:$4 sm:$0xff]  }
 0x41f   :  { %9936 = vmatpush2.bf16.msra.mxu0 %v21289_v58  ;;  %v21358_v58 = vld [vmem:[#allocation2 + $0xeb8] ss:$40 sps:$4 sm:$0xff]  }
 0x420   :  { %9937 = vmatprep.subr.bf16.mxu0 %v21297_v29  ;;  %v21366_v29 = vld [vmem:[#allocation2 + $0xe6c] ss:$40 sps:$4 sm:$0xff]  }
 0x421   :  { %9977 = vmatpush2.bf16.msra.mxu1 %v21292_v32  ;;  %v21361_v32 = vld [vmem:[#allocation2 + $0x968] ss:$40 sps:$4 sm:$0xff]  }
 0x422   :  { %9978 = vmatprep.subr.bf16.mxu1 %v21300_v33  ;;  %v21369_v33 = vld [vmem:[#allocation2 + $0x91c] ss:$40 sps:$4 sm:$0xff]  }
 0x423   :  { %9938 = vmatpush2.bf16.msra.mxu0 %v21295_v34  ;;  %v21364_v34 = vld [vmem:[#allocation2 + $0xe68] ss:$40 sps:$4 sm:$0xff]  }
 0x424   :  { %9939 = vmatprep.subr.bf16.mxu0 %v21303_v47  ;;  %v21372_v47 = vld [vmem:[#allocation2 + $0xe1c] ss:$40 sps:$4 sm:$0xff]  }
 0x425   :  { %9979 = vmatpush2.bf16.msra.mxu1 %v21298_v51  ;;  %v21367_v51 = vld [vmem:[#allocation2 + $0x918] ss:$40 sps:$4 sm:$0xff]  }
 0x426   :  { %9980 = vmatprep.subr.bf16.mxu1 %v21306_v41  ;;  %v21375_v41 = vld [vmem:[#allocation2 + $0x8cc] ss:$40 sps:$4 sm:$0xff]  }
 0x427   :  { %9940 = vmatpush2.bf16.msra.mxu0 %v21301_v42  ;;  %v21370_v42 = vld [vmem:[#allocation2 + $0xe18] ss:$40 sps:$4 sm:$0xff]  }
 0x428   :  { %9991 = vmatprep.subr.bf16.mxu0 %v21309_v43  ;;  %v21378_v43 = vld [vmem:[#allocation2 + $0xdcc] ss:$40 sps:$4 sm:$0xff]  }
 0x429   :  { %9981 = vmatpush2.bf16.msra.mxu1 %v21304_v16  ;;  %v21373_v16 = vld [vmem:[#allocation2 + $0x8c8] ss:$40 sps:$4 sm:$0xff]  }
 0x42a   :  { %9942 = vmatmul.mubr.bf16.vlgmr.msra.gmra.mxu0 %v23919_v30  ;;  %10032 = vmatprep.subr.bf16.mxu1 %v21312_v63  ;;  %v21381_v63 = vld [vmem:[#allocation2 + $0x87c] ss:$40 sps:$4 sm:$0xff]  }
 0x42b   :  { %9992 = vmatpush1.bf16.msra.mxu0 %v21307_v17  ;;  %10023 = vmatprep.mubr.bf16.mxu0 %v23855_v56  ;;  %v21376_v17 = vld [vmem:[#allocation2 + $0xdc8] ss:$40 sps:$4 sm:$0xff]  }
 0x42c   :  { %9983 = vmatmul.mubr.bf16.vlgmr.msra.gmra.mxu1 %v23823_v38  ;;  %9993 = vmatprep.subr.bf16.mxu0 %v21315_v44  ;;  %v21384_v44 = vld [vmem:[#allocation2 + $0xd7c] ss:$40 sps:$4 sm:$0xff]  }
 0x42d   :  { %10033 = vmatpush1.bf16.msra.mxu1 %v21310_v48  ;;  %10064 = vmatprep.mubr.bf16.mxu1 %v23883_v36  ;;  %v21379_v48 = vld [vmem:[#allocation2 + $0x878] ss:$40 sps:$4 sm:$0xff]  }
 0x42e   :  { %10034 = vmatprep.subr.bf16.mxu1 %v21318_v49  ;;  %v21387_v49 = vld [vmem:[#allocation2 + $0x82c] ss:$40 sps:$4 sm:$0xff]  }
 0x42f   :  { %9994 = vmatpush1.bf16.msra.mxu0 %v21313_v50  ;;  %v21382_v50 = vld [vmem:[#allocation2 + $0xd78] ss:$40 sps:$4 sm:$0xff]  }
 0x430   :  { %9995 = vmatprep.subr.bf16.mxu0 %v21321_v52  ;;  %v21390_v52 = vld [vmem:[#allocation2 + $0xd2c] ss:$40 sps:$4 sm:$0xff]  }
 0x431   :  { %10035 = vmatpush1.bf16.msra.mxu1 %v21316_v54  ;;  %v21385_v54 = vld [vmem:[#allocation2 + $0x828] ss:$40 sps:$4 sm:$0xff]  }
 0x432   :  { %10036 = vmatprep.subr.bf16.mxu1 %v21324_v57  ;;  %v21393_v57 = vld [vmem:[#allocation2 + $0x7dc] ss:$40 sps:$4 sm:$0xff]  }
 0x433   :  { %9996 = vmatpush1.bf16.msra.mxu0 %v21319_v59  ;;  %v21388_v59 = vld [vmem:[#allocation2 + $0xd28] ss:$40 sps:$4 sm:$0xff]  }
 0x434   :  { %9997 = vmatprep.subr.bf16.mxu0 %v21327_v60  ;;  %v21396_v60 = vld [vmem:[#allocation2 + $0xcdc] ss:$40 sps:$4 sm:$0xff]  }
 0x435   :  { %10037 = vmatpush1.bf16.msra.mxu1 %v21322_v61  ;;  %v21391_v61 = vld [vmem:[#allocation2 + $0x7d8] ss:$40 sps:$4 sm:$0xff]  }
 0x436   :  { %10038 = vmatprep.subr.bf16.mxu1 %v21330_v1  ;;  %v21399_v1 = vld [vmem:[#allocation2 + $0x78c] ss:$40 sps:$4 sm:$0xff]  }
 0x437   :  { %9998 = vmatpush1.bf16.msra.mxu0 %v21325_v2  ;;  %v21394_v2 = vld [vmem:[#allocation2 + $0xcd8] ss:$40 sps:$4 sm:$0xff]  }
 0x438   :  { %9999 = vmatprep.subr.bf16.mxu0 %v21333_v5  ;;  %v21397_v5 = vld [vmem:[#allocation2 + $0x788] ss:$40 sps:$4 sm:$0xff]  }
 0x439   :  { %10039 = vmatpush1.bf16.msra.mxu1 %v21328_v6  ;;  %v21402_v6 = vld [vmem:[#allocation2 + $0xc8c] ss:$40 sps:$4 sm:$0xff]  }
 0x43a   :  { %10040 = vmatprep.subr.bf16.mxu1 %v21336_v7  ;;  %v5691_v7 = vld [vmem:[#allocation3] sm:$0xff] }
 0x43b   :  { %10000 = vmatpush1.bf16.msra.mxu0 %v21331_v24  ;;  %v21405_v24 = vld [vmem:[#allocation2 + $0x113c] ss:$40 sps:$4 sm:$0xff]  }
 0x43c   :  { %10001 = vmatprep.subr.bf16.mxu0 %v21339_v8  ;;  %v21400_v8 = vld [vmem:[#allocation2 + $0xc88] ss:$40 sps:$4 sm:$0xff]  }
 0x43d   :  { %10041 = vmatpush1.bf16.msra.mxu1 %v21334_v9  ;;  %v21408_v9 = vld [vmem:[#allocation2 + $0x163c] ss:$40 sps:$4 sm:$0xff]  }
 0x43e   :  { %10042 = vmatprep.subr.bf16.mxu1 %v21342_v10  ;;  %v5698_v10 = vrot.slane %v5691_v7, %v23802_v35 }
 0x43f   :  { %10002 = vmatpush1.bf16.msra.mxu0 %v21337_v11  ;;  %v21403_v11 = vld [vmem:[#allocation2 + $0x1138] ss:$40 sps:$4 sm:$0xff]  }
 0x440   :  { %10003 = vmatprep.subr.bf16.mxu0 %v21345_v12  ;;  %v21411_v12 = vld [vmem:[#allocation2 + $0x10ec] ss:$40 sps:$4 sm:$0xff]  }
 0x441   :  { %10043 = vmatpush1.bf16.msra.mxu1 %v21340_v13  ;;  %v5702_v13 = vrot.slane %v5691_v7, %v23805_v40  ;;  %v21445_v7 = vld [vmem:[#allocation2 + $0xf08] ss:$40 sps:$4 sm:$0xff]  }
 0x442   :  { %10044 = vmatprep.subr.bf16.mxu1 %v21348_v14  ;;  %v21406_v14 = vld [vmem:[#allocation2 + $0x1638] ss:$40 sps:$4 sm:$0xff]  }
 0x443   :  { %10004 = vmatpush1.bf16.msra.mxu0 %v21343_v27 }
 0x444   :  { %10005 = vmatprep.subr.bf16.mxu0 %v21351_v37  ;;  %v21414_v37 = vld [vmem:[#allocation2 + $0x15ec] ss:$40 sps:$4 sm:$0xff]  }
 0x445   :  { %10045 = vmatpush1.bf16.msra.mxu1 %v21346_v20 }
 0x446   :  { %10046 = vmatprep.subr.bf16.mxu1 %v21354_v21  ;;  %v21409_v21 = vld [vmem:[#allocation2 + $0x10e8] ss:$40 sps:$4 sm:$0xff]  }
 0x447   :  { %10006 = vmatpush1.bf16.msra.mxu0 %v21349_v22 }
 0x448   :  { %10007 = vmatprep.subr.bf16.mxu0 %v21357_v23 }
 0x449   :  { %10047 = vmatpush1.bf16.msra.mxu1 %v21352_v46  ;;  %v21417_v46 = vld [vmem:[#allocation2 + $0x109c] ss:$40 sps:$4 sm:$0xff]  }
 0x44a   :  { %10048 = vmatprep.subr.bf16.mxu1 %v21360_v25 }
 0x44b   :  { %10008 = vmatpush2.bf16.msra.mxu0 %v21355_v26 }
 0x44c   :  { %10009 = vmatprep.subr.bf16.mxu0 %v21363_v28  ;;  %v21412_v28 = vld [vmem:[#allocation2 + $0x15e8] ss:$40 sps:$4 sm:$0xff]  }
 0x44d   :  { %10049 = vmatpush2.bf16.msra.mxu1 %v21358_v58 }
 0x44e   :  { %10050 = vmatprep.subr.bf16.mxu1 %v21366_v29 }
 0x44f   :  { %10010 = vmatpush2.bf16.msra.mxu0 %v21361_v32  ;;  %v21420_v32 = vld [vmem:[#allocation2 + $0x159c] ss:$40 sps:$4 sm:$0xff]  }
 0x450   :  { %10011 = vmatprep.subr.bf16.mxu0 %v21369_v33 }
 0x451   :  { %10051 = vmatpush2.bf16.msra.mxu1 %v21364_v34  ;;  %v21415_v34 = vld [vmem:[#allocation2 + $0x1098] ss:$40 sps:$4 sm:$0xff]  }
 0x452   :  { %10052 = vmatprep.subr.bf16.mxu1 %v21372_v47 }
 0x453   :  { %10012 = vmatpush2.bf16.msra.mxu0 %v21367_v51  ;;  %v21423_v51 = vld [vmem:[#allocation2 + $0x104c] ss:$40 sps:$4 sm:$0xff]  }
 0x454   :  { %10013 = vmatprep.subr.bf16.mxu0 %v21375_v41 }
 0x455   :  { %10053 = vmatpush2.bf16.msra.mxu1 %v21370_v42  ;;  %v21418_v42 = vld [vmem:[#allocation2 + $0x1598] ss:$40 sps:$4 sm:$0xff]  }
 0x456   :  { %10054 = vmatprep.subr.bf16.mxu1 %v21378_v43  ;;  %v21426_v43 = vld [vmem:[#allocation2 + $0x154c] ss:$40 sps:$4 sm:$0xff]  }
 0x457   :  { %10014 = vmatpush2.bf16.msra.mxu0 %v21373_v16 }
 0x458   :  { %10015 = vmatprep.subr.bf16.mxu0 %v21381_v63  ;;  %v21421_v63 = vld [vmem:[#allocation2 + $0x1048] ss:$40 sps:$4 sm:$0xff]  }
 0x459   :  { %10055 = vmatpush2.bf16.msra.mxu1 %v21376_v17  ;;  %v21429_v17 = vld [vmem:[#allocation2 + $0xffc] ss:$40 sps:$4 sm:$0xff]  }
 0x45a   :  { %10056 = vmatprep.subr.bf16.mxu1 %v21384_v44  ;;  %v21424_v44 = vld [vmem:[#allocation2 + $0x1548] ss:$40 sps:$4 sm:$0xff]  }
 0x45b   :  { %10016 = vmatpush2.bf16.msra.mxu0 %v21379_v48  ;;  %v21432_v48 = vld [vmem:[#allocation2 + $0x14fc] ss:$40 sps:$4 sm:$0xff]  }
 0x45c   :  { %10017 = vmatprep.subr.bf16.mxu0 %v21387_v49  ;;  %v21427_v49 = vld [vmem:[#allocation2 + $0xff8] ss:$40 sps:$4 sm:$0xff]  }
 0x45d   :  { %10057 = vmatpush2.bf16.msra.mxu1 %v21382_v50  ;;  %v21435_v50 = vld [vmem:[#allocation2 + $0xfac] ss:$40 sps:$4 sm:$0xff]  }
 0x45e   :  { %10058 = vmatprep.subr.bf16.mxu1 %v21390_v52  ;;  %v21430_v52 = vld [vmem:[#allocation2 + $0x14f8] ss:$40 sps:$4 sm:$0xff]  }
 0x45f   :  { %10018 = vmatpush2.bf16.msra.mxu0 %v21385_v54  ;;  %v21438_v54 = vld [vmem:[#allocation2 + $0x14ac] ss:$40 sps:$4 sm:$0xff]  }
 0x460   :  { %10019 = vmatprep.subr.bf16.mxu0 %v21393_v57  ;;  %v21433_v57 = vld [vmem:[#allocation2 + $0xfa8] ss:$40 sps:$4 sm:$0xff]  }
 0x461   :  { %10059 = vmatpush2.bf16.msra.mxu1 %v21388_v59  ;;  %v21441_v59 = vld [vmem:[#allocation2 + $0xf5c] ss:$40 sps:$4 sm:$0xff]  }
 0x462   :  { %10060 = vmatprep.subr.bf16.mxu1 %v21396_v60  ;;  %v21436_v60 = vld [vmem:[#allocation2 + $0x14a8] ss:$40 sps:$4 sm:$0xff]  }
 0x463   :  { %10020 = vmatpush2.bf16.msra.mxu0 %v21391_v61  ;;  %v21444_v61 = vld [vmem:[#allocation2 + $0x145c] ss:$40 sps:$4 sm:$0xff]  }
 0x464   :  { %10021 = vmatprep.subr.bf16.mxu0 %v21399_v1  ;;  %v21439_v1 = vld [vmem:[#allocation2 + $0xf58] ss:$40 sps:$4 sm:$0xff]  }
 0x465   :  { %10061 = vmatpush2.bf16.msra.mxu1 %v21394_v2  ;;  %v21447_v2 = vld [vmem:[#allocation2 + $0xf0c] ss:$40 sps:$4 sm:$0xff]  }
 0x466   :  { %10062 = vmatprep.subr.bf16.mxu1 %v21402_v6  ;;  %v21450_v6 = vld [vmem:[#allocation2 + $0x140c] ss:$40 sps:$4 sm:$0xff]  }
 0x467   :  { %10022 = vmatpush2.bf16.msra.mxu0 %v21397_v5  ;;  %v21442_v5 = vld [vmem:[#allocation2 + $0x1458] ss:$40 sps:$4 sm:$0xff]  }
 0x468   :  { %10073 = vmatprep.subr.bf16.mxu0 %v21405_v24  ;;  %v21453_v24 = vld [vmem:[#allocation2 + $0x13bc] ss:$40 sps:$4 sm:$0xff]  }
 0x469   :  { %10063 = vmatpush2.bf16.msra.mxu1 %v21400_v8  ;;  %v21448_v8 = vld [vmem:[#allocation2 + $0x1408] ss:$40 sps:$4 sm:$0xff]  }
 0x46a   :  { %v9779_v27 = vpop.f32.mrf.mxu0  ;;  %10024 = vmatmul.mubr.bf16.vlgmr.msra.gmra.mxu0 %v23853_v55  ;;  %10114 = vmatprep.subr.bf16.mxu1 %v21408_v9  ;;  %v21456_v9 = vld [vmem:[#allocation2 + $0x18bc] ss:$40 sps:$4 sm:$0xff]  }
 0x46b   :  { %v9780_v20 = vadd.f32 %v9779_v27, %v5698_v10  ;;  %10074 = vmatpush1.bf16.msra.mxu0 %v21403_v11  ;;  %10105 = vmatprep.mubr.bf16.mxu0 %v23903_v4  ;;  %v21451_v10 = vld [vmem:[#allocation2 + $0x13b8] ss:$40 sps:$4 sm:$0xff]   ;;  %v21459_v11 = vld [vmem:[#allocation2 + $0x136c] ss:$40 sps:$4 sm:$0xff]   ;;  %v21465_v27 = vld [vmem:[#allocation2 + $0x131c] ss:$40 sps:$4 sm:$0xff]  }
 0x46c   :  { %v9781_v22 = vpop.f32.mrf.mxu0  ;;  %v9820_v23 = vpop.f32.mrf.mxu1  ;;  %10065 = vmatmul.mubr.bf16.vlgmr.msra.gmra.mxu1 %v23881_v15  ;;  %10075 = vmatprep.subr.bf16.mxu0 %v21411_v12  ;;  %v21454_v12 = vld [vmem:[#allocation2 + $0x18b8] ss:$40 sps:$4 sm:$0xff]  }
 0x46d   :  { %v9782_v25 = vadd.f32 %v9781_v22, %v5702_v13  ;;  %v23942_v26 = vadd.f32 %v9820_v23, %v9780_v20  ;;  %10115 = vmatpush1.bf16.msra.mxu1 %v21406_v14  ;;  %10146 = vmatprep.mubr.bf16.mxu1 %v23921_v31  ;;  %v21462_v13 = vld [vmem:[#allocation2 + $0x186c] ss:$40 sps:$4 sm:$0xff]   ;;  %v21457_v14 = vld [vmem:[#allocation2 + $0x1368] ss:$40 sps:$4 sm:$0xff]   ;;  %v21468_v20 = vld [vmem:[#allocation2 + $0x181c] ss:$40 sps:$4 sm:$0xff]  }
 0x46e   :  { %v9783_v58 = vpop.f32.mrf.mxu0  ;;  %v9822_v29 = vpop.f32.mrf.mxu1  ;;  %10116 = vmatprep.subr.bf16.mxu1 %v21414_v37  ;;  %v21460_v37 = vld [vmem:[#allocation2 + $0x1868] ss:$40 sps:$4 sm:$0xff]   ;;  %v21471_v22 = vld [vmem:[#allocation2 + $0x12cc] ss:$40 sps:$4 sm:$0xff]   ;;  %v21466_v23 = vld [vmem:[#allocation2 + $0x1818] ss:$40 sps:$4 sm:$0xff]  }
 0x46f   :  { %v23945_v33 = vadd.f32 %v9822_v29, %v9782_v25  ;;  %10076 = vmatpush1.bf16.msra.mxu0 %v21409_v21  ;;  %v21463_v21 = vld [vmem:[#allocation2 + $0x1318] ss:$40 sps:$4 sm:$0xff]   ;;  %v21469_v25 = vld [vmem:[#allocation2 + $0x12c8] ss:$40 sps:$4 sm:$0xff]   ;;  %v21480_v29 = vld [vmem:[#allocation2 + $0x177c] ss:$40 sps:$4 sm:$0xff]  }
 0x470   :  { %v9784_v47 = vpop.f32.mrf.mxu0  ;;  %10077 = vmatprep.subr.bf16.mxu0 %v21417_v46  ;;  %v9824_v41 = vpop.f32.mrf.mxu1  ;;  %v21474_v46 = vld [vmem:[#allocation2 + $0x17cc] ss:$40 sps:$4 sm:$0xff]   ;;  %v21472_v58 = vld [vmem:[#allocation2 + $0x17c8] ss:$40 sps:$4 sm:$0xff]  }
 0x471   :  { %10117 = vmatpush1.bf16.msra.mxu1 %v21412_v28  ;;  %v21477_v28 = vld [vmem:[#allocation2 + $0x127c] ss:$40 sps:$4 sm:$0xff]   ;;  %v21478_v47 = vld [vmem:[#allocation2 + $0x1778] ss:$40 sps:$4 sm:$0xff]   ;;  %v21481_v41 = vld [vmem:[#allocation2 + $0x1228] ss:$40 sps:$4 sm:$0xff]  }
 0x472   :  { %10118 = vmatprep.subr.bf16.mxu1 %v21420_v32  ;;  %v9825_v16 = vpop.f32.mrf.mxu1  ;;  %v21475_v32 = vld [vmem:[#allocation2 + $0x1278] ss:$40 sps:$4 sm:$0xff]  }
 0x473   :  { %10078 = vmatpush1.bf16.msra.mxu0 %v21415_v34  ;;  %v21483_v34 = vld [vmem:[#allocation2 + $0x122c] ss:$40 sps:$4 sm:$0xff]   ;;  %v21492_v16 = vld [vmem:[#allocation2 + $0x16dc] ss:$40 sps:$4 sm:$0xff]  }
 0x474   :  { %10079 = vmatprep.subr.bf16.mxu0 %v21423_v51  ;;  %v21486_v51 = vld [vmem:[#allocation2 + $0x172c] ss:$40 sps:$4 sm:$0xff]  }
 0x475   :  { %10119 = vmatpush1.bf16.msra.mxu1 %v21418_v42  ;;  %v21489_v42 = vld [vmem:[#allocation2 + $0x11dc] ss:$40 sps:$4 sm:$0xff]  }
 0x476   :  { %10120 = vmatprep.subr.bf16.mxu1 %v21426_v43  ;;  %v21484_v43 = vld [vmem:[#allocation2 + $0x1728] ss:$40 sps:$4 sm:$0xff]  }
 0x477   :  { %10080 = vmatpush1.bf16.msra.mxu0 %v21421_v63  ;;  %v21487_v63 = vld [vmem:[#allocation2 + $0x11d8] ss:$40 sps:$4 sm:$0xff]  }
 0x478   :  { %10081 = vmatprep.subr.bf16.mxu0 %v21429_v17  ;;  %v21495_v17 = vld [vmem:[#allocation2 + $0x118c] ss:$40 sps:$4 sm:$0xff]  }
 0x479   :  { %10121 = vmatpush1.bf16.msra.mxu1 %v21424_v44  ;;  %v21490_v44 = vld [vmem:[#allocation2 + $0x16d8] ss:$40 sps:$4 sm:$0xff]  }
 0x47a   :  { %10122 = vmatprep.subr.bf16.mxu1 %v21432_v48  ;;  %v21498_v48 = vld [vmem:[#allocation2 + $0x168c] ss:$40 sps:$4 sm:$0xff]  }
 0x47b   :  { %10082 = vmatpush1.bf16.msra.mxu0 %v21427_v49  ;;  %v21493_v49 = vld [vmem:[#allocation2 + $0x1188] ss:$40 sps:$4 sm:$0xff]  }
 0x47c   :  { %10083 = vmatprep.subr.bf16.mxu0 %v21435_v50  ;;  %v21501_v50 = vld [vmem:[#allocation2 + $0x244] ss:$40 sps:$4 sm:$0xff]  }
 0x47d   :  { %10123 = vmatpush1.bf16.msra.mxu1 %v21430_v52  ;;  %v21496_v52 = vld [vmem:[#allocation2 + $0x1688] ss:$40 sps:$4 sm:$0xff]  }
 0x47e   :  { %10124 = vmatprep.subr.bf16.mxu1 %v21438_v54  ;;  %v21504_v54 = vld [vmem:[#allocation2 + $0x744] ss:$40 sps:$4 sm:$0xff]  }
 0x47f   :  { %10084 = vmatpush1.bf16.msra.mxu0 %v21433_v57  ;;  %v21499_v57 = vld [vmem:[#allocation2 + $0x240] ss:$40 sps:$4 sm:$0xff]  }
 0x480   :  { %10085 = vmatprep.subr.bf16.mxu0 %v21441_v59  ;;  %v21507_v59 = vld [vmem:[#allocation2 + $0x1f4] ss:$40 sps:$4 sm:$0xff]  }
 0x481   :  { %10125 = vmatpush1.bf16.msra.mxu1 %v21436_v60  ;;  %v21502_v60 = vld [vmem:[#allocation2 + $0x740] ss:$40 sps:$4 sm:$0xff]  }
 0x482   :  { %10126 = vmatprep.subr.bf16.mxu1 %v21444_v61 }
 0x483   :  { %10086 = vmatpush1.bf16.msra.mxu0 %v21439_v1  ;;  %v21510_v1 = vld [vmem:[#allocation2 + $0x6f4] ss:$40 sps:$4 sm:$0xff]  }
 0x484   :  { %10087 = vmatprep.subr.bf16.mxu0 %v21447_v2 }
 0x485   :  { %10127 = vmatpush1.bf16.msra.mxu1 %v21442_v5  ;;  %v21505_v5 = vld [vmem:[#allocation2 + $0x1f0] ss:$40 sps:$4 sm:$0xff]  }
 0x486   :  { %10128 = vmatprep.subr.bf16.mxu1 %v21450_v6 }
 0x487   :  { %10088 = vmatpush1.bf16.msra.mxu0 %v21445_v7 }
 0x488   :  { %10089 = vmatprep.subr.bf16.mxu0 %v21453_v24  ;;  %v21513_v24 = vld [vmem:[#allocation2 + $0x1a4] ss:$40 sps:$4 sm:$0xff]  }
 0x489   :  { %10129 = vmatpush1.bf16.msra.mxu1 %v21448_v8 }
 0x48a   :  { %10130 = vmatprep.subr.bf16.mxu1 %v21456_v9 }
 0x48b   :  { %10090 = vmatpush2.bf16.msra.mxu0 %v21451_v10  ;;  %v21508_v10 = vld [vmem:[#allocation2 + $0x6f0] ss:$40 sps:$4 sm:$0xff]  }
 0x48c   :  { %10091 = vmatprep.subr.bf16.mxu0 %v21459_v11 }
 0x48d   :  { %10131 = vmatpush2.bf16.msra.mxu1 %v21454_v12  ;;  %v21516_v12 = vld [vmem:[#allocation2 + $0x6a4] ss:$40 sps:$4 sm:$0xff]  }
 0x48e   :  { %10132 = vmatprep.subr.bf16.mxu1 %v21462_v13 }
 0x48f   :  { %10092 = vmatpush2.bf16.msra.mxu0 %v21457_v14  ;;  %v21511_v14 = vld [vmem:[#allocation2 + $0x1a0] ss:$40 sps:$4 sm:$0xff]  }
 0x490   :  { %10093 = vmatprep.subr.bf16.mxu0 %v21465_v27 }
 0x491   :  { %10133 = vmatpush2.bf16.msra.mxu1 %v21460_v37  ;;  %v21519_v37 = vld [vmem:[#allocation2 + $0x154] ss:$40 sps:$4 sm:$0xff]  }
 0x492   :  { %10134 = vmatprep.subr.bf16.mxu1 %v21468_v20 }
 0x493   :  { %10094 = vmatpush2.bf16.msra.mxu0 %v21463_v21  ;;  %v21522_v21 = vld [vmem:[#allocation2 + $0x654] ss:$40 sps:$4 sm:$0xff]  }
 0x494   :  { %10095 = vmatprep.subr.bf16.mxu0 %v21471_v22 }
 0x495   :  { %10135 = vmatpush2.bf16.msra.mxu1 %v21466_v23  ;;  %v21517_v23 = vld [vmem:[#allocation2 + $0x150] ss:$40 sps:$4 sm:$0xff]  }
 0x496   :  { %10136 = vmatprep.subr.bf16.mxu1 %v21474_v46  ;;  %v21525_v46 = vld [vmem:[#allocation2 + $0x104] ss:$40 sps:$4 sm:$0xff]  }
 0x497   :  { %10096 = vmatpush2.bf16.msra.mxu0 %v21469_v25  ;;  %v21520_v25 = vld [vmem:[#allocation2 + $0x650] ss:$40 sps:$4 sm:$0xff]  }
 0x498   :  { %10097 = vmatprep.subr.bf16.mxu0 %v21477_v28  ;;  %v21528_v28 = vld [vmem:[#allocation2 + $0x604] ss:$40 sps:$4 sm:$0xff]  }
 0x499   :  { %10137 = vmatpush2.bf16.msra.mxu1 %v21472_v58  ;;  %v21523_v58 = vld [vmem:[#allocation2 + $0x100] ss:$40 sps:$4 sm:$0xff]  }
 0x49a   :  { %10138 = vmatprep.subr.bf16.mxu1 %v21480_v29  ;;  %v21531_v29 = vld [vmem:[#allocation2 + $0xb4] ss:$40 sps:$4 sm:$0xff]  }
 0x49b   :  { %10098 = vmatpush2.bf16.msra.mxu0 %v21475_v32  ;;  %v21526_v32 = vld [vmem:[#allocation2 + $0x600] ss:$40 sps:$4 sm:$0xff]  }
 0x49c   :  { %10099 = vmatprep.subr.bf16.mxu0 %v21483_v34  ;;  %v21534_v34 = vld [vmem:[#allocation2 + $0x5b4] ss:$40 sps:$4 sm:$0xff]  }
 0x49d   :  { %10139 = vmatpush2.bf16.msra.mxu1 %v21478_v47  ;;  %v21529_v47 = vld [vmem:[#allocation2 + $0xb0] ss:$40 sps:$4 sm:$0xff]  }
 0x49e   :  { %10140 = vmatprep.subr.bf16.mxu1 %v21486_v51  ;;  %v21537_v51 = vld [vmem:[#allocation2 + $0x64] ss:$40 sps:$4 sm:$0xff]  }
 0x49f   :  { %10100 = vmatpush2.bf16.msra.mxu0 %v21481_v41  ;;  %v21532_v41 = vld [vmem:[#allocation2 + $0x5b0] ss:$40 sps:$4 sm:$0xff]  }
 0x4a0   :  { %10101 = vmatprep.subr.bf16.mxu0 %v21489_v42  ;;  %v21540_v42 = vld [vmem:[#allocation2 + $0x564] ss:$40 sps:$4 sm:$0xff]  }
 0x4a1   :  { %10141 = vmatpush2.bf16.msra.mxu1 %v21484_v43  ;;  %v21535_v43 = vld [vmem:[#allocation2 + $0x60] ss:$40 sps:$4 sm:$0xff]  }
 0x4a2   :  { %10142 = vmatprep.subr.bf16.mxu1 %v21492_v16  ;;  %v21543_v16 = vld [vmem:[#allocation2 + $0x14] ss:$40 sps:$4 sm:$0xff]  }
 0x4a3   :  { %10102 = vmatpush2.bf16.msra.mxu0 %v21487_v63  ;;  %v21538_v63 = vld [vmem:[#allocation2 + $0x560] ss:$40 sps:$4 sm:$0xff]  }
 0x4a4   :  { %10103 = vmatprep.subr.bf16.mxu0 %v21495_v17  ;;  %v21546_v17 = vld [vmem:[#allocation2 + $0x514] ss:$40 sps:$4 sm:$0xff]  }
 0x4a5   :  { %10143 = vmatpush2.bf16.msra.mxu1 %v21490_v44  ;;  %v21541_v44 = vld [vmem:[#allocation2 + $0x10] ss:$40 sps:$4 sm:$0xff]  }
 0x4a6   :  { %10144 = vmatprep.subr.bf16.mxu1 %v21498_v48  ;;  %v21549_v48 = vld [vmem:[#allocation2 + $0x4c4] ss:$40 sps:$4 sm:$0xff]  }
 0x4a7   :  { %10104 = vmatpush2.bf16.msra.mxu0 %v21493_v49  ;;  %v21544_v49 = vld [vmem:[#allocation2 + $0x510] ss:$40 sps:$4 sm:$0xff]  }
 0x4a8   :  { %10155 = vmatprep.subr.bf16.mxu0 %v21501_v50  ;;  %v21552_v50 = vld [vmem:[#allocation2 + $0x9c4] ss:$40 sps:$4 sm:$0xff]  }
 0x4a9   :  { %10145 = vmatpush2.bf16.msra.mxu1 %v21496_v52  ;;  %v21547_v52 = vld [vmem:[#allocation2 + $0x4c0] ss:$40 sps:$4 sm:$0xff]  }
 0x4aa   :  { %v9861_v61 = vpop.f32.mrf.mxu0  ;;  %10106 = vmatmul.mubr.bf16.vlgmr.msra.gmra.mxu0 %v23901_v53  ;;  %10196 = vmatprep.subr.bf16.mxu1 %v21504_v54  ;;  %v21555_v54 = vld [vmem:[#allocation2 + $0x474] ss:$40 sps:$4 sm:$0xff]  }
 0x4ab   :  { %v9862_v2 = vadd.f32 %v9861_v61, %v23942_v26  ;;  %10156 = vmatpush1.bf16.msra.mxu0 %v21499_v57  ;;  %10187 = vmatprep.mubr.bf16.mxu0 %v23825_v39  ;;  %v21550_v57 = vld [vmem:[#allocation2 + $0x9c0] ss:$40 sps:$4 sm:$0xff]   ;;  %v21561_v61 = vld [vmem:[#allocation2 + $0x424] ss:$40 sps:$4 sm:$0xff]  }
 0x4ac   :  { %v9863_v6 = vpop.f32.mrf.mxu0  ;;  %v9902_v7 = vpop.f32.mrf.mxu1  ;;  %10147 = vmatmul.mubr.bf16.vlgmr.msra.gmra.mxu1 %v23919_v30  ;;  %10157 = vmatprep.subr.bf16.mxu0 %v21507_v59  ;;  %v21558_v59 = vld [vmem:[#allocation2 + $0x974] ss:$40 sps:$4 sm:$0xff]  }
 0x4ad   :  { %v9864_v8 = vadd.f32 %v9863_v6, %v23945_v33  ;;  %v23952_v9 = vadd.f32 %v9902_v7, %v9862_v2  ;;  %10197 = vmatpush1.bf16.msra.mxu1 %v21502_v60  ;;  %10228 = vmatprep.mubr.bf16.mxu1 %v23855_v56  ;;  %v21514_v33 = vld [vmem:[#allocation2 + $0x6a0] ss:$40 sps:$4 sm:$0xff]   ;;  %v21553_v60 = vld [vmem:[#allocation2 + $0x470] ss:$40 sps:$4 sm:$0xff]   ;;  %v21564_v2 = vld [vmem:[#allocation2 + $0x924] ss:$40 sps:$4 sm:$0xff]  }
 0x4ae   :  { %v9865_v11 = vpop.f32.mrf.mxu0  ;;  %v9904_v26 = vpop.f32.mrf.mxu1  ;;  %10198 = vmatprep.subr.bf16.mxu1 %v21510_v1  ;;  %v21556_v1 = vld [vmem:[#allocation2 + $0x970] ss:$40 sps:$4 sm:$0xff]   ;;  %v21567_v6 = vld [vmem:[#allocation2 + $0x3d4] ss:$40 sps:$4 sm:$0xff]   ;;  %v21562_v7 = vld [vmem:[#allocation2 + $0x920] ss:$40 sps:$4 sm:$0xff]  }
 0x4af   :  { %v23955_v13 = vadd.f32 %v9904_v26, %v9864_v8  ;;  %10158 = vmatpush1.bf16.msra.mxu0 %v21505_v5  ;;  %v21559_v5 = vld [vmem:[#allocation2 + $0x420] ss:$40 sps:$4 sm:$0xff]   ;;  %v21565_v8 = vld [vmem:[#allocation2 + $0x3d0] ss:$40 sps:$4 sm:$0xff]   ;;  %v21576_v26 = vld [vmem:[#allocation2 + $0x884] ss:$40 sps:$4 sm:$0xff]  }
 0x4b0   :  { %v9866_v27 = vpop.f32.mrf.mxu0  ;;  %10159 = vmatprep.subr.bf16.mxu0 %v21513_v24  ;;  %v9906_v20 = vpop.f32.mrf.mxu1  ;;  %v21570_v24 = vld [vmem:[#allocation2 + $0x8d4] ss:$40 sps:$4 sm:$0xff]   ;;  %v21568_v11 = vld [vmem:[#allocation2 + $0x8d0] ss:$40 sps:$4 sm:$0xff]  }
 0x4b1   :  { %10199 = vmatpush1.bf16.msra.mxu1 %v21508_v10  ;;  %v21573_v10 = vld [vmem:[#allocation2 + $0x384] ss:$40 sps:$4 sm:$0xff]   ;;  %v21574_v27 = vld [vmem:[#allocation2 + $0x880] ss:$40 sps:$4 sm:$0xff]   ;;  %v21577_v20 = vld [vmem:[#allocation2 + $0x330] ss:$40 sps:$4 sm:$0xff]  }
 0x4b2   :  { %10200 = vmatprep.subr.bf16.mxu1 %v21516_v12  ;;  %v9907_v22 = vpop.f32.mrf.mxu1  ;;  %v21571_v12 = vld [vmem:[#allocation2 + $0x380] ss:$40 sps:$4 sm:$0xff]  }
 0x4b3   :  { %10160 = vmatpush1.bf16.msra.mxu0 %v21511_v14  ;;  %v21579_v14 = vld [vmem:[#allocation2 + $0x334] ss:$40 sps:$4 sm:$0xff]   ;;  %v21588_v22 = vld [vmem:[#allocation2 + $0x7e4] ss:$40 sps:$4 sm:$0xff]  }
 0x4b4   :  { %10161 = vmatprep.subr.bf16.mxu0 %v21519_v37  ;;  %v21582_v37 = vld [vmem:[#allocation2 + $0x834] ss:$40 sps:$4 sm:$0xff]  }
 0x4b5   :  { %10201 = vmatpush1.bf16.msra.mxu1 %v21514_v33  ;;  %v21585_v33 = vld [vmem:[#allocation2 + $0x2e4] ss:$40 sps:$4 sm:$0xff]  }
 0x4b6   :  { %10202 = vmatprep.subr.bf16.mxu1 %v21522_v21  ;;  %v21580_v21 = vld [vmem:[#allocation2 + $0x830] ss:$40 sps:$4 sm:$0xff]  }
 0x4b7   :  { %10162 = vmatpush1.bf16.msra.mxu0 %v21517_v23  ;;  %v21583_v23 = vld [vmem:[#allocation2 + $0x2e0] ss:$40 sps:$4 sm:$0xff]  }
 0x4b8   :  { %10163 = vmatprep.subr.bf16.mxu0 %v21525_v46  ;;  %v21591_v46 = vld [vmem:[#allocation2 + $0x294] ss:$40 sps:$4 sm:$0xff]  }
 0x4b9   :  { %10203 = vmatpush1.bf16.msra.mxu1 %v21520_v25  ;;  %v21586_v25 = vld [vmem:[#allocation2 + $0x7e0] ss:$40 sps:$4 sm:$0xff]  }
 0x4ba   :  { %10204 = vmatprep.subr.bf16.mxu1 %v21528_v28  ;;  %v21594_v28 = vld [vmem:[#allocation2 + $0x794] ss:$40 sps:$4 sm:$0xff]  }
 0x4bb   :  { %10164 = vmatpush1.bf16.msra.mxu0 %v21523_v58  ;;  %v21589_v58 = vld [vmem:[#allocation2 + $0x290] ss:$40 sps:$4 sm:$0xff]  }
 0x4bc   :  { %10165 = vmatprep.subr.bf16.mxu0 %v21531_v29  ;;  %v21597_v29 = vld [vmem:[#allocation2 + $0xc44] ss:$40 sps:$4 sm:$0xff]  }
 0x4bd   :  { %10205 = vmatpush1.bf16.msra.mxu1 %v21526_v32  ;;  %v21592_v32 = vld [vmem:[#allocation2 + $0x790] ss:$40 sps:$4 sm:$0xff]  }
 0x4be   :  { %10206 = vmatprep.subr.bf16.mxu1 %v21534_v34  ;;  %v21600_v34 = vld [vmem:[#allocation2 + $0x1144] ss:$40 sps:$4 sm:$0xff]  }
 0x4bf   :  { %10166 = vmatpush1.bf16.msra.mxu0 %v21529_v47  ;;  %v21595_v47 = vld [vmem:[#allocation2 + $0xc40] ss:$40 sps:$4 sm:$0xff]  }
 0x4c0   :  { %10167 = vmatprep.subr.bf16.mxu0 %v21537_v51  ;;  %v21603_v51 = vld [vmem:[#allocation2 + $0xbf4] ss:$40 sps:$4 sm:$0xff]  }
 0x4c1   :  { %10207 = vmatpush1.bf16.msra.mxu1 %v21532_v41  ;;  %v21598_v41 = vld [vmem:[#allocation2 + $0x1140] ss:$40 sps:$4 sm:$0xff]  }
 0x4c2   :  { %10208 = vmatprep.subr.bf16.mxu1 %v21540_v42 }
 0x4c3   :  { %10168 = vmatpush1.bf16.msra.mxu0 %v21535_v43  ;;  %v21606_v43 = vld [vmem:[#allocation2 + $0x10f4] ss:$40 sps:$4 sm:$0xff]  }
 0x4c4   :  { %10169 = vmatprep.subr.bf16.mxu0 %v21543_v16 }
 0x4c5   :  { %10209 = vmatpush1.bf16.msra.mxu1 %v21538_v63  ;;  %v21601_v63 = vld [vmem:[#allocation2 + $0xbf0] ss:$40 sps:$4 sm:$0xff]  }
 0x4c6   :  { %10210 = vmatprep.subr.bf16.mxu1 %v21546_v17 }
 0x4c7   :  { %10170 = vmatpush1.bf16.msra.mxu0 %v21541_v44  ;;  %v21609_v44 = vld [vmem:[#allocation2 + $0xba4] ss:$40 sps:$4 sm:$0xff]  }
 0x4c8   :  { %10171 = vmatprep.subr.bf16.mxu0 %v21549_v48 }
 0x4c9   :  { %10211 = vmatpush1.bf16.msra.mxu1 %v21544_v49 }
 0x4ca   :  { %10212 = vmatprep.subr.bf16.mxu1 %v21552_v50 }
 0x4cb   :  { %10172 = vmatpush2.bf16.msra.mxu0 %v21547_v52  ;;  %v21604_v52 = vld [vmem:[#allocation2 + $0x10f0] ss:$40 sps:$4 sm:$0xff]  }
 0x4cc   :  { %10173 = vmatprep.subr.bf16.mxu0 %v21555_v54 }
 0x4cd   :  { %10213 = vmatpush2.bf16.msra.mxu1 %v21550_v57 }
 0x4ce   :  { %10214 = vmatprep.subr.bf16.mxu1 %v21558_v59 }
 0x4cf   :  { %10174 = vmatpush2.bf16.msra.mxu0 %v21553_v60 }
 0x4d0   :  { %10175 = vmatprep.subr.bf16.mxu0 %v21561_v61  ;;  %v21607_v61 = vld [vmem:[#allocation2 + $0xba0] ss:$40 sps:$4 sm:$0xff]  }
 0x4d1   :  { %10215 = vmatpush2.bf16.msra.mxu1 %v21556_v1 }
 0x4d2   :  { %10216 = vmatprep.subr.bf16.mxu1 %v21564_v2  ;;  %v21615_v2 = vld [vmem:[#allocation2 + $0xb54] ss:$40 sps:$4 sm:$0xff]  }
 0x4d3   :  { %10176 = vmatpush2.bf16.msra.mxu0 %v21559_v5 }
 0x4d4   :  { %10177 = vmatprep.subr.bf16.mxu0 %v21567_v6 }
 0x4d5   :  { %10217 = vmatpush2.bf16.msra.mxu1 %v21562_v7  ;;  %v21618_v7 = vld [vmem:[#allocation2 + $0x1054] ss:$40 sps:$4 sm:$0xff]  }
 0x4d6   :  { %10218 = vmatprep.subr.bf16.mxu1 %v21570_v24 }
 0x4d7   :  { %10178 = vmatpush2.bf16.msra.mxu0 %v21565_v8  ;;  %v21613_v8 = vld [vmem:[#allocation2 + $0xb50] ss:$40 sps:$4 sm:$0xff]  }
 0x4d8   :  { %10179 = vmatprep.subr.bf16.mxu0 %v21573_v10  ;;  %v21621_v10 = vld [vmem:[#allocation2 + $0xb04] ss:$40 sps:$4 sm:$0xff]  }
 0x4d9   :  { %10219 = vmatpush2.bf16.msra.mxu1 %v21568_v11  ;;  %v21616_v11 = vld [vmem:[#allocation2 + $0x1050] ss:$40 sps:$4 sm:$0xff]  }
 0x4da   :  { %10220 = vmatprep.subr.bf16.mxu1 %v21576_v26  ;;  %v21624_v26 = vld [vmem:[#allocation2 + $0x1004] ss:$40 sps:$4 sm:$0xff]  }
 0x4db   :  { %10180 = vmatpush2.bf16.msra.mxu0 %v21571_v12  ;;  %v21619_v12 = vld [vmem:[#allocation2 + $0xb00] ss:$40 sps:$4 sm:$0xff]  }
 0x4dc   :  { %10181 = vmatprep.subr.bf16.mxu0 %v21579_v14  ;;  %v21627_v14 = vld [vmem:[#allocation2 + $0xab4] ss:$40 sps:$4 sm:$0xff]  }
 0x4dd   :  { %10221 = vmatpush2.bf16.msra.mxu1 %v21574_v27  ;;  %v21622_v27 = vld [vmem:[#allocation2 + $0x1000] ss:$40 sps:$4 sm:$0xff]  }
 0x4de   :  { %10222 = vmatprep.subr.bf16.mxu1 %v21582_v37  ;;  %v21630_v37 = vld [vmem:[#allocation2 + $0xfb4] ss:$40 sps:$4 sm:$0xff]  }
 0x4df   :  { %10182 = vmatpush2.bf16.msra.mxu0 %v21577_v20  ;;  %v21625_v20 = vld [vmem:[#allocation2 + $0xab0] ss:$40 sps:$4 sm:$0xff]  }
 0x4e0   :  { %10183 = vmatprep.subr.bf16.mxu0 %v21585_v33  ;;  %v21633_v33 = vld [vmem:[#allocation2 + $0xa64] ss:$40 sps:$4 sm:$0xff]  }
 0x4e1   :  { %10223 = vmatpush2.bf16.msra.mxu1 %v21580_v21  ;;  %v21628_v21 = vld [vmem:[#allocation2 + $0xfb0] ss:$40 sps:$4 sm:$0xff]  }
 0x4e2   :  { %10224 = vmatprep.subr.bf16.mxu1 %v21588_v22  ;;  %v21636_v22 = vld [vmem:[#allocation2 + $0xf64] ss:$40 sps:$4 sm:$0xff]  }
 0x4e3   :  { %10184 = vmatpush2.bf16.msra.mxu0 %v21583_v23  ;;  %v21631_v23 = vld [vmem:[#allocation2 + $0xa60] ss:$40 sps:$4 sm:$0xff]  }
 0x4e4   :  { %10185 = vmatprep.subr.bf16.mxu0 %v21591_v46  ;;  %v21639_v46 = vld [vmem:[#allocation2 + $0xa14] ss:$40 sps:$4 sm:$0xff]  }
 0x4e5   :  { %10225 = vmatpush2.bf16.msra.mxu1 %v21586_v25  ;;  %v21634_v25 = vld [vmem:[#allocation2 + $0xf60] ss:$40 sps:$4 sm:$0xff]  }
 0x4e6   :  { %10226 = vmatprep.subr.bf16.mxu1 %v21594_v28  ;;  %v21642_v28 = vld [vmem:[#allocation2 + $0xf14] ss:$40 sps:$4 sm:$0xff]  }
 0x4e7   :  { %10186 = vmatpush2.bf16.msra.mxu0 %v21589_v58  ;;  %v21637_v58 = vld [vmem:[#allocation2 + $0xa10] ss:$40 sps:$4 sm:$0xff]  }
 0x4e8   :  { %10237 = vmatprep.subr.bf16.mxu0 %v21597_v29  ;;  %v21645_v29 = vld [vmem:[#allocation2 + $0xec4] ss:$40 sps:$4 sm:$0xff]  }
 0x4e9   :  { %10227 = vmatpush2.bf16.msra.mxu1 %v21592_v32  ;;  %v21640_v32 = vld [vmem:[#allocation2 + $0xf10] ss:$40 sps:$4 sm:$0xff]  }
 0x4ea   :  { %v9943_v42 = vpop.f32.mrf.mxu0  ;;  %10188 = vmatmul.mubr.bf16.vlgmr.msra.gmra.mxu0 %v23823_v38  ;;  %10278 = vmatprep.subr.bf16.mxu1 %v21600_v34  ;;  %v21648_v34 = vld [vmem:[#allocation2 + $0x13c4] ss:$40 sps:$4 sm:$0xff]  }
 0x4eb   :  { %v9944_v16 = vadd.f32 %v9943_v42, %v23952_v9  ;;  %10238 = vmatpush1.bf16.msra.mxu0 %v21595_v47  ;;  %10269 = vmatprep.mubr.bf16.mxu0 %v23883_v36  ;;  %v21612_v9 = vld [vmem:[#allocation2 + $0x10a4] ss:$40 sps:$4 sm:$0xff]   ;;  %v21643_v47 = vld [vmem:[#allocation2 + $0xec0] ss:$40 sps:$4 sm:$0xff]   ;;  %v21654_v42 = vld [vmem:[#allocation2 + $0x1374] ss:$40 sps:$4 sm:$0xff]  }
 0x4ec   :  { %v9945_v17 = vpop.f32.mrf.mxu0  ;;  %10229 = vmatmul.mubr.bf16.vlgmr.msra.gmra.mxu1 %v23853_v55  ;;  %10239 = vmatprep.subr.bf16.mxu0 %v21603_v51  ;;  %v23961_v48 = vpop.f32.mrf.mxu1  ;;  %v21651_v51 = vld [vmem:[#allocation2 + $0xe74] ss:$40 sps:$4 sm:$0xff]  }
 0x4ed   :  { %v10770_v49 = vmax.f32 %v9944_v16, 0.0  ;;  %v9946_v50 = vadd.f32 %v9945_v17, %v23955_v13  ;;  %10279 = vmatpush1.bf16.msra.mxu1 %v21598_v41  ;;  %10310 = vmatprep.mubr.bf16.mxu1 %v23903_v4  ;;  %v21610_v13 = vld [vmem:[#allocation2 + $0x10a0] ss:$40 sps:$4 sm:$0xff]   ;;  %v21657_v16 = vld [vmem:[#allocation2 + $0xe24] ss:$40 sps:$4 sm:$0xff]  }
 0x4ee   :  { %v9947_v54 = vpop.f32.mrf.mxu0  ;;  %10280 = vmatprep.subr.bf16.mxu1 %v21606_v43  ;;  %v23965_v57 = vpop.f32.mrf.mxu1  ;;  %v21646_v41 = vld [vmem:[#allocation2 + $0x13c0] ss:$40 sps:$4 sm:$0xff]   ;;  %v21649_v43 = vld [vmem:[#allocation2 + $0xe70] ss:$40 sps:$4 sm:$0xff]   ;;  %v21660_v17 = vld [vmem:[#allocation2 + $0x1324] ss:$40 sps:$4 sm:$0xff]  }
 0x4ef   :  { %v23967_v59 = vpack.c.bf16 %v10770_v49, %v10770_v49  ;;  %v10771_v60 = vmax.f32 %v9946_v50, 0.0  ;;  %10240 = vmatpush1.bf16.msra.mxu0 %v21601_v63  ;;  %v21652_v63 = vld [vmem:[#allocation2 + $0x1370] ss:$40 sps:$4 sm:$0xff]   ;;  %v21663_v49 = vld [vmem:[#allocation2 + $0xdd4] ss:$40 sps:$4 sm:$0xff]  }
 0x4f0   :  { %v9948_v1 = vpop.f32.mrf.mxu0  ;;  %10241 = vmatprep.subr.bf16.mxu0 %v21609_v44  ;;  %v9988_v5 = vpop.f32.mrf.mxu1  ;;  %v21655_v44 = vld [vmem:[#allocation2 + $0xe20] ss:$40 sps:$4 sm:$0xff]   ;;  %v21661_v54 = vld [vmem:[#allocation2 + $0xdd0] ss:$40 sps:$4 sm:$0xff]  }
 0x4f1   :  { %v23969_v6 = vpack.c.bf16 %v10771_v60, %v10771_v60  ;;  %10281 = vmatpush1.bf16.msra.mxu1 %v21604_v52  ;;  %v21658_v50 = vld [vmem:[#allocation2 + $0x1320] ss:$40 sps:$4 sm:$0xff]   ;;  %v21666_v52 = vld [vmem:[#allocation2 + $0x12d4] ss:$40 sps:$4 sm:$0xff]   ;;  %v21664_v60 = vld [vmem:[#allocation2 + $0x12d0] ss:$40 sps:$4 sm:$0xff]  }
 0x4f2   :  { %10282 = vmatprep.subr.bf16.mxu1 %v21612_v9  ;;  %v9989_v24 = vpop.f32.mrf.mxu1  ;;  %v21669_v9 = vld [vmem:[#allocation2 + $0xd84] ss:$40 sps:$4 sm:$0xff]   ;;  %v21667_v1 = vld [vmem:[#allocation2 + $0xd80] ss:$40 sps:$4 sm:$0xff]  }
 0x4f3   :  { %10242 = vmatpush1.bf16.msra.mxu0 %v21607_v61  ;;  %v21672_v61 = vld [vmem:[#allocation2 + $0x1284] ss:$40 sps:$4 sm:$0xff]   ;;  %v21670_v5 = vld [vmem:[#allocation2 + $0x1280] ss:$40 sps:$4 sm:$0xff]  }
 0x4f4   :  { %10243 = vmatprep.subr.bf16.mxu0 %v21615_v2  ;;  %v21675_v2 = vld [vmem:[#allocation2 + $0xd34] ss:$40 sps:$4 sm:$0xff]   ;;  %v21681_v24 = vld [vmem:[#allocation2 + $0xce4] ss:$40 sps:$4 sm:$0xff]  }
 0x4f5   :  { %10283 = vmatpush1.bf16.msra.mxu1 %v21610_v13  ;;  %v21678_v13 = vld [vmem:[#allocation2 + $0x1234] ss:$40 sps:$4 sm:$0xff]  }
 0x4f6   :  { %10284 = vmatprep.subr.bf16.mxu1 %v21618_v7  ;;  %v21673_v7 = vld [vmem:[#allocation2 + $0xd30] ss:$40 sps:$4 sm:$0xff]  }
 0x4f7   :  { %10244 = vmatpush1.bf16.msra.mxu0 %v21613_v8  ;;  %v21676_v8 = vld [vmem:[#allocation2 + $0x1230] ss:$40 sps:$4 sm:$0xff]  }
 0x4f8   :  { %10245 = vmatprep.subr.bf16.mxu0 %v21621_v10  ;;  %v21684_v10 = vld [vmem:[#allocation2 + $0x11e4] ss:$40 sps:$4 sm:$0xff]  }
 0x4f9   :  { %10285 = vmatpush1.bf16.msra.mxu1 %v21616_v11  ;;  %v21679_v11 = vld [vmem:[#allocation2 + $0xce0] ss:$40 sps:$4 sm:$0xff]  }
 0x4fa   :  { %10286 = vmatprep.subr.bf16.mxu1 %v21624_v26  ;;  %v21687_v26 = vld [vmem:[#allocation2 + $0xc94] ss:$40 sps:$4 sm:$0xff]  }
 0x4fb   :  { %10246 = vmatpush1.bf16.msra.mxu0 %v21619_v12  ;;  %v21682_v12 = vld [vmem:[#allocation2 + $0x11e0] ss:$40 sps:$4 sm:$0xff]  }
 0x4fc   :  { %10247 = vmatprep.subr.bf16.mxu0 %v21627_v14  ;;  %v21690_v14 = vld [vmem:[#allocation2 + $0x1194] ss:$40 sps:$4 sm:$0xff]  }
 0x4fd   :  { %10287 = vmatpush1.bf16.msra.mxu1 %v21622_v27  ;;  %v23971_v27 = vld [vmem:[#allocation3] sm:$0xff] }
 0x4fe   :  { %10288 = vmatprep.subr.bf16.mxu1 %v21630_v37  ;;  %v5706_v37 = vrot.slane %v23971_v27, %v23828_v0 }
 0x4ff   :  { %10248 = vmatpush1.bf16.msra.mxu0 %v21625_v20  ;;  %v21685_v20 = vld [vmem:[#allocation2 + $0xc90] ss:$40 sps:$4 sm:$0xff]  }
 0x500   :  { %10249 = vmatprep.subr.bf16.mxu0 %v21633_v33  ;;  %v21693_v33 = vld [vmem:[#allocation2 + $0x1644] ss:$40 sps:$4 sm:$0xff]  }
 0x501   :  { %10289 = vmatpush1.bf16.msra.mxu1 %v21628_v21  ;;  %v5710_v21 = vrot.slane %v23971_v27, %v23831_v45 }
 0x502   :  { %10290 = vmatprep.subr.bf16.mxu1 %v21636_v22  ;;  %v21688_v22 = vld [vmem:[#allocation2 + $0x1190] ss:$40 sps:$4 sm:$0xff]  }
 0x503   :  { %10250 = vmatpush1.bf16.msra.mxu0 %v21631_v23  ;;  %v21696_v23 = vld [vmem:[#allocation2 + $0x24c] ss:$40 sps:$4 sm:$0xff]  }
 0x504   :  { %10251 = vmatprep.subr.bf16.mxu0 %v21639_v46  ;;  %v9985_v46 = vadd.f32 %v23961_v48, %v5706_v37  ;;  %v21732_v37 = vld [vmem:[#allocation2 + $0x6c] ss:$40 sps:$4 sm:$0xff]  }
 0x505   :  { %10291 = vmatpush1.bf16.msra.mxu1 %v21634_v25  ;;  %v21691_v25 = vld [vmem:[#allocation2 + $0x1640] ss:$40 sps:$4 sm:$0xff]  }
 0x506   :  { %10292 = vmatprep.subr.bf16.mxu1 %v21642_v28  ;;  %v21699_v28 = vld [vmem:[#allocation2 + $0x15f4] ss:$40 sps:$4 sm:$0xff]  }
 0x507   :  { %10252 = vmatpush1.bf16.msra.mxu0 %v21637_v58  ;;  %v9987_v58 = vadd.f32 %v23965_v57, %v5710_v21  ;;  %v21730_v21 = vld [vmem:[#allocation2 + $0x68] ss:$40 sps:$4 sm:$0xff]  }
 0x508   :  { %10253 = vmatprep.subr.bf16.mxu0 %v21645_v29  ;;  %v21694_v29 = vld [vmem:[#allocation2 + $0x248] ss:$40 sps:$4 sm:$0xff]  }
 0x509   :  { %10293 = vmatpush1.bf16.msra.mxu1 %v21640_v32 }
 0x50a   :  { %10294 = vmatprep.subr.bf16.mxu1 %v21648_v34  ;;  %v21702_v34 = vld [vmem:[#allocation2 + $0x1fc] ss:$40 sps:$4 sm:$0xff]  }
 0x50b   :  { %10254 = vmatpush2.bf16.msra.mxu0 %v21643_v47 }
 0x50c   :  { %10255 = vmatprep.subr.bf16.mxu0 %v21651_v51  ;;  %v21697_v51 = vld [vmem:[#allocation2 + $0x15f0] ss:$40 sps:$4 sm:$0xff]  }
 0x50d   :  { %10295 = vmatpush2.bf16.msra.mxu1 %v21646_v41 }
 0x50e   :  { %10296 = vmatprep.subr.bf16.mxu1 %v21654_v42  ;;  %v21705_v42 = vld [vmem:[#allocation2 + $0x15a4] ss:$40 sps:$4 sm:$0xff]  }
 0x50f   :  { %10256 = vmatpush2.bf16.msra.mxu0 %v21649_v43 }
 0x510   :  { %10257 = vmatprep.subr.bf16.mxu0 %v21657_v16  ;;  %v21700_v16 = vld [vmem:[#allocation2 + $0x1f8] ss:$40 sps:$4 sm:$0xff]  }
 0x511   :  { %10297 = vmatpush2.bf16.msra.mxu1 %v21652_v63 }
 0x512   :  { %10298 = vmatprep.subr.bf16.mxu1 %v21660_v17 }
 0x513   :  { %10258 = vmatpush2.bf16.msra.mxu0 %v21655_v44  ;;  %v21708_v44 = vld [vmem:[#allocation2 + $0x1ac] ss:$40 sps:$4 sm:$0xff]  }
 0x514   :  { %10259 = vmatprep.subr.bf16.mxu0 %v21663_v49 }
 0x515   :  { %10299 = vmatpush2.bf16.msra.mxu1 %v21658_v50  ;;  %v21703_v50 = vld [vmem:[#allocation2 + $0x15a0] ss:$40 sps:$4 sm:$0xff]  }
 0x516   :  { %10300 = vmatprep.subr.bf16.mxu1 %v21666_v52 }
 0x517   :  { %10260 = vmatpush2.bf16.msra.mxu0 %v21661_v54  ;;  %v21711_v54 = vld [vmem:[#allocation2 + $0x1554] ss:$40 sps:$4 sm:$0xff]  }
 0x518   :  { %10261 = vmatprep.subr.bf16.mxu0 %v21669_v9 }
 0x519   :  { %10301 = vmatpush2.bf16.msra.mxu1 %v21664_v60  ;;  %v21706_v60 = vld [vmem:[#allocation2 + $0x1a8] ss:$40 sps:$4 sm:$0xff]  }
 0x51a   :  { %10302 = vmatprep.subr.bf16.mxu1 %v21672_v61  ;;  %v21714_v61 = vld [vmem:[#allocation2 + $0x15c] ss:$40 sps:$4 sm:$0xff]  }
 0x51b   :  { %10262 = vmatpush2.bf16.msra.mxu0 %v21667_v1 }
 0x51c   :  { %10263 = vmatprep.subr.bf16.mxu0 %v21675_v2  ;;  %v21709_v2 = vld [vmem:[#allocation2 + $0x1550] ss:$40 sps:$4 sm:$0xff]  }
 0x51d   :  { %10303 = vmatpush2.bf16.msra.mxu1 %v21670_v5  ;;  %v21717_v5 = vld [vmem:[#allocation2 + $0x1504] ss:$40 sps:$4 sm:$0xff]  }
 0x51e   :  { %10304 = vmatprep.subr.bf16.mxu1 %v21678_v13  ;;  %v21712_v13 = vld [vmem:[#allocation2 + $0x158] ss:$40 sps:$4 sm:$0xff]  }
 0x51f   :  { %10264 = vmatpush2.bf16.msra.mxu0 %v21673_v7  ;;  %v21720_v7 = vld [vmem:[#allocation2 + $0x10c] ss:$40 sps:$4 sm:$0xff]  }
 0x520   :  { %10265 = vmatprep.subr.bf16.mxu0 %v21681_v24  ;;  %v21715_v24 = vld [vmem:[#allocation2 + $0x1500] ss:$40 sps:$4 sm:$0xff]  }
 0x521   :  { %10305 = vmatpush2.bf16.msra.mxu1 %v21676_v8  ;;  %v21723_v8 = vld [vmem:[#allocation2 + $0x14b4] ss:$40 sps:$4 sm:$0xff]  }
 0x522   :  { %10306 = vmatprep.subr.bf16.mxu1 %v21684_v10  ;;  %v21718_v10 = vld [vmem:[#allocation2 + $0x108] ss:$40 sps:$4 sm:$0xff]  }
 0x523   :  { %10266 = vmatpush2.bf16.msra.mxu0 %v21679_v11  ;;  %v21726_v11 = vld [vmem:[#allocation2 + $0xbc] ss:$40 sps:$4 sm:$0xff]  }
 0x524   :  { %10267 = vmatprep.subr.bf16.mxu0 %v21687_v26  ;;  %v21721_v26 = vld [vmem:[#allocation2 + $0x14b0] ss:$40 sps:$4 sm:$0xff]  }
 0x525   :  { %10307 = vmatpush2.bf16.msra.mxu1 %v21682_v12  ;;  %v21729_v12 = vld [vmem:[#allocation2 + $0x1464] ss:$40 sps:$4 sm:$0xff]  }
 0x526   :  { %10308 = vmatprep.subr.bf16.mxu1 %v21690_v14  ;;  %v21724_v14 = vld [vmem:[#allocation2 + $0xb8] ss:$40 sps:$4 sm:$0xff]  }
 0x527   :  { %10268 = vmatpush2.bf16.msra.mxu0 %v21685_v20  ;;  %v21727_v20 = vld [vmem:[#allocation2 + $0x1460] ss:$40 sps:$4 sm:$0xff]  }
 0x528   :  { %10319 = vmatprep.subr.bf16.mxu0 %v21693_v33  ;;  %v21735_v33 = vld [vmem:[#allocation2 + $0x1414] ss:$40 sps:$4 sm:$0xff]  }
 0x529   :  { %10309 = vmatpush2.bf16.msra.mxu1 %v21688_v22  ;;  %v21738_v22 = vld [vmem:[#allocation2 + $0x1c] ss:$40 sps:$4 sm:$0xff]  }
 0x52a   :  { %v10025_v32 = vpop.f32.mrf.mxu0  ;;  %10270 = vmatmul.mubr.bf16.vlgmr.msra.gmra.mxu0 %v23881_v15  ;;  %10360 = vmatprep.subr.bf16.mxu1 %v21696_v23  ;;  %v21733_v23 = vld [vmem:[#allocation2 + $0x1410] ss:$40 sps:$4 sm:$0xff]  }
 0x52b   :  { %v10026_v47 = vadd.f32 %v10025_v32, %v9985_v46  ;;  %10320 = vmatpush1.bf16.msra.mxu0 %v21691_v25  ;;  %10351 = vmatprep.mubr.bf16.mxu0 %v23921_v31  ;;  %v21741_v46 = vld [vmem:[#allocation2 + $0x18c4] ss:$40 sps:$4 sm:$0xff]   ;;  %v21736_v25 = vld [vmem:[#allocation2 + $0x18] ss:$40 sps:$4 sm:$0xff]   ;;  %v21742_v32 = vld [vmem:[#allocation2 + $0x4c8] ss:$40 sps:$4 sm:$0xff]  }
 0x52c   :  { %v10027_v41 = vpop.f32.mrf.mxu0  ;;  %v10066_v48 = vpop.f32.mrf.mxu1  ;;  %10311 = vmatmul.mubr.bf16.vlgmr.msra.gmra.mxu1 %v23901_v53  ;;  %10321 = vmatprep.subr.bf16.mxu0 %v21699_v28  ;;  %v21744_v28 = vld [vmem:[#allocation2 + $0x4cc] ss:$40 sps:$4 sm:$0xff]  }
 0x52d   :  { %v10028_v43 = vadd.f32 %v10027_v41, %v9987_v58  ;;  %v23982_v57 = vadd.f32 %v10066_v48, %v10026_v47  ;;  %10361 = vmatpush1.bf16.msra.mxu1 %v21694_v29  ;;  %10392 = vmatprep.mubr.bf16.mxu1 %v23825_v39  ;;  %v21739_v58 = vld [vmem:[#allocation2 + $0x18c0] ss:$40 sps:$4 sm:$0xff]   ;;  %v21747_v29 = vld [vmem:[#allocation2 + $0x1874] ss:$40 sps:$4 sm:$0xff]   ;;  %v21745_v47 = vld [vmem:[#allocation2 + $0x1870] ss:$40 sps:$4 sm:$0xff]  }
 0x52e   :  { %v10029_v63 = vpop.f32.mrf.mxu0  ;;  %v10068_v17 = vpop.f32.mrf.mxu1  ;;  %10362 = vmatprep.subr.bf16.mxu1 %v21702_v34  ;;  %v21750_v34 = vld [vmem:[#allocation2 + $0x47c] ss:$40 sps:$4 sm:$0xff]   ;;  %v21748_v41 = vld [vmem:[#allocation2 + $0x478] ss:$40 sps:$4 sm:$0xff]   ;;  %v21756_v48 = vld [vmem:[#allocation2 + $0x42c] ss:$40 sps:$4 sm:$0xff]  }
 0x52f   :  { %v23985_v49 = vadd.f32 %v10068_v17, %v10028_v43  ;;  %10322 = vmatpush1.bf16.msra.mxu0 %v21697_v51  ;;  %v21753_v51 = vld [vmem:[#allocation2 + $0x1824] ss:$40 sps:$4 sm:$0xff]   ;;  %v21759_v43 = vld [vmem:[#allocation2 + $0x17d4] ss:$40 sps:$4 sm:$0xff]   ;;  %v21757_v17 = vld [vmem:[#allocation2 + $0x17d0] ss:$40 sps:$4 sm:$0xff]  }
 0x530   :  { %v10030_v52 = vpop.f32.mrf.mxu0  ;;  %10323 = vmatprep.subr.bf16.mxu0 %v21705_v42  ;;  %v10070_v9 = vpop.f32.mrf.mxu1  ;;  %v21751_v42 = vld [vmem:[#allocation2 + $0x1820] ss:$40 sps:$4 sm:$0xff]   ;;  %v21762_v63 = vld [vmem:[#allocation2 + $0x3dc] ss:$40 sps:$4 sm:$0xff]  }
 0x531   :  { %10363 = vmatpush1.bf16.msra.mxu1 %v21700_v16  ;;  %v21754_v16 = vld [vmem:[#allocation2 + $0x428] ss:$40 sps:$4 sm:$0xff]   ;;  %v21768_v52 = vld [vmem:[#allocation2 + $0x38c] ss:$40 sps:$4 sm:$0xff]  }
 0x532   :  { %10364 = vmatprep.subr.bf16.mxu1 %v21708_v44  ;;  %v10071_v1 = vpop.f32.mrf.mxu1  ;;  %v21765_v44 = vld [vmem:[#allocation2 + $0x1784] ss:$40 sps:$4 sm:$0xff]   ;;  %v21771_v9 = vld [vmem:[#allocation2 + $0x1734] ss:$40 sps:$4 sm:$0xff]  }
 0x533   :  { %10324 = vmatpush1.bf16.msra.mxu0 %v21703_v50  ;;  %v21760_v50 = vld [vmem:[#allocation2 + $0x3d8] ss:$40 sps:$4 sm:$0xff]  }
 0x534   :  { %10325 = vmatprep.subr.bf16.mxu0 %v21711_v54  ;;  %v21763_v54 = vld [vmem:[#allocation2 + $0x1780] ss:$40 sps:$4 sm:$0xff]   ;;  %v21769_v1 = vld [vmem:[#allocation2 + $0x1730] ss:$40 sps:$4 sm:$0xff]  }
 0x535   :  { %10365 = vmatpush1.bf16.msra.mxu1 %v21706_v60  ;;  %v21766_v60 = vld [vmem:[#allocation2 + $0x388] ss:$40 sps:$4 sm:$0xff]  }
 0x536   :  { %10366 = vmatprep.subr.bf16.mxu1 %v21714_v61  ;;  %v21774_v61 = vld [vmem:[#allocation2 + $0x33c] ss:$40 sps:$4 sm:$0xff]  }
 0x537   :  { %10326 = vmatpush1.bf16.msra.mxu0 %v21709_v2  ;;  %v21777_v2 = vld [vmem:[#allocation2 + $0x16e4] ss:$40 sps:$4 sm:$0xff]  }
 0x538   :  { %10327 = vmatprep.subr.bf16.mxu0 %v21717_v5  ;;  %v21772_v5 = vld [vmem:[#allocation2 + $0x338] ss:$40 sps:$4 sm:$0xff]  }
 0x539   :  { %10367 = vmatpush1.bf16.msra.mxu1 %v21712_v13  ;;  %v21780_v13 = vld [vmem:[#allocation2 + $0x2ec] ss:$40 sps:$4 sm:$0xff]  }
 0x53a   :  { %10368 = vmatprep.subr.bf16.mxu1 %v21720_v7  ;;  %v21775_v7 = vld [vmem:[#allocation2 + $0x16e0] ss:$40 sps:$4 sm:$0xff]  }
 0x53b   :  { %10328 = vmatpush1.bf16.msra.mxu0 %v21715_v24  ;;  %v21783_v24 = vld [vmem:[#allocation2 + $0x1694] ss:$40 sps:$4 sm:$0xff]  }
 0x53c   :  { %10329 = vmatprep.subr.bf16.mxu0 %v21723_v8  ;;  %v21778_v8 = vld [vmem:[#allocation2 + $0x2e8] ss:$40 sps:$4 sm:$0xff]  }
 0x53d   :  { %10369 = vmatpush1.bf16.msra.mxu1 %v21718_v10  ;;  %v21786_v10 = vld [vmem:[#allocation2 + $0x29c] ss:$40 sps:$4 sm:$0xff]  }
 0x53e   :  { %10370 = vmatprep.subr.bf16.mxu1 %v21726_v11  ;;  %v21781_v11 = vld [vmem:[#allocation2 + $0x1690] ss:$40 sps:$4 sm:$0xff]  }
 0x53f   :  { %10330 = vmatpush1.bf16.msra.mxu0 %v21721_v26  ;;  %v21789_v26 = vld [vmem:[#allocation2 + $0x74c] ss:$40 sps:$4 sm:$0xff]  }
 0x540   :  { %10331 = vmatprep.subr.bf16.mxu0 %v21729_v12  ;;  %v21784_v12 = vld [vmem:[#allocation2 + $0x298] ss:$40 sps:$4 sm:$0xff]  }
 0x541   :  { %10371 = vmatpush1.bf16.msra.mxu1 %v21724_v14  ;;  %v21792_v14 = vld [vmem:[#allocation2 + $0xc4c] ss:$40 sps:$4 sm:$0xff]  }
 0x542   :  { %10372 = vmatprep.subr.bf16.mxu1 %v21732_v37  ;;  %v21787_v37 = vld [vmem:[#allocation2 + $0x748] ss:$40 sps:$4 sm:$0xff]  }
 0x543   :  { %10332 = vmatpush1.bf16.msra.mxu0 %v21727_v20  ;;  %v21795_v20 = vld [vmem:[#allocation2 + $0x6fc] ss:$40 sps:$4 sm:$0xff]  }
 0x544   :  { %10333 = vmatprep.subr.bf16.mxu0 %v21735_v33  ;;  %v21790_v33 = vld [vmem:[#allocation2 + $0xc48] ss:$40 sps:$4 sm:$0xff]  }
 0x545   :  { %10373 = vmatpush1.bf16.msra.mxu1 %v21730_v21 }
 0x546   :  { %10374 = vmatprep.subr.bf16.mxu1 %v21738_v22  ;;  %v21798_v22 = vld [vmem:[#allocation2 + $0xbfc] ss:$40 sps:$4 sm:$0xff]  }
 0x547   :  { %10334 = vmatpush1.bf16.msra.mxu0 %v21733_v23 }
 0x548   :  { %10335 = vmatprep.subr.bf16.mxu0 %v21741_v46  ;;  %v21793_v46 = vld [vmem:[#allocation2 + $0x6f8] ss:$40 sps:$4 sm:$0xff]  }
 0x549   :  { %10375 = vmatpush1.bf16.msra.mxu1 %v21736_v25 }
 0x54a   :  { %10376 = vmatprep.subr.bf16.mxu1 %v21744_v28 }
 0x54b   :  { %10336 = vmatpush2.bf16.msra.mxu0 %v21739_v58  ;;  %v21801_v58 = vld [vmem:[#allocation2 + $0x6ac] ss:$40 sps:$4 sm:$0xff]  }
 0x54c   :  { %10337 = vmatprep.subr.bf16.mxu0 %v21747_v29 }
 0x54d   :  { %10377 = vmatpush2.bf16.msra.mxu1 %v21742_v32 }
 0x54e   :  { %10378 = vmatprep.subr.bf16.mxu1 %v21750_v34  ;;  %v21796_v34 = vld [vmem:[#allocation2 + $0xbf8] ss:$40 sps:$4 sm:$0xff]  }
 0x54f   :  { %10338 = vmatpush2.bf16.msra.mxu0 %v21745_v47 }
 0x550   :  { %10339 = vmatprep.subr.bf16.mxu0 %v21753_v51 }
 0x551   :  { %10379 = vmatpush2.bf16.msra.mxu1 %v21748_v41 }
 0x552   :  { %10380 = vmatprep.subr.bf16.mxu1 %v21756_v48 }
 0x553   :  { %10340 = vmatpush2.bf16.msra.mxu0 %v21751_v42  ;;  %v21799_v42 = vld [vmem:[#allocation2 + $0x6a8] ss:$40 sps:$4 sm:$0xff]  }
 0x554   :  { %10341 = vmatprep.subr.bf16.mxu0 %v21759_v43 }
 0x555   :  { %10381 = vmatpush2.bf16.msra.mxu1 %v21754_v16  ;;  %v21807_v16 = vld [vmem:[#allocation2 + $0x65c] ss:$40 sps:$4 sm:$0xff]  }
 0x556   :  { %10382 = vmatprep.subr.bf16.mxu1 %v21762_v63 }
 0x557   :  { %10342 = vmatpush2.bf16.msra.mxu0 %v21757_v17 }
 0x558   :  { %10343 = vmatprep.subr.bf16.mxu0 %v21765_v44  ;;  %v21802_v44 = vld [vmem:[#allocation2 + $0xba8] ss:$40 sps:$4 sm:$0xff]  }
 0x559   :  { %10383 = vmatpush2.bf16.msra.mxu1 %v21760_v50  ;;  %v21810_v50 = vld [vmem:[#allocation2 + $0xb5c] ss:$40 sps:$4 sm:$0xff]  }
 0x55a   :  { %10384 = vmatprep.subr.bf16.mxu1 %v21768_v52 }
 0x55b   :  { %10344 = vmatpush2.bf16.msra.mxu0 %v21763_v54 }
 0x55c   :  { %10345 = vmatprep.subr.bf16.mxu0 %v21771_v9  ;;  %v21805_v9 = vld [vmem:[#allocation2 + $0x658] ss:$40 sps:$4 sm:$0xff]  }
 0x55d   :  { %10385 = vmatpush2.bf16.msra.mxu1 %v21766_v60  ;;  %v21813_v60 = vld [vmem:[#allocation2 + $0x60c] ss:$40 sps:$4 sm:$0xff]  }
 0x55e   :  { %10386 = vmatprep.subr.bf16.mxu1 %v21774_v61  ;;  %v21808_v61 = vld [vmem:[#allocation2 + $0xb58] ss:$40 sps:$4 sm:$0xff]  }
 0x55f   :  { %10346 = vmatpush2.bf16.msra.mxu0 %v21769_v1  ;;  %v21816_v1 = vld [vmem:[#allocation2 + $0xb0c] ss:$40 sps:$4 sm:$0xff]  }
 0x560   :  { %10347 = vmatprep.subr.bf16.mxu0 %v21777_v2  ;;  %v21811_v2 = vld [vmem:[#allocation2 + $0x608] ss:$40 sps:$4 sm:$0xff]  }
 0x561   :  { %10387 = vmatpush2.bf16.msra.mxu1 %v21772_v5  ;;  %v21819_v5 = vld [vmem:[#allocation2 + $0x5bc] ss:$40 sps:$4 sm:$0xff]  }
 0x562   :  { %10388 = vmatprep.subr.bf16.mxu1 %v21780_v13  ;;  %v21814_v13 = vld [vmem:[#allocation2 + $0xb08] ss:$40 sps:$4 sm:$0xff]  }
 0x563   :  { %10348 = vmatpush2.bf16.msra.mxu0 %v21775_v7  ;;  %v21822_v7 = vld [vmem:[#allocation2 + $0xabc] ss:$40 sps:$4 sm:$0xff]  }
 0x564   :  { %10349 = vmatprep.subr.bf16.mxu0 %v21783_v24  ;;  %v21817_v24 = vld [vmem:[#allocation2 + $0x5b8] ss:$40 sps:$4 sm:$0xff]  }
 0x565   :  { %10389 = vmatpush2.bf16.msra.mxu1 %v21778_v8  ;;  %v21825_v8 = vld [vmem:[#allocation2 + $0x56c] ss:$40 sps:$4 sm:$0xff]  }
 0x566   :  { %10390 = vmatprep.subr.bf16.mxu1 %v21786_v10  ;;  %v21820_v10 = vld [vmem:[#allocation2 + $0xab8] ss:$40 sps:$4 sm:$0xff]  }
 0x567   :  { %10350 = vmatpush2.bf16.msra.mxu0 %v21781_v11  ;;  %v21828_v11 = vld [vmem:[#allocation2 + $0xa6c] ss:$40 sps:$4 sm:$0xff]  }
 0x568   :  { %10401 = vmatprep.subr.bf16.mxu0 %v21789_v26  ;;  %v21823_v26 = vld [vmem:[#allocation2 + $0x568] ss:$40 sps:$4 sm:$0xff]  }
 0x569   :  { %10391 = vmatpush2.bf16.msra.mxu1 %v21784_v12  ;;  %v21831_v12 = vld [vmem:[#allocation2 + $0x51c] ss:$40 sps:$4 sm:$0xff]  }
 0x56a   :  { %v10107_v21 = vpop.f32.mrf.mxu0  ;;  %10352 = vmatmul.mubr.bf16.vlgmr.msra.gmra.mxu0 %v23919_v30  ;;  %10442 = vmatprep.subr.bf16.mxu1 %v21792_v14  ;;  %v21826_v14 = vld [vmem:[#allocation2 + $0xa68] ss:$40 sps:$4 sm:$0xff]  }
 0x56b   :  { %v10108_v23 = vadd.f32 %v10107_v21, %v23982_v57  ;;  %10402 = vmatpush1.bf16.msra.mxu0 %v21787_v37  ;;  %10433 = vmatprep.mubr.bf16.mxu0 %v23855_v56  ;;  %v21804_v57 = vld [vmem:[#allocation2 + $0xbac] ss:$40 sps:$4 sm:$0xff]   ;;  %v21834_v37 = vld [vmem:[#allocation2 + $0xa1c] ss:$40 sps:$4 sm:$0xff]   ;;  %v21832_v21 = vld [vmem:[#allocation2 + $0xa18] ss:$40 sps:$4 sm:$0xff]  }
 0x56c   :  { %v10109_v25 = vpop.f32.mrf.mxu0  ;;  %v10148_v28 = vpop.f32.mrf.mxu1  ;;  %10393 = vmatmul.mubr.bf16.vlgmr.msra.gmra.mxu1 %v23823_v38  ;;  %10403 = vmatprep.subr.bf16.mxu0 %v21795_v20  ;;  %v21829_v20 = vld [vmem:[#allocation2 + $0x518] ss:$40 sps:$4 sm:$0xff]  }
 0x56d   :  { %v10110_v29 = vadd.f32 %v10109_v25, %v23985_v49  ;;  %v10149_v32 = vadd.f32 %v10148_v28, %v10108_v23  ;;  %10443 = vmatpush1.bf16.msra.mxu1 %v21790_v33  ;;  %10474 = vmatprep.mubr.bf16.mxu1 %v23883_v36  ;;  %v21837_v33 = vld [vmem:[#allocation2 + $0x9cc] ss:$40 sps:$4 sm:$0xff]   ;;  %v21835_v23 = vld [vmem:[#allocation2 + $0x9c8] ss:$40 sps:$4 sm:$0xff]   ;;  %v21846_v28 = vld [vmem:[#allocation2 + $0xe7c] ss:$40 sps:$4 sm:$0xff]  }
 0x56e   :  { %v10111_v47 = vpop.f32.mrf.mxu0  ;;  %v10150_v51 = vpop.f32.mrf.mxu1  ;;  %10444 = vmatprep.subr.bf16.mxu1 %v21798_v22  ;;  %v21840_v22 = vld [vmem:[#allocation2 + $0xecc] ss:$40 sps:$4 sm:$0xff]   ;;  %v21838_v25 = vld [vmem:[#allocation2 + $0xec8] ss:$40 sps:$4 sm:$0xff]  }
 0x56f   :  { %v10772_v41 = vmax.f32 %v10149_v32, 0.0  ;;  %v10151_v48 = vadd.f32 %v10150_v51, %v10110_v29  ;;  %10404 = vmatpush1.bf16.msra.mxu0 %v21793_v46  ;;  %v21843_v46 = vld [vmem:[#allocation2 + $0x97c] ss:$40 sps:$4 sm:$0xff]   ;;  %v21849_v29 = vld [vmem:[#allocation2 + $0x92c] ss:$40 sps:$4 sm:$0xff]  }
 0x570   :  { %v10112_v43 = vpop.f32.mrf.mxu0  ;;  %10405 = vmatprep.subr.bf16.mxu0 %v21801_v58  ;;  %v10152_v63 = vpop.f32.mrf.mxu1  ;;  %v21841_v58 = vld [vmem:[#allocation2 + $0x978] ss:$40 sps:$4 sm:$0xff]   ;;  %v21847_v47 = vld [vmem:[#allocation2 + $0x928] ss:$40 sps:$4 sm:$0xff]   ;;  %v21855_v51 = vld [vmem:[#allocation2 + $0x8dc] ss:$40 sps:$4 sm:$0xff]  }
 0x571   :  { %v23993_v17 = vpack.c.bf16 %v10772_v41, %v10772_v41  ;;  %v10773_v49 = vmax.f32 %v10151_v48, 0.0  ;;  %10445 = vmatpush1.bf16.msra.mxu1 %v21796_v34  ;;  %v21844_v32 = vld [vmem:[#allocation2 + $0xe78] ss:$40 sps:$4 sm:$0xff]   ;;  %v21852_v34 = vld [vmem:[#allocation2 + $0xe2c] ss:$40 sps:$4 sm:$0xff]  }
 0x572   :  { %10446 = vmatprep.subr.bf16.mxu1 %v21804_v57  ;;  %v10153_v52 = vpop.f32.mrf.mxu1  ;;  %v21850_v57 = vld [vmem:[#allocation2 + $0xe28] ss:$40 sps:$4 sm:$0xff]   ;;  %v21858_v41 = vld [vmem:[#allocation2 + $0xddc] ss:$40 sps:$4 sm:$0xff]   ;;  %v21853_v48 = vld [vmem:[#allocation2 + $0x8d8] ss:$40 sps:$4 sm:$0xff]  }
 0x573   :  { %v23995_v54 = vpack.c.bf16 %v10773_v49, %v10773_v49  ;;  %10406 = vmatpush1.bf16.msra.mxu0 %v21799_v42  ;;  %v21861_v42 = vld [vmem:[#allocation2 + $0x88c] ss:$40 sps:$4 sm:$0xff]   ;;  %v21856_v43 = vld [vmem:[#allocation2 + $0xdd8] ss:$40 sps:$4 sm:$0xff]   ;;  %v21859_v63 = vld [vmem:[#allocation2 + $0x888] ss:$40 sps:$4 sm:$0xff]  }
 0x574   :  { %10407 = vmatprep.subr.bf16.mxu0 %v21807_v16  ;;  %v21864_v16 = vld [vmem:[#allocation2 + $0xd8c] ss:$40 sps:$4 sm:$0xff]   ;;  %v21867_v49 = vld [vmem:[#allocation2 + $0x83c] ss:$40 sps:$4 sm:$0xff]   ;;  %v21865_v52 = vld [vmem:[#allocation2 + $0x838] ss:$40 sps:$4 sm:$0xff]  }
 0x575   :  { %10447 = vmatpush1.bf16.msra.mxu1 %v21802_v44  ;;  %v21862_v44 = vld [vmem:[#allocation2 + $0xd88] ss:$40 sps:$4 sm:$0xff]  }
 0x576   :  { %10448 = vmatprep.subr.bf16.mxu1 %v21810_v50  ;;  %v21870_v50 = vld [vmem:[#allocation2 + $0xd3c] ss:$40 sps:$4 sm:$0xff]  }
 0x577   :  { %10408 = vmatpush1.bf16.msra.mxu0 %v21805_v9  ;;  %v21873_v9 = vld [vmem:[#allocation2 + $0x7ec] ss:$40 sps:$4 sm:$0xff]  }
 0x578   :  { %10409 = vmatprep.subr.bf16.mxu0 %v21813_v60  ;;  %v21868_v60 = vld [vmem:[#allocation2 + $0xd38] ss:$40 sps:$4 sm:$0xff]  }
 0x579   :  { %10449 = vmatpush1.bf16.msra.mxu1 %v21808_v61  ;;  %v21876_v61 = vld [vmem:[#allocation2 + $0xcec] ss:$40 sps:$4 sm:$0xff]  }
 0x57a   :  { %10450 = vmatprep.subr.bf16.mxu1 %v21816_v1  ;;  %v21871_v1 = vld [vmem:[#allocation2 + $0x7e8] ss:$40 sps:$4 sm:$0xff]  }
 0x57b   :  { %10410 = vmatpush1.bf16.msra.mxu0 %v21811_v2  ;;  %v21879_v2 = vld [vmem:[#allocation2 + $0x79c] ss:$40 sps:$4 sm:$0xff]  }
 0x57c   :  { %10411 = vmatprep.subr.bf16.mxu0 %v21819_v5  ;;  %v21874_v5 = vld [vmem:[#allocation2 + $0xce8] ss:$40 sps:$4 sm:$0xff]  }
 0x57d   :  { %10451 = vmatpush1.bf16.msra.mxu1 %v21814_v13  ;;  %v21882_v13 = vld [vmem:[#allocation2 + $0xc9c] ss:$40 sps:$4 sm:$0xff]  }
 0x57e   :  { %10452 = vmatprep.subr.bf16.mxu1 %v21822_v7  ;;  %v21877_v7 = vld [vmem:[#allocation2 + $0x798] ss:$40 sps:$4 sm:$0xff]  }
 0x57f   :  { %10412 = vmatpush1.bf16.msra.mxu0 %v21817_v24  ;;  %v21885_v24 = vld [vmem:[#allocation2 + $0x114c] ss:$40 sps:$4 sm:$0xff]  }
 0x580   :  { %10413 = vmatprep.subr.bf16.mxu0 %v21825_v8  ;;  %v21880_v8 = vld [vmem:[#allocation2 + $0xc98] ss:$40 sps:$4 sm:$0xff]  }
 0x581   :  { %10453 = vmatpush1.bf16.msra.mxu1 %v21820_v10  ;;  %v21888_v10 = vld [vmem:[#allocation2 + $0x164c] ss:$40 sps:$4 sm:$0xff]  }
 0x582   :  { %10454 = vmatprep.subr.bf16.mxu1 %v21828_v11  ;;  %v5714_v11 = vrot.slane %v23971_v27, %v23858_v62 }
 0x583   :  { %10414 = vmatpush1.bf16.msra.mxu0 %v21823_v26  ;;  %v21883_v26 = vld [vmem:[#allocation2 + $0x1148] ss:$40 sps:$4 sm:$0xff]  }
 0x584   :  { %10415 = vmatprep.subr.bf16.mxu0 %v21831_v12  ;;  %v21891_v12 = vld [vmem:[#allocation2 + $0x10fc] ss:$40 sps:$4 sm:$0xff]  }
 0x585   :  { %10455 = vmatpush1.bf16.msra.mxu1 %v21826_v14  ;;  %v5718_v14 = vrot.slane %v23971_v27, %v23861_v3  ;;  %v21892_v27 = vld [vmem:[#allocation2 + $0x15f8] ss:$40 sps:$4 sm:$0xff]  }
 0x586   :  { %10456 = vmatprep.subr.bf16.mxu1 %v21834_v37  ;;  %v21886_v37 = vld [vmem:[#allocation2 + $0x1648] ss:$40 sps:$4 sm:$0xff]  }
 0x587   :  { %10416 = vmatpush1.bf16.msra.mxu0 %v21829_v20 }
 0x588   :  { %10417 = vmatprep.subr.bf16.mxu0 %v21837_v33  ;;  %v21894_v33 = vld [vmem:[#allocation2 + $0x15fc] ss:$40 sps:$4 sm:$0xff]  }
 0x589   :  { %10457 = vmatpush1.bf16.msra.mxu1 %v21832_v21 }
 0x58a   :  { %10458 = vmatprep.subr.bf16.mxu1 %v21840_v22  ;;  %v21889_v22 = vld [vmem:[#allocation2 + $0x10f8] ss:$40 sps:$4 sm:$0xff]  }
 0x58b   :  { %10418 = vmatpush2.bf16.msra.mxu0 %v21835_v23 }
 0x58c   :  { %10419 = vmatprep.subr.bf16.mxu0 %v21843_v46 }
 0x58d   :  { %10459 = vmatpush2.bf16.msra.mxu1 %v21838_v25  ;;  %v21897_v25 = vld [vmem:[#allocation2 + $0x10ac] ss:$40 sps:$4 sm:$0xff]  }
 0x58e   :  { %10460 = vmatprep.subr.bf16.mxu1 %v21846_v28 }
 0x58f   :  { %10420 = vmatpush2.bf16.msra.mxu0 %v21841_v58 }
 0x590   :  { %10421 = vmatprep.subr.bf16.mxu0 %v21849_v29 }
 0x591   :  { %10461 = vmatpush2.bf16.msra.mxu1 %v21844_v32 }
 0x592   :  { %10462 = vmatprep.subr.bf16.mxu1 %v21852_v34  ;;  %v21900_v34 = vld [vmem:[#allocation2 + $0x15ac] ss:$40 sps:$4 sm:$0xff]  }
 0x593   :  { %10422 = vmatpush2.bf16.msra.mxu0 %v21847_v47 }
 0x594   :  { %10423 = vmatprep.subr.bf16.mxu0 %v21855_v51  ;;  %v21895_v51 = vld [vmem:[#allocation2 + $0x10a8] ss:$40 sps:$4 sm:$0xff]  }
 0x595   :  { %10463 = vmatpush2.bf16.msra.mxu1 %v21850_v57 }
 0x596   :  { %10464 = vmatprep.subr.bf16.mxu1 %v21858_v41  ;;  %v21903_v41 = vld [vmem:[#allocation2 + $0x105c] ss:$40 sps:$4 sm:$0xff]  }
 0x597   :  { %10424 = vmatpush2.bf16.msra.mxu0 %v21853_v48 }
 0x598   :  { %10425 = vmatprep.subr.bf16.mxu0 %v21861_v42  ;;  %v21898_v42 = vld [vmem:[#allocation2 + $0x15a8] ss:$40 sps:$4 sm:$0xff]  }
 0x599   :  { %10465 = vmatpush2.bf16.msra.mxu1 %v21856_v43  ;;  %v21906_v43 = vld [vmem:[#allocation2 + $0x155c] ss:$40 sps:$4 sm:$0xff]  }
 0x59a   :  { %10466 = vmatprep.subr.bf16.mxu1 %v21864_v16 }
 0x59b   :  { %10426 = vmatpush2.bf16.msra.mxu0 %v21859_v63  ;;  %v21901_v63 = vld [vmem:[#allocation2 + $0x1058] ss:$40 sps:$4 sm:$0xff]  }
 0x59c   :  { %10427 = vmatprep.subr.bf16.mxu0 %v21867_v49  ;;  %v21909_v49 = vld [vmem:[#allocation2 + $0x100c] ss:$40 sps:$4 sm:$0xff]  }
 0x59d   :  { %10467 = vmatpush2.bf16.msra.mxu1 %v21862_v44  ;;  %v21904_v44 = vld [vmem:[#allocation2 + $0x1558] ss:$40 sps:$4 sm:$0xff]  }
 0x59e   :  { %10468 = vmatprep.subr.bf16.mxu1 %v21870_v50  ;;  %v21912_v50 = vld [vmem:[#allocation2 + $0x150c] ss:$40 sps:$4 sm:$0xff]  }
 0x59f   :  { %10428 = vmatpush2.bf16.msra.mxu0 %v21865_v52  ;;  %v21907_v52 = vld [vmem:[#allocation2 + $0x1008] ss:$40 sps:$4 sm:$0xff]  }
 0x5a0   :  { %10429 = vmatprep.subr.bf16.mxu0 %v21873_v9  ;;  %v21915_v9 = vld [vmem:[#allocation2 + $0xfbc] ss:$40 sps:$4 sm:$0xff]  }
 0x5a1   :  { %10469 = vmatpush2.bf16.msra.mxu1 %v21868_v60  ;;  %v21910_v60 = vld [vmem:[#allocation2 + $0x1508] ss:$40 sps:$4 sm:$0xff]  }
 0x5a2   :  { %10470 = vmatprep.subr.bf16.mxu1 %v21876_v61  ;;  %v21918_v61 = vld [vmem:[#allocation2 + $0x14bc] ss:$40 sps:$4 sm:$0xff]  }
 0x5a3   :  { %10430 = vmatpush2.bf16.msra.mxu0 %v21871_v1  ;;  %v21913_v1 = vld [vmem:[#allocation2 + $0xfb8] ss:$40 sps:$4 sm:$0xff]  }
 0x5a4   :  { %10431 = vmatprep.subr.bf16.mxu0 %v21879_v2  ;;  %v21921_v2 = vld [vmem:[#allocation2 + $0xf6c] ss:$40 sps:$4 sm:$0xff]  }
 0x5a5   :  { %10471 = vmatpush2.bf16.msra.mxu1 %v21874_v5  ;;  %v21916_v5 = vld [vmem:[#allocation2 + $0x14b8] ss:$40 sps:$4 sm:$0xff]  }
 0x5a6   :  { %10472 = vmatprep.subr.bf16.mxu1 %v21882_v13  ;;  %v21924_v13 = vld [vmem:[#allocation2 + $0x146c] ss:$40 sps:$4 sm:$0xff]  }
 0x5a7   :  { %10432 = vmatpush2.bf16.msra.mxu0 %v21877_v7  ;;  %v21919_v7 = vld [vmem:[#allocation2 + $0xf68] ss:$40 sps:$4 sm:$0xff]  }
 0x5a8   :  { %10483 = vmatprep.subr.bf16.mxu0 %v21885_v24  ;;  %v21927_v24 = vld [vmem:[#allocation2 + $0xf1c] ss:$40 sps:$4 sm:$0xff]  }
 0x5a9   :  { %10473 = vmatpush2.bf16.msra.mxu1 %v21880_v8  ;;  %v21922_v8 = vld [vmem:[#allocation2 + $0x1468] ss:$40 sps:$4 sm:$0xff]  }
 0x5aa   :  { %v10189_v20 = vpop.f32.mrf.mxu0  ;;  %10434 = vmatmul.mubr.bf16.vlgmr.msra.gmra.mxu0 %v23853_v55  ;;  %10524 = vmatprep.subr.bf16.mxu1 %v21888_v10  ;;  %v21930_v10 = vld [vmem:[#allocation2 + $0x141c] ss:$40 sps:$4 sm:$0xff]  }
 0x5ab   :  { %v10190_v21 = vadd.f32 %v10189_v20, %v5714_v11  ;;  %10484 = vmatpush1.bf16.msra.mxu0 %v21883_v26  ;;  %10515 = vmatprep.mubr.bf16.mxu0 %v23903_v4  ;;  %v21925_v11 = vld [vmem:[#allocation2 + $0xf18] ss:$40 sps:$4 sm:$0xff]   ;;  %v21933_v26 = vld [vmem:[#allocation2 + $0x13cc] ss:$40 sps:$4 sm:$0xff]   ;;  %v21939_v20 = vld [vmem:[#allocation2 + $0x137c] ss:$40 sps:$4 sm:$0xff]  }
 0x5ac   :  { %v10191_v23 = vpop.f32.mrf.mxu0  ;;  %v10230_v46 = vpop.f32.mrf.mxu1  ;;  %10475 = vmatmul.mubr.bf16.vlgmr.msra.gmra.mxu1 %v23881_v15  ;;  %10485 = vmatprep.subr.bf16.mxu0 %v21891_v12  ;;  %v21928_v12 = vld [vmem:[#allocation2 + $0x1418] ss:$40 sps:$4 sm:$0xff]  }
 0x5ad   :  { %v10192_v28 = vadd.f32 %v10191_v23, %v5718_v14  ;;  %v24004_v58 = vadd.f32 %v10230_v46, %v10190_v21  ;;  %10525 = vmatpush1.bf16.msra.mxu1 %v21886_v37  ;;  %10556 = vmatprep.mubr.bf16.mxu1 %v23921_v31  ;;  %v21936_v14 = vld [vmem:[#allocation2 + $0x18cc] ss:$40 sps:$4 sm:$0xff]   ;;  %v21931_v37 = vld [vmem:[#allocation2 + $0x13c8] ss:$40 sps:$4 sm:$0xff]   ;;  %v21942_v21 = vld [vmem:[#allocation2 + $0x187c] ss:$40 sps:$4 sm:$0xff]  }
 0x5ae   :  { %v10193_v29 = vpop.f32.mrf.mxu0  ;;  %v10232_v32 = vpop.f32.mrf.mxu1  ;;  %10526 = vmatprep.subr.bf16.mxu1 %v21894_v33  ;;  %v21934_v33 = vld [vmem:[#allocation2 + $0x18c8] ss:$40 sps:$4 sm:$0xff]   ;;  %v21945_v23 = vld [vmem:[#allocation2 + $0x132c] ss:$40 sps:$4 sm:$0xff]   ;;  %v21940_v46 = vld [vmem:[#allocation2 + $0x1878] ss:$40 sps:$4 sm:$0xff]  }
 0x5af   :  { %v24007_v47 = vadd.f32 %v10232_v32, %v10192_v28  ;;  %10486 = vmatpush1.bf16.msra.mxu0 %v21889_v22  ;;  %v21937_v22 = vld [vmem:[#allocation2 + $0x1378] ss:$40 sps:$4 sm:$0xff]   ;;  %v21943_v28 = vld [vmem:[#allocation2 + $0x1328] ss:$40 sps:$4 sm:$0xff]   ;;  %v21954_v32 = vld [vmem:[#allocation2 + $0x17dc] ss:$40 sps:$4 sm:$0xff]  }
 0x5b0   :  { %v10194_v57 = vpop.f32.mrf.mxu0  ;;  %10487 = vmatprep.subr.bf16.mxu0 %v21897_v25  ;;  %v10234_v48 = vpop.f32.mrf.mxu1  ;;  %v21948_v25 = vld [vmem:[#allocation2 + $0x182c] ss:$40 sps:$4 sm:$0xff]   ;;  %v21946_v29 = vld [vmem:[#allocation2 + $0x1828] ss:$40 sps:$4 sm:$0xff]  }
 0x5b1   :  { %10527 = vmatpush1.bf16.msra.mxu1 %v21892_v27  ;;  %v21951_v27 = vld [vmem:[#allocation2 + $0x12dc] ss:$40 sps:$4 sm:$0xff]   ;;  %v21952_v57 = vld [vmem:[#allocation2 + $0x17d8] ss:$40 sps:$4 sm:$0xff]   ;;  %v21955_v48 = vld [vmem:[#allocation2 + $0x1288] ss:$40 sps:$4 sm:$0xff]  }
 0x5b2   :  { %10528 = vmatprep.subr.bf16.mxu1 %v21900_v34  ;;  %v10235_v16 = vpop.f32.mrf.mxu1  ;;  %v21949_v34 = vld [vmem:[#allocation2 + $0x12d8] ss:$40 sps:$4 sm:$0xff]  }
 0x5b3   :  { %10488 = vmatpush1.bf16.msra.mxu0 %v21895_v51  ;;  %v21957_v51 = vld [vmem:[#allocation2 + $0x128c] ss:$40 sps:$4 sm:$0xff]   ;;  %v21966_v16 = vld [vmem:[#allocation2 + $0x173c] ss:$40 sps:$4 sm:$0xff]  }
 0x5b4   :  { %10489 = vmatprep.subr.bf16.mxu0 %v21903_v41  ;;  %v21960_v41 = vld [vmem:[#allocation2 + $0x178c] ss:$40 sps:$4 sm:$0xff]  }
 0x5b5   :  { %10529 = vmatpush1.bf16.msra.mxu1 %v21898_v42  ;;  %v21963_v42 = vld [vmem:[#allocation2 + $0x123c] ss:$40 sps:$4 sm:$0xff]  }
 0x5b6   :  { %10530 = vmatprep.subr.bf16.mxu1 %v21906_v43  ;;  %v21958_v43 = vld [vmem:[#allocation2 + $0x1788] ss:$40 sps:$4 sm:$0xff]  }
 0x5b7   :  { %10490 = vmatpush1.bf16.msra.mxu0 %v21901_v63  ;;  %v21961_v63 = vld [vmem:[#allocation2 + $0x1238] ss:$40 sps:$4 sm:$0xff]  }
 0x5b8   :  { %10491 = vmatprep.subr.bf16.mxu0 %v21909_v49  ;;  %v21969_v49 = vld [vmem:[#allocation2 + $0x11ec] ss:$40 sps:$4 sm:$0xff]  }
 0x5b9   :  { %10531 = vmatpush1.bf16.msra.mxu1 %v21904_v44  ;;  %v21964_v44 = vld [vmem:[#allocation2 + $0x1738] ss:$40 sps:$4 sm:$0xff]  }
 0x5ba   :  { %10532 = vmatprep.subr.bf16.mxu1 %v21912_v50  ;;  %v21972_v50 = vld [vmem:[#allocation2 + $0x16ec] ss:$40 sps:$4 sm:$0xff]  }
 0x5bb   :  { %10492 = vmatpush1.bf16.msra.mxu0 %v21907_v52  ;;  %v21967_v52 = vld [vmem:[#allocation2 + $0x11e8] ss:$40 sps:$4 sm:$0xff]  }
 0x5bc   :  { %10493 = vmatprep.subr.bf16.mxu0 %v21915_v9  ;;  %v21975_v9 = vld [vmem:[#allocation2 + $0x119c] ss:$40 sps:$4 sm:$0xff]  }
 0x5bd   :  { %10533 = vmatpush1.bf16.msra.mxu1 %v21910_v60  ;;  %v21970_v60 = vld [vmem:[#allocation2 + $0x16e8] ss:$40 sps:$4 sm:$0xff]  }
 0x5be   :  { %10534 = vmatprep.subr.bf16.mxu1 %v21918_v61  ;;  %v21978_v61 = vld [vmem:[#allocation2 + $0x169c] ss:$40 sps:$4 sm:$0xff]  }
 0x5bf   :  { %10494 = vmatpush1.bf16.msra.mxu0 %v21913_v1  ;;  %v21973_v1 = vld [vmem:[#allocation2 + $0x1198] ss:$40 sps:$4 sm:$0xff]  }
 0x5c0   :  { %10495 = vmatprep.subr.bf16.mxu0 %v21921_v2  ;;  %v21981_v2 = vld [vmem:[#allocation2 + $0x254] ss:$40 sps:$4 sm:$0xff]  }
 0x5c1   :  { %10535 = vmatpush1.bf16.msra.mxu1 %v21916_v5  ;;  %v21976_v5 = vld [vmem:[#allocation2 + $0x1698] ss:$40 sps:$4 sm:$0xff]  }
 0x5c2   :  { %10536 = vmatprep.subr.bf16.mxu1 %v21924_v13  ;;  %v21984_v13 = vld [vmem:[#allocation2 + $0x754] ss:$40 sps:$4 sm:$0xff]  }
 0x5c3   :  { %10496 = vmatpush1.bf16.msra.mxu0 %v21919_v7  ;;  %v21979_v7 = vld [vmem:[#allocation2 + $0x250] ss:$40 sps:$4 sm:$0xff]  }
 0x5c4   :  { %10497 = vmatprep.subr.bf16.mxu0 %v21927_v24  ;;  %v21987_v24 = vld [vmem:[#allocation2 + $0x204] ss:$40 sps:$4 sm:$0xff]  }
 0x5c5   :  { %10537 = vmatpush1.bf16.msra.mxu1 %v21922_v8  ;;  %v21982_v8 = vld [vmem:[#allocation2 + $0x750] ss:$40 sps:$4 sm:$0xff]  }
 0x5c6   :  { %10538 = vmatprep.subr.bf16.mxu1 %v21930_v10 }
 0x5c7   :  { %10498 = vmatpush1.bf16.msra.mxu0 %v21925_v11  ;;  %v21990_v11 = vld [vmem:[#allocation2 + $0x704] ss:$40 sps:$4 sm:$0xff]  }
 0x5c8   :  { %10499 = vmatprep.subr.bf16.mxu0 %v21933_v26 }
 0x5c9   :  { %10539 = vmatpush1.bf16.msra.mxu1 %v21928_v12  ;;  %v21985_v12 = vld [vmem:[#allocation2 + $0x200] ss:$40 sps:$4 sm:$0xff]  }
 0x5ca   :  { %10540 = vmatprep.subr.bf16.mxu1 %v21936_v14 }
 0x5cb   :  { %10500 = vmatpush2.bf16.msra.mxu0 %v21931_v37 }
 0x5cc   :  { %10501 = vmatprep.subr.bf16.mxu0 %v21939_v20  ;;  %v21993_v20 = vld [vmem:[#allocation2 + $0x1b4] ss:$40 sps:$4 sm:$0xff]  }
 0x5cd   :  { %10541 = vmatpush2.bf16.msra.mxu1 %v21934_v33 }
 0x5ce   :  { %10542 = vmatprep.subr.bf16.mxu1 %v21942_v21 }
 0x5cf   :  { %10502 = vmatpush2.bf16.msra.mxu0 %v21937_v22  ;;  %v21988_v22 = vld [vmem:[#allocation2 + $0x700] ss:$40 sps:$4 sm:$0xff]  }
 0x5d0   :  { %10503 = vmatprep.subr.bf16.mxu0 %v21945_v23 }
 0x5d1   :  { %10543 = vmatpush2.bf16.msra.mxu1 %v21940_v46  ;;  %v21996_v46 = vld [vmem:[#allocation2 + $0x6b4] ss:$40 sps:$4 sm:$0xff]  }
 0x5d2   :  { %10544 = vmatprep.subr.bf16.mxu1 %v21948_v25 }
 0x5d3   :  { %10504 = vmatpush2.bf16.msra.mxu0 %v21943_v28 }
 0x5d4   :  { %10505 = vmatprep.subr.bf16.mxu0 %v21951_v27  ;;  %v21999_v27 = vld [vmem:[#allocation2 + $0x164] ss:$40 sps:$4 sm:$0xff]  }
 0x5d5   :  { %10545 = vmatpush2.bf16.msra.mxu1 %v21946_v29 }
 0x5d6   :  { %10546 = vmatprep.subr.bf16.mxu1 %v21954_v32  ;;  %v22002_v32 = vld [vmem:[#allocation2 + $0x664] ss:$40 sps:$4 sm:$0xff]  }
 0x5d7   :  { %10506 = vmatpush2.bf16.msra.mxu0 %v21949_v34 }
 0x5d8   :  { %10507 = vmatprep.subr.bf16.mxu0 %v21957_v51  ;;  %v21997_v51 = vld [vmem:[#allocation2 + $0x160] ss:$40 sps:$4 sm:$0xff]  }
 0x5d9   :  { %10547 = vmatpush2.bf16.msra.mxu1 %v21952_v57  ;;  %v22000_v57 = vld [vmem:[#allocation2 + $0x660] ss:$40 sps:$4 sm:$0xff]  }
 0x5da   :  { %10548 = vmatprep.subr.bf16.mxu1 %v21960_v41  ;;  %v22008_v41 = vld [vmem:[#allocation2 + $0x614] ss:$40 sps:$4 sm:$0xff]  }
 0x5db   :  { %10508 = vmatpush2.bf16.msra.mxu0 %v21955_v48  ;;  %v22003_v48 = vld [vmem:[#allocation2 + $0x110] ss:$40 sps:$4 sm:$0xff]  }
 0x5dc   :  { %10509 = vmatprep.subr.bf16.mxu0 %v21963_v42  ;;  %v22011_v42 = vld [vmem:[#allocation2 + $0xc4] ss:$40 sps:$4 sm:$0xff]  }
 0x5dd   :  { %10549 = vmatpush2.bf16.msra.mxu1 %v21958_v43  ;;  %v22006_v43 = vld [vmem:[#allocation2 + $0x610] ss:$40 sps:$4 sm:$0xff]  }
 0x5de   :  { %10550 = vmatprep.subr.bf16.mxu1 %v21966_v16  ;;  %v22014_v16 = vld [vmem:[#allocation2 + $0x5c4] ss:$40 sps:$4 sm:$0xff]  }
 0x5df   :  { %10510 = vmatpush2.bf16.msra.mxu0 %v21961_v63  ;;  %v22009_v63 = vld [vmem:[#allocation2 + $0xc0] ss:$40 sps:$4 sm:$0xff]  }
 0x5e0   :  { %10511 = vmatprep.subr.bf16.mxu0 %v21969_v49  ;;  %v22017_v49 = vld [vmem:[#allocation2 + $0x74] ss:$40 sps:$4 sm:$0xff]  }
 0x5e1   :  { %10551 = vmatpush2.bf16.msra.mxu1 %v21964_v44  ;;  %v22012_v44 = vld [vmem:[#allocation2 + $0x5c0] ss:$40 sps:$4 sm:$0xff]  }
 0x5e2   :  { %10552 = vmatprep.subr.bf16.mxu1 %v21972_v50  ;;  %v22020_v50 = vld [vmem:[#allocation2 + $0x574] ss:$40 sps:$4 sm:$0xff]  }
 0x5e3   :  { %10512 = vmatpush2.bf16.msra.mxu0 %v21967_v52  ;;  %v22015_v52 = vld [vmem:[#allocation2 + $0x70] ss:$40 sps:$4 sm:$0xff]  }
 0x5e4   :  { %10513 = vmatprep.subr.bf16.mxu0 %v21975_v9  ;;  %v22023_v9 = vld [vmem:[#allocation2 + $0x24] ss:$40 sps:$4 sm:$0xff]  }
 0x5e5   :  { %10553 = vmatpush2.bf16.msra.mxu1 %v21970_v60  ;;  %v22018_v60 = vld [vmem:[#allocation2 + $0x570] ss:$40 sps:$4 sm:$0xff]  }
 0x5e6   :  { %10554 = vmatprep.subr.bf16.mxu1 %v21978_v61  ;;  %v22026_v61 = vld [vmem:[#allocation2 + $0x524] ss:$40 sps:$4 sm:$0xff]  }
 0x5e7   :  { %10514 = vmatpush2.bf16.msra.mxu0 %v21973_v1  ;;  %v22021_v1 = vld [vmem:[#allocation2 + $0x20] ss:$40 sps:$4 sm:$0xff]  }
 0x5e8   :  { %10565 = vmatprep.subr.bf16.mxu0 %v21981_v2  ;;  %v22029_v2 = vld [vmem:[#allocation2 + $0x4d4] ss:$40 sps:$4 sm:$0xff]  }
 0x5e9   :  { %10555 = vmatpush2.bf16.msra.mxu1 %v21976_v5  ;;  %v22024_v5 = vld [vmem:[#allocation2 + $0x520] ss:$40 sps:$4 sm:$0xff]  }
 0x5ea   :  { %v10271_v10 = vpop.f32.mrf.mxu0  ;;  %10516 = vmatmul.mubr.bf16.vlgmr.msra.gmra.mxu0 %v23901_v53  ;;  %10606 = vmatprep.subr.bf16.mxu1 %v21984_v13  ;;  %v22032_v13 = vld [vmem:[#allocation2 + $0x9d4] ss:$40 sps:$4 sm:$0xff]  }
 0x5eb   :  { %v10272_v26 = vadd.f32 %v10271_v10, %v24004_v58  ;;  %10566 = vmatpush1.bf16.msra.mxu0 %v21979_v7  ;;  %10597 = vmatprep.mubr.bf16.mxu0 %v23825_v39  ;;  %v21991_v39 = vld [vmem:[#allocation2 + $0x1b0] ss:$40 sps:$4 sm:$0xff]   ;;  %v22038_v10 = vld [vmem:[#allocation2 + $0x984] ss:$40 sps:$4 sm:$0xff]  }
 0x5ec   :  { %v10273_v14 = vpop.f32.mrf.mxu0  ;;  %v10312_v37 = vpop.f32.mrf.mxu1  ;;  %10557 = vmatmul.mubr.bf16.vlgmr.msra.gmra.mxu1 %v23919_v30  ;;  %10567 = vmatprep.subr.bf16.mxu0 %v21987_v24  ;;  %v22027_v7 = vld [vmem:[#allocation2 + $0x4d0] ss:$40 sps:$4 sm:$0xff]   ;;  %v22035_v24 = vld [vmem:[#allocation2 + $0x484] ss:$40 sps:$4 sm:$0xff]  }
 0x5ed   :  { %v10274_v33 = vadd.f32 %v10273_v14, %v24007_v47  ;;  %v24014_v21 = vadd.f32 %v10312_v37, %v10272_v26  ;;  %10607 = vmatpush1.bf16.msra.mxu1 %v21982_v8  ;;  %10638 = vmatprep.mubr.bf16.mxu1 %v23855_v56  ;;  %v21994_v47 = vld [vmem:[#allocation2 + $0x6b0] ss:$40 sps:$4 sm:$0xff]   ;;  %v22005_v56 = vld [vmem:[#allocation2 + $0x114] ss:$40 sps:$4 sm:$0xff]  }
 0x5ee   :  { %v10275_v23 = vpop.f32.mrf.mxu0  ;;  %v10314_v58 = vpop.f32.mrf.mxu1  ;;  %10608 = vmatprep.subr.bf16.mxu1 %v21990_v11  ;;  %v22030_v8 = vld [vmem:[#allocation2 + $0x9d0] ss:$40 sps:$4 sm:$0xff]   ;;  %v22033_v11 = vld [vmem:[#allocation2 + $0x480] ss:$40 sps:$4 sm:$0xff]   ;;  %v22041_v26 = vld [vmem:[#allocation2 + $0x434] ss:$40 sps:$4 sm:$0xff]  }
 0x5ef   :  { %v24017_v25 = vadd.f32 %v10314_v58, %v10274_v33  ;;  %10568 = vmatpush1.bf16.msra.mxu0 %v21985_v12  ;;  %v22036_v12 = vld [vmem:[#allocation2 + $0x980] ss:$40 sps:$4 sm:$0xff]   ;;  %v22044_v14 = vld [vmem:[#allocation2 + $0x934] ss:$40 sps:$4 sm:$0xff]   ;;  %v22039_v37 = vld [vmem:[#allocation2 + $0x430] ss:$40 sps:$4 sm:$0xff]  }
 0x5f0   :  { %v10276_v28 = vpop.f32.mrf.mxu0  ;;  %10569 = vmatprep.subr.bf16.mxu0 %v21993_v20  ;;  %v10316_v29 = vpop.f32.mrf.mxu1  ;;  %v22047_v20 = vld [vmem:[#allocation2 + $0x3e4] ss:$40 sps:$4 sm:$0xff]   ;;  %v22042_v33 = vld [vmem:[#allocation2 + $0x930] ss:$40 sps:$4 sm:$0xff]   ;;  %v22045_v23 = vld [vmem:[#allocation2 + $0x3e0] ss:$40 sps:$4 sm:$0xff]  }
 0x5f1   :  { %10609 = vmatpush1.bf16.msra.mxu1 %v21988_v22  ;;  %v22050_v22 = vld [vmem:[#allocation2 + $0x8e4] ss:$40 sps:$4 sm:$0xff]   ;;  %v22053_v58 = vld [vmem:[#allocation2 + $0x394] ss:$40 sps:$4 sm:$0xff]   ;;  %v22051_v28 = vld [vmem:[#allocation2 + $0x390] ss:$40 sps:$4 sm:$0xff]  }
 0x5f2   :  { %10610 = vmatprep.subr.bf16.mxu1 %v21996_v46  ;;  %v10317_v34 = vpop.f32.mrf.mxu1  ;;  %v22048_v46 = vld [vmem:[#allocation2 + $0x8e0] ss:$40 sps:$4 sm:$0xff]   ;;  %v22054_v29 = vld [vmem:[#allocation2 + $0x890] ss:$40 sps:$4 sm:$0xff]  }
 0x5f3   :  { %10570 = vmatpush1.bf16.msra.mxu0 %v21991_v39  ;;  %v22056_v39 = vld [vmem:[#allocation2 + $0x894] ss:$40 sps:$4 sm:$0xff]  }
 0x5f4   :  { %10571 = vmatprep.subr.bf16.mxu0 %v21999_v27  ;;  %v22059_v27 = vld [vmem:[#allocation2 + $0x344] ss:$40 sps:$4 sm:$0xff]   ;;  %v22065_v34 = vld [vmem:[#allocation2 + $0x2f4] ss:$40 sps:$4 sm:$0xff]  }
 0x5f5   :  { %10611 = vmatpush1.bf16.msra.mxu1 %v21994_v47  ;;  %v22062_v47 = vld [vmem:[#allocation2 + $0x844] ss:$40 sps:$4 sm:$0xff]  }
 0x5f6   :  { %10612 = vmatprep.subr.bf16.mxu1 %v22002_v32  ;;  %v22057_v32 = vld [vmem:[#allocation2 + $0x340] ss:$40 sps:$4 sm:$0xff]  }
 0x5f7   :  { %10572 = vmatpush1.bf16.msra.mxu0 %v21997_v51  ;;  %v22060_v51 = vld [vmem:[#allocation2 + $0x840] ss:$40 sps:$4 sm:$0xff]  }
 0x5f8   :  { %10573 = vmatprep.subr.bf16.mxu0 %v22005_v56  ;;  %v22068_v56 = vld [vmem:[#allocation2 + $0x7f4] ss:$40 sps:$4 sm:$0xff]  }
 0x5f9   :  { %10613 = vmatpush1.bf16.msra.mxu1 %v22000_v57  ;;  %v22063_v57 = vld [vmem:[#allocation2 + $0x2f0] ss:$40 sps:$4 sm:$0xff]  }
 0x5fa   :  { %10614 = vmatprep.subr.bf16.mxu1 %v22008_v41  ;;  %v22071_v41 = vld [vmem:[#allocation2 + $0x2a4] ss:$40 sps:$4 sm:$0xff]  }
 0x5fb   :  { %10574 = vmatpush1.bf16.msra.mxu0 %v22003_v48  ;;  %v22066_v48 = vld [vmem:[#allocation2 + $0x7f0] ss:$40 sps:$4 sm:$0xff]  }
 0x5fc   :  { %10575 = vmatprep.subr.bf16.mxu0 %v22011_v42  ;;  %v22074_v42 = vld [vmem:[#allocation2 + $0x7a4] ss:$40 sps:$4 sm:$0xff]  }
 0x5fd   :  { %10615 = vmatpush1.bf16.msra.mxu1 %v22006_v43  ;;  %v22069_v43 = vld [vmem:[#allocation2 + $0x2a0] ss:$40 sps:$4 sm:$0xff]  }
 0x5fe   :  { %10616 = vmatprep.subr.bf16.mxu1 %v22014_v16  ;;  %v22077_v16 = vld [vmem:[#allocation2 + $0xc54] ss:$40 sps:$4 sm:$0xff]  }
 0x5ff   :  { %10576 = vmatpush1.bf16.msra.mxu0 %v22009_v63  ;;  %v22072_v63 = vld [vmem:[#allocation2 + $0x7a0] ss:$40 sps:$4 sm:$0xff]  }
 0x600   :  { %10577 = vmatprep.subr.bf16.mxu0 %v22017_v49  ;;  %v22080_v49 = vld [vmem:[#allocation2 + $0x1154] ss:$40 sps:$4 sm:$0xff]  }
 0x601   :  { %10617 = vmatpush1.bf16.msra.mxu1 %v22012_v44  ;;  %v22075_v44 = vld [vmem:[#allocation2 + $0xc50] ss:$40 sps:$4 sm:$0xff]  }
 0x602   :  { %10618 = vmatprep.subr.bf16.mxu1 %v22020_v50  ;;  %v22083_v50 = vld [vmem:[#allocation2 + $0xc04] ss:$40 sps:$4 sm:$0xff]  }
 0x603   :  { %10578 = vmatpush1.bf16.msra.mxu0 %v22015_v52  ;;  %v22078_v52 = vld [vmem:[#allocation2 + $0x1150] ss:$40 sps:$4 sm:$0xff]  }
 0x604   :  { %10579 = vmatprep.subr.bf16.mxu0 %v22023_v9 }
 0x605   :  { %10619 = vmatpush1.bf16.msra.mxu1 %v22018_v60  ;;  %v22086_v60 = vld [vmem:[#allocation2 + $0x1104] ss:$40 sps:$4 sm:$0xff]  }
 0x606   :  { %10620 = vmatprep.subr.bf16.mxu1 %v22026_v61 }
 0x607   :  { %10580 = vmatpush1.bf16.msra.mxu0 %v22021_v1  ;;  %v22081_v1 = vld [vmem:[#allocation2 + $0xc00] ss:$40 sps:$4 sm:$0xff]  }
 0x608   :  { %10581 = vmatprep.subr.bf16.mxu0 %v22029_v2 }
 0x609   :  { %10621 = vmatpush1.bf16.msra.mxu1 %v22024_v5  ;;  %v22089_v5 = vld [vmem:[#allocation2 + $0xbb4] ss:$40 sps:$4 sm:$0xff]  }
 0x60a   :  { %10622 = vmatprep.subr.bf16.mxu1 %v22032_v13 }
 0x60b   :  { %10582 = vmatpush2.bf16.msra.mxu0 %v22027_v7 }
 0x60c   :  { %10583 = vmatprep.subr.bf16.mxu0 %v22035_v24 }
 0x60d   :  { %10623 = vmatpush2.bf16.msra.mxu1 %v22030_v8 }
 0x60e   :  { %10624 = vmatprep.subr.bf16.mxu1 %v22038_v10 }
 0x60f   :  { %10584 = vmatpush2.bf16.msra.mxu0 %v22033_v11 }
 0x610   :  { %10585 = vmatprep.subr.bf16.mxu0 %v22041_v26 }
 0x611   :  { %10625 = vmatpush2.bf16.msra.mxu1 %v22036_v12  ;;  %v22095_v12 = vld [vmem:[#allocation2 + $0xb64] ss:$40 sps:$4 sm:$0xff]  }
 0x612   :  { %10626 = vmatprep.subr.bf16.mxu1 %v22044_v14 }
 0x613   :  { %10586 = vmatpush2.bf16.msra.mxu0 %v22039_v37 }
 0x614   :  { %10587 = vmatprep.subr.bf16.mxu0 %v22047_v20 }
 0x615   :  { %10627 = vmatpush2.bf16.msra.mxu1 %v22042_v33  ;;  %v22093_v33 = vld [vmem:[#allocation2 + $0xb60] ss:$40 sps:$4 sm:$0xff]  }
 0x616   :  { %10628 = vmatprep.subr.bf16.mxu1 %v22050_v22  ;;  %v22101_v22 = vld [vmem:[#allocation2 + $0xb14] ss:$40 sps:$4 sm:$0xff]  }
 0x617   :  { %10588 = vmatpush2.bf16.msra.mxu0 %v22045_v23  ;;  %v22096_v23 = vld [vmem:[#allocation2 + $0x1060] ss:$40 sps:$4 sm:$0xff]  }
 0x618   :  { %10589 = vmatprep.subr.bf16.mxu0 %v22053_v58  ;;  %v22104_v58 = vld [vmem:[#allocation2 + $0x1014] ss:$40 sps:$4 sm:$0xff]  }
 0x619   :  { %10629 = vmatpush2.bf16.msra.mxu1 %v22048_v46  ;;  %v22099_v46 = vld [vmem:[#allocation2 + $0xb10] ss:$40 sps:$4 sm:$0xff]  }
 0x61a   :  { %10630 = vmatprep.subr.bf16.mxu1 %v22056_v39  ;;  %v22107_v39 = vld [vmem:[#allocation2 + $0xac4] ss:$40 sps:$4 sm:$0xff]  }
 0x61b   :  { %10590 = vmatpush2.bf16.msra.mxu0 %v22051_v28  ;;  %v22102_v28 = vld [vmem:[#allocation2 + $0x1010] ss:$40 sps:$4 sm:$0xff]  }
 0x61c   :  { %10591 = vmatprep.subr.bf16.mxu0 %v22059_v27  ;;  %v22110_v27 = vld [vmem:[#allocation2 + $0xfc4] ss:$40 sps:$4 sm:$0xff]  }
 0x61d   :  { %10631 = vmatpush2.bf16.msra.mxu1 %v22054_v29  ;;  %v22105_v29 = vld [vmem:[#allocation2 + $0xac0] ss:$40 sps:$4 sm:$0xff]  }
 0x61e   :  { %10632 = vmatprep.subr.bf16.mxu1 %v22062_v47  ;;  %v22113_v47 = vld [vmem:[#allocation2 + $0xa74] ss:$40 sps:$4 sm:$0xff]  }
 0x61f   :  { %10592 = vmatpush2.bf16.msra.mxu0 %v22057_v32  ;;  %v22108_v32 = vld [vmem:[#allocation2 + $0xfc0] ss:$40 sps:$4 sm:$0xff]  }
 0x620   :  { %10593 = vmatprep.subr.bf16.mxu0 %v22065_v34  ;;  %v22116_v34 = vld [vmem:[#allocation2 + $0xf74] ss:$40 sps:$4 sm:$0xff]  }
 0x621   :  { %10633 = vmatpush2.bf16.msra.mxu1 %v22060_v51  ;;  %v22111_v51 = vld [vmem:[#allocation2 + $0xa70] ss:$40 sps:$4 sm:$0xff]  }
 0x622   :  { %10634 = vmatprep.subr.bf16.mxu1 %v22068_v56  ;;  %v22119_v56 = vld [vmem:[#allocation2 + $0xa24] ss:$40 sps:$4 sm:$0xff]  }
 0x623   :  { %10594 = vmatpush2.bf16.msra.mxu0 %v22063_v57  ;;  %v22114_v57 = vld [vmem:[#allocation2 + $0xf70] ss:$40 sps:$4 sm:$0xff]  }
 0x624   :  { %10595 = vmatprep.subr.bf16.mxu0 %v22071_v41  ;;  %v22122_v41 = vld [vmem:[#allocation2 + $0xf24] ss:$40 sps:$4 sm:$0xff]  }
 0x625   :  { %10635 = vmatpush2.bf16.msra.mxu1 %v22066_v48  ;;  %v22117_v48 = vld [vmem:[#allocation2 + $0xa20] ss:$40 sps:$4 sm:$0xff]  }
 0x626   :  { %10636 = vmatprep.subr.bf16.mxu1 %v22074_v42  ;;  %v22125_v42 = vld [vmem:[#allocation2 + $0xed4] ss:$40 sps:$4 sm:$0xff]  }
 0x627   :  { %10596 = vmatpush2.bf16.msra.mxu0 %v22069_v43  ;;  %v22120_v43 = vld [vmem:[#allocation2 + $0xf20] ss:$40 sps:$4 sm:$0xff]  }
 0x628   :  { %10647 = vmatprep.subr.bf16.mxu0 %v22077_v16  ;;  %v22128_v16 = vld [vmem:[#allocation2 + $0x13d4] ss:$40 sps:$4 sm:$0xff]  }
 0x629   :  { %10637 = vmatpush2.bf16.msra.mxu1 %v22072_v63  ;;  %v22123_v63 = vld [vmem:[#allocation2 + $0xed0] ss:$40 sps:$4 sm:$0xff]  }
 0x62a   :  { %v10353_v9 = vpop.f32.mrf.mxu0  ;;  %10598 = vmatmul.mubr.bf16.vlgmr.msra.gmra.mxu0 %v23823_v38  ;;  %10688 = vmatprep.subr.bf16.mxu1 %v22080_v49  ;;  %v22084_v38 = vld [vmem:[#allocation2 + $0x1100] ss:$40 sps:$4 sm:$0xff]   ;;  %v22131_v49 = vld [vmem:[#allocation2 + $0xe84] ss:$40 sps:$4 sm:$0xff]  }
 0x62b   :  { %v10354_v61 = vadd.f32 %v10353_v9, %v24014_v21  ;;  %10648 = vmatpush1.bf16.msra.mxu0 %v22075_v44  ;;  %10679 = vmatprep.mubr.bf16.mxu0 %v23883_v36  ;;  %v22092_v21 = vld [vmem:[#allocation2 + $0x10b4] ss:$40 sps:$4 sm:$0xff]   ;;  %v22126_v44 = vld [vmem:[#allocation2 + $0x13d0] ss:$40 sps:$4 sm:$0xff]  }
 0x62c   :  { %v10355_v2 = vpop.f32.mrf.mxu0  ;;  %10639 = vmatmul.mubr.bf16.vlgmr.msra.gmra.mxu1 %v23853_v55  ;;  %10649 = vmatprep.subr.bf16.mxu0 %v22083_v50  ;;  %v24023_v13 = vpop.f32.mrf.mxu1  ;;  %v22087_v55 = vld [vmem:[#allocation2 + $0xbb0] ss:$40 sps:$4 sm:$0xff]   ;;  %v22134_v50 = vld [vmem:[#allocation2 + $0x1384] ss:$40 sps:$4 sm:$0xff]   ;;  %v22137_v9 = vld [vmem:[#allocation2 + $0xe34] ss:$40 sps:$4 sm:$0xff]  }
 0x62d   :  { %v10774_v7 = vmax.f32 %v10354_v61, 0.0  ;;  %v10356_v24 = vadd.f32 %v10355_v2, %v24017_v25  ;;  %10689 = vmatpush1.bf16.msra.mxu1 %v22078_v52  ;;  %10720 = vmatprep.mubr.bf16.mxu1 %v23903_v4  ;;  %v22090_v25 = vld [vmem:[#allocation2 + $0x10b0] ss:$40 sps:$4 sm:$0xff]   ;;  %v22098_v4 = vld [vmem:[#allocation2 + $0x1064] ss:$40 sps:$4 sm:$0xff]  }
 0x62e   :  { %v10357_v8 = vpop.f32.mrf.mxu0  ;;  %10690 = vmatprep.subr.bf16.mxu1 %v22086_v60  ;;  %v24027_v10 = vpop.f32.mrf.mxu1  ;;  %v22129_v52 = vld [vmem:[#allocation2 + $0xe80] ss:$40 sps:$4 sm:$0xff]   ;;  %v22140_v61 = vld [vmem:[#allocation2 + $0x1334] ss:$40 sps:$4 sm:$0xff]   ;;  %v22143_v2 = vld [vmem:[#allocation2 + $0xde4] ss:$40 sps:$4 sm:$0xff]  }
 0x62f   :  { %v24029_v36 = vpack.c.bf16 %v10774_v7, %v10774_v7  ;;  %v10775_v11 = vmax.f32 %v10356_v24, 0.0  ;;  %10650 = vmatpush1.bf16.msra.mxu0 %v22081_v1  ;;  %v22132_v60 = vld [vmem:[#allocation2 + $0x1380] ss:$40 sps:$4 sm:$0xff]   ;;  %v22135_v1 = vld [vmem:[#allocation2 + $0xe30] ss:$40 sps:$4 sm:$0xff]  }
 0x630   :  { %v10358_v26 = vpop.f32.mrf.mxu0  ;;  %10651 = vmatprep.subr.bf16.mxu0 %v22089_v5  ;;  %v10398_v14 = vpop.f32.mrf.mxu1  ;;  %v22138_v5 = vld [vmem:[#allocation2 + $0x1330] ss:$40 sps:$4 sm:$0xff]   ;;  %v22146_v7 = vld [vmem:[#allocation2 + $0x12e4] ss:$40 sps:$4 sm:$0xff]   ;;  %v22141_v24 = vld [vmem:[#allocation2 + $0xde0] ss:$40 sps:$4 sm:$0xff]  }
 0x631   :  { %v24031_v37 = vpack.c.bf16 %v10775_v11, %v10775_v11  ;;  %10691 = vmatpush1.bf16.msra.mxu1 %v22084_v38  ;;  %v22149_v38 = vld [vmem:[#allocation2 + $0xd94] ss:$40 sps:$4 sm:$0xff]   ;;  %v22144_v8 = vld [vmem:[#allocation2 + $0x12e0] ss:$40 sps:$4 sm:$0xff]   ;;  %v22147_v11 = vld [vmem:[#allocation2 + $0xd90] ss:$40 sps:$4 sm:$0xff]  }
 0x632   :  { %10692 = vmatprep.subr.bf16.mxu1 %v22092_v21  ;;  %v10399_v20 = vpop.f32.mrf.mxu1  ;;  %v22152_v21 = vld [vmem:[#allocation2 + $0x1294] ss:$40 sps:$4 sm:$0xff]   ;;  %v22150_v26 = vld [vmem:[#allocation2 + $0x1290] ss:$40 sps:$4 sm:$0xff]   ;;  %v22153_v14 = vld [vmem:[#allocation2 + $0xd40] ss:$40 sps:$4 sm:$0xff]  }
 0x633   :  { %10652 = vmatpush1.bf16.msra.mxu0 %v22087_v55  ;;  %v22155_v55 = vld [vmem:[#allocation2 + $0xd44] ss:$40 sps:$4 sm:$0xff]   ;;  %v22164_v20 = vld [vmem:[#allocation2 + $0x11f4] ss:$40 sps:$4 sm:$0xff]  }
 0x634   :  { %10653 = vmatprep.subr.bf16.mxu0 %v22095_v12  ;;  %v22158_v12 = vld [vmem:[#allocation2 + $0x1244] ss:$40 sps:$4 sm:$0xff]  }
 0x635   :  { %10693 = vmatpush1.bf16.msra.mxu1 %v22090_v25  ;;  %v22161_v25 = vld [vmem:[#allocation2 + $0xcf4] ss:$40 sps:$4 sm:$0xff]  }
 0x636   :  { %10694 = vmatprep.subr.bf16.mxu1 %v22098_v4  ;;  %v22156_v4 = vld [vmem:[#allocation2 + $0x1240] ss:$40 sps:$4 sm:$0xff]  }
 0x637   :  { %10654 = vmatpush1.bf16.msra.mxu0 %v22093_v33  ;;  %v22159_v33 = vld [vmem:[#allocation2 + $0xcf0] ss:$40 sps:$4 sm:$0xff]  }
 0x638   :  { %10655 = vmatprep.subr.bf16.mxu0 %v22101_v22  ;;  %v22167_v22 = vld [vmem:[#allocation2 + $0xca4] ss:$40 sps:$4 sm:$0xff]  }
 0x639   :  { %10695 = vmatpush1.bf16.msra.mxu1 %v22096_v23  ;;  %v22162_v23 = vld [vmem:[#allocation2 + $0x11f0] ss:$40 sps:$4 sm:$0xff]  }
 0x63a   :  { %10696 = vmatprep.subr.bf16.mxu1 %v22104_v58  ;;  %v22170_v58 = vld [vmem:[#allocation2 + $0x11a4] ss:$40 sps:$4 sm:$0xff]  }
 0x63b   :  { %10656 = vmatpush1.bf16.msra.mxu0 %v22099_v46  ;;  %v22220_v46 = vld [vmem:[#allocation3] sm:$0xff] }
 0x63c   :  { %10657 = vmatprep.subr.bf16.mxu0 %v22107_v39  ;;  %v5722_v39 = vrot.slane %v22220_v46, %v23886_v18 }
 0x63d   :  { %10697 = vmatpush1.bf16.msra.mxu1 %v22102_v28  ;;  %v22165_v28 = vld [vmem:[#allocation2 + $0xca0] ss:$40 sps:$4 sm:$0xff]  }
 0x63e   :  { %10698 = vmatprep.subr.bf16.mxu1 %v22110_v27  ;;  %v22173_v27 = vld [vmem:[#allocation2 + $0x1654] ss:$40 sps:$4 sm:$0xff]  }
 0x63f   :  { %10658 = vmatpush1.bf16.msra.mxu0 %v22105_v29  ;;  %v5726_v29 = vrot.slane %v22220_v46, %v23889_v19  ;;  %v22218_v46 = vld [vmem:[#allocation2 + $0x16a4] ss:$40 sps:$4 sm:$0xff]  }
 0x640   :  { %10659 = vmatprep.subr.bf16.mxu0 %v22113_v47  ;;  %v22168_v47 = vld [vmem:[#allocation2 + $0x11a0] ss:$40 sps:$4 sm:$0xff]  }
 0x641   :  { %10699 = vmatpush1.bf16.msra.mxu1 %v22108_v32  ;;  %v10395_v32 = vadd.f32 %v24023_v13, %v5722_v39  ;;  %v22179_v13 = vld [vmem:[#allocation2 + $0x15b4] ss:$40 sps:$4 sm:$0xff]   ;;  %v22216_v39 = vld [vmem:[#allocation2 + $0x16a0] ss:$40 sps:$4 sm:$0xff]  }
 0x642   :  { %10700 = vmatprep.subr.bf16.mxu1 %v22116_v34  ;;  %v22171_v34 = vld [vmem:[#allocation2 + $0x1650] ss:$40 sps:$4 sm:$0xff]  }
 0x643   :  { %10660 = vmatpush1.bf16.msra.mxu0 %v22111_v51  ;;  %v22176_v51 = vld [vmem:[#allocation2 + $0x1604] ss:$40 sps:$4 sm:$0xff]  }
 0x644   :  { %10661 = vmatprep.subr.bf16.mxu0 %v22119_v56  ;;  %v10397_v56 = vadd.f32 %v24027_v10, %v5726_v29 }
 0x645   :  { %10701 = vmatpush1.bf16.msra.mxu1 %v22114_v57 }
 0x646   :  { %10702 = vmatprep.subr.bf16.mxu1 %v22122_v41 }
 0x647   :  { %10662 = vmatpush1.bf16.msra.mxu0 %v22117_v48  ;;  %v22174_v48 = vld [vmem:[#allocation2 + $0x1600] ss:$40 sps:$4 sm:$0xff]  }
 0x648   :  { %10663 = vmatprep.subr.bf16.mxu0 %v22125_v42 }
 0x649   :  { %10703 = vmatpush1.bf16.msra.mxu1 %v22120_v43 }
 0x64a   :  { %10704 = vmatprep.subr.bf16.mxu1 %v22128_v16 }
 0x64b   :  { %10664 = vmatpush2.bf16.msra.mxu0 %v22123_v63 }
 0x64c   :  { %10665 = vmatprep.subr.bf16.mxu0 %v22131_v49 }
 0x64d   :  { %10705 = vmatpush2.bf16.msra.mxu1 %v22126_v44 }
 0x64e   :  { %10706 = vmatprep.subr.bf16.mxu1 %v22134_v50 }
 0x64f   :  { %10666 = vmatpush2.bf16.msra.mxu0 %v22129_v52  ;;  %v22182_v52 = vld [vmem:[#allocation2 + $0x1564] ss:$40 sps:$4 sm:$0xff]  }
 0x650   :  { %10667 = vmatprep.subr.bf16.mxu0 %v22137_v9 }
 0x651   :  { %10707 = vmatpush2.bf16.msra.mxu1 %v22132_v60  ;;  %v22180_v60 = vld [vmem:[#allocation2 + $0x1560] ss:$40 sps:$4 sm:$0xff]  }
 0x652   :  { %10708 = vmatprep.subr.bf16.mxu1 %v22140_v61  ;;  %v22183_v61 = vld [vmem:[#allocation2 + $0x1510] ss:$40 sps:$4 sm:$0xff]  }
 0x653   :  { %10668 = vmatpush2.bf16.msra.mxu0 %v22135_v1  ;;  %v22188_v1 = vld [vmem:[#allocation2 + $0x14c4] ss:$40 sps:$4 sm:$0xff]  }
 0x654   :  { %10669 = vmatprep.subr.bf16.mxu0 %v22143_v2  ;;  %v22186_v2 = vld [vmem:[#allocation2 + $0x14c0] ss:$40 sps:$4 sm:$0xff]  }
 0x655   :  { %10709 = vmatpush2.bf16.msra.mxu1 %v22138_v5  ;;  %v22191_v5 = vld [vmem:[#allocation2 + $0x1474] ss:$40 sps:$4 sm:$0xff]  }
 0x656   :  { %10710 = vmatprep.subr.bf16.mxu1 %v22146_v7  ;;  %v22189_v7 = vld [vmem:[#allocation2 + $0x1470] ss:$40 sps:$4 sm:$0xff]  }
 0x657   :  { %10670 = vmatpush2.bf16.msra.mxu0 %v22141_v24  ;;  %v22194_v24 = vld [vmem:[#allocation2 + $0x1424] ss:$40 sps:$4 sm:$0xff]  }
 0x658   :  { %10671 = vmatprep.subr.bf16.mxu0 %v22149_v38  ;;  %v22192_v38 = vld [vmem:[#allocation2 + $0x1420] ss:$40 sps:$4 sm:$0xff]  }
 0x659   :  { %10711 = vmatpush2.bf16.msra.mxu1 %v22144_v8  ;;  %v22197_v8 = vld [vmem:[#allocation2 + $0x18d4] ss:$40 sps:$4 sm:$0xff]  }
 0x65a   :  { %10712 = vmatprep.subr.bf16.mxu1 %v22152_v21  ;;  %v22195_v21 = vld [vmem:[#allocation2 + $0x18d0] ss:$40 sps:$4 sm:$0xff]  }
 0x65b   :  { %10672 = vmatpush2.bf16.msra.mxu0 %v22147_v11  ;;  %v22200_v11 = vld [vmem:[#allocation2 + $0x1884] ss:$40 sps:$4 sm:$0xff]  }
 0x65c   :  { %10673 = vmatprep.subr.bf16.mxu0 %v22155_v55  ;;  %v22198_v55 = vld [vmem:[#allocation2 + $0x1880] ss:$40 sps:$4 sm:$0xff]  }
 0x65d   :  { %10713 = vmatpush2.bf16.msra.mxu1 %v22150_v26  ;;  %v22203_v26 = vld [vmem:[#allocation2 + $0x1834] ss:$40 sps:$4 sm:$0xff]  }
 0x65e   :  { %10714 = vmatprep.subr.bf16.mxu1 %v22158_v12  ;;  %v22201_v12 = vld [vmem:[#allocation2 + $0x1830] ss:$40 sps:$4 sm:$0xff]  }
 0x65f   :  { %10674 = vmatpush2.bf16.msra.mxu0 %v22153_v14  ;;  %v22206_v14 = vld [vmem:[#allocation2 + $0x17e4] ss:$40 sps:$4 sm:$0xff]  }
 0x660   :  { %10675 = vmatprep.subr.bf16.mxu0 %v22161_v25  ;;  %v22204_v25 = vld [vmem:[#allocation2 + $0x17e0] ss:$40 sps:$4 sm:$0xff]  }
 0x661   :  { %10715 = vmatpush2.bf16.msra.mxu1 %v22156_v4  ;;  %v22209_v4 = vld [vmem:[#allocation2 + $0x1794] ss:$40 sps:$4 sm:$0xff]  }
 0x662   :  { %10716 = vmatprep.subr.bf16.mxu1 %v22164_v20  ;;  %v22207_v20 = vld [vmem:[#allocation2 + $0x1790] ss:$40 sps:$4 sm:$0xff]  }
 0x663   :  { %10676 = vmatpush2.bf16.msra.mxu0 %v22159_v33  ;;  %v22212_v33 = vld [vmem:[#allocation2 + $0x1744] ss:$40 sps:$4 sm:$0xff]  }
 0x664   :  { %10677 = vmatprep.subr.bf16.mxu0 %v22167_v22  ;;  %v22210_v22 = vld [vmem:[#allocation2 + $0x1740] ss:$40 sps:$4 sm:$0xff]  }
 0x665   :  { %10717 = vmatpush2.bf16.msra.mxu1 %v22162_v23  ;;  %v22215_v23 = vld [vmem:[#allocation2 + $0x16f4] ss:$40 sps:$4 sm:$0xff]  }
 0x666   :  { %10718 = vmatprep.subr.bf16.mxu1 %v22170_v58  ;;  %v22213_v58 = vld [vmem:[#allocation2 + $0x16f0] ss:$40 sps:$4 sm:$0xff]  }
 0x667   :  { %10678 = vmatpush2.bf16.msra.mxu0 %v22165_v28 }
 0x668   :  { %10729 = vmatprep.subr.bf16.mxu0 %v22173_v27 }
 0x669   :  { %10719 = vmatpush2.bf16.msra.mxu1 %v22168_v47 }
 0x66a   :  { %v10435_v57 = vpop.f32.mrf.mxu0  ;;  %10680 = vmatmul.mubr.bf16.vlgmr.msra.gmra.mxu0 %v23881_v15  ;;  %v22177_v15 = vld [vmem:[#allocation2 + $0x15b0] ss:$40 sps:$4 sm:$0xff]  }
 0x66b   :  { %v10436_v41 = vadd.f32 %v10435_v57, %v10395_v32  ;;  %10730 = vmatpush1.bf16.msra.mxu0 %v22171_v34  ;;  %10761 = vmatprep.mubr.bf16.mxu0 %v23921_v31 }
 0x66c   :  { %v10437_v42 = vpop.f32.mrf.mxu0  ;;  %v10476_v43 = vpop.f32.mrf.mxu1  ;;  %10721 = vmatmul.mubr.bf16.vlgmr.msra.gmra.mxu1 %v23901_v53  ;;  %10731 = vmatprep.subr.bf16.mxu0 %v22176_v51  ;;  %v22185_v53 = vld [vmem:[#allocation2 + $0x1514] ss:$40 sps:$4 sm:$0xff]  }
 0x66d   :  { %v10438_v16 = vadd.f32 %v10437_v42, %v10397_v56  ;;  %v24040_v63 = vadd.f32 %v10476_v43, %v10436_v41 }
 0x66e   :  { %v10439_v49 = vpop.f32.mrf.mxu0  ;;  %v10478_v10 = vpop.f32.mrf.mxu1 }
 0x66f   :  { %v24042_v44 = vadd.f32 %v10478_v10, %v10438_v16  ;;  %10732 = vmatpush1.bf16.msra.mxu0 %v22174_v48 }
 0x670   :  { %v10440_v50 = vpop.f32.mrf.mxu0  ;;  %10733 = vmatprep.subr.bf16.mxu0 %v22179_v13  ;;  %v10480_v9 = vpop.f32.mrf.mxu1 }
 0x672   :  { %v10481_v31 = vpop.f32.mrf.mxu1 }
 0x673   :  { %10734 = vmatpush1.bf16.msra.mxu0 %v22177_v15 }
 0x674   :  { %10735 = vmatprep.subr.bf16.mxu0 %v22182_v52 }
 0x677   :  { %10736 = vmatpush1.bf16.msra.mxu0 %v22180_v60 }
 0x678   :  { %10737 = vmatprep.subr.bf16.mxu0 %v22185_v53 }
 0x67b   :  { %10738 = vmatpush1.bf16.msra.mxu0 %v22183_v61 }
 0x67c   :  { %10739 = vmatprep.subr.bf16.mxu0 %v22188_v1 }
 0x67f   :  { %10740 = vmatpush1.bf16.msra.mxu0 %v22186_v2 }
 0x680   :  { %10741 = vmatprep.subr.bf16.mxu0 %v22191_v5 }
 0x683   :  { %10742 = vmatpush1.bf16.msra.mxu0 %v22189_v7 }
 0x684   :  { %10743 = vmatprep.subr.bf16.mxu0 %v22194_v24 }
 0x687   :  { %10744 = vmatpush1.bf16.msra.mxu0 %v22192_v38 }
 0x688   :  { %10745 = vmatprep.subr.bf16.mxu0 %v22197_v8 }
 0x68b   :  { %10746 = vmatpush2.bf16.msra.mxu0 %v22195_v21 }
 0x68c   :  { %10747 = vmatprep.subr.bf16.mxu0 %v22200_v11 }
 0x68f   :  { %10748 = vmatpush2.bf16.msra.mxu0 %v22198_v55 }
 0x690   :  { %10749 = vmatprep.subr.bf16.mxu0 %v22203_v26 }
 0x693   :  { %10750 = vmatpush2.bf16.msra.mxu0 %v22201_v12 }
 0x694   :  { %10751 = vmatprep.subr.bf16.mxu0 %v22206_v14 }
 0x697   :  { %10752 = vmatpush2.bf16.msra.mxu0 %v22204_v25 }
 0x698   :  { %10753 = vmatprep.subr.bf16.mxu0 %v22209_v4 }
 0x69b   :  { %10754 = vmatpush2.bf16.msra.mxu0 %v22207_v20 }
 0x69c   :  { %10755 = vmatprep.subr.bf16.mxu0 %v22212_v33 }
 0x69f   :  { %10756 = vmatpush2.bf16.msra.mxu0 %v22210_v22 }
 0x6a0   :  { %10757 = vmatprep.subr.bf16.mxu0 %v22215_v23 }
 0x6a3   :  { %10758 = vmatpush2.bf16.msra.mxu0 %v22213_v58 }
 0x6a4   :  { %10759 = vmatprep.subr.bf16.mxu0 %v22218_v46 }
 0x6a7   :  { %10760 = vmatpush2.bf16.msra.mxu0 %v22216_v39 }
 0x6aa   :  { %v10517_v28 = vpop.f32.mrf.mxu0  ;;  %10762 = vmatmul.mubr.bf16.vlgmr.msra.gmra.mxu0 %v23919_v30  ;;  %v5692_v30 = vld [vmem:[#allocation3 + $0x8] sm:$0x3] }
 0x6ab   :  { %v10518_v27 = vadd.f32 %v10517_v28, %v24040_v63  ;;  %v5730_v63 = vrot.slane %v5692_v30, %v23802_v35  ;;  %v5734_v10 = vrot.slane %v5692_v30, %v23805_v40 }
 0x6ac   :  { %v10519_v29 = vpop.f32.mrf.mxu0  ;;  %v10558_v47 = vpop.f32.mrf.mxu1 }
 0x6ad   :  { %v10520_v32 = vadd.f32 %v10519_v29, %v24042_v44  ;;  %v10559_v34 = vadd.f32 %v10558_v47, %v10518_v27 }
 0x6ae   :  { %v10521_v51 = vpop.f32.mrf.mxu0  ;;  %v10560_v56 = vpop.f32.mrf.mxu1 }
 0x6af   :  { %v10776_v57 = vmax.f32 %v10559_v34, 0.0  ;;  %v10561_v41 = vadd.f32 %v10560_v56, %v10520_v32 }
 0x6b0   :  { %v10522_v48 = vpop.f32.mrf.mxu0  ;;  %v10562_v42 = vpop.f32.mrf.mxu1 }
 0x6b1   :  { %v24047_v43 = vpack.c.bf16 %v10776_v57, %v10776_v57  ;;  %v10777_v13 = vmax.f32 %v10561_v41, 0.0 }
 0x6b2   :  { %v10563_v16 = vpop.f32.mrf.mxu1 }
 0x6b3   :  { %v24049_v49 = vpack.c.bf16 %v10777_v13, %v10777_v13 }
 0x6ea   :  { %v10599_v15 = vpop.f32.mrf.mxu0 }
 0x6eb   :  { %v10600_v44 = vadd.f32 %v10599_v15, %v5730_v63 }
 0x6ec   :  { %v10601_v50 = vpop.f32.mrf.mxu0  ;;  %v10640_v52 = vpop.f32.mrf.mxu1 }
 0x6ed   :  { %v10602_v9 = vadd.f32 %v10601_v50, %v5734_v10  ;;  %v10641_v31 = vadd.f32 %v10640_v52, %v10600_v44 }
 0x6ee   :  { %v10603_v60 = vpop.f32.mrf.mxu0  ;;  %v10642_v53 = vpop.f32.mrf.mxu1 }
 0x6ef   :  { %v10643_v61 = vadd.f32 %v10642_v53, %v10602_v9 }
 0x6f0   :  { %v10604_v1 = vpop.f32.mrf.mxu0  ;;  %v10644_v2 = vpop.f32.mrf.mxu1 }
 0x6f2   :  { %v10645_v5 = vpop.f32.mrf.mxu1 }
 0x72a   :  { %v10681_v7 = vpop.f32.mrf.mxu0 }
 0x72b   :  { %v10682_v12 = vadd.f32 %v10681_v7, %v10641_v31 }
 0x72c   :  { %v10683_v24 = vpop.f32.mrf.mxu0  ;;  %v10722_v38 = vpop.f32.mrf.mxu1 }
 0x72d   :  { %v10684_v14 = vadd.f32 %v10683_v24, %v10643_v61  ;;  %v10723_v25 = vadd.f32 %v10722_v38, %v10682_v12 }
 0x72e   :  { %v10685_v8 = vpop.f32.mrf.mxu0  ;;  %v10724_v21 = vpop.f32.mrf.mxu1 }
 0x72f   :  { %v10725_v20 = vadd.f32 %v10724_v21, %v10684_v14 }
 0x730   :  { %v10686_v11 = vpop.f32.mrf.mxu0  ;;  %v10726_v55 = vpop.f32.mrf.mxu1 }
 0x732   :  { %v10727_v26 = vpop.f32.mrf.mxu1 }
 0x76a   :  { %v10763_v4 = vpop.f32.mrf.mxu0 }
 0x76b   :  { %v10764_v33 = vadd.f32 %v10763_v4, %v10723_v25 }
 0x76c   :  { %v10765_v22 = vpop.f32.mrf.mxu0 }
 0x76d   :  { %v10778_v23 = vmax.f32 %v10764_v33, 0.0  ;;  %v10766_v58 = vadd.f32 %v10765_v22, %v10725_v20 }
 0x76e   :  { %v10767_v46 = vpop.f32.mrf.mxu0 }
 0x76f   :  { %v24053_v39 = vpack.c.bf16 %v10778_v23, %v10778_v23  ;;  %v10779_v28 = vmax.f32 %v10766_v58, 0.0 }
 0x770   :  { %v10768_v27 = vpop.f32.mrf.mxu0 }
 0x771   :  { %v24055_v29 = vpack.c.bf16 %v10779_v28, %v10779_v28 }
 0x772   :  { %23671 = dma.done.wait [#allocation8 + $0x2], 102400 }
 0x773   :  { %23672 = vsyncadd [#allocation8 + $0x2], 4294864896 }
 0x774   :  { %23673 = dma.done.wait [#allocation8 + $0x3], 160 }
 0x775   :  { %23674 = vsyncadd [#allocation8 + $0x3], 4294967136  ;;  %15680 = vmatprep.mubr.bf16.mxu1 %v23969_v6  ;;  %15721 = vmatprep.mubr.bf16.mxu0 %v23995_v54  ;;  %v22221_v47 = vld [vmem:[#allocation4 + $0x234] ss:$40 sps:$4 sm:$0xff]   ;;  %v22223_v32 = vld [vmem:[#allocation4 + $0x230] ss:$40 sps:$4 sm:$0xff]  }
 0x776   :  { %15648 = vmatprep.subr.bf16.mxu1 %v22221_v47  ;;  %v22224_v34 = vld [vmem:[#allocation4 + $0x734] ss:$40 sps:$4 sm:$0xff]   ;;  %v22226_v51 = vld [vmem:[#allocation4 + $0x730] ss:$40 sps:$4 sm:$0xff]   ;;  %v22227_v56 = vld [vmem:[#allocation4 + $0x1e4] ss:$40 sps:$4 sm:$0xff]  }
 0x777   :  { %15649 = vmatpush1.bf16.msra.mxu1 %v22223_v32  ;;  %v22229_v57 = vld [vmem:[#allocation4 + $0x1e0] ss:$40 sps:$4 sm:$0xff]   ;;  %15689 = vmatprep.subr.bf16.mxu0 %v22224_v34  ;;  %v22230_v41 = vld [vmem:[#allocation4 + $0x6e4] ss:$40 sps:$4 sm:$0xff]   ;;  %v22233_v42 = vld [vmem:[#allocation4 + $0x194] ss:$40 sps:$4 sm:$0xff]  }
 0x778   :  { %15690 = vmatpush1.bf16.msra.mxu0 %v22226_v51  ;;  %15650 = vmatprep.subr.bf16.mxu1 %v22227_v56  ;;  %v22232_v48 = vld [vmem:[#allocation4 + $0x6e0] ss:$40 sps:$4 sm:$0xff]   ;;  %v22235_v13 = vld [vmem:[#allocation4 + $0x190] ss:$40 sps:$4 sm:$0xff]   ;;  %v22236_v16 = vld [vmem:[#allocation4 + $0x694] ss:$40 sps:$4 sm:$0xff]  }
 0x779   :  { %15691 = vmatprep.subr.bf16.mxu0 %v22230_v41  ;;  %v22239_v30 = vld [vmem:[#allocation4 + $0x144] ss:$40 sps:$4 sm:$0xff]   ;;  %v22238_v63 = vld [vmem:[#allocation4 + $0x690] ss:$40 sps:$4 sm:$0xff]   ;;  %v22241_v15 = vld [vmem:[#allocation4 + $0x140] ss:$40 sps:$4 sm:$0xff]  }
 0x77a   :  { %v22242_v10 = vld [vmem:[#allocation4 + $0x644] ss:$40 sps:$4 sm:$0xff]   ;;  %v22245_v44 = vld [vmem:[#allocation4 + $0xf4] ss:$40 sps:$4 sm:$0xff]   ;;  %v22244_v50 = vld [vmem:[#allocation4 + $0x640] ss:$40 sps:$4 sm:$0xff]  }
 0x77b   :  { %15651 = vmatpush1.bf16.msra.mxu1 %v22229_v57  ;;  %v22248_v52 = vld [vmem:[#allocation4 + $0x5f4] ss:$40 sps:$4 sm:$0xff]   ;;  %v22247_v9 = vld [vmem:[#allocation4 + $0xf0] ss:$40 sps:$4 sm:$0xff]   ;;  %v22251_v31 = vld [vmem:[#allocation4 + $0xa4] ss:$40 sps:$4 sm:$0xff]  }
 0x77c   :  { %15652 = vmatprep.subr.bf16.mxu1 %v22233_v42  ;;  %15692 = vmatpush1.bf16.msra.mxu0 %v22232_v48  ;;  %v22250_v60 = vld [vmem:[#allocation4 + $0x5f0] ss:$40 sps:$4 sm:$0xff]   ;;  %v22254_v53 = vld [vmem:[#allocation4 + $0x5a4] ss:$40 sps:$4 sm:$0xff]   ;;  %v22253_v61 = vld [vmem:[#allocation4 + $0xa0] ss:$40 sps:$4 sm:$0xff]  }
 0x77d   :  { %15693 = vmatprep.subr.bf16.mxu0 %v22236_v16  ;;  %v22257_v1 = vld [vmem:[#allocation4 + $0x54] ss:$40 sps:$4 sm:$0xff]   ;;  %v22256_v2 = vld [vmem:[#allocation4 + $0x5a0] ss:$40 sps:$4 sm:$0xff]   ;;  %v22259_v7 = vld [vmem:[#allocation4 + $0x50] ss:$40 sps:$4 sm:$0xff]  }
 0x77e   :  { %v22260_v5 = vld [vmem:[#allocation4 + $0x554] ss:$40 sps:$4 sm:$0xff]   ;;  %v22263_v24 = vld [vmem:[#allocation4 + $0x4] ss:$40 sps:$4 sm:$0xff]   ;;  %v22262_v38 = vld [vmem:[#allocation4 + $0x550] ss:$40 sps:$4 sm:$0xff]  }
 0x77f   :  { %15653 = vmatpush1.bf16.msra.mxu1 %v22235_v13  ;;  %v22266_v8 = vld [vmem:[#allocation4 + $0x504] ss:$40 sps:$4 sm:$0xff]   ;;  %v22265_v21 = vld [vmem:[#allocation4] ss:$40 sps:$4 sm:$0xff]   ;;  %v22269_v11 = vld [vmem:[#allocation4 + $0x4b4] ss:$40 sps:$4 sm:$0xff]  }
 0x780   :  { %15654 = vmatprep.subr.bf16.mxu1 %v22239_v30  ;;  %15694 = vmatpush1.bf16.msra.mxu0 %v22238_v63  ;;  %v22268_v55 = vld [vmem:[#allocation4 + $0x500] ss:$40 sps:$4 sm:$0xff]   ;;  %v22272_v26 = vld [vmem:[#allocation4 + $0x9b4] ss:$40 sps:$4 sm:$0xff]   ;;  %v22271_v12 = vld [vmem:[#allocation4 + $0x4b0] ss:$40 sps:$4 sm:$0xff]  }
 0x781   :  { %15695 = vmatprep.subr.bf16.mxu0 %v22242_v10  ;;  %v22275_v14 = vld [vmem:[#allocation4 + $0x464] ss:$40 sps:$4 sm:$0xff]   ;;  %v22274_v25 = vld [vmem:[#allocation4 + $0x9b0] ss:$40 sps:$4 sm:$0xff]   ;;  %v22277_v20 = vld [vmem:[#allocation4 + $0x460] ss:$40 sps:$4 sm:$0xff]  }
 0x782   :  { %v22278_v4 = vld [vmem:[#allocation4 + $0x964] ss:$40 sps:$4 sm:$0xff]   ;;  %v22281_v33 = vld [vmem:[#allocation4 + $0x414] ss:$40 sps:$4 sm:$0xff]   ;;  %v22280_v22 = vld [vmem:[#allocation4 + $0x960] ss:$40 sps:$4 sm:$0xff]  }
 0x783   :  { %15655 = vmatpush1.bf16.msra.mxu1 %v22241_v15  ;;  %v22284_v23 = vld [vmem:[#allocation4 + $0x914] ss:$40 sps:$4 sm:$0xff]   ;;  %v22283_v58 = vld [vmem:[#allocation4 + $0x410] ss:$40 sps:$4 sm:$0xff]   ;;  %v22287_v46 = vld [vmem:[#allocation4 + $0x3c4] ss:$40 sps:$4 sm:$0xff]  }
 0x784   :  { %15656 = vmatprep.subr.bf16.mxu1 %v22245_v44  ;;  %15696 = vmatpush1.bf16.msra.mxu0 %v22244_v50  ;;  %v22286_v28 = vld [vmem:[#allocation4 + $0x910] ss:$40 sps:$4 sm:$0xff]   ;;  %v22290_v27 = vld [vmem:[#allocation4 + $0x8c4] ss:$40 sps:$4 sm:$0xff]   ;;  %v22289_v47 = vld [vmem:[#allocation4 + $0x3c0] ss:$40 sps:$4 sm:$0xff]  }
 0x785   :  { %15697 = vmatprep.subr.bf16.mxu0 %v22248_v52  ;;  %v22293_v32 = vld [vmem:[#allocation4 + $0x374] ss:$40 sps:$4 sm:$0xff]   ;;  %v22292_v34 = vld [vmem:[#allocation4 + $0x8c0] ss:$40 sps:$4 sm:$0xff]   ;;  %v22295_v56 = vld [vmem:[#allocation4 + $0x370] ss:$40 sps:$4 sm:$0xff]  }
 0x786   :  { %v22296_v51 = vld [vmem:[#allocation4 + $0x874] ss:$40 sps:$4 sm:$0xff]   ;;  %v22299_v57 = vld [vmem:[#allocation4 + $0x324] ss:$40 sps:$4 sm:$0xff]   ;;  %v22298_v41 = vld [vmem:[#allocation4 + $0x870] ss:$40 sps:$4 sm:$0xff]  }
 0x787   :  { %15657 = vmatpush1.bf16.msra.mxu1 %v22247_v9  ;;  %v22302_v48 = vld [vmem:[#allocation4 + $0x824] ss:$40 sps:$4 sm:$0xff]   ;;  %v22301_v42 = vld [vmem:[#allocation4 + $0x320] ss:$40 sps:$4 sm:$0xff]   ;;  %v22305_v13 = vld [vmem:[#allocation4 + $0x2d4] ss:$40 sps:$4 sm:$0xff]  }
 0x788   :  { %15658 = vmatprep.subr.bf16.mxu1 %v22251_v31  ;;  %15698 = vmatpush1.bf16.msra.mxu0 %v22250_v60  ;;  %v22304_v16 = vld [vmem:[#allocation4 + $0x820] ss:$40 sps:$4 sm:$0xff]   ;;  %v22308_v30 = vld [vmem:[#allocation4 + $0x7d4] ss:$40 sps:$4 sm:$0xff]   ;;  %v22307_v63 = vld [vmem:[#allocation4 + $0x2d0] ss:$40 sps:$4 sm:$0xff]  }
 0x789   :  { %15699 = vmatprep.subr.bf16.mxu0 %v22254_v53  ;;  %v22311_v10 = vld [vmem:[#allocation4 + $0x284] ss:$40 sps:$4 sm:$0xff]   ;;  %v22310_v15 = vld [vmem:[#allocation4 + $0x7d0] ss:$40 sps:$4 sm:$0xff]   ;;  %v22313_v50 = vld [vmem:[#allocation4 + $0x280] ss:$40 sps:$4 sm:$0xff]  }
 0x78a   :  { %v22314_v44 = vld [vmem:[#allocation4 + $0x784] ss:$40 sps:$4 sm:$0xff]   ;;  %v22319_v52 = vld [vmem:[#allocation4 + $0xc34] ss:$40 sps:$4 sm:$0xff]   ;;  %v22316_v9 = vld [vmem:[#allocation4 + $0x780] ss:$40 sps:$4 sm:$0xff]  }
 0x78b   :  { %15659 = vmatpush1.bf16.msra.mxu1 %v22253_v61  ;;  %v22322_v31 = vld [vmem:[#allocation4 + $0x1134] ss:$40 sps:$4 sm:$0xff]   ;;  %v22317_v60 = vld [vmem:[#allocation4 + $0xc30] ss:$40 sps:$4 sm:$0xff]   ;;  %v22325_v53 = vld [vmem:[#allocation4 + $0xbe4] ss:$40 sps:$4 sm:$0xff]  }
 0x78c   :  { %15660 = vmatprep.subr.bf16.mxu1 %v22257_v1  ;;  %15700 = vmatpush1.bf16.msra.mxu0 %v22256_v2  ;;  %v22320_v61 = vld [vmem:[#allocation4 + $0x1130] ss:$40 sps:$4 sm:$0xff]   ;;  %v22328_v1 = vld [vmem:[#allocation4 + $0x10e4] ss:$40 sps:$4 sm:$0xff]   ;;  %v22323_v2 = vld [vmem:[#allocation4 + $0xbe0] ss:$40 sps:$4 sm:$0xff]  }
 0x78d   :  { %15701 = vmatprep.subr.bf16.mxu0 %v22260_v5  ;;  %v22331_v5 = vld [vmem:[#allocation4 + $0xb94] ss:$40 sps:$4 sm:$0xff]  }
 0x78f   :  { %15661 = vmatpush1.bf16.msra.mxu1 %v22259_v7  ;;  %v22326_v7 = vld [vmem:[#allocation4 + $0x10e0] ss:$40 sps:$4 sm:$0xff]  }
 0x790   :  { %15662 = vmatprep.subr.bf16.mxu1 %v22263_v24  ;;  %15702 = vmatpush1.bf16.msra.mxu0 %v22262_v38  ;;  %v22334_v24 = vld [vmem:[#allocation4 + $0x1094] ss:$40 sps:$4 sm:$0xff]   ;;  %v22329_v38 = vld [vmem:[#allocation4 + $0xb90] ss:$40 sps:$4 sm:$0xff]  }
 0x791   :  { %15703 = vmatprep.subr.bf16.mxu0 %v22266_v8  ;;  %v22337_v8 = vld [vmem:[#allocation4 + $0xb44] ss:$40 sps:$4 sm:$0xff]  }
 0x793   :  { %15663 = vmatpush1.bf16.msra.mxu1 %v22265_v21  ;;  %v22332_v21 = vld [vmem:[#allocation4 + $0x1090] ss:$40 sps:$4 sm:$0xff]  }
 0x794   :  { %15664 = vmatprep.subr.bf16.mxu1 %v22269_v11  ;;  %15704 = vmatpush1.bf16.msra.mxu0 %v22268_v55  ;;  %v22340_v11 = vld [vmem:[#allocation4 + $0x1044] ss:$40 sps:$4 sm:$0xff]   ;;  %v22335_v55 = vld [vmem:[#allocation4 + $0xb40] ss:$40 sps:$4 sm:$0xff]  }
 0x795   :  { %15705 = vmatprep.subr.bf16.mxu0 %v22272_v26  ;;  %v22343_v26 = vld [vmem:[#allocation4 + $0xaf4] ss:$40 sps:$4 sm:$0xff]  }
 0x797   :  { %15665 = vmatpush2.bf16.msra.mxu1 %v22271_v12  ;;  %v22338_v12 = vld [vmem:[#allocation4 + $0x1040] ss:$40 sps:$4 sm:$0xff]  }
 0x798   :  { %15666 = vmatprep.subr.bf16.mxu1 %v22275_v14  ;;  %15706 = vmatpush2.bf16.msra.mxu0 %v22274_v25  ;;  %v22346_v14 = vld [vmem:[#allocation4 + $0xff4] ss:$40 sps:$4 sm:$0xff]   ;;  %v22341_v25 = vld [vmem:[#allocation4 + $0xaf0] ss:$40 sps:$4 sm:$0xff]  }
 0x799   :  { %15707 = vmatprep.subr.bf16.mxu0 %v22278_v4  ;;  %v22349_v4 = vld [vmem:[#allocation4 + $0xaa4] ss:$40 sps:$4 sm:$0xff]  }
 0x79b   :  { %15667 = vmatpush2.bf16.msra.mxu1 %v22277_v20  ;;  %v22344_v20 = vld [vmem:[#allocation4 + $0xff0] ss:$40 sps:$4 sm:$0xff]  }
 0x79c   :  { %15668 = vmatprep.subr.bf16.mxu1 %v22281_v33  ;;  %15708 = vmatpush2.bf16.msra.mxu0 %v22280_v22  ;;  %v22352_v33 = vld [vmem:[#allocation4 + $0xfa4] ss:$40 sps:$4 sm:$0xff]   ;;  %v22347_v22 = vld [vmem:[#allocation4 + $0xaa0] ss:$40 sps:$4 sm:$0xff]  }
 0x79d   :  { %15709 = vmatprep.subr.bf16.mxu0 %v22284_v23  ;;  %v22355_v23 = vld [vmem:[#allocation4 + $0xa54] ss:$40 sps:$4 sm:$0xff]  }
 0x79f   :  { %15669 = vmatpush2.bf16.msra.mxu1 %v22283_v58  ;;  %v22350_v58 = vld [vmem:[#allocation4 + $0xfa0] ss:$40 sps:$4 sm:$0xff]  }
 0x7a0   :  { %15670 = vmatprep.subr.bf16.mxu1 %v22287_v46  ;;  %15710 = vmatpush2.bf16.msra.mxu0 %v22286_v28  ;;  %v22358_v46 = vld [vmem:[#allocation4 + $0xf54] ss:$40 sps:$4 sm:$0xff]   ;;  %v22353_v28 = vld [vmem:[#allocation4 + $0xa50] ss:$40 sps:$4 sm:$0xff]  }
 0x7a1   :  { %15711 = vmatprep.subr.bf16.mxu0 %v22290_v27  ;;  %v22361_v27 = vld [vmem:[#allocation4 + $0xa04] ss:$40 sps:$4 sm:$0xff]  }
 0x7a3   :  { %15671 = vmatpush2.bf16.msra.mxu1 %v22289_v47  ;;  %v22356_v47 = vld [vmem:[#allocation4 + $0xf50] ss:$40 sps:$4 sm:$0xff]  }
 0x7a4   :  { %15672 = vmatprep.subr.bf16.mxu1 %v22293_v32  ;;  %15712 = vmatpush2.bf16.msra.mxu0 %v22292_v34  ;;  %v22364_v32 = vld [vmem:[#allocation4 + $0xf04] ss:$40 sps:$4 sm:$0xff]   ;;  %v22359_v34 = vld [vmem:[#allocation4 + $0xa00] ss:$40 sps:$4 sm:$0xff]  }
 0x7a5   :  { %15713 = vmatprep.subr.bf16.mxu0 %v22296_v51  ;;  %v22367_v51 = vld [vmem:[#allocation4 + $0xeb4] ss:$40 sps:$4 sm:$0xff]  }
 0x7a7   :  { %15673 = vmatpush2.bf16.msra.mxu1 %v22295_v56  ;;  %v22362_v56 = vld [vmem:[#allocation4 + $0xf00] ss:$40 sps:$4 sm:$0xff]  }
 0x7a8   :  { %15674 = vmatprep.subr.bf16.mxu1 %v22299_v57  ;;  %15714 = vmatpush2.bf16.msra.mxu0 %v22298_v41  ;;  %v22370_v57 = vld [vmem:[#allocation4 + $0x13b4] ss:$40 sps:$4 sm:$0xff]   ;;  %v22365_v41 = vld [vmem:[#allocation4 + $0xeb0] ss:$40 sps:$4 sm:$0xff]  }
 0x7a9   :  { %15715 = vmatprep.subr.bf16.mxu0 %v22302_v48  ;;  %v22373_v48 = vld [vmem:[#allocation4 + $0xe64] ss:$40 sps:$4 sm:$0xff]  }
 0x7ab   :  { %15675 = vmatpush2.bf16.msra.mxu1 %v22301_v42  ;;  %v22368_v42 = vld [vmem:[#allocation4 + $0x13b0] ss:$40 sps:$4 sm:$0xff]  }
 0x7ac   :  { %15676 = vmatprep.subr.bf16.mxu1 %v22305_v13  ;;  %15716 = vmatpush2.bf16.msra.mxu0 %v22304_v16  ;;  %v22376_v13 = vld [vmem:[#allocation4 + $0x1364] ss:$40 sps:$4 sm:$0xff]   ;;  %v22371_v16 = vld [vmem:[#allocation4 + $0xe60] ss:$40 sps:$4 sm:$0xff]  }
 0x7ad   :  { %15717 = vmatprep.subr.bf16.mxu0 %v22308_v30  ;;  %v22379_v30 = vld [vmem:[#allocation4 + $0xe14] ss:$40 sps:$4 sm:$0xff]  }
 0x7af   :  { %15677 = vmatpush2.bf16.msra.mxu1 %v22307_v63  ;;  %v22374_v63 = vld [vmem:[#allocation4 + $0x1360] ss:$40 sps:$4 sm:$0xff]  }
 0x7b0   :  { %15678 = vmatprep.subr.bf16.mxu1 %v22311_v10  ;;  %15718 = vmatpush2.bf16.msra.mxu0 %v22310_v15  ;;  %v22382_v10 = vld [vmem:[#allocation4 + $0x1314] ss:$40 sps:$4 sm:$0xff]   ;;  %v22377_v15 = vld [vmem:[#allocation4 + $0xe10] ss:$40 sps:$4 sm:$0xff]  }
 0x7b1   :  { %15719 = vmatprep.subr.bf16.mxu0 %v22314_v44  ;;  %v22385_v44 = vld [vmem:[#allocation4 + $0xdc4] ss:$40 sps:$4 sm:$0xff]  }
 0x7b3   :  { %15679 = vmatpush2.bf16.msra.mxu1 %v22313_v50  ;;  %v22380_v50 = vld [vmem:[#allocation4 + $0x1310] ss:$40 sps:$4 sm:$0xff]  }
 0x7b4   :  { %15730 = vmatprep.subr.bf16.mxu1 %v22319_v52  ;;  %15720 = vmatpush2.bf16.msra.mxu0 %v22316_v9  ;;  %v22388_v52 = vld [vmem:[#allocation4 + $0x12c4] ss:$40 sps:$4 sm:$0xff]   ;;  %v22383_v9 = vld [vmem:[#allocation4 + $0xdc0] ss:$40 sps:$4 sm:$0xff]  }
 0x7b5   :  { %15771 = vmatprep.subr.bf16.mxu0 %v22322_v31  ;;  %v22391_v31 = vld [vmem:[#allocation4 + $0xd74] ss:$40 sps:$4 sm:$0xff]  }
 0x7b6   :  { %15681 = vmatmul.mubr.bf16.vlgmr.msra.gmra.mxu1 %v23967_v59 }
 0x7b7   :  { %15731 = vmatpush1.bf16.msra.mxu1 %v22317_v60  ;;  %15762 = vmatprep.mubr.bf16.mxu1 %v24031_v37  ;;  %v22386_v60 = vld [vmem:[#allocation4 + $0x12c0] ss:$40 sps:$4 sm:$0xff]  }
 0x7b8   :  { %15722 = vmatmul.mubr.bf16.vlgmr.msra.gmra.mxu0 %v23993_v17  ;;  %15732 = vmatprep.subr.bf16.mxu1 %v22325_v53  ;;  %v22394_v53 = vld [vmem:[#allocation4 + $0x1274] ss:$40 sps:$4 sm:$0xff]  }
 0x7b9   :  { %15772 = vmatpush1.bf16.msra.mxu0 %v22320_v61  ;;  %15803 = vmatprep.mubr.bf16.mxu0 %v24049_v49  ;;  %v22389_v61 = vld [vmem:[#allocation4 + $0xd70] ss:$40 sps:$4 sm:$0xff]  }
 0x7ba   :  { %15773 = vmatprep.subr.bf16.mxu0 %v22328_v1  ;;  %v22397_v1 = vld [vmem:[#allocation4 + $0xd24] ss:$40 sps:$4 sm:$0xff]  }
 0x7bb   :  { %15733 = vmatpush1.bf16.msra.mxu1 %v22323_v2  ;;  %v22392_v2 = vld [vmem:[#allocation4 + $0x1270] ss:$40 sps:$4 sm:$0xff]  }
 0x7bc   :  { %15734 = vmatprep.subr.bf16.mxu1 %v22331_v5  ;;  %v22400_v5 = vld [vmem:[#allocation4 + $0x1224] ss:$40 sps:$4 sm:$0xff]  }
 0x7bd   :  { %15774 = vmatpush1.bf16.msra.mxu0 %v22326_v7  ;;  %v22395_v7 = vld [vmem:[#allocation4 + $0xd20] ss:$40 sps:$4 sm:$0xff]  }
 0x7be   :  { %15775 = vmatprep.subr.bf16.mxu0 %v22334_v24  ;;  %v22403_v24 = vld [vmem:[#allocation4 + $0xcd4] ss:$40 sps:$4 sm:$0xff]  }
 0x7bf   :  { %15735 = vmatpush1.bf16.msra.mxu1 %v22329_v38  ;;  %v22398_v38 = vld [vmem:[#allocation4 + $0x1220] ss:$40 sps:$4 sm:$0xff]  }
 0x7c0   :  { %15736 = vmatprep.subr.bf16.mxu1 %v22337_v8  ;;  %v22406_v8 = vld [vmem:[#allocation4 + $0x11d4] ss:$40 sps:$4 sm:$0xff]  }
 0x7c1   :  { %15776 = vmatpush1.bf16.msra.mxu0 %v22332_v21  ;;  %v22401_v21 = vld [vmem:[#allocation4 + $0xcd0] ss:$40 sps:$4 sm:$0xff]  }
 0x7c2   :  { %15777 = vmatprep.subr.bf16.mxu0 %v22340_v11  ;;  %v22409_v11 = vld [vmem:[#allocation4 + $0xc84] ss:$40 sps:$4 sm:$0xff]  }
 0x7c3   :  { %15737 = vmatpush1.bf16.msra.mxu1 %v22335_v55  ;;  %v22404_v55 = vld [vmem:[#allocation4 + $0x11d0] ss:$40 sps:$4 sm:$0xff]  }
 0x7c4   :  { %15738 = vmatprep.subr.bf16.mxu1 %v22343_v26  ;;  %v22412_v26 = vld [vmem:[#allocation4 + $0x1184] ss:$40 sps:$4 sm:$0xff]  }
 0x7c5   :  { %15778 = vmatpush1.bf16.msra.mxu0 %v22338_v12  ;;  %v22407_v12 = vld [vmem:[#allocation4 + $0xc80] ss:$40 sps:$4 sm:$0xff]  }
 0x7c6   :  { %15779 = vmatprep.subr.bf16.mxu0 %v22346_v14  ;;  %v22415_v14 = vld [vmem:[#allocation4 + $0x1634] ss:$40 sps:$4 sm:$0xff]  }
 0x7c7   :  { %15739 = vmatpush1.bf16.msra.mxu1 %v22341_v25  ;;  %v22410_v25 = vld [vmem:[#allocation4 + $0x1180] ss:$40 sps:$4 sm:$0xff]  }
 0x7c8   :  { %15740 = vmatprep.subr.bf16.mxu1 %v22349_v4  ;;  %v22418_v4 = vld [vmem:[#allocation4 + $0x23c] ss:$40 sps:$4 sm:$0xff]  }
 0x7c9   :  { %15780 = vmatpush1.bf16.msra.mxu0 %v22344_v20  ;;  %v22413_v20 = vld [vmem:[#allocation4 + $0x1630] ss:$40 sps:$4 sm:$0xff]  }
 0x7ca   :  { %15781 = vmatprep.subr.bf16.mxu0 %v22352_v33  ;;  %v22421_v33 = vld [vmem:[#allocation4 + $0x15e4] ss:$40 sps:$4 sm:$0xff]  }
 0x7cb   :  { %15741 = vmatpush1.bf16.msra.mxu1 %v22347_v22  ;;  %v22416_v22 = vld [vmem:[#allocation4 + $0x238] ss:$40 sps:$4 sm:$0xff]  }
 0x7cc   :  { %15742 = vmatprep.subr.bf16.mxu1 %v22355_v23  ;;  %v22424_v23 = vld [vmem:[#allocation4 + $0x1ec] ss:$40 sps:$4 sm:$0xff]  }
 0x7cd   :  { %15782 = vmatpush1.bf16.msra.mxu0 %v22350_v58  ;;  %v22419_v58 = vld [vmem:[#allocation4 + $0x15e0] ss:$40 sps:$4 sm:$0xff]  }
 0x7ce   :  { %15783 = vmatprep.subr.bf16.mxu0 %v22358_v46  ;;  %v22427_v46 = vld [vmem:[#allocation4 + $0x1594] ss:$40 sps:$4 sm:$0xff]  }
 0x7cf   :  { %15743 = vmatpush1.bf16.msra.mxu1 %v22353_v28  ;;  %v22422_v28 = vld [vmem:[#allocation4 + $0x1e8] ss:$40 sps:$4 sm:$0xff]  }
 0x7d0   :  { %15744 = vmatprep.subr.bf16.mxu1 %v22361_v27  ;;  %v22430_v27 = vld [vmem:[#allocation4 + $0x19c] ss:$40 sps:$4 sm:$0xff]  }
 0x7d1   :  { %15784 = vmatpush1.bf16.msra.mxu0 %v22356_v47  ;;  %v22425_v47 = vld [vmem:[#allocation4 + $0x1590] ss:$40 sps:$4 sm:$0xff]  }
 0x7d2   :  { %15785 = vmatprep.subr.bf16.mxu0 %v22364_v32  ;;  %v22433_v32 = vld [vmem:[#allocation4 + $0x1544] ss:$40 sps:$4 sm:$0xff]  }
 0x7d3   :  { %15745 = vmatpush1.bf16.msra.mxu1 %v22359_v34  ;;  %v22428_v34 = vld [vmem:[#allocation4 + $0x198] ss:$40 sps:$4 sm:$0xff]  }
 0x7d4   :  { %15746 = vmatprep.subr.bf16.mxu1 %v22367_v51  ;;  %v22436_v51 = vld [vmem:[#allocation4 + $0x14c] ss:$40 sps:$4 sm:$0xff]  }
 0x7d5   :  { %15786 = vmatpush1.bf16.msra.mxu0 %v22362_v56  ;;  %v22431_v56 = vld [vmem:[#allocation4 + $0x1540] ss:$40 sps:$4 sm:$0xff]  }
 0x7d6   :  { %15787 = vmatprep.subr.bf16.mxu0 %v22370_v57  ;;  %v22439_v57 = vld [vmem:[#allocation4 + $0x14f4] ss:$40 sps:$4 sm:$0xff]  }
 0x7d7   :  { %15747 = vmatpush2.bf16.msra.mxu1 %v22365_v41  ;;  %v22434_v41 = vld [vmem:[#allocation4 + $0x148] ss:$40 sps:$4 sm:$0xff]  }
 0x7d8   :  { %15748 = vmatprep.subr.bf16.mxu1 %v22373_v48  ;;  %v22442_v48 = vld [vmem:[#allocation4 + $0xfc] ss:$40 sps:$4 sm:$0xff]  }
 0x7d9   :  { %15788 = vmatpush2.bf16.msra.mxu0 %v22368_v42  ;;  %v22437_v42 = vld [vmem:[#allocation4 + $0x14f0] ss:$40 sps:$4 sm:$0xff]  }
 0x7da   :  { %15789 = vmatprep.subr.bf16.mxu0 %v22376_v13  ;;  %v22445_v13 = vld [vmem:[#allocation4 + $0x14a4] ss:$40 sps:$4 sm:$0xff]  }
 0x7db   :  { %15749 = vmatpush2.bf16.msra.mxu1 %v22371_v16  ;;  %v22440_v16 = vld [vmem:[#allocation4 + $0xf8] ss:$40 sps:$4 sm:$0xff]  }
 0x7dc   :  { %15750 = vmatprep.subr.bf16.mxu1 %v22379_v30  ;;  %v22448_v30 = vld [vmem:[#allocation4 + $0xac] ss:$40 sps:$4 sm:$0xff]  }
 0x7dd   :  { %15790 = vmatpush2.bf16.msra.mxu0 %v22374_v63  ;;  %v22443_v63 = vld [vmem:[#allocation4 + $0x14a0] ss:$40 sps:$4 sm:$0xff]  }
 0x7de   :  { %15791 = vmatprep.subr.bf16.mxu0 %v22382_v10  ;;  %v22451_v10 = vld [vmem:[#allocation4 + $0x1454] ss:$40 sps:$4 sm:$0xff]  }
 0x7df   :  { %15751 = vmatpush2.bf16.msra.mxu1 %v22377_v15  ;;  %v22446_v15 = vld [vmem:[#allocation4 + $0xa8] ss:$40 sps:$4 sm:$0xff]  }
 0x7e0   :  { %15752 = vmatprep.subr.bf16.mxu1 %v22385_v44  ;;  %v22454_v44 = vld [vmem:[#allocation4 + $0x5c] ss:$40 sps:$4 sm:$0xff]  }
 0x7e1   :  { %15792 = vmatpush2.bf16.msra.mxu0 %v22380_v50  ;;  %v22449_v50 = vld [vmem:[#allocation4 + $0x1450] ss:$40 sps:$4 sm:$0xff]  }
 0x7e2   :  { %15793 = vmatprep.subr.bf16.mxu0 %v22388_v52  ;;  %v22457_v52 = vld [vmem:[#allocation4 + $0x1404] ss:$40 sps:$4 sm:$0xff]  }
 0x7e3   :  { %15753 = vmatpush2.bf16.msra.mxu1 %v22383_v9  ;;  %v22452_v9 = vld [vmem:[#allocation4 + $0x58] ss:$40 sps:$4 sm:$0xff]  }
 0x7e4   :  { %15754 = vmatprep.subr.bf16.mxu1 %v22391_v31  ;;  %v22460_v31 = vld [vmem:[#allocation4 + $0xc] ss:$40 sps:$4 sm:$0xff]  }
 0x7e5   :  { %15794 = vmatpush2.bf16.msra.mxu0 %v22386_v60  ;;  %v22455_v60 = vld [vmem:[#allocation4 + $0x1400] ss:$40 sps:$4 sm:$0xff]  }
 0x7e6   :  { %15795 = vmatprep.subr.bf16.mxu0 %v22394_v53  ;;  %v22463_v53 = vld [vmem:[#allocation4 + $0x18b4] ss:$40 sps:$4 sm:$0xff]  }
 0x7e7   :  { %15755 = vmatpush2.bf16.msra.mxu1 %v22389_v61  ;;  %v22458_v61 = vld [vmem:[#allocation4 + $0x8] ss:$40 sps:$4 sm:$0xff]  }
 0x7e8   :  { %15756 = vmatprep.subr.bf16.mxu1 %v22397_v1  ;;  %v22466_v1 = vld [vmem:[#allocation4 + $0x4bc] ss:$40 sps:$4 sm:$0xff]  }
 0x7e9   :  { %15796 = vmatpush2.bf16.msra.mxu0 %v22392_v2  ;;  %v22461_v2 = vld [vmem:[#allocation4 + $0x18b0] ss:$40 sps:$4 sm:$0xff]  }
 0x7ea   :  { %15797 = vmatprep.subr.bf16.mxu0 %v22400_v5  ;;  %v22469_v5 = vld [vmem:[#allocation4 + $0x1864] ss:$40 sps:$4 sm:$0xff]  }
 0x7eb   :  { %15757 = vmatpush2.bf16.msra.mxu1 %v22395_v7  ;;  %v22464_v7 = vld [vmem:[#allocation4 + $0x4b8] ss:$40 sps:$4 sm:$0xff]  }
 0x7ec   :  { %15758 = vmatprep.subr.bf16.mxu1 %v22403_v24  ;;  %v22472_v24 = vld [vmem:[#allocation4 + $0x46c] ss:$40 sps:$4 sm:$0xff]  }
 0x7ed   :  { %15798 = vmatpush2.bf16.msra.mxu0 %v22398_v38  ;;  %v22467_v38 = vld [vmem:[#allocation4 + $0x1860] ss:$40 sps:$4 sm:$0xff]  }
 0x7ee   :  { %15799 = vmatprep.subr.bf16.mxu0 %v22406_v8  ;;  %v22475_v8 = vld [vmem:[#allocation4 + $0x1814] ss:$40 sps:$4 sm:$0xff]  }
 0x7ef   :  { %15759 = vmatpush2.bf16.msra.mxu1 %v22401_v21  ;;  %v22470_v21 = vld [vmem:[#allocation4 + $0x468] ss:$40 sps:$4 sm:$0xff]  }
 0x7f0   :  { %15760 = vmatprep.subr.bf16.mxu1 %v22409_v11  ;;  %v22478_v11 = vld [vmem:[#allocation4 + $0x41c] ss:$40 sps:$4 sm:$0xff]  }
 0x7f1   :  { %15800 = vmatpush2.bf16.msra.mxu0 %v22404_v55  ;;  %v22473_v55 = vld [vmem:[#allocation4 + $0x1810] ss:$40 sps:$4 sm:$0xff]  }
 0x7f2   :  { %15801 = vmatprep.subr.bf16.mxu0 %v22412_v26  ;;  %v22481_v26 = vld [vmem:[#allocation4 + $0x17c4] ss:$40 sps:$4 sm:$0xff]  }
 0x7f3   :  { %15761 = vmatpush2.bf16.msra.mxu1 %v22407_v12  ;;  %v22476_v12 = vld [vmem:[#allocation4 + $0x418] ss:$40 sps:$4 sm:$0xff]  }
 0x7f4   :  { %15812 = vmatprep.subr.bf16.mxu1 %v22415_v14  ;;  %v22484_v14 = vld [vmem:[#allocation4 + $0x3cc] ss:$40 sps:$4 sm:$0xff]  }
 0x7f5   :  { %15802 = vmatpush2.bf16.msra.mxu0 %v22410_v25  ;;  %v22479_v25 = vld [vmem:[#allocation4 + $0x17c0] ss:$40 sps:$4 sm:$0xff]  }
 0x7f6   :  { %15763 = vmatmul.mubr.bf16.vlgmr.msra.gmra.mxu1 %v24029_v36  ;;  %15853 = vmatprep.subr.bf16.mxu0 %v22418_v4  ;;  %v22487_v4 = vld [vmem:[#allocation4 + $0x1774] ss:$40 sps:$4 sm:$0xff]  }
 0x7f7   :  { %15813 = vmatpush1.bf16.msra.mxu1 %v22413_v20  ;;  %15844 = vmatprep.mubr.bf16.mxu1 %v24055_v29  ;;  %v22482_v20 = vld [vmem:[#allocation4 + $0x3c8] ss:$40 sps:$4 sm:$0xff]  }
 0x7f8   :  { %15804 = vmatmul.mubr.bf16.vlgmr.msra.gmra.mxu0 %v24047_v43  ;;  %15814 = vmatprep.subr.bf16.mxu1 %v22421_v33  ;;  %v22490_v33 = vld [vmem:[#allocation4 + $0x37c] ss:$40 sps:$4 sm:$0xff]  }
 0x7f9   :  { %15854 = vmatpush1.bf16.msra.mxu0 %v22416_v22  ;;  %15885 = vmatprep.mubr.bf16.mxu0 %v23969_v6  ;;  %v22485_v22 = vld [vmem:[#allocation4 + $0x1770] ss:$40 sps:$4 sm:$0xff]  }
 0x7fa   :  { %15855 = vmatprep.subr.bf16.mxu0 %v22424_v23  ;;  %v22493_v23 = vld [vmem:[#allocation4 + $0x1724] ss:$40 sps:$4 sm:$0xff]  }
 0x7fb   :  { %15815 = vmatpush1.bf16.msra.mxu1 %v22419_v58  ;;  %v22488_v58 = vld [vmem:[#allocation4 + $0x378] ss:$40 sps:$4 sm:$0xff]  }
 0x7fc   :  { %15816 = vmatprep.subr.bf16.mxu1 %v22427_v46  ;;  %v22496_v46 = vld [vmem:[#allocation4 + $0x32c] ss:$40 sps:$4 sm:$0xff]  }
 0x7fd   :  { %15856 = vmatpush1.bf16.msra.mxu0 %v22422_v28  ;;  %v22491_v28 = vld [vmem:[#allocation4 + $0x1720] ss:$40 sps:$4 sm:$0xff]  }
 0x7fe   :  { %15857 = vmatprep.subr.bf16.mxu0 %v22430_v27  ;;  %v22499_v27 = vld [vmem:[#allocation4 + $0x16d4] ss:$40 sps:$4 sm:$0xff]  }
 0x7ff   :  { %15817 = vmatpush1.bf16.msra.mxu1 %v22425_v47  ;;  %v22494_v47 = vld [vmem:[#allocation4 + $0x328] ss:$40 sps:$4 sm:$0xff]  }
 0x800   :  { %15818 = vmatprep.subr.bf16.mxu1 %v22433_v32  ;;  %v22502_v32 = vld [vmem:[#allocation4 + $0x2dc] ss:$40 sps:$4 sm:$0xff]  }
 0x801   :  { %15858 = vmatpush1.bf16.msra.mxu0 %v22428_v34  ;;  %v22497_v34 = vld [vmem:[#allocation4 + $0x16d0] ss:$40 sps:$4 sm:$0xff]  }
 0x802   :  { %15859 = vmatprep.subr.bf16.mxu0 %v22436_v51  ;;  %v22505_v51 = vld [vmem:[#allocation4 + $0x1684] ss:$40 sps:$4 sm:$0xff]  }
 0x803   :  { %15819 = vmatpush1.bf16.msra.mxu1 %v22431_v56  ;;  %v22500_v56 = vld [vmem:[#allocation4 + $0x2d8] ss:$40 sps:$4 sm:$0xff]  }
 0x804   :  { %15820 = vmatprep.subr.bf16.mxu1 %v22439_v57  ;;  %v22508_v57 = vld [vmem:[#allocation4 + $0x28c] ss:$40 sps:$4 sm:$0xff]  }
 0x805   :  { %15860 = vmatpush1.bf16.msra.mxu0 %v22434_v41  ;;  %v22503_v41 = vld [vmem:[#allocation4 + $0x1680] ss:$40 sps:$4 sm:$0xff]  }
 0x806   :  { %15861 = vmatprep.subr.bf16.mxu0 %v22442_v48  ;;  %v22511_v48 = vld [vmem:[#allocation4 + $0x73c] ss:$40 sps:$4 sm:$0xff]  }
 0x807   :  { %15821 = vmatpush1.bf16.msra.mxu1 %v22437_v42  ;;  %v22506_v42 = vld [vmem:[#allocation4 + $0x288] ss:$40 sps:$4 sm:$0xff]  }
 0x808   :  { %15822 = vmatprep.subr.bf16.mxu1 %v22445_v13  ;;  %v22514_v13 = vld [vmem:[#allocation4 + $0xc3c] ss:$40 sps:$4 sm:$0xff]  }
 0x809   :  { %15862 = vmatpush1.bf16.msra.mxu0 %v22440_v16  ;;  %v22509_v16 = vld [vmem:[#allocation4 + $0x738] ss:$40 sps:$4 sm:$0xff]  }
 0x80a   :  { %15863 = vmatprep.subr.bf16.mxu0 %v22448_v30  ;;  %v22517_v30 = vld [vmem:[#allocation4 + $0x6ec] ss:$40 sps:$4 sm:$0xff]  }
 0x80b   :  { %15823 = vmatpush1.bf16.msra.mxu1 %v22443_v63  ;;  %v22512_v63 = vld [vmem:[#allocation4 + $0xc38] ss:$40 sps:$4 sm:$0xff]  }
 0x80c   :  { %15824 = vmatprep.subr.bf16.mxu1 %v22451_v10  ;;  %v22520_v10 = vld [vmem:[#allocation4 + $0xbec] ss:$40 sps:$4 sm:$0xff]  }
 0x80d   :  { %15864 = vmatpush1.bf16.msra.mxu0 %v22446_v15  ;;  %v22515_v15 = vld [vmem:[#allocation4 + $0x6e8] ss:$40 sps:$4 sm:$0xff]  }
 0x80e   :  { %15865 = vmatprep.subr.bf16.mxu0 %v22454_v44  ;;  %v22523_v44 = vld [vmem:[#allocation4 + $0x69c] ss:$40 sps:$4 sm:$0xff]  }
 0x80f   :  { %15825 = vmatpush1.bf16.msra.mxu1 %v22449_v50  ;;  %v22518_v50 = vld [vmem:[#allocation4 + $0xbe8] ss:$40 sps:$4 sm:$0xff]  }
 0x810   :  { %15826 = vmatprep.subr.bf16.mxu1 %v22457_v52  ;;  %v22526_v52 = vld [vmem:[#allocation4 + $0xb9c] ss:$40 sps:$4 sm:$0xff]  }
 0x811   :  { %15866 = vmatpush1.bf16.msra.mxu0 %v22452_v9  ;;  %v22521_v9 = vld [vmem:[#allocation4 + $0x698] ss:$40 sps:$4 sm:$0xff]  }
 0x812   :  { %15867 = vmatprep.subr.bf16.mxu0 %v22460_v31  ;;  %v22529_v31 = vld [vmem:[#allocation4 + $0x64c] ss:$40 sps:$4 sm:$0xff]  }
 0x813   :  { %15827 = vmatpush1.bf16.msra.mxu1 %v22455_v60  ;;  %v22524_v60 = vld [vmem:[#allocation4 + $0xb98] ss:$40 sps:$4 sm:$0xff]  }
 0x814   :  { %15828 = vmatprep.subr.bf16.mxu1 %v22463_v53  ;;  %v22532_v53 = vld [vmem:[#allocation4 + $0xb4c] ss:$40 sps:$4 sm:$0xff]  }
 0x815   :  { %15868 = vmatpush1.bf16.msra.mxu0 %v22458_v61  ;;  %v22527_v61 = vld [vmem:[#allocation4 + $0x648] ss:$40 sps:$4 sm:$0xff]  }
 0x816   :  { %15869 = vmatprep.subr.bf16.mxu0 %v22466_v1  ;;  %v22535_v1 = vld [vmem:[#allocation4 + $0x5fc] ss:$40 sps:$4 sm:$0xff]  }
 0x817   :  { %15829 = vmatpush2.bf16.msra.mxu1 %v22461_v2  ;;  %v22530_v2 = vld [vmem:[#allocation4 + $0xb48] ss:$40 sps:$4 sm:$0xff]  }
 0x818   :  { %15830 = vmatprep.subr.bf16.mxu1 %v22469_v5  ;;  %v22538_v5 = vld [vmem:[#allocation4 + $0xafc] ss:$40 sps:$4 sm:$0xff]  }
 0x819   :  { %15870 = vmatpush2.bf16.msra.mxu0 %v22464_v7  ;;  %v22533_v7 = vld [vmem:[#allocation4 + $0x5f8] ss:$40 sps:$4 sm:$0xff]  }
 0x81a   :  { %15871 = vmatprep.subr.bf16.mxu0 %v22472_v24  ;;  %v22541_v24 = vld [vmem:[#allocation4 + $0x5ac] ss:$40 sps:$4 sm:$0xff]  }
 0x81b   :  { %15831 = vmatpush2.bf16.msra.mxu1 %v22467_v38  ;;  %v22536_v38 = vld [vmem:[#allocation4 + $0xaf8] ss:$40 sps:$4 sm:$0xff]  }
 0x81c   :  { %15832 = vmatprep.subr.bf16.mxu1 %v22475_v8  ;;  %v22544_v8 = vld [vmem:[#allocation4 + $0xaac] ss:$40 sps:$4 sm:$0xff]  }
 0x81d   :  { %15872 = vmatpush2.bf16.msra.mxu0 %v22470_v21  ;;  %v22539_v21 = vld [vmem:[#allocation4 + $0x5a8] ss:$40 sps:$4 sm:$0xff]  }
 0x81e   :  { %15873 = vmatprep.subr.bf16.mxu0 %v22478_v11  ;;  %v22547_v11 = vld [vmem:[#allocation4 + $0x55c] ss:$40 sps:$4 sm:$0xff]  }
 0x81f   :  { %15833 = vmatpush2.bf16.msra.mxu1 %v22473_v55  ;;  %v22542_v55 = vld [vmem:[#allocation4 + $0xaa8] ss:$40 sps:$4 sm:$0xff]  }
 0x820   :  { %15834 = vmatprep.subr.bf16.mxu1 %v22481_v26  ;;  %v22550_v26 = vld [vmem:[#allocation4 + $0xa5c] ss:$40 sps:$4 sm:$0xff]  }
 0x821   :  { %15874 = vmatpush2.bf16.msra.mxu0 %v22476_v12  ;;  %v22545_v12 = vld [vmem:[#allocation4 + $0x558] ss:$40 sps:$4 sm:$0xff]  }
 0x822   :  { %15875 = vmatprep.subr.bf16.mxu0 %v22484_v14  ;;  %v22553_v14 = vld [vmem:[#allocation4 + $0x50c] ss:$40 sps:$4 sm:$0xff]  }
 0x823   :  { %15835 = vmatpush2.bf16.msra.mxu1 %v22479_v25  ;;  %v22548_v25 = vld [vmem:[#allocation4 + $0xa58] ss:$40 sps:$4 sm:$0xff]  }
 0x824   :  { %15836 = vmatprep.subr.bf16.mxu1 %v22487_v4  ;;  %v22556_v4 = vld [vmem:[#allocation4 + $0xa0c] ss:$40 sps:$4 sm:$0xff]  }
 0x825   :  { %15876 = vmatpush2.bf16.msra.mxu0 %v22482_v20  ;;  %v22551_v20 = vld [vmem:[#allocation4 + $0x508] ss:$40 sps:$4 sm:$0xff]  }
 0x826   :  { %15877 = vmatprep.subr.bf16.mxu0 %v22490_v33  ;;  %v22559_v33 = vld [vmem:[#allocation4 + $0x9bc] ss:$40 sps:$4 sm:$0xff]  }
 0x827   :  { %15837 = vmatpush2.bf16.msra.mxu1 %v22485_v22  ;;  %v22554_v22 = vld [vmem:[#allocation4 + $0xa08] ss:$40 sps:$4 sm:$0xff]  }
 0x828   :  { %15838 = vmatprep.subr.bf16.mxu1 %v22493_v23  ;;  %v22562_v23 = vld [vmem:[#allocation4 + $0xebc] ss:$40 sps:$4 sm:$0xff]  }
 0x829   :  { %15878 = vmatpush2.bf16.msra.mxu0 %v22488_v58  ;;  %v22557_v58 = vld [vmem:[#allocation4 + $0x9b8] ss:$40 sps:$4 sm:$0xff]  }
 0x82a   :  { %15879 = vmatprep.subr.bf16.mxu0 %v22496_v46  ;;  %v22565_v46 = vld [vmem:[#allocation4 + $0x96c] ss:$40 sps:$4 sm:$0xff]  }
 0x82b   :  { %15839 = vmatpush2.bf16.msra.mxu1 %v22491_v28  ;;  %v22560_v28 = vld [vmem:[#allocation4 + $0xeb8] ss:$40 sps:$4 sm:$0xff]  }
 0x82c   :  { %15840 = vmatprep.subr.bf16.mxu1 %v22499_v27  ;;  %v22568_v27 = vld [vmem:[#allocation4 + $0xe6c] ss:$40 sps:$4 sm:$0xff]  }
 0x82d   :  { %15880 = vmatpush2.bf16.msra.mxu0 %v22494_v47  ;;  %v22563_v47 = vld [vmem:[#allocation4 + $0x968] ss:$40 sps:$4 sm:$0xff]  }
 0x82e   :  { %15881 = vmatprep.subr.bf16.mxu0 %v22502_v32  ;;  %v22571_v32 = vld [vmem:[#allocation4 + $0x91c] ss:$40 sps:$4 sm:$0xff]  }
 0x82f   :  { %15841 = vmatpush2.bf16.msra.mxu1 %v22497_v34  ;;  %v22566_v34 = vld [vmem:[#allocation4 + $0xe68] ss:$40 sps:$4 sm:$0xff]  }
 0x830   :  { %15842 = vmatprep.subr.bf16.mxu1 %v22505_v51  ;;  %v22574_v51 = vld [vmem:[#allocation4 + $0xe1c] ss:$40 sps:$4 sm:$0xff]  }
 0x831   :  { %15882 = vmatpush2.bf16.msra.mxu0 %v22500_v56  ;;  %v22569_v56 = vld [vmem:[#allocation4 + $0x918] ss:$40 sps:$4 sm:$0xff]  }
 0x832   :  { %15883 = vmatprep.subr.bf16.mxu0 %v22508_v57  ;;  %v22577_v57 = vld [vmem:[#allocation4 + $0x8cc] ss:$40 sps:$4 sm:$0xff]  }
 0x833   :  { %15843 = vmatpush2.bf16.msra.mxu1 %v22503_v41  ;;  %v22572_v41 = vld [vmem:[#allocation4 + $0xe18] ss:$40 sps:$4 sm:$0xff]  }
 0x834   :  { %15894 = vmatprep.subr.bf16.mxu1 %v22511_v48  ;;  %v22580_v48 = vld [vmem:[#allocation4 + $0xdcc] ss:$40 sps:$4 sm:$0xff]  }
 0x835   :  { %15884 = vmatpush2.bf16.msra.mxu0 %v22506_v42  ;;  %v22575_v42 = vld [vmem:[#allocation4 + $0x8c8] ss:$40 sps:$4 sm:$0xff]  }
 0x836   :  { %15845 = vmatmul.mubr.bf16.vlgmr.msra.gmra.mxu1 %v24053_v39  ;;  %15935 = vmatprep.subr.bf16.mxu0 %v22514_v13  ;;  %v22583_v13 = vld [vmem:[#allocation4 + $0x87c] ss:$40 sps:$4 sm:$0xff]  }
 0x837   :  { %15895 = vmatpush1.bf16.msra.mxu1 %v22509_v16  ;;  %15926 = vmatprep.mubr.bf16.mxu1 %v23995_v54  ;;  %v22578_v16 = vld [vmem:[#allocation4 + $0xdc8] ss:$40 sps:$4 sm:$0xff]  }
 0x838   :  { %15886 = vmatmul.mubr.bf16.vlgmr.msra.gmra.mxu0 %v23967_v59  ;;  %15896 = vmatprep.subr.bf16.mxu1 %v22517_v30  ;;  %v22586_v30 = vld [vmem:[#allocation4 + $0xd7c] ss:$40 sps:$4 sm:$0xff]  }
 0x839   :  { %15936 = vmatpush1.bf16.msra.mxu0 %v22512_v63  ;;  %15967 = vmatprep.mubr.bf16.mxu0 %v24031_v37  ;;  %v22581_v63 = vld [vmem:[#allocation4 + $0x878] ss:$40 sps:$4 sm:$0xff]  }
 0x83a   :  { %15937 = vmatprep.subr.bf16.mxu0 %v22520_v10  ;;  %v22589_v10 = vld [vmem:[#allocation4 + $0x82c] ss:$40 sps:$4 sm:$0xff]  }
 0x83b   :  { %15897 = vmatpush1.bf16.msra.mxu1 %v22515_v15  ;;  %v22584_v15 = vld [vmem:[#allocation4 + $0xd78] ss:$40 sps:$4 sm:$0xff]  }
 0x83c   :  { %15898 = vmatprep.subr.bf16.mxu1 %v22523_v44  ;;  %v22592_v44 = vld [vmem:[#allocation4 + $0xd2c] ss:$40 sps:$4 sm:$0xff]  }
 0x83d   :  { %15938 = vmatpush1.bf16.msra.mxu0 %v22518_v50  ;;  %v22587_v50 = vld [vmem:[#allocation4 + $0x828] ss:$40 sps:$4 sm:$0xff]  }
 0x83e   :  { %15939 = vmatprep.subr.bf16.mxu0 %v22526_v52  ;;  %v22595_v52 = vld [vmem:[#allocation4 + $0x7dc] ss:$40 sps:$4 sm:$0xff]  }
 0x83f   :  { %15899 = vmatpush1.bf16.msra.mxu1 %v22521_v9  ;;  %v22590_v9 = vld [vmem:[#allocation4 + $0xd28] ss:$40 sps:$4 sm:$0xff]  }
 0x840   :  { %15900 = vmatprep.subr.bf16.mxu1 %v22529_v31  ;;  %v22598_v31 = vld [vmem:[#allocation4 + $0xcdc] ss:$40 sps:$4 sm:$0xff]  }
 0x841   :  { %15940 = vmatpush1.bf16.msra.mxu0 %v22524_v60  ;;  %v22593_v60 = vld [vmem:[#allocation4 + $0x7d8] ss:$40 sps:$4 sm:$0xff]  }
 0x842   :  { %15941 = vmatprep.subr.bf16.mxu0 %v22532_v53  ;;  %v22601_v53 = vld [vmem:[#allocation4 + $0x78c] ss:$40 sps:$4 sm:$0xff]  }
 0x843   :  { %15901 = vmatpush1.bf16.msra.mxu1 %v22527_v61  ;;  %v22596_v61 = vld [vmem:[#allocation4 + $0xcd8] ss:$40 sps:$4 sm:$0xff]  }
 0x844   :  { %15902 = vmatprep.subr.bf16.mxu1 %v22535_v1  ;;  %v22599_v1 = vld [vmem:[#allocation4 + $0x788] ss:$40 sps:$4 sm:$0xff]  }
 0x845   :  { %15942 = vmatpush1.bf16.msra.mxu0 %v22530_v2  ;;  %v22604_v2 = vld [vmem:[#allocation4 + $0xc8c] ss:$40 sps:$4 sm:$0xff]  }
 0x846   :  { %15943 = vmatprep.subr.bf16.mxu0 %v22538_v5  ;;  %v11594_v5 = vld [vmem:[#allocation5] sm:$0xff] }
 0x847   :  { %15903 = vmatpush1.bf16.msra.mxu1 %v22533_v7  ;;  %v22607_v7 = vld [vmem:[#allocation4 + $0x113c] ss:$40 sps:$4 sm:$0xff]  }
 0x848   :  { %15904 = vmatprep.subr.bf16.mxu1 %v22541_v24  ;;  %v22602_v24 = vld [vmem:[#allocation4 + $0xc88] ss:$40 sps:$4 sm:$0xff]  }
 0x849   :  { %15944 = vmatpush1.bf16.msra.mxu0 %v22536_v38  ;;  %v22610_v38 = vld [vmem:[#allocation4 + $0x163c] ss:$40 sps:$4 sm:$0xff]  }
 0x84a   :  { %15945 = vmatprep.subr.bf16.mxu0 %v22544_v8  ;;  %v11601_v8 = vrot.slane %v11594_v5, %v23802_v35 }
 0x84b   :  { %15905 = vmatpush1.bf16.msra.mxu1 %v22539_v21  ;;  %v22605_v21 = vld [vmem:[#allocation4 + $0x1138] ss:$40 sps:$4 sm:$0xff]  }
 0x84c   :  { %15906 = vmatprep.subr.bf16.mxu1 %v22547_v11  ;;  %v22613_v11 = vld [vmem:[#allocation4 + $0x10ec] ss:$40 sps:$4 sm:$0xff]  }
 0x84d   :  { %15946 = vmatpush1.bf16.msra.mxu0 %v22542_v55  ;;  %v11605_v55 = vrot.slane %v11594_v5, %v23805_v40  ;;  %v22647_v5 = vld [vmem:[#allocation4 + $0xf08] ss:$40 sps:$4 sm:$0xff]  }
 0x84e   :  { %15947 = vmatprep.subr.bf16.mxu0 %v22550_v26  ;;  %v22608_v26 = vld [vmem:[#allocation4 + $0x1638] ss:$40 sps:$4 sm:$0xff]  }
 0x84f   :  { %15907 = vmatpush1.bf16.msra.mxu1 %v22545_v12 }
 0x850   :  { %15908 = vmatprep.subr.bf16.mxu1 %v22553_v14  ;;  %v22616_v14 = vld [vmem:[#allocation4 + $0x15ec] ss:$40 sps:$4 sm:$0xff]  }
 0x851   :  { %15948 = vmatpush1.bf16.msra.mxu0 %v22548_v25 }
 0x852   :  { %15949 = vmatprep.subr.bf16.mxu0 %v22556_v4  ;;  %v22611_v4 = vld [vmem:[#allocation4 + $0x10e8] ss:$40 sps:$4 sm:$0xff]  }
 0x853   :  { %15909 = vmatpush1.bf16.msra.mxu1 %v22551_v20 }
 0x854   :  { %15910 = vmatprep.subr.bf16.mxu1 %v22559_v33 }
 0x855   :  { %15950 = vmatpush1.bf16.msra.mxu0 %v22554_v22  ;;  %v22619_v22 = vld [vmem:[#allocation4 + $0x109c] ss:$40 sps:$4 sm:$0xff]  }
 0x856   :  { %15951 = vmatprep.subr.bf16.mxu0 %v22562_v23 }
 0x857   :  { %15911 = vmatpush2.bf16.msra.mxu1 %v22557_v58 }
 0x858   :  { %15912 = vmatprep.subr.bf16.mxu1 %v22565_v46  ;;  %v22614_v46 = vld [vmem:[#allocation4 + $0x15e8] ss:$40 sps:$4 sm:$0xff]  }
 0x859   :  { %15952 = vmatpush2.bf16.msra.mxu0 %v22560_v28 }
 0x85a   :  { %15953 = vmatprep.subr.bf16.mxu0 %v22568_v27 }
 0x85b   :  { %15913 = vmatpush2.bf16.msra.mxu1 %v22563_v47  ;;  %v22622_v47 = vld [vmem:[#allocation4 + $0x159c] ss:$40 sps:$4 sm:$0xff]  }
 0x85c   :  { %15914 = vmatprep.subr.bf16.mxu1 %v22571_v32 }
 0x85d   :  { %15954 = vmatpush2.bf16.msra.mxu0 %v22566_v34  ;;  %v22617_v34 = vld [vmem:[#allocation4 + $0x1098] ss:$40 sps:$4 sm:$0xff]  }
 0x85e   :  { %15955 = vmatprep.subr.bf16.mxu0 %v22574_v51 }
 0x85f   :  { %15915 = vmatpush2.bf16.msra.mxu1 %v22569_v56  ;;  %v22625_v56 = vld [vmem:[#allocation4 + $0x104c] ss:$40 sps:$4 sm:$0xff]  }
 0x860   :  { %15916 = vmatprep.subr.bf16.mxu1 %v22577_v57 }
 0x861   :  { %15956 = vmatpush2.bf16.msra.mxu0 %v22572_v41  ;;  %v22620_v41 = vld [vmem:[#allocation4 + $0x1598] ss:$40 sps:$4 sm:$0xff]  }
 0x862   :  { %15957 = vmatprep.subr.bf16.mxu0 %v22580_v48  ;;  %v22628_v48 = vld [vmem:[#allocation4 + $0x154c] ss:$40 sps:$4 sm:$0xff]  }
 0x863   :  { %15917 = vmatpush2.bf16.msra.mxu1 %v22575_v42 }
 0x864   :  { %15918 = vmatprep.subr.bf16.mxu1 %v22583_v13  ;;  %v22623_v13 = vld [vmem:[#allocation4 + $0x1048] ss:$40 sps:$4 sm:$0xff]  }
 0x865   :  { %15958 = vmatpush2.bf16.msra.mxu0 %v22578_v16  ;;  %v22631_v16 = vld [vmem:[#allocation4 + $0xffc] ss:$40 sps:$4 sm:$0xff]  }
 0x866   :  { %15959 = vmatprep.subr.bf16.mxu0 %v22586_v30  ;;  %v22626_v30 = vld [vmem:[#allocation4 + $0x1548] ss:$40 sps:$4 sm:$0xff]  }
 0x867   :  { %15919 = vmatpush2.bf16.msra.mxu1 %v22581_v63  ;;  %v22634_v63 = vld [vmem:[#allocation4 + $0x14fc] ss:$40 sps:$4 sm:$0xff]  }
 0x868   :  { %15920 = vmatprep.subr.bf16.mxu1 %v22589_v10  ;;  %v22629_v10 = vld [vmem:[#allocation4 + $0xff8] ss:$40 sps:$4 sm:$0xff]  }
 0x869   :  { %15960 = vmatpush2.bf16.msra.mxu0 %v22584_v15  ;;  %v22637_v15 = vld [vmem:[#allocation4 + $0xfac] ss:$40 sps:$4 sm:$0xff]  }
 0x86a   :  { %15961 = vmatprep.subr.bf16.mxu0 %v22592_v44  ;;  %v22632_v44 = vld [vmem:[#allocation4 + $0x14f8] ss:$40 sps:$4 sm:$0xff]  }
 0x86b   :  { %15921 = vmatpush2.bf16.msra.mxu1 %v22587_v50  ;;  %v22640_v50 = vld [vmem:[#allocation4 + $0x14ac] ss:$40 sps:$4 sm:$0xff]  }
 0x86c   :  { %15922 = vmatprep.subr.bf16.mxu1 %v22595_v52  ;;  %v22635_v52 = vld [vmem:[#allocation4 + $0xfa8] ss:$40 sps:$4 sm:$0xff]  }
 0x86d   :  { %15962 = vmatpush2.bf16.msra.mxu0 %v22590_v9  ;;  %v22643_v9 = vld [vmem:[#allocation4 + $0xf5c] ss:$40 sps:$4 sm:$0xff]  }
 0x86e   :  { %15963 = vmatprep.subr.bf16.mxu0 %v22598_v31  ;;  %v22638_v31 = vld [vmem:[#allocation4 + $0x14a8] ss:$40 sps:$4 sm:$0xff]  }
 0x86f   :  { %15923 = vmatpush2.bf16.msra.mxu1 %v22593_v60  ;;  %v22646_v60 = vld [vmem:[#allocation4 + $0x145c] ss:$40 sps:$4 sm:$0xff]  }
 0x870   :  { %15924 = vmatprep.subr.bf16.mxu1 %v22601_v53  ;;  %v22641_v53 = vld [vmem:[#allocation4 + $0xf58] ss:$40 sps:$4 sm:$0xff]  }
 0x871   :  { %15964 = vmatpush2.bf16.msra.mxu0 %v22596_v61  ;;  %v22649_v61 = vld [vmem:[#allocation4 + $0xf0c] ss:$40 sps:$4 sm:$0xff]  }
 0x872   :  { %15965 = vmatprep.subr.bf16.mxu0 %v22604_v2  ;;  %v22652_v2 = vld [vmem:[#allocation4 + $0x140c] ss:$40 sps:$4 sm:$0xff]  }
 0x873   :  { %15925 = vmatpush2.bf16.msra.mxu1 %v22599_v1  ;;  %v22644_v1 = vld [vmem:[#allocation4 + $0x1458] ss:$40 sps:$4 sm:$0xff]  }
 0x874   :  { %15976 = vmatprep.subr.bf16.mxu1 %v22607_v7  ;;  %v22655_v7 = vld [vmem:[#allocation4 + $0x13bc] ss:$40 sps:$4 sm:$0xff]  }
 0x875   :  { %15966 = vmatpush2.bf16.msra.mxu0 %v22602_v24  ;;  %v22650_v24 = vld [vmem:[#allocation4 + $0x1408] ss:$40 sps:$4 sm:$0xff]  }
 0x876   :  { %v15682_v12 = vpop.f32.mrf.mxu1  ;;  %15927 = vmatmul.mubr.bf16.vlgmr.msra.gmra.mxu1 %v23993_v17  ;;  %16017 = vmatprep.subr.bf16.mxu0 %v22610_v38  ;;  %v22658_v38 = vld [vmem:[#allocation4 + $0x18bc] ss:$40 sps:$4 sm:$0xff]  }
 0x877   :  { %v15683_v25 = vadd.f32 %v15682_v12, %v11601_v8  ;;  %15977 = vmatpush1.bf16.msra.mxu1 %v22605_v21  ;;  %16008 = vmatprep.mubr.bf16.mxu1 %v24049_v49  ;;  %v22653_v8 = vld [vmem:[#allocation4 + $0x13b8] ss:$40 sps:$4 sm:$0xff]   ;;  %v22661_v21 = vld [vmem:[#allocation4 + $0x136c] ss:$40 sps:$4 sm:$0xff]   ;;  %v22667_v12 = vld [vmem:[#allocation4 + $0x131c] ss:$40 sps:$4 sm:$0xff]  }
 0x878   :  { %v15684_v20 = vpop.f32.mrf.mxu1  ;;  %v15723_v33 = vpop.f32.mrf.mxu0  ;;  %15968 = vmatmul.mubr.bf16.vlgmr.msra.gmra.mxu0 %v24029_v36  ;;  %15978 = vmatprep.subr.bf16.mxu1 %v22613_v11  ;;  %v22656_v11 = vld [vmem:[#allocation4 + $0x18b8] ss:$40 sps:$4 sm:$0xff]  }
 0x879   :  { %v15685_v23 = vadd.f32 %v15684_v20, %v11605_v55  ;;  %v24076_v58 = vadd.f32 %v15723_v33, %v15683_v25  ;;  %16018 = vmatpush1.bf16.msra.mxu0 %v22608_v26  ;;  %16049 = vmatprep.mubr.bf16.mxu0 %v24055_v29  ;;  %v22664_v55 = vld [vmem:[#allocation4 + $0x186c] ss:$40 sps:$4 sm:$0xff]   ;;  %v22659_v26 = vld [vmem:[#allocation4 + $0x1368] ss:$40 sps:$4 sm:$0xff]   ;;  %v22670_v25 = vld [vmem:[#allocation4 + $0x181c] ss:$40 sps:$4 sm:$0xff]  }
 0x87a   :  { %v15686_v28 = vpop.f32.mrf.mxu1  ;;  %v15725_v27 = vpop.f32.mrf.mxu0  ;;  %16019 = vmatprep.subr.bf16.mxu0 %v22616_v14  ;;  %v22662_v14 = vld [vmem:[#allocation4 + $0x1868] ss:$40 sps:$4 sm:$0xff]   ;;  %v22673_v20 = vld [vmem:[#allocation4 + $0x12cc] ss:$40 sps:$4 sm:$0xff]   ;;  %v22668_v33 = vld [vmem:[#allocation4 + $0x1818] ss:$40 sps:$4 sm:$0xff]  }
 0x87b   :  { %v24079_v32 = vadd.f32 %v15725_v27, %v15685_v23  ;;  %15979 = vmatpush1.bf16.msra.mxu1 %v22611_v4  ;;  %v22665_v4 = vld [vmem:[#allocation4 + $0x1318] ss:$40 sps:$4 sm:$0xff]   ;;  %v22671_v23 = vld [vmem:[#allocation4 + $0x12c8] ss:$40 sps:$4 sm:$0xff]   ;;  %v22682_v27 = vld [vmem:[#allocation4 + $0x177c] ss:$40 sps:$4 sm:$0xff]  }
 0x87c   :  { %v15687_v51 = vpop.f32.mrf.mxu1  ;;  %15980 = vmatprep.subr.bf16.mxu1 %v22619_v22  ;;  %v15727_v57 = vpop.f32.mrf.mxu0  ;;  %v22676_v22 = vld [vmem:[#allocation4 + $0x17cc] ss:$40 sps:$4 sm:$0xff]   ;;  %v22674_v28 = vld [vmem:[#allocation4 + $0x17c8] ss:$40 sps:$4 sm:$0xff]  }
 0x87d   :  { %16020 = vmatpush1.bf16.msra.mxu0 %v22614_v46  ;;  %v22679_v46 = vld [vmem:[#allocation4 + $0x127c] ss:$40 sps:$4 sm:$0xff]   ;;  %v22680_v51 = vld [vmem:[#allocation4 + $0x1778] ss:$40 sps:$4 sm:$0xff]   ;;  %v22683_v57 = vld [vmem:[#allocation4 + $0x1228] ss:$40 sps:$4 sm:$0xff]  }
 0x87e   :  { %16021 = vmatprep.subr.bf16.mxu0 %v22622_v47  ;;  %v15728_v42 = vpop.f32.mrf.mxu0  ;;  %v22677_v47 = vld [vmem:[#allocation4 + $0x1278] ss:$40 sps:$4 sm:$0xff]  }
 0x87f   :  { %15981 = vmatpush1.bf16.msra.mxu1 %v22617_v34  ;;  %v22685_v34 = vld [vmem:[#allocation4 + $0x122c] ss:$40 sps:$4 sm:$0xff]   ;;  %v22694_v42 = vld [vmem:[#allocation4 + $0x16dc] ss:$40 sps:$4 sm:$0xff]  }
 0x880   :  { %15982 = vmatprep.subr.bf16.mxu1 %v22625_v56  ;;  %v22688_v56 = vld [vmem:[#allocation4 + $0x172c] ss:$40 sps:$4 sm:$0xff]  }
 0x881   :  { %16022 = vmatpush1.bf16.msra.mxu0 %v22620_v41  ;;  %v22691_v41 = vld [vmem:[#allocation4 + $0x11dc] ss:$40 sps:$4 sm:$0xff]  }
 0x882   :  { %16023 = vmatprep.subr.bf16.mxu0 %v22628_v48  ;;  %v22686_v48 = vld [vmem:[#allocation4 + $0x1728] ss:$40 sps:$4 sm:$0xff]  }
 0x883   :  { %15983 = vmatpush1.bf16.msra.mxu1 %v22623_v13  ;;  %v22689_v13 = vld [vmem:[#allocation4 + $0x11d8] ss:$40 sps:$4 sm:$0xff]  }
 0x884   :  { %15984 = vmatprep.subr.bf16.mxu1 %v22631_v16  ;;  %v22697_v16 = vld [vmem:[#allocation4 + $0x118c] ss:$40 sps:$4 sm:$0xff]  }
 0x885   :  { %16024 = vmatpush1.bf16.msra.mxu0 %v22626_v30  ;;  %v22692_v30 = vld [vmem:[#allocation4 + $0x16d8] ss:$40 sps:$4 sm:$0xff]  }
 0x886   :  { %16025 = vmatprep.subr.bf16.mxu0 %v22634_v63  ;;  %v22700_v63 = vld [vmem:[#allocation4 + $0x168c] ss:$40 sps:$4 sm:$0xff]  }
 0x887   :  { %15985 = vmatpush1.bf16.msra.mxu1 %v22629_v10  ;;  %v22695_v10 = vld [vmem:[#allocation4 + $0x1188] ss:$40 sps:$4 sm:$0xff]  }
 0x888   :  { %15986 = vmatprep.subr.bf16.mxu1 %v22637_v15  ;;  %v22703_v15 = vld [vmem:[#allocation4 + $0x244] ss:$40 sps:$4 sm:$0xff]  }
 0x889   :  { %16026 = vmatpush1.bf16.msra.mxu0 %v22632_v44  ;;  %v22698_v44 = vld [vmem:[#allocation4 + $0x1688] ss:$40 sps:$4 sm:$0xff]  }
 0x88a   :  { %16027 = vmatprep.subr.bf16.mxu0 %v22640_v50  ;;  %v22706_v50 = vld [vmem:[#allocation4 + $0x744] ss:$40 sps:$4 sm:$0xff]  }
 0x88b   :  { %15987 = vmatpush1.bf16.msra.mxu1 %v22635_v52  ;;  %v22701_v52 = vld [vmem:[#allocation4 + $0x240] ss:$40 sps:$4 sm:$0xff]  }
 0x88c   :  { %15988 = vmatprep.subr.bf16.mxu1 %v22643_v9  ;;  %v22709_v9 = vld [vmem:[#allocation4 + $0x1f4] ss:$40 sps:$4 sm:$0xff]  }
 0x88d   :  { %16028 = vmatpush1.bf16.msra.mxu0 %v22638_v31  ;;  %v22704_v31 = vld [vmem:[#allocation4 + $0x740] ss:$40 sps:$4 sm:$0xff]  }
 0x88e   :  { %16029 = vmatprep.subr.bf16.mxu0 %v22646_v60 }
 0x88f   :  { %15989 = vmatpush1.bf16.msra.mxu1 %v22641_v53  ;;  %v22712_v53 = vld [vmem:[#allocation4 + $0x6f4] ss:$40 sps:$4 sm:$0xff]  }
 0x890   :  { %15990 = vmatprep.subr.bf16.mxu1 %v22649_v61 }
 0x891   :  { %16030 = vmatpush1.bf16.msra.mxu0 %v22644_v1  ;;  %v22707_v1 = vld [vmem:[#allocation4 + $0x1f0] ss:$40 sps:$4 sm:$0xff]  }
 0x892   :  { %16031 = vmatprep.subr.bf16.mxu0 %v22652_v2 }
 0x893   :  { %15991 = vmatpush1.bf16.msra.mxu1 %v22647_v5 }
 0x894   :  { %15992 = vmatprep.subr.bf16.mxu1 %v22655_v7  ;;  %v22715_v7 = vld [vmem:[#allocation4 + $0x1a4] ss:$40 sps:$4 sm:$0xff]  }
 0x895   :  { %16032 = vmatpush1.bf16.msra.mxu0 %v22650_v24 }
 0x896   :  { %16033 = vmatprep.subr.bf16.mxu0 %v22658_v38 }
 0x897   :  { %15993 = vmatpush2.bf16.msra.mxu1 %v22653_v8  ;;  %v22710_v8 = vld [vmem:[#allocation4 + $0x6f0] ss:$40 sps:$4 sm:$0xff]  }
 0x898   :  { %15994 = vmatprep.subr.bf16.mxu1 %v22661_v21 }
 0x899   :  { %16034 = vmatpush2.bf16.msra.mxu0 %v22656_v11  ;;  %v22718_v11 = vld [vmem:[#allocation4 + $0x6a4] ss:$40 sps:$4 sm:$0xff]  }
 0x89a   :  { %16035 = vmatprep.subr.bf16.mxu0 %v22664_v55 }
 0x89b   :  { %15995 = vmatpush2.bf16.msra.mxu1 %v22659_v26  ;;  %v22713_v26 = vld [vmem:[#allocation4 + $0x1a0] ss:$40 sps:$4 sm:$0xff]  }
 0x89c   :  { %15996 = vmatprep.subr.bf16.mxu1 %v22667_v12 }
 0x89d   :  { %16036 = vmatpush2.bf16.msra.mxu0 %v22662_v14  ;;  %v22721_v14 = vld [vmem:[#allocation4 + $0x154] ss:$40 sps:$4 sm:$0xff]  }
 0x89e   :  { %16037 = vmatprep.subr.bf16.mxu0 %v22670_v25 }
 0x89f   :  { %15997 = vmatpush2.bf16.msra.mxu1 %v22665_v4  ;;  %v22724_v4 = vld [vmem:[#allocation4 + $0x654] ss:$40 sps:$4 sm:$0xff]  }
 0x8a0   :  { %15998 = vmatprep.subr.bf16.mxu1 %v22673_v20 }
 0x8a1   :  { %16038 = vmatpush2.bf16.msra.mxu0 %v22668_v33  ;;  %v22719_v33 = vld [vmem:[#allocation4 + $0x150] ss:$40 sps:$4 sm:$0xff]  }
 0x8a2   :  { %16039 = vmatprep.subr.bf16.mxu0 %v22676_v22  ;;  %v22727_v22 = vld [vmem:[#allocation4 + $0x104] ss:$40 sps:$4 sm:$0xff]  }
 0x8a3   :  { %15999 = vmatpush2.bf16.msra.mxu1 %v22671_v23  ;;  %v22722_v23 = vld [vmem:[#allocation4 + $0x650] ss:$40 sps:$4 sm:$0xff]  }
 0x8a4   :  { %16000 = vmatprep.subr.bf16.mxu1 %v22679_v46  ;;  %v22730_v46 = vld [vmem:[#allocation4 + $0x604] ss:$40 sps:$4 sm:$0xff]  }
 0x8a5   :  { %16040 = vmatpush2.bf16.msra.mxu0 %v22674_v28  ;;  %v22725_v28 = vld [vmem:[#allocation4 + $0x100] ss:$40 sps:$4 sm:$0xff]  }
 0x8a6   :  { %16041 = vmatprep.subr.bf16.mxu0 %v22682_v27  ;;  %v22733_v27 = vld [vmem:[#allocation4 + $0xb4] ss:$40 sps:$4 sm:$0xff]  }
 0x8a7   :  { %16001 = vmatpush2.bf16.msra.mxu1 %v22677_v47  ;;  %v22728_v47 = vld [vmem:[#allocation4 + $0x600] ss:$40 sps:$4 sm:$0xff]  }
 0x8a8   :  { %16002 = vmatprep.subr.bf16.mxu1 %v22685_v34  ;;  %v22736_v34 = vld [vmem:[#allocation4 + $0x5b4] ss:$40 sps:$4 sm:$0xff]  }
 0x8a9   :  { %16042 = vmatpush2.bf16.msra.mxu0 %v22680_v51  ;;  %v22731_v51 = vld [vmem:[#allocation4 + $0xb0] ss:$40 sps:$4 sm:$0xff]  }
 0x8aa   :  { %16043 = vmatprep.subr.bf16.mxu0 %v22688_v56  ;;  %v22739_v56 = vld [vmem:[#allocation4 + $0x64] ss:$40 sps:$4 sm:$0xff]  }
 0x8ab   :  { %16003 = vmatpush2.bf16.msra.mxu1 %v22683_v57  ;;  %v22734_v57 = vld [vmem:[#allocation4 + $0x5b0] ss:$40 sps:$4 sm:$0xff]  }
 0x8ac   :  { %16004 = vmatprep.subr.bf16.mxu1 %v22691_v41  ;;  %v22742_v41 = vld [vmem:[#allocation4 + $0x564] ss:$40 sps:$4 sm:$0xff]  }
 0x8ad   :  { %16044 = vmatpush2.bf16.msra.mxu0 %v22686_v48  ;;  %v22737_v48 = vld [vmem:[#allocation4 + $0x60] ss:$40 sps:$4 sm:$0xff]  }
 0x8ae   :  { %16045 = vmatprep.subr.bf16.mxu0 %v22694_v42  ;;  %v22745_v42 = vld [vmem:[#allocation4 + $0x14] ss:$40 sps:$4 sm:$0xff]  }
 0x8af   :  { %16005 = vmatpush2.bf16.msra.mxu1 %v22689_v13  ;;  %v22740_v13 = vld [vmem:[#allocation4 + $0x560] ss:$40 sps:$4 sm:$0xff]  }
 0x8b0   :  { %16006 = vmatprep.subr.bf16.mxu1 %v22697_v16  ;;  %v22748_v16 = vld [vmem:[#allocation4 + $0x514] ss:$40 sps:$4 sm:$0xff]  }
 0x8b1   :  { %16046 = vmatpush2.bf16.msra.mxu0 %v22692_v30  ;;  %v22743_v30 = vld [vmem:[#allocation4 + $0x10] ss:$40 sps:$4 sm:$0xff]  }
 0x8b2   :  { %16047 = vmatprep.subr.bf16.mxu0 %v22700_v63  ;;  %v22751_v63 = vld [vmem:[#allocation4 + $0x4c4] ss:$40 sps:$4 sm:$0xff]  }
 0x8b3   :  { %16007 = vmatpush2.bf16.msra.mxu1 %v22695_v10  ;;  %v22746_v10 = vld [vmem:[#allocation4 + $0x510] ss:$40 sps:$4 sm:$0xff]  }
 0x8b4   :  { %16058 = vmatprep.subr.bf16.mxu1 %v22703_v15  ;;  %v22754_v15 = vld [vmem:[#allocation4 + $0x9c4] ss:$40 sps:$4 sm:$0xff]  }
 0x8b5   :  { %16048 = vmatpush2.bf16.msra.mxu0 %v22698_v44  ;;  %v22749_v44 = vld [vmem:[#allocation4 + $0x4c0] ss:$40 sps:$4 sm:$0xff]  }
 0x8b6   :  { %v15764_v60 = vpop.f32.mrf.mxu1  ;;  %16009 = vmatmul.mubr.bf16.vlgmr.msra.gmra.mxu1 %v24047_v43  ;;  %16099 = vmatprep.subr.bf16.mxu0 %v22706_v50  ;;  %v22757_v50 = vld [vmem:[#allocation4 + $0x474] ss:$40 sps:$4 sm:$0xff]  }
 0x8b7   :  { %v15765_v61 = vadd.f32 %v15764_v60, %v24076_v58  ;;  %16059 = vmatpush1.bf16.msra.mxu1 %v22701_v52  ;;  %16090 = vmatprep.mubr.bf16.mxu1 %v23969_v6  ;;  %v22752_v52 = vld [vmem:[#allocation4 + $0x9c0] ss:$40 sps:$4 sm:$0xff]   ;;  %v22763_v60 = vld [vmem:[#allocation4 + $0x424] ss:$40 sps:$4 sm:$0xff]  }
 0x8b8   :  { %v15766_v2 = vpop.f32.mrf.mxu1  ;;  %v15805_v5 = vpop.f32.mrf.mxu0  ;;  %16050 = vmatmul.mubr.bf16.vlgmr.msra.gmra.mxu0 %v24053_v39  ;;  %16060 = vmatprep.subr.bf16.mxu1 %v22709_v9  ;;  %v22760_v9 = vld [vmem:[#allocation4 + $0x974] ss:$40 sps:$4 sm:$0xff]  }
 0x8b9   :  { %v15767_v24 = vadd.f32 %v15766_v2, %v24079_v32  ;;  %v24086_v38 = vadd.f32 %v15805_v5, %v15765_v61  ;;  %16100 = vmatpush1.bf16.msra.mxu0 %v22704_v31  ;;  %16131 = vmatprep.mubr.bf16.mxu0 %v23995_v54  ;;  %v22716_v32 = vld [vmem:[#allocation4 + $0x6a0] ss:$40 sps:$4 sm:$0xff]   ;;  %v22755_v31 = vld [vmem:[#allocation4 + $0x470] ss:$40 sps:$4 sm:$0xff]   ;;  %v22766_v61 = vld [vmem:[#allocation4 + $0x924] ss:$40 sps:$4 sm:$0xff]  }
 0x8ba   :  { %v15768_v21 = vpop.f32.mrf.mxu1  ;;  %v15807_v58 = vpop.f32.mrf.mxu0  ;;  %16101 = vmatprep.subr.bf16.mxu0 %v22712_v53  ;;  %v22758_v53 = vld [vmem:[#allocation4 + $0x970] ss:$40 sps:$4 sm:$0xff]   ;;  %v22769_v2 = vld [vmem:[#allocation4 + $0x3d4] ss:$40 sps:$4 sm:$0xff]   ;;  %v22764_v5 = vld [vmem:[#allocation4 + $0x920] ss:$40 sps:$4 sm:$0xff]  }
 0x8bb   :  { %v24089_v55 = vadd.f32 %v15807_v58, %v15767_v24  ;;  %16061 = vmatpush1.bf16.msra.mxu1 %v22707_v1  ;;  %v22761_v1 = vld [vmem:[#allocation4 + $0x420] ss:$40 sps:$4 sm:$0xff]   ;;  %v22767_v24 = vld [vmem:[#allocation4 + $0x3d0] ss:$40 sps:$4 sm:$0xff]   ;;  %v22778_v58 = vld [vmem:[#allocation4 + $0x884] ss:$40 sps:$4 sm:$0xff]  }
 0x8bc   :  { %v15769_v12 = vpop.f32.mrf.mxu1  ;;  %16062 = vmatprep.subr.bf16.mxu1 %v22715_v7  ;;  %v15809_v25 = vpop.f32.mrf.mxu0  ;;  %v22772_v7 = vld [vmem:[#allocation4 + $0x8d4] ss:$40 sps:$4 sm:$0xff]   ;;  %v22770_v21 = vld [vmem:[#allocation4 + $0x8d0] ss:$40 sps:$4 sm:$0xff]  }
 0x8bd   :  { %16102 = vmatpush1.bf16.msra.mxu0 %v22710_v8  ;;  %v22775_v8 = vld [vmem:[#allocation4 + $0x384] ss:$40 sps:$4 sm:$0xff]   ;;  %v22776_v12 = vld [vmem:[#allocation4 + $0x880] ss:$40 sps:$4 sm:$0xff]   ;;  %v22779_v25 = vld [vmem:[#allocation4 + $0x330] ss:$40 sps:$4 sm:$0xff]  }
 0x8be   :  { %16103 = vmatprep.subr.bf16.mxu0 %v22718_v11  ;;  %v15810_v20 = vpop.f32.mrf.mxu0  ;;  %v22773_v11 = vld [vmem:[#allocation4 + $0x380] ss:$40 sps:$4 sm:$0xff]  }
 0x8bf   :  { %16063 = vmatpush1.bf16.msra.mxu1 %v22713_v26  ;;  %v22781_v26 = vld [vmem:[#allocation4 + $0x334] ss:$40 sps:$4 sm:$0xff]   ;;  %v22790_v20 = vld [vmem:[#allocation4 + $0x7e4] ss:$40 sps:$4 sm:$0xff]  }
 0x8c0   :  { %16064 = vmatprep.subr.bf16.mxu1 %v22721_v14  ;;  %v22784_v14 = vld [vmem:[#allocation4 + $0x834] ss:$40 sps:$4 sm:$0xff]  }
 0x8c1   :  { %16104 = vmatpush1.bf16.msra.mxu0 %v22716_v32  ;;  %v22787_v32 = vld [vmem:[#allocation4 + $0x2e4] ss:$40 sps:$4 sm:$0xff]  }
 0x8c2   :  { %16105 = vmatprep.subr.bf16.mxu0 %v22724_v4  ;;  %v22782_v4 = vld [vmem:[#allocation4 + $0x830] ss:$40 sps:$4 sm:$0xff]  }
 0x8c3   :  { %16065 = vmatpush1.bf16.msra.mxu1 %v22719_v33  ;;  %v22785_v33 = vld [vmem:[#allocation4 + $0x2e0] ss:$40 sps:$4 sm:$0xff]  }
 0x8c4   :  { %16066 = vmatprep.subr.bf16.mxu1 %v22727_v22  ;;  %v22793_v22 = vld [vmem:[#allocation4 + $0x294] ss:$40 sps:$4 sm:$0xff]  }
 0x8c5   :  { %16106 = vmatpush1.bf16.msra.mxu0 %v22722_v23  ;;  %v22788_v23 = vld [vmem:[#allocation4 + $0x7e0] ss:$40 sps:$4 sm:$0xff]  }
 0x8c6   :  { %16107 = vmatprep.subr.bf16.mxu0 %v22730_v46  ;;  %v22796_v46 = vld [vmem:[#allocation4 + $0x794] ss:$40 sps:$4 sm:$0xff]  }
 0x8c7   :  { %16067 = vmatpush1.bf16.msra.mxu1 %v22725_v28  ;;  %v22791_v28 = vld [vmem:[#allocation4 + $0x290] ss:$40 sps:$4 sm:$0xff]  }
 0x8c8   :  { %16068 = vmatprep.subr.bf16.mxu1 %v22733_v27  ;;  %v22799_v27 = vld [vmem:[#allocation4 + $0xc44] ss:$40 sps:$4 sm:$0xff]  }
 0x8c9   :  { %16108 = vmatpush1.bf16.msra.mxu0 %v22728_v47  ;;  %v22794_v47 = vld [vmem:[#allocation4 + $0x790] ss:$40 sps:$4 sm:$0xff]  }
 0x8ca   :  { %16109 = vmatprep.subr.bf16.mxu0 %v22736_v34  ;;  %v22802_v34 = vld [vmem:[#allocation4 + $0x1144] ss:$40 sps:$4 sm:$0xff]  }
 0x8cb   :  { %16069 = vmatpush1.bf16.msra.mxu1 %v22731_v51  ;;  %v22797_v51 = vld [vmem:[#allocation4 + $0xc40] ss:$40 sps:$4 sm:$0xff]  }
 0x8cc   :  { %16070 = vmatprep.subr.bf16.mxu1 %v22739_v56  ;;  %v22805_v56 = vld [vmem:[#allocation4 + $0xbf4] ss:$40 sps:$4 sm:$0xff]  }
 0x8cd   :  { %16110 = vmatpush1.bf16.msra.mxu0 %v22734_v57  ;;  %v22800_v57 = vld [vmem:[#allocation4 + $0x1140] ss:$40 sps:$4 sm:$0xff]  }
 0x8ce   :  { %16111 = vmatprep.subr.bf16.mxu0 %v22742_v41 }
 0x8cf   :  { %16071 = vmatpush1.bf16.msra.mxu1 %v22737_v48  ;;  %v22808_v48 = vld [vmem:[#allocation4 + $0x10f4] ss:$40 sps:$4 sm:$0xff]  }
 0x8d0   :  { %16072 = vmatprep.subr.bf16.mxu1 %v22745_v42 }
 0x8d1   :  { %16112 = vmatpush1.bf16.msra.mxu0 %v22740_v13  ;;  %v22803_v13 = vld [vmem:[#allocation4 + $0xbf0] ss:$40 sps:$4 sm:$0xff]  }
 0x8d2   :  { %16113 = vmatprep.subr.bf16.mxu0 %v22748_v16 }
 0x8d3   :  { %16073 = vmatpush1.bf16.msra.mxu1 %v22743_v30  ;;  %v22811_v30 = vld [vmem:[#allocation4 + $0xba4] ss:$40 sps:$4 sm:$0xff]  }
 0x8d4   :  { %16074 = vmatprep.subr.bf16.mxu1 %v22751_v63 }
 0x8d5   :  { %16114 = vmatpush1.bf16.msra.mxu0 %v22746_v10 }
 0x8d6   :  { %16115 = vmatprep.subr.bf16.mxu0 %v22754_v15 }
 0x8d7   :  { %16075 = vmatpush2.bf16.msra.mxu1 %v22749_v44  ;;  %v22806_v44 = vld [vmem:[#allocation4 + $0x10f0] ss:$40 sps:$4 sm:$0xff]  }
 0x8d8   :  { %16076 = vmatprep.subr.bf16.mxu1 %v22757_v50 }
 0x8d9   :  { %16116 = vmatpush2.bf16.msra.mxu0 %v22752_v52 }
 0x8da   :  { %16117 = vmatprep.subr.bf16.mxu0 %v22760_v9 }
 0x8db   :  { %16077 = vmatpush2.bf16.msra.mxu1 %v22755_v31 }
 0x8dc   :  { %16078 = vmatprep.subr.bf16.mxu1 %v22763_v60  ;;  %v22809_v60 = vld [vmem:[#allocation4 + $0xba0] ss:$40 sps:$4 sm:$0xff]  }
 0x8dd   :  { %16118 = vmatpush2.bf16.msra.mxu0 %v22758_v53 }
 0x8de   :  { %16119 = vmatprep.subr.bf16.mxu0 %v22766_v61  ;;  %v22817_v61 = vld [vmem:[#allocation4 + $0xb54] ss:$40 sps:$4 sm:$0xff]  }
 0x8df   :  { %16079 = vmatpush2.bf16.msra.mxu1 %v22761_v1 }
 0x8e0   :  { %16080 = vmatprep.subr.bf16.mxu1 %v22769_v2 }
 0x8e1   :  { %16120 = vmatpush2.bf16.msra.mxu0 %v22764_v5  ;;  %v22820_v5 = vld [vmem:[#allocation4 + $0x1054] ss:$40 sps:$4 sm:$0xff]  }
 0x8e2   :  { %16121 = vmatprep.subr.bf16.mxu0 %v22772_v7 }
 0x8e3   :  { %16081 = vmatpush2.bf16.msra.mxu1 %v22767_v24  ;;  %v22815_v24 = vld [vmem:[#allocation4 + $0xb50] ss:$40 sps:$4 sm:$0xff]  }
 0x8e4   :  { %16082 = vmatprep.subr.bf16.mxu1 %v22775_v8  ;;  %v22823_v8 = vld [vmem:[#allocation4 + $0xb04] ss:$40 sps:$4 sm:$0xff]  }
 0x8e5   :  { %16122 = vmatpush2.bf16.msra.mxu0 %v22770_v21  ;;  %v22818_v21 = vld [vmem:[#allocation4 + $0x1050] ss:$40 sps:$4 sm:$0xff]  }
 0x8e6   :  { %16123 = vmatprep.subr.bf16.mxu0 %v22778_v58  ;;  %v22826_v58 = vld [vmem:[#allocation4 + $0x1004] ss:$40 sps:$4 sm:$0xff]  }
 0x8e7   :  { %16083 = vmatpush2.bf16.msra.mxu1 %v22773_v11  ;;  %v22821_v11 = vld [vmem:[#allocation4 + $0xb00] ss:$40 sps:$4 sm:$0xff]  }
 0x8e8   :  { %16084 = vmatprep.subr.bf16.mxu1 %v22781_v26  ;;  %v22829_v26 = vld [vmem:[#allocation4 + $0xab4] ss:$40 sps:$4 sm:$0xff]  }
 0x8e9   :  { %16124 = vmatpush2.bf16.msra.mxu0 %v22776_v12  ;;  %v22824_v12 = vld [vmem:[#allocation4 + $0x1000] ss:$40 sps:$4 sm:$0xff]  }
 0x8ea   :  { %16125 = vmatprep.subr.bf16.mxu0 %v22784_v14  ;;  %v22832_v14 = vld [vmem:[#allocation4 + $0xfb4] ss:$40 sps:$4 sm:$0xff]  }
 0x8eb   :  { %16085 = vmatpush2.bf16.msra.mxu1 %v22779_v25  ;;  %v22827_v25 = vld [vmem:[#allocation4 + $0xab0] ss:$40 sps:$4 sm:$0xff]  }
 0x8ec   :  { %16086 = vmatprep.subr.bf16.mxu1 %v22787_v32  ;;  %v22835_v32 = vld [vmem:[#allocation4 + $0xa64] ss:$40 sps:$4 sm:$0xff]  }
 0x8ed   :  { %16126 = vmatpush2.bf16.msra.mxu0 %v22782_v4  ;;  %v22830_v4 = vld [vmem:[#allocation4 + $0xfb0] ss:$40 sps:$4 sm:$0xff]  }
 0x8ee   :  { %16127 = vmatprep.subr.bf16.mxu0 %v22790_v20  ;;  %v22838_v20 = vld [vmem:[#allocation4 + $0xf64] ss:$40 sps:$4 sm:$0xff]  }
 0x8ef   :  { %16087 = vmatpush2.bf16.msra.mxu1 %v22785_v33  ;;  %v22833_v33 = vld [vmem:[#allocation4 + $0xa60] ss:$40 sps:$4 sm:$0xff]  }
 0x8f0   :  { %16088 = vmatprep.subr.bf16.mxu1 %v22793_v22  ;;  %v22841_v22 = vld [vmem:[#allocation4 + $0xa14] ss:$40 sps:$4 sm:$0xff]  }
 0x8f1   :  { %16128 = vmatpush2.bf16.msra.mxu0 %v22788_v23  ;;  %v22836_v23 = vld [vmem:[#allocation4 + $0xf60] ss:$40 sps:$4 sm:$0xff]  }
 0x8f2   :  { %16129 = vmatprep.subr.bf16.mxu0 %v22796_v46  ;;  %v22844_v46 = vld [vmem:[#allocation4 + $0xf14] ss:$40 sps:$4 sm:$0xff]  }
 0x8f3   :  { %16089 = vmatpush2.bf16.msra.mxu1 %v22791_v28  ;;  %v22839_v28 = vld [vmem:[#allocation4 + $0xa10] ss:$40 sps:$4 sm:$0xff]  }
 0x8f4   :  { %16140 = vmatprep.subr.bf16.mxu1 %v22799_v27  ;;  %v22847_v27 = vld [vmem:[#allocation4 + $0xec4] ss:$40 sps:$4 sm:$0xff]  }
 0x8f5   :  { %16130 = vmatpush2.bf16.msra.mxu0 %v22794_v47  ;;  %v22842_v47 = vld [vmem:[#allocation4 + $0xf10] ss:$40 sps:$4 sm:$0xff]  }
 0x8f6   :  { %v15846_v41 = vpop.f32.mrf.mxu1  ;;  %16091 = vmatmul.mubr.bf16.vlgmr.msra.gmra.mxu1 %v23967_v59  ;;  %16181 = vmatprep.subr.bf16.mxu0 %v22802_v34  ;;  %v22850_v34 = vld [vmem:[#allocation4 + $0x13c4] ss:$40 sps:$4 sm:$0xff]  }
 0x8f7   :  { %v15847_v42 = vadd.f32 %v15846_v41, %v24086_v38  ;;  %16141 = vmatpush1.bf16.msra.mxu1 %v22797_v51  ;;  %16172 = vmatprep.mubr.bf16.mxu1 %v24031_v37  ;;  %v22814_v38 = vld [vmem:[#allocation4 + $0x10a4] ss:$40 sps:$4 sm:$0xff]   ;;  %v22845_v51 = vld [vmem:[#allocation4 + $0xec0] ss:$40 sps:$4 sm:$0xff]   ;;  %v22856_v41 = vld [vmem:[#allocation4 + $0x1374] ss:$40 sps:$4 sm:$0xff]  }
 0x8f8   :  { %v15848_v16 = vpop.f32.mrf.mxu1  ;;  %16132 = vmatmul.mubr.bf16.vlgmr.msra.gmra.mxu0 %v23993_v17  ;;  %16142 = vmatprep.subr.bf16.mxu1 %v22805_v56  ;;  %v24095_v63 = vpop.f32.mrf.mxu0  ;;  %v22853_v56 = vld [vmem:[#allocation4 + $0xe74] ss:$40 sps:$4 sm:$0xff]  }
 0x8f9   :  { %v16673_v10 = vmax.f32 %v15847_v42, 0.0  ;;  %v15849_v15 = vadd.f32 %v15848_v16, %v24089_v55  ;;  %16182 = vmatpush1.bf16.msra.mxu0 %v22800_v57  ;;  %16213 = vmatprep.mubr.bf16.mxu0 %v24049_v49  ;;  %v22812_v55 = vld [vmem:[#allocation4 + $0x10a0] ss:$40 sps:$4 sm:$0xff]   ;;  %v22859_v42 = vld [vmem:[#allocation4 + $0xe24] ss:$40 sps:$4 sm:$0xff]  }
 0x8fa   :  { %v15850_v50 = vpop.f32.mrf.mxu1  ;;  %16183 = vmatprep.subr.bf16.mxu0 %v22808_v48  ;;  %v24099_v52 = vpop.f32.mrf.mxu0  ;;  %v22848_v57 = vld [vmem:[#allocation4 + $0x13c0] ss:$40 sps:$4 sm:$0xff]   ;;  %v22851_v48 = vld [vmem:[#allocation4 + $0xe70] ss:$40 sps:$4 sm:$0xff]   ;;  %v22862_v16 = vld [vmem:[#allocation4 + $0x1324] ss:$40 sps:$4 sm:$0xff]  }
 0x8fb   :  { %v24101_v9 = vpack.c.bf16 %v16673_v10, %v16673_v10  ;;  %v16674_v31 = vmax.f32 %v15849_v15, 0.0  ;;  %16143 = vmatpush1.bf16.msra.mxu1 %v22803_v13  ;;  %v22854_v13 = vld [vmem:[#allocation4 + $0x1370] ss:$40 sps:$4 sm:$0xff]   ;;  %v22865_v10 = vld [vmem:[#allocation4 + $0xdd4] ss:$40 sps:$4 sm:$0xff]  }
 0x8fc   :  { %v15851_v53 = vpop.f32.mrf.mxu1  ;;  %16144 = vmatprep.subr.bf16.mxu1 %v22811_v30  ;;  %v15891_v1 = vpop.f32.mrf.mxu0  ;;  %v22857_v30 = vld [vmem:[#allocation4 + $0xe20] ss:$40 sps:$4 sm:$0xff]   ;;  %v22863_v50 = vld [vmem:[#allocation4 + $0xdd0] ss:$40 sps:$4 sm:$0xff]  }
 0x8fd   :  { %v24103_v2 = vpack.c.bf16 %v16674_v31, %v16674_v31  ;;  %16184 = vmatpush1.bf16.msra.mxu0 %v22806_v44  ;;  %v22860_v15 = vld [vmem:[#allocation4 + $0x1320] ss:$40 sps:$4 sm:$0xff]   ;;  %v22868_v44 = vld [vmem:[#allocation4 + $0x12d4] ss:$40 sps:$4 sm:$0xff]   ;;  %v22866_v31 = vld [vmem:[#allocation4 + $0x12d0] ss:$40 sps:$4 sm:$0xff]  }
 0x8fe   :  { %16185 = vmatprep.subr.bf16.mxu0 %v22814_v38  ;;  %v15892_v7 = vpop.f32.mrf.mxu0  ;;  %v22871_v38 = vld [vmem:[#allocation4 + $0xd84] ss:$40 sps:$4 sm:$0xff]   ;;  %v22869_v53 = vld [vmem:[#allocation4 + $0xd80] ss:$40 sps:$4 sm:$0xff]  }
 0x8ff   :  { %16145 = vmatpush1.bf16.msra.mxu1 %v22809_v60  ;;  %v22874_v60 = vld [vmem:[#allocation4 + $0x1284] ss:$40 sps:$4 sm:$0xff]   ;;  %v22872_v1 = vld [vmem:[#allocation4 + $0x1280] ss:$40 sps:$4 sm:$0xff]  }
 0x900   :  { %16146 = vmatprep.subr.bf16.mxu1 %v22817_v61  ;;  %v22877_v61 = vld [vmem:[#allocation4 + $0xd34] ss:$40 sps:$4 sm:$0xff]   ;;  %v22883_v7 = vld [vmem:[#allocation4 + $0xce4] ss:$40 sps:$4 sm:$0xff]  }
 0x901   :  { %16186 = vmatpush1.bf16.msra.mxu0 %v22812_v55  ;;  %v22880_v55 = vld [vmem:[#allocation4 + $0x1234] ss:$40 sps:$4 sm:$0xff]  }
 0x902   :  { %16187 = vmatprep.subr.bf16.mxu0 %v22820_v5  ;;  %v22875_v5 = vld [vmem:[#allocation4 + $0xd30] ss:$40 sps:$4 sm:$0xff]  }
 0x903   :  { %16147 = vmatpush1.bf16.msra.mxu1 %v22815_v24  ;;  %v22878_v24 = vld [vmem:[#allocation4 + $0x1230] ss:$40 sps:$4 sm:$0xff]  }
 0x904   :  { %16148 = vmatprep.subr.bf16.mxu1 %v22823_v8  ;;  %v22886_v8 = vld [vmem:[#allocation4 + $0x11e4] ss:$40 sps:$4 sm:$0xff]  }
 0x905   :  { %16188 = vmatpush1.bf16.msra.mxu0 %v22818_v21  ;;  %v22881_v21 = vld [vmem:[#allocation4 + $0xce0] ss:$40 sps:$4 sm:$0xff]  }
 0x906   :  { %16189 = vmatprep.subr.bf16.mxu0 %v22826_v58  ;;  %v22889_v58 = vld [vmem:[#allocation4 + $0xc94] ss:$40 sps:$4 sm:$0xff]  }
 0x907   :  { %16149 = vmatpush1.bf16.msra.mxu1 %v22821_v11  ;;  %v22884_v11 = vld [vmem:[#allocation4 + $0x11e0] ss:$40 sps:$4 sm:$0xff]  }
 0x908   :  { %16150 = vmatprep.subr.bf16.mxu1 %v22829_v26  ;;  %v22892_v26 = vld [vmem:[#allocation4 + $0x1194] ss:$40 sps:$4 sm:$0xff]  }
 0x909   :  { %16190 = vmatpush1.bf16.msra.mxu0 %v22824_v12  ;;  %v24105_v12 = vld [vmem:[#allocation5] sm:$0xff] }
 0x90a   :  { %16191 = vmatprep.subr.bf16.mxu0 %v22832_v14  ;;  %v11609_v14 = vrot.slane %v24105_v12, %v23828_v0  ;;  %v22896_v0 = vld [vmem:[#allocation4 + $0x248] ss:$40 sps:$4 sm:$0xff]  }
 0x90b   :  { %16151 = vmatpush1.bf16.msra.mxu1 %v22827_v25  ;;  %v22887_v25 = vld [vmem:[#allocation4 + $0xc90] ss:$40 sps:$4 sm:$0xff]  }
 0x90c   :  { %16152 = vmatprep.subr.bf16.mxu1 %v22835_v32  ;;  %v22895_v32 = vld [vmem:[#allocation4 + $0x1644] ss:$40 sps:$4 sm:$0xff]  }
 0x90d   :  { %16192 = vmatpush1.bf16.msra.mxu0 %v22830_v4  ;;  %v11613_v4 = vrot.slane %v24105_v12, %v23831_v45 }
 0x90e   :  { %16193 = vmatprep.subr.bf16.mxu0 %v22838_v20  ;;  %v22890_v20 = vld [vmem:[#allocation4 + $0x1190] ss:$40 sps:$4 sm:$0xff]  }
 0x90f   :  { %16153 = vmatpush1.bf16.msra.mxu1 %v22833_v33  ;;  %v22898_v33 = vld [vmem:[#allocation4 + $0x24c] ss:$40 sps:$4 sm:$0xff]  }
 0x910   :  { %16154 = vmatprep.subr.bf16.mxu1 %v22841_v22  ;;  %v15888_v22 = vadd.f32 %v24095_v63, %v11609_v14  ;;  %v22937_v14 = vld [vmem:[#allocation4 + $0x1414] ss:$40 sps:$4 sm:$0xff]  }
 0x911   :  { %16194 = vmatpush1.bf16.msra.mxu0 %v22836_v23  ;;  %v22893_v23 = vld [vmem:[#allocation4 + $0x1640] ss:$40 sps:$4 sm:$0xff]  }
 0x912   :  { %16195 = vmatprep.subr.bf16.mxu0 %v22844_v46  ;;  %v22901_v46 = vld [vmem:[#allocation4 + $0x15f4] ss:$40 sps:$4 sm:$0xff]  }
 0x913   :  { %16155 = vmatpush1.bf16.msra.mxu1 %v22839_v28  ;;  %v15890_v28 = vadd.f32 %v24099_v52, %v11613_v4  ;;  %v22935_v4 = vld [vmem:[#allocation4 + $0x1410] ss:$40 sps:$4 sm:$0xff]  }
 0x914   :  { %16156 = vmatprep.subr.bf16.mxu1 %v22847_v27 }
 0x915   :  { %16196 = vmatpush1.bf16.msra.mxu0 %v22842_v47  ;;  %v22904_v47 = vld [vmem:[#allocation4 + $0x1fc] ss:$40 sps:$4 sm:$0xff]  }
 0x916   :  { %16197 = vmatprep.subr.bf16.mxu0 %v22850_v34  ;;  %v22899_v34 = vld [vmem:[#allocation4 + $0x15f0] ss:$40 sps:$4 sm:$0xff]  }
 0x917   :  { %16157 = vmatpush2.bf16.msra.mxu1 %v22845_v51 }
 0x918   :  { %16158 = vmatprep.subr.bf16.mxu1 %v22853_v56  ;;  %v22907_v56 = vld [vmem:[#allocation4 + $0x15a4] ss:$40 sps:$4 sm:$0xff]  }
 0x919   :  { %16198 = vmatpush2.bf16.msra.mxu0 %v22848_v57 }
 0x91a   :  { %16199 = vmatprep.subr.bf16.mxu0 %v22856_v41  ;;  %v22902_v41 = vld [vmem:[#allocation4 + $0x1f8] ss:$40 sps:$4 sm:$0xff]  }
 0x91b   :  { %16159 = vmatpush2.bf16.msra.mxu1 %v22851_v48 }
 0x91c   :  { %16160 = vmatprep.subr.bf16.mxu1 %v22859_v42 }
 0x91d   :  { %16200 = vmatpush2.bf16.msra.mxu0 %v22854_v13  ;;  %v22910_v13 = vld [vmem:[#allocation4 + $0x1ac] ss:$40 sps:$4 sm:$0xff]  }
 0x91e   :  { %16201 = vmatprep.subr.bf16.mxu0 %v22862_v16 }
 0x91f   :  { %16161 = vmatpush2.bf16.msra.mxu1 %v22857_v30  ;;  %v22905_v30 = vld [vmem:[#allocation4 + $0x15a0] ss:$40 sps:$4 sm:$0xff]  }
 0x920   :  { %16162 = vmatprep.subr.bf16.mxu1 %v22865_v10 }
 0x921   :  { %16202 = vmatpush2.bf16.msra.mxu0 %v22860_v15  ;;  %v22913_v15 = vld [vmem:[#allocation4 + $0x1554] ss:$40 sps:$4 sm:$0xff]  }
 0x922   :  { %16203 = vmatprep.subr.bf16.mxu0 %v22868_v44 }
 0x923   :  { %16163 = vmatpush2.bf16.msra.mxu1 %v22863_v50  ;;  %v22908_v50 = vld [vmem:[#allocation4 + $0x1a8] ss:$40 sps:$4 sm:$0xff]  }
 0x924   :  { %16164 = vmatprep.subr.bf16.mxu1 %v22871_v38  ;;  %v22916_v38 = vld [vmem:[#allocation4 + $0x15c] ss:$40 sps:$4 sm:$0xff]  }
 0x925   :  { %16204 = vmatpush2.bf16.msra.mxu0 %v22866_v31 }
 0x926   :  { %16205 = vmatprep.subr.bf16.mxu0 %v22874_v60  ;;  %v22911_v60 = vld [vmem:[#allocation4 + $0x1550] ss:$40 sps:$4 sm:$0xff]  }
 0x927   :  { %16165 = vmatpush2.bf16.msra.mxu1 %v22869_v53  ;;  %v22919_v53 = vld [vmem:[#allocation4 + $0x1504] ss:$40 sps:$4 sm:$0xff]  }
 0x928   :  { %16166 = vmatprep.subr.bf16.mxu1 %v22877_v61  ;;  %v22914_v61 = vld [vmem:[#allocation4 + $0x158] ss:$40 sps:$4 sm:$0xff]  }
 0x929   :  { %16206 = vmatpush2.bf16.msra.mxu0 %v22872_v1  ;;  %v22922_v1 = vld [vmem:[#allocation4 + $0x10c] ss:$40 sps:$4 sm:$0xff]  }
 0x92a   :  { %16207 = vmatprep.subr.bf16.mxu0 %v22880_v55  ;;  %v22917_v55 = vld [vmem:[#allocation4 + $0x1500] ss:$40 sps:$4 sm:$0xff]  }
 0x92b   :  { %16167 = vmatpush2.bf16.msra.mxu1 %v22875_v5  ;;  %v22925_v5 = vld [vmem:[#allocation4 + $0x14b4] ss:$40 sps:$4 sm:$0xff]  }
 0x92c   :  { %16168 = vmatprep.subr.bf16.mxu1 %v22883_v7  ;;  %v22920_v7 = vld [vmem:[#allocation4 + $0x108] ss:$40 sps:$4 sm:$0xff]  }
 0x92d   :  { %16208 = vmatpush2.bf16.msra.mxu0 %v22878_v24  ;;  %v22928_v24 = vld [vmem:[#allocation4 + $0xbc] ss:$40 sps:$4 sm:$0xff]  }
 0x92e   :  { %16209 = vmatprep.subr.bf16.mxu0 %v22886_v8  ;;  %v22923_v8 = vld [vmem:[#allocation4 + $0x14b0] ss:$40 sps:$4 sm:$0xff]  }
 0x92f   :  { %16169 = vmatpush2.bf16.msra.mxu1 %v22881_v21  ;;  %v22931_v21 = vld [vmem:[#allocation4 + $0x1464] ss:$40 sps:$4 sm:$0xff]  }
 0x930   :  { %16170 = vmatprep.subr.bf16.mxu1 %v22889_v58  ;;  %v22926_v58 = vld [vmem:[#allocation4 + $0xb8] ss:$40 sps:$4 sm:$0xff]  }
 0x931   :  { %16210 = vmatpush2.bf16.msra.mxu0 %v22884_v11  ;;  %v22934_v11 = vld [vmem:[#allocation4 + $0x6c] ss:$40 sps:$4 sm:$0xff]  }
 0x932   :  { %16211 = vmatprep.subr.bf16.mxu0 %v22892_v26  ;;  %v22929_v26 = vld [vmem:[#allocation4 + $0x1460] ss:$40 sps:$4 sm:$0xff]  }
 0x933   :  { %16171 = vmatpush2.bf16.msra.mxu1 %v22887_v25  ;;  %v22932_v25 = vld [vmem:[#allocation4 + $0x68] ss:$40 sps:$4 sm:$0xff]  }
 0x934   :  { %16222 = vmatprep.subr.bf16.mxu1 %v22895_v32  ;;  %v22940_v32 = vld [vmem:[#allocation4 + $0x1c] ss:$40 sps:$4 sm:$0xff]  }
 0x935   :  { %16212 = vmatpush2.bf16.msra.mxu0 %v22890_v20  ;;  %v22943_v20 = vld [vmem:[#allocation4 + $0x18c4] ss:$40 sps:$4 sm:$0xff]  }
 0x936   :  { %v15928_v27 = vpop.f32.mrf.mxu1  ;;  %16173 = vmatmul.mubr.bf16.vlgmr.msra.gmra.mxu1 %v24029_v36  ;;  %16263 = vmatprep.subr.bf16.mxu0 %v22898_v33  ;;  %v22938_v33 = vld [vmem:[#allocation4 + $0x18] ss:$40 sps:$4 sm:$0xff]  }
 0x937   :  { %v15929_v45 = vadd.f32 %v15928_v27, %v15888_v22  ;;  %16223 = vmatpush1.bf16.msra.mxu1 %v22893_v23  ;;  %16254 = vmatprep.mubr.bf16.mxu1 %v24055_v29  ;;  %v22946_v22 = vld [vmem:[#allocation4 + $0x4cc] ss:$40 sps:$4 sm:$0xff]   ;;  %v22941_v23 = vld [vmem:[#allocation4 + $0x18c0] ss:$40 sps:$4 sm:$0xff]   ;;  %v22947_v27 = vld [vmem:[#allocation4 + $0x1870] ss:$40 sps:$4 sm:$0xff]  }
 0x938   :  { %v15930_v51 = vpop.f32.mrf.mxu1  ;;  %v15969_v63 = vpop.f32.mrf.mxu0  ;;  %16214 = vmatmul.mubr.bf16.vlgmr.msra.gmra.mxu0 %v24047_v43  ;;  %16224 = vmatprep.subr.bf16.mxu1 %v22901_v46  ;;  %v22949_v46 = vld [vmem:[#allocation4 + $0x1874] ss:$40 sps:$4 sm:$0xff]  }
 0x939   :  { %v15931_v57 = vadd.f32 %v15930_v51, %v15890_v28  ;;  %v24116_v52 = vadd.f32 %v15969_v63, %v15929_v45  ;;  %16264 = vmatpush1.bf16.msra.mxu0 %v22896_v0  ;;  %16295 = vmatprep.mubr.bf16.mxu0 %v23969_v6  ;;  %v22944_v28 = vld [vmem:[#allocation4 + $0x4c8] ss:$40 sps:$4 sm:$0xff]   ;;  %v22952_v0 = vld [vmem:[#allocation4 + $0x47c] ss:$40 sps:$4 sm:$0xff]   ;;  %v22950_v45 = vld [vmem:[#allocation4 + $0x478] ss:$40 sps:$4 sm:$0xff]  }
 0x93a   :  { %v15932_v48 = vpop.f32.mrf.mxu1  ;;  %v15971_v42 = vpop.f32.mrf.mxu0  ;;  %16265 = vmatprep.subr.bf16.mxu0 %v22904_v47  ;;  %v22955_v47 = vld [vmem:[#allocation4 + $0x1824] ss:$40 sps:$4 sm:$0xff]   ;;  %v22953_v51 = vld [vmem:[#allocation4 + $0x1820] ss:$40 sps:$4 sm:$0xff]   ;;  %v22961_v63 = vld [vmem:[#allocation4 + $0x17d4] ss:$40 sps:$4 sm:$0xff]  }
 0x93b   :  { %v24119_v16 = vadd.f32 %v15971_v42, %v15931_v57  ;;  %16225 = vmatpush1.bf16.msra.mxu1 %v22899_v34  ;;  %v22958_v34 = vld [vmem:[#allocation4 + $0x42c] ss:$40 sps:$4 sm:$0xff]   ;;  %v22964_v57 = vld [vmem:[#allocation4 + $0x3dc] ss:$40 sps:$4 sm:$0xff]   ;;  %v22962_v42 = vld [vmem:[#allocation4 + $0x3d8] ss:$40 sps:$4 sm:$0xff]  }
 0x93c   :  { %v15933_v10 = vpop.f32.mrf.mxu1  ;;  %16226 = vmatprep.subr.bf16.mxu1 %v22907_v56  ;;  %v15973_v44 = vpop.f32.mrf.mxu0  ;;  %v22956_v56 = vld [vmem:[#allocation4 + $0x428] ss:$40 sps:$4 sm:$0xff]   ;;  %v22967_v48 = vld [vmem:[#allocation4 + $0x1784] ss:$40 sps:$4 sm:$0xff]  }
 0x93d   :  { %16266 = vmatpush1.bf16.msra.mxu0 %v22902_v41  ;;  %v22959_v41 = vld [vmem:[#allocation4 + $0x17d0] ss:$40 sps:$4 sm:$0xff]   ;;  %v22973_v10 = vld [vmem:[#allocation4 + $0x1734] ss:$40 sps:$4 sm:$0xff]  }
 0x93e   :  { %16267 = vmatprep.subr.bf16.mxu0 %v22910_v13  ;;  %v15974_v31 = vpop.f32.mrf.mxu0  ;;  %v22970_v13 = vld [vmem:[#allocation4 + $0x38c] ss:$40 sps:$4 sm:$0xff]   ;;  %v22976_v44 = vld [vmem:[#allocation4 + $0x33c] ss:$40 sps:$4 sm:$0xff]  }
 0x93f   :  { %16227 = vmatpush1.bf16.msra.mxu1 %v22905_v30  ;;  %v22965_v30 = vld [vmem:[#allocation4 + $0x1780] ss:$40 sps:$4 sm:$0xff]  }
 0x940   :  { %16228 = vmatprep.subr.bf16.mxu1 %v22913_v15  ;;  %v22968_v15 = vld [vmem:[#allocation4 + $0x388] ss:$40 sps:$4 sm:$0xff]   ;;  %v22974_v31 = vld [vmem:[#allocation4 + $0x338] ss:$40 sps:$4 sm:$0xff]  }
 0x941   :  { %16268 = vmatpush1.bf16.msra.mxu0 %v22908_v50  ;;  %v22971_v50 = vld [vmem:[#allocation4 + $0x1730] ss:$40 sps:$4 sm:$0xff]  }
 0x942   :  { %16269 = vmatprep.subr.bf16.mxu0 %v22916_v38  ;;  %v22979_v38 = vld [vmem:[#allocation4 + $0x16e4] ss:$40 sps:$4 sm:$0xff]  }
 0x943   :  { %16229 = vmatpush1.bf16.msra.mxu1 %v22911_v60  ;;  %v22982_v60 = vld [vmem:[#allocation4 + $0x2ec] ss:$40 sps:$4 sm:$0xff]  }
 0x944   :  { %16230 = vmatprep.subr.bf16.mxu1 %v22919_v53  ;;  %v22977_v53 = vld [vmem:[#allocation4 + $0x16e0] ss:$40 sps:$4 sm:$0xff]  }
 0x945   :  { %16270 = vmatpush1.bf16.msra.mxu0 %v22914_v61  ;;  %v22985_v61 = vld [vmem:[#allocation4 + $0x1694] ss:$40 sps:$4 sm:$0xff]  }
 0x946   :  { %16271 = vmatprep.subr.bf16.mxu0 %v22922_v1  ;;  %v22980_v1 = vld [vmem:[#allocation4 + $0x2e8] ss:$40 sps:$4 sm:$0xff]  }
 0x947   :  { %16231 = vmatpush1.bf16.msra.mxu1 %v22917_v55  ;;  %v22988_v55 = vld [vmem:[#allocation4 + $0x29c] ss:$40 sps:$4 sm:$0xff]  }
 0x948   :  { %16232 = vmatprep.subr.bf16.mxu1 %v22925_v5  ;;  %v22983_v5 = vld [vmem:[#allocation4 + $0x1690] ss:$40 sps:$4 sm:$0xff]  }
 0x949   :  { %16272 = vmatpush1.bf16.msra.mxu0 %v22920_v7  ;;  %v22991_v7 = vld [vmem:[#allocation4 + $0x74c] ss:$40 sps:$4 sm:$0xff]  }
 0x94a   :  { %16273 = vmatprep.subr.bf16.mxu0 %v22928_v24  ;;  %v22986_v24 = vld [vmem:[#allocation4 + $0x298] ss:$40 sps:$4 sm:$0xff]  }
 0x94b   :  { %16233 = vmatpush1.bf16.msra.mxu1 %v22923_v8  ;;  %v22994_v8 = vld [vmem:[#allocation4 + $0xc4c] ss:$40 sps:$4 sm:$0xff]  }
 0x94c   :  { %16234 = vmatprep.subr.bf16.mxu1 %v22931_v21  ;;  %v22989_v21 = vld [vmem:[#allocation4 + $0x748] ss:$40 sps:$4 sm:$0xff]  }
 0x94d   :  { %16274 = vmatpush1.bf16.msra.mxu0 %v22926_v58  ;;  %v22997_v58 = vld [vmem:[#allocation4 + $0x6fc] ss:$40 sps:$4 sm:$0xff]  }
 0x94e   :  { %16275 = vmatprep.subr.bf16.mxu0 %v22934_v11  ;;  %v22992_v11 = vld [vmem:[#allocation4 + $0xc48] ss:$40 sps:$4 sm:$0xff]  }
 0x94f   :  { %16235 = vmatpush1.bf16.msra.mxu1 %v22929_v26 }
 0x950   :  { %16236 = vmatprep.subr.bf16.mxu1 %v22937_v14  ;;  %v23000_v14 = vld [vmem:[#allocation4 + $0xbfc] ss:$40 sps:$4 sm:$0xff]  }
 0x951   :  { %16276 = vmatpush1.bf16.msra.mxu0 %v22932_v25 }
 0x952   :  { %16277 = vmatprep.subr.bf16.mxu0 %v22940_v32  ;;  %v22995_v32 = vld [vmem:[#allocation4 + $0x6f8] ss:$40 sps:$4 sm:$0xff]  }
 0x953   :  { %16237 = vmatpush1.bf16.msra.mxu1 %v22935_v4 }
 0x954   :  { %16238 = vmatprep.subr.bf16.mxu1 %v22943_v20 }
 0x955   :  { %16278 = vmatpush1.bf16.msra.mxu0 %v22938_v33  ;;  %v23003_v33 = vld [vmem:[#allocation4 + $0x6ac] ss:$40 sps:$4 sm:$0xff]  }
 0x956   :  { %16279 = vmatprep.subr.bf16.mxu0 %v22946_v22 }
 0x957   :  { %16239 = vmatpush2.bf16.msra.mxu1 %v22941_v23 }
 0x958   :  { %16240 = vmatprep.subr.bf16.mxu1 %v22949_v46  ;;  %v22998_v46 = vld [vmem:[#allocation4 + $0xbf8] ss:$40 sps:$4 sm:$0xff]  }
 0x959   :  { %16280 = vmatpush2.bf16.msra.mxu0 %v22944_v28 }
 0x95a   :  { %16281 = vmatprep.subr.bf16.mxu0 %v22952_v0 }
 0x95b   :  { %16241 = vmatpush2.bf16.msra.mxu1 %v22947_v27 }
 0x95c   :  { %16242 = vmatprep.subr.bf16.mxu1 %v22955_v47 }
 0x95d   :  { %16282 = vmatpush2.bf16.msra.mxu0 %v22950_v45  ;;  %v23001_v45 = vld [vmem:[#allocation4 + $0x6a8] ss:$40 sps:$4 sm:$0xff]  }
 0x95e   :  { %16283 = vmatprep.subr.bf16.mxu0 %v22958_v34 }
 0x95f   :  { %16243 = vmatpush2.bf16.msra.mxu1 %v22953_v51  ;;  %v23009_v51 = vld [vmem:[#allocation4 + $0x65c] ss:$40 sps:$4 sm:$0xff]  }
 0x960   :  { %16244 = vmatprep.subr.bf16.mxu1 %v22961_v63 }
 0x961   :  { %16284 = vmatpush2.bf16.msra.mxu0 %v22956_v56 }
 0x962   :  { %16285 = vmatprep.subr.bf16.mxu0 %v22964_v57  ;;  %v23004_v57 = vld [vmem:[#allocation4 + $0xba8] ss:$40 sps:$4 sm:$0xff]  }
 0x963   :  { %16245 = vmatpush2.bf16.msra.mxu1 %v22959_v41  ;;  %v23012_v41 = vld [vmem:[#allocation4 + $0xb5c] ss:$40 sps:$4 sm:$0xff]  }
 0x964   :  { %16246 = vmatprep.subr.bf16.mxu1 %v22967_v48 }
 0x965   :  { %16286 = vmatpush2.bf16.msra.mxu0 %v22962_v42 }
 0x966   :  { %16287 = vmatprep.subr.bf16.mxu0 %v22970_v13  ;;  %v23007_v13 = vld [vmem:[#allocation4 + $0x658] ss:$40 sps:$4 sm:$0xff]  }
 0x967   :  { %16247 = vmatpush2.bf16.msra.mxu1 %v22965_v30  ;;  %v23015_v30 = vld [vmem:[#allocation4 + $0x60c] ss:$40 sps:$4 sm:$0xff]  }
 0x968   :  { %16248 = vmatprep.subr.bf16.mxu1 %v22973_v10  ;;  %v23010_v10 = vld [vmem:[#allocation4 + $0xb58] ss:$40 sps:$4 sm:$0xff]  }
 0x969   :  { %16288 = vmatpush2.bf16.msra.mxu0 %v22968_v15  ;;  %v23018_v15 = vld [vmem:[#allocation4 + $0xb0c] ss:$40 sps:$4 sm:$0xff]  }
 0x96a   :  { %16289 = vmatprep.subr.bf16.mxu0 %v22976_v44  ;;  %v23013_v44 = vld [vmem:[#allocation4 + $0x608] ss:$40 sps:$4 sm:$0xff]  }
 0x96b   :  { %16249 = vmatpush2.bf16.msra.mxu1 %v22971_v50  ;;  %v23021_v50 = vld [vmem:[#allocation4 + $0x5bc] ss:$40 sps:$4 sm:$0xff]  }
 0x96c   :  { %16250 = vmatprep.subr.bf16.mxu1 %v22979_v38  ;;  %v23016_v38 = vld [vmem:[#allocation4 + $0xb08] ss:$40 sps:$4 sm:$0xff]  }
 0x96d   :  { %16290 = vmatpush2.bf16.msra.mxu0 %v22974_v31  ;;  %v23024_v31 = vld [vmem:[#allocation4 + $0xabc] ss:$40 sps:$4 sm:$0xff]  }
 0x96e   :  { %16291 = vmatprep.subr.bf16.mxu0 %v22982_v60  ;;  %v23019_v60 = vld [vmem:[#allocation4 + $0x5b8] ss:$40 sps:$4 sm:$0xff]  }
 0x96f   :  { %16251 = vmatpush2.bf16.msra.mxu1 %v22977_v53  ;;  %v23027_v53 = vld [vmem:[#allocation4 + $0x56c] ss:$40 sps:$4 sm:$0xff]  }
 0x970   :  { %16252 = vmatprep.subr.bf16.mxu1 %v22985_v61  ;;  %v23022_v61 = vld [vmem:[#allocation4 + $0xab8] ss:$40 sps:$4 sm:$0xff]  }
 0x971   :  { %16292 = vmatpush2.bf16.msra.mxu0 %v22980_v1  ;;  %v23030_v1 = vld [vmem:[#allocation4 + $0xa6c] ss:$40 sps:$4 sm:$0xff]  }
 0x972   :  { %16293 = vmatprep.subr.bf16.mxu0 %v22988_v55  ;;  %v23025_v55 = vld [vmem:[#allocation4 + $0x568] ss:$40 sps:$4 sm:$0xff]  }
 0x973   :  { %16253 = vmatpush2.bf16.msra.mxu1 %v22983_v5  ;;  %v23033_v5 = vld [vmem:[#allocation4 + $0x51c] ss:$40 sps:$4 sm:$0xff]  }
 0x974   :  { %16304 = vmatprep.subr.bf16.mxu1 %v22991_v7  ;;  %v23028_v7 = vld [vmem:[#allocation4 + $0xa68] ss:$40 sps:$4 sm:$0xff]  }
 0x975   :  { %16294 = vmatpush2.bf16.msra.mxu0 %v22986_v24  ;;  %v23036_v24 = vld [vmem:[#allocation4 + $0xa1c] ss:$40 sps:$4 sm:$0xff]  }
 0x976   :  { %v16010_v26 = vpop.f32.mrf.mxu1  ;;  %16255 = vmatmul.mubr.bf16.vlgmr.msra.gmra.mxu1 %v24053_v39  ;;  %16345 = vmatprep.subr.bf16.mxu0 %v22994_v8  ;;  %v23031_v8 = vld [vmem:[#allocation4 + $0x518] ss:$40 sps:$4 sm:$0xff]  }
 0x977   :  { %v16011_v25 = vadd.f32 %v16010_v26, %v24116_v52  ;;  %16305 = vmatpush1.bf16.msra.mxu1 %v22989_v21  ;;  %16336 = vmatprep.mubr.bf16.mxu1 %v23995_v54  ;;  %v23006_v52 = vld [vmem:[#allocation4 + $0xbac] ss:$40 sps:$4 sm:$0xff]   ;;  %v23037_v26 = vld [vmem:[#allocation4 + $0x9c8] ss:$40 sps:$4 sm:$0xff]  }
 0x978   :  { %v16012_v4 = vpop.f32.mrf.mxu1  ;;  %v16051_v20 = vpop.f32.mrf.mxu0  ;;  %16296 = vmatmul.mubr.bf16.vlgmr.msra.gmra.mxu0 %v23967_v59  ;;  %16306 = vmatprep.subr.bf16.mxu1 %v22997_v58  ;;  %v23039_v21 = vld [vmem:[#allocation4 + $0x9cc] ss:$40 sps:$4 sm:$0xff]   ;;  %v23034_v58 = vld [vmem:[#allocation4 + $0xa18] ss:$40 sps:$4 sm:$0xff]  }
 0x979   :  { %v16013_v22 = vadd.f32 %v16012_v4, %v24119_v16  ;;  %v16052_v23 = vadd.f32 %v16051_v20, %v16011_v25  ;;  %16346 = vmatpush1.bf16.msra.mxu0 %v22992_v11  ;;  %16377 = vmatprep.mubr.bf16.mxu0 %v24031_v37  ;;  %v23042_v11 = vld [vmem:[#allocation4 + $0xecc] ss:$40 sps:$4 sm:$0xff]   ;;  %v23040_v25 = vld [vmem:[#allocation4 + $0xec8] ss:$40 sps:$4 sm:$0xff]   ;;  %v23043_v4 = vld [vmem:[#allocation4 + $0x978] ss:$40 sps:$4 sm:$0xff]  }
 0x97a   :  { %v16014_v28 = vpop.f32.mrf.mxu1  ;;  %v16053_v0 = vpop.f32.mrf.mxu0  ;;  %16347 = vmatprep.subr.bf16.mxu0 %v23000_v14  ;;  %v23045_v14 = vld [vmem:[#allocation4 + $0x97c] ss:$40 sps:$4 sm:$0xff]   ;;  %v23051_v20 = vld [vmem:[#allocation4 + $0x92c] ss:$40 sps:$4 sm:$0xff]  }
 0x97b   :  { %v16675_v27 = vmax.f32 %v16052_v23, 0.0  ;;  %v16054_v47 = vadd.f32 %v16053_v0, %v16013_v22  ;;  %16307 = vmatpush1.bf16.msra.mxu1 %v22995_v32  ;;  %v23048_v32 = vld [vmem:[#allocation4 + $0xe7c] ss:$40 sps:$4 sm:$0xff]   ;;  %v23054_v22 = vld [vmem:[#allocation4 + $0xe2c] ss:$40 sps:$4 sm:$0xff]  }
 0x97c   :  { %v16015_v34 = vpop.f32.mrf.mxu1  ;;  %16308 = vmatprep.subr.bf16.mxu1 %v23003_v33  ;;  %v16055_v63 = vpop.f32.mrf.mxu0  ;;  %v23046_v33 = vld [vmem:[#allocation4 + $0xe78] ss:$40 sps:$4 sm:$0xff]   ;;  %v23049_v23 = vld [vmem:[#allocation4 + $0x928] ss:$40 sps:$4 sm:$0xff]   ;;  %v23060_v0 = vld [vmem:[#allocation4 + $0xddc] ss:$40 sps:$4 sm:$0xff]  }
 0x97d   :  { %v24127_v56 = vpack.c.bf16 %v16675_v27, %v16675_v27  ;;  %v16676_v16 = vmax.f32 %v16054_v47, 0.0  ;;  %16348 = vmatpush1.bf16.msra.mxu0 %v22998_v46  ;;  %v23057_v46 = vld [vmem:[#allocation4 + $0x8dc] ss:$40 sps:$4 sm:$0xff]   ;;  %v23052_v28 = vld [vmem:[#allocation4 + $0xe28] ss:$40 sps:$4 sm:$0xff]  }
 0x97e   :  { %16349 = vmatprep.subr.bf16.mxu0 %v23006_v52  ;;  %v16056_v48 = vpop.f32.mrf.mxu0  ;;  %v23055_v52 = vld [vmem:[#allocation4 + $0x8d8] ss:$40 sps:$4 sm:$0xff]   ;;  %v23063_v27 = vld [vmem:[#allocation4 + $0x88c] ss:$40 sps:$4 sm:$0xff]   ;;  %v23061_v34 = vld [vmem:[#allocation4 + $0x888] ss:$40 sps:$4 sm:$0xff]  }
 0x97f   :  { %v24129_v42 = vpack.c.bf16 %v16676_v16, %v16676_v16  ;;  %16309 = vmatpush1.bf16.msra.mxu1 %v23001_v45  ;;  %v23058_v47 = vld [vmem:[#allocation4 + $0xdd8] ss:$40 sps:$4 sm:$0xff]   ;;  %v23066_v45 = vld [vmem:[#allocation4 + $0xd8c] ss:$40 sps:$4 sm:$0xff]   ;;  %v23064_v63 = vld [vmem:[#allocation4 + $0xd88] ss:$40 sps:$4 sm:$0xff]  }
 0x980   :  { %16310 = vmatprep.subr.bf16.mxu1 %v23009_v51  ;;  %v23069_v51 = vld [vmem:[#allocation4 + $0x83c] ss:$40 sps:$4 sm:$0xff]   ;;  %v23070_v48 = vld [vmem:[#allocation4 + $0xd38] ss:$40 sps:$4 sm:$0xff]  }
 0x981   :  { %16350 = vmatpush1.bf16.msra.mxu0 %v23004_v57  ;;  %v23072_v16 = vld [vmem:[#allocation4 + $0xd3c] ss:$40 sps:$4 sm:$0xff]   ;;  %v23067_v57 = vld [vmem:[#allocation4 + $0x838] ss:$40 sps:$4 sm:$0xff]  }
 0x982   :  { %16351 = vmatprep.subr.bf16.mxu0 %v23012_v41  ;;  %v23075_v41 = vld [vmem:[#allocation4 + $0x7ec] ss:$40 sps:$4 sm:$0xff]  }
 0x983   :  { %16311 = vmatpush1.bf16.msra.mxu1 %v23007_v13  ;;  %v23078_v13 = vld [vmem:[#allocation4 + $0xcec] ss:$40 sps:$4 sm:$0xff]  }
 0x984   :  { %16312 = vmatprep.subr.bf16.mxu1 %v23015_v30  ;;  %v23073_v30 = vld [vmem:[#allocation4 + $0x7e8] ss:$40 sps:$4 sm:$0xff]  }
 0x985   :  { %16352 = vmatpush1.bf16.msra.mxu0 %v23010_v10  ;;  %v23081_v10 = vld [vmem:[#allocation4 + $0x79c] ss:$40 sps:$4 sm:$0xff]  }
 0x986   :  { %16353 = vmatprep.subr.bf16.mxu0 %v23018_v15  ;;  %v23076_v15 = vld [vmem:[#allocation4 + $0xce8] ss:$40 sps:$4 sm:$0xff]  }
 0x987   :  { %16313 = vmatpush1.bf16.msra.mxu1 %v23013_v44  ;;  %v23084_v44 = vld [vmem:[#allocation4 + $0xc9c] ss:$40 sps:$4 sm:$0xff]  }
 0x988   :  { %16314 = vmatprep.subr.bf16.mxu1 %v23021_v50  ;;  %v23079_v50 = vld [vmem:[#allocation4 + $0x798] ss:$40 sps:$4 sm:$0xff]  }
 0x989   :  { %16354 = vmatpush1.bf16.msra.mxu0 %v23016_v38  ;;  %v23087_v38 = vld [vmem:[#allocation4 + $0x114c] ss:$40 sps:$4 sm:$0xff]  }
 0x98a   :  { %16355 = vmatprep.subr.bf16.mxu0 %v23024_v31  ;;  %v23082_v31 = vld [vmem:[#allocation4 + $0xc98] ss:$40 sps:$4 sm:$0xff]  }
 0x98b   :  { %16315 = vmatpush1.bf16.msra.mxu1 %v23019_v60  ;;  %v23090_v60 = vld [vmem:[#allocation4 + $0x164c] ss:$40 sps:$4 sm:$0xff]  }
 0x98c   :  { %16316 = vmatprep.subr.bf16.mxu1 %v23027_v53  ;;  %v11617_v53 = vrot.slane %v24105_v12, %v23858_v62 }
 0x98d   :  { %16356 = vmatpush1.bf16.msra.mxu0 %v23022_v61  ;;  %v23085_v61 = vld [vmem:[#allocation4 + $0x1148] ss:$40 sps:$4 sm:$0xff]  }
 0x98e   :  { %16357 = vmatprep.subr.bf16.mxu0 %v23030_v1  ;;  %v23093_v1 = vld [vmem:[#allocation4 + $0x10fc] ss:$40 sps:$4 sm:$0xff]  }
 0x98f   :  { %16317 = vmatpush1.bf16.msra.mxu1 %v23025_v55  ;;  %v11621_v55 = vrot.slane %v24105_v12, %v23861_v3  ;;  %v23094_v3 = vld [vmem:[#allocation4 + $0x15f8] ss:$40 sps:$4 sm:$0xff]  }
 0x990   :  { %16318 = vmatprep.subr.bf16.mxu1 %v23033_v5  ;;  %v23088_v5 = vld [vmem:[#allocation4 + $0x1648] ss:$40 sps:$4 sm:$0xff]  }
 0x991   :  { %16358 = vmatpush1.bf16.msra.mxu0 %v23028_v7 }
 0x992   :  { %16359 = vmatprep.subr.bf16.mxu0 %v23036_v24  ;;  %v23096_v24 = vld [vmem:[#allocation4 + $0x15fc] ss:$40 sps:$4 sm:$0xff]  }
 0x993   :  { %16319 = vmatpush1.bf16.msra.mxu1 %v23031_v8 }
 0x994   :  { %16320 = vmatprep.subr.bf16.mxu1 %v23039_v21  ;;  %v23091_v21 = vld [vmem:[#allocation4 + $0x10f8] ss:$40 sps:$4 sm:$0xff]  }
 0x995   :  { %16360 = vmatpush1.bf16.msra.mxu0 %v23034_v58 }
 0x996   :  { %16361 = vmatprep.subr.bf16.mxu0 %v23042_v11  ;;  %v23099_v11 = vld [vmem:[#allocation4 + $0x10ac] ss:$40 sps:$4 sm:$0xff]  }
 0x997   :  { %16321 = vmatpush2.bf16.msra.mxu1 %v23037_v26 }
 0x998   :  { %16322 = vmatprep.subr.bf16.mxu1 %v23045_v14 }
 0x999   :  { %16362 = vmatpush2.bf16.msra.mxu0 %v23040_v25 }
 0x99a   :  { %16363 = vmatprep.subr.bf16.mxu0 %v23048_v32  ;;  %v23102_v32 = vld [vmem:[#allocation4 + $0x15ac] ss:$40 sps:$4 sm:$0xff]  }
 0x99b   :  { %16323 = vmatpush2.bf16.msra.mxu1 %v23043_v4 }
 0x99c   :  { %16324 = vmatprep.subr.bf16.mxu1 %v23051_v20  ;;  %v23097_v20 = vld [vmem:[#allocation4 + $0x10a8] ss:$40 sps:$4 sm:$0xff]  }
 0x99d   :  { %16364 = vmatpush2.bf16.msra.mxu0 %v23046_v33 }
 0x99e   :  { %16365 = vmatprep.subr.bf16.mxu0 %v23054_v22  ;;  %v23105_v22 = vld [vmem:[#allocation4 + $0x105c] ss:$40 sps:$4 sm:$0xff]  }
 0x99f   :  { %16325 = vmatpush2.bf16.msra.mxu1 %v23049_v23 }
 0x9a0   :  { %16326 = vmatprep.subr.bf16.mxu1 %v23057_v46  ;;  %v23100_v46 = vld [vmem:[#allocation4 + $0x15a8] ss:$40 sps:$4 sm:$0xff]  }
 0x9a1   :  { %16366 = vmatpush2.bf16.msra.mxu0 %v23052_v28  ;;  %v23108_v28 = vld [vmem:[#allocation4 + $0x155c] ss:$40 sps:$4 sm:$0xff]  }
 0x9a2   :  { %16367 = vmatprep.subr.bf16.mxu0 %v23060_v0 }
 0x9a3   :  { %16327 = vmatpush2.bf16.msra.mxu1 %v23055_v52  ;;  %v23103_v52 = vld [vmem:[#allocation4 + $0x1058] ss:$40 sps:$4 sm:$0xff]  }
 0x9a4   :  { %16328 = vmatprep.subr.bf16.mxu1 %v23063_v27  ;;  %v23111_v27 = vld [vmem:[#allocation4 + $0x100c] ss:$40 sps:$4 sm:$0xff]  }
 0x9a5   :  { %16368 = vmatpush2.bf16.msra.mxu0 %v23058_v47  ;;  %v23106_v47 = vld [vmem:[#allocation4 + $0x1558] ss:$40 sps:$4 sm:$0xff]  }
 0x9a6   :  { %16369 = vmatprep.subr.bf16.mxu0 %v23066_v45  ;;  %v23114_v45 = vld [vmem:[#allocation4 + $0x150c] ss:$40 sps:$4 sm:$0xff]  }
 0x9a7   :  { %16329 = vmatpush2.bf16.msra.mxu1 %v23061_v34  ;;  %v23109_v34 = vld [vmem:[#allocation4 + $0x1008] ss:$40 sps:$4 sm:$0xff]  }
 0x9a8   :  { %16330 = vmatprep.subr.bf16.mxu1 %v23069_v51  ;;  %v23117_v51 = vld [vmem:[#allocation4 + $0xfbc] ss:$40 sps:$4 sm:$0xff]  }
 0x9a9   :  { %16370 = vmatpush2.bf16.msra.mxu0 %v23064_v63  ;;  %v23112_v63 = vld [vmem:[#allocation4 + $0x1508] ss:$40 sps:$4 sm:$0xff]  }
 0x9aa   :  { %16371 = vmatprep.subr.bf16.mxu0 %v23072_v16  ;;  %v23120_v16 = vld [vmem:[#allocation4 + $0x14bc] ss:$40 sps:$4 sm:$0xff]  }
 0x9ab   :  { %16331 = vmatpush2.bf16.msra.mxu1 %v23067_v57  ;;  %v23115_v57 = vld [vmem:[#allocation4 + $0xfb8] ss:$40 sps:$4 sm:$0xff]  }
 0x9ac   :  { %16332 = vmatprep.subr.bf16.mxu1 %v23075_v41  ;;  %v23123_v41 = vld [vmem:[#allocation4 + $0xf6c] ss:$40 sps:$4 sm:$0xff]  }
 0x9ad   :  { %16372 = vmatpush2.bf16.msra.mxu0 %v23070_v48  ;;  %v23118_v48 = vld [vmem:[#allocation4 + $0x14b8] ss:$40 sps:$4 sm:$0xff]  }
 0x9ae   :  { %16373 = vmatprep.subr.bf16.mxu0 %v23078_v13  ;;  %v23126_v13 = vld [vmem:[#allocation4 + $0x146c] ss:$40 sps:$4 sm:$0xff]  }
 0x9af   :  { %16333 = vmatpush2.bf16.msra.mxu1 %v23073_v30  ;;  %v23121_v30 = vld [vmem:[#allocation4 + $0xf68] ss:$40 sps:$4 sm:$0xff]  }
 0x9b0   :  { %16334 = vmatprep.subr.bf16.mxu1 %v23081_v10  ;;  %v23129_v10 = vld [vmem:[#allocation4 + $0xf1c] ss:$40 sps:$4 sm:$0xff]  }
 0x9b1   :  { %16374 = vmatpush2.bf16.msra.mxu0 %v23076_v15  ;;  %v23124_v15 = vld [vmem:[#allocation4 + $0x1468] ss:$40 sps:$4 sm:$0xff]  }
 0x9b2   :  { %16375 = vmatprep.subr.bf16.mxu0 %v23084_v44  ;;  %v23132_v44 = vld [vmem:[#allocation4 + $0x141c] ss:$40 sps:$4 sm:$0xff]  }
 0x9b3   :  { %16335 = vmatpush2.bf16.msra.mxu1 %v23079_v50  ;;  %v23127_v50 = vld [vmem:[#allocation4 + $0xf18] ss:$40 sps:$4 sm:$0xff]  }
 0x9b4   :  { %16386 = vmatprep.subr.bf16.mxu1 %v23087_v38  ;;  %v23135_v38 = vld [vmem:[#allocation4 + $0x13cc] ss:$40 sps:$4 sm:$0xff]  }
 0x9b5   :  { %16376 = vmatpush2.bf16.msra.mxu0 %v23082_v31  ;;  %v23130_v31 = vld [vmem:[#allocation4 + $0x1418] ss:$40 sps:$4 sm:$0xff]  }
 0x9b6   :  { %v16092_v7 = vpop.f32.mrf.mxu1  ;;  %16337 = vmatmul.mubr.bf16.vlgmr.msra.gmra.mxu1 %v23993_v17  ;;  %16427 = vmatprep.subr.bf16.mxu0 %v23090_v60  ;;  %v23138_v60 = vld [vmem:[#allocation4 + $0x18cc] ss:$40 sps:$4 sm:$0xff]  }
 0x9b7   :  { %v16093_v8 = vadd.f32 %v16092_v7, %v11617_v53  ;;  %16387 = vmatpush1.bf16.msra.mxu1 %v23085_v61  ;;  %16418 = vmatprep.mubr.bf16.mxu1 %v24049_v49  ;;  %v23133_v53 = vld [vmem:[#allocation4 + $0x13c8] ss:$40 sps:$4 sm:$0xff]   ;;  %v23141_v61 = vld [vmem:[#allocation4 + $0x137c] ss:$40 sps:$4 sm:$0xff]   ;;  %v23147_v7 = vld [vmem:[#allocation4 + $0x132c] ss:$40 sps:$4 sm:$0xff]  }
 0x9b8   :  { %v16094_v58 = vpop.f32.mrf.mxu1  ;;  %v16133_v62 = vpop.f32.mrf.mxu0  ;;  %16378 = vmatmul.mubr.bf16.vlgmr.msra.gmra.mxu0 %v24029_v36  ;;  %16388 = vmatprep.subr.bf16.mxu1 %v23093_v1  ;;  %v23136_v1 = vld [vmem:[#allocation4 + $0x18c8] ss:$40 sps:$4 sm:$0xff]  }
 0x9b9   :  { %v16095_v26 = vadd.f32 %v16094_v58, %v11621_v55  ;;  %v24138_v14 = vadd.f32 %v16133_v62, %v16093_v8  ;;  %16428 = vmatpush1.bf16.msra.mxu0 %v23088_v5  ;;  %16459 = vmatprep.mubr.bf16.mxu0 %v24055_v29  ;;  %v23144_v55 = vld [vmem:[#allocation4 + $0x187c] ss:$40 sps:$4 sm:$0xff]   ;;  %v23139_v5 = vld [vmem:[#allocation4 + $0x1378] ss:$40 sps:$4 sm:$0xff]   ;;  %v23150_v8 = vld [vmem:[#allocation4 + $0x182c] ss:$40 sps:$4 sm:$0xff]  }
 0x9ba   :  { %v16096_v12 = vpop.f32.mrf.mxu1  ;;  %v16135_v25 = vpop.f32.mrf.mxu0  ;;  %16429 = vmatprep.subr.bf16.mxu0 %v23096_v24  ;;  %v23142_v24 = vld [vmem:[#allocation4 + $0x1878] ss:$40 sps:$4 sm:$0xff]   ;;  %v23153_v58 = vld [vmem:[#allocation4 + $0x12dc] ss:$40 sps:$4 sm:$0xff]   ;;  %v23148_v62 = vld [vmem:[#allocation4 + $0x1828] ss:$40 sps:$4 sm:$0xff]  }
 0x9bb   :  { %v24141_v4 = vadd.f32 %v16135_v25, %v16095_v26  ;;  %16389 = vmatpush1.bf16.msra.mxu1 %v23091_v21  ;;  %v23145_v21 = vld [vmem:[#allocation4 + $0x1328] ss:$40 sps:$4 sm:$0xff]   ;;  %v23151_v26 = vld [vmem:[#allocation4 + $0x12d8] ss:$40 sps:$4 sm:$0xff]   ;;  %v23162_v25 = vld [vmem:[#allocation4 + $0x178c] ss:$40 sps:$4 sm:$0xff]  }
 0x9bc   :  { %v16097_v33 = vpop.f32.mrf.mxu1  ;;  %16390 = vmatprep.subr.bf16.mxu1 %v23099_v11  ;;  %v16137_v23 = vpop.f32.mrf.mxu0  ;;  %v23156_v11 = vld [vmem:[#allocation4 + $0x17dc] ss:$40 sps:$4 sm:$0xff]   ;;  %v23154_v12 = vld [vmem:[#allocation4 + $0x17d8] ss:$40 sps:$4 sm:$0xff]  }
 0x9bd   :  { %16430 = vmatpush1.bf16.msra.mxu0 %v23094_v3  ;;  %v23159_v3 = vld [vmem:[#allocation4 + $0x128c] ss:$40 sps:$4 sm:$0xff]   ;;  %v23160_v33 = vld [vmem:[#allocation4 + $0x1788] ss:$40 sps:$4 sm:$0xff]   ;;  %v23163_v23 = vld [vmem:[#allocation4 + $0x1238] ss:$40 sps:$4 sm:$0xff]  }
 0x9be   :  { %16431 = vmatprep.subr.bf16.mxu0 %v23102_v32  ;;  %v16138_v0 = vpop.f32.mrf.mxu0  ;;  %v23157_v32 = vld [vmem:[#allocation4 + $0x1288] ss:$40 sps:$4 sm:$0xff]  }
 0x9bf   :  { %16391 = vmatpush1.bf16.msra.mxu1 %v23097_v20  ;;  %v23165_v20 = vld [vmem:[#allocation4 + $0x123c] ss:$40 sps:$4 sm:$0xff]   ;;  %v23174_v0 = vld [vmem:[#allocation4 + $0x16ec] ss:$40 sps:$4 sm:$0xff]  }
 0x9c0   :  { %16392 = vmatprep.subr.bf16.mxu1 %v23105_v22  ;;  %v23168_v22 = vld [vmem:[#allocation4 + $0x173c] ss:$40 sps:$4 sm:$0xff]  }
 0x9c1   :  { %16432 = vmatpush1.bf16.msra.mxu0 %v23100_v46  ;;  %v23171_v46 = vld [vmem:[#allocation4 + $0x11ec] ss:$40 sps:$4 sm:$0xff]  }
 0x9c2   :  { %16433 = vmatprep.subr.bf16.mxu0 %v23108_v28  ;;  %v23166_v28 = vld [vmem:[#allocation4 + $0x1738] ss:$40 sps:$4 sm:$0xff]  }
 0x9c3   :  { %16393 = vmatpush1.bf16.msra.mxu1 %v23103_v52  ;;  %v23169_v52 = vld [vmem:[#allocation4 + $0x11e8] ss:$40 sps:$4 sm:$0xff]  }
 0x9c4   :  { %16394 = vmatprep.subr.bf16.mxu1 %v23111_v27  ;;  %v23177_v27 = vld [vmem:[#allocation4 + $0x119c] ss:$40 sps:$4 sm:$0xff]  }
 0x9c5   :  { %16434 = vmatpush1.bf16.msra.mxu0 %v23106_v47  ;;  %v23172_v47 = vld [vmem:[#allocation4 + $0x16e8] ss:$40 sps:$4 sm:$0xff]  }
 0x9c6   :  { %16435 = vmatprep.subr.bf16.mxu0 %v23114_v45  ;;  %v23180_v45 = vld [vmem:[#allocation4 + $0x169c] ss:$40 sps:$4 sm:$0xff]  }
 0x9c7   :  { %16395 = vmatpush1.bf16.msra.mxu1 %v23109_v34  ;;  %v23175_v34 = vld [vmem:[#allocation4 + $0x1198] ss:$40 sps:$4 sm:$0xff]  }
 0x9c8   :  { %16396 = vmatprep.subr.bf16.mxu1 %v23117_v51  ;;  %v23183_v51 = vld [vmem:[#allocation4 + $0x254] ss:$40 sps:$4 sm:$0xff]  }
 0x9c9   :  { %16436 = vmatpush1.bf16.msra.mxu0 %v23112_v63  ;;  %v23178_v63 = vld [vmem:[#allocation4 + $0x1698] ss:$40 sps:$4 sm:$0xff]  }
 0x9ca   :  { %16437 = vmatprep.subr.bf16.mxu0 %v23120_v16  ;;  %v23186_v16 = vld [vmem:[#allocation4 + $0x754] ss:$40 sps:$4 sm:$0xff]  }
 0x9cb   :  { %16397 = vmatpush1.bf16.msra.mxu1 %v23115_v57  ;;  %v23181_v57 = vld [vmem:[#allocation4 + $0x250] ss:$40 sps:$4 sm:$0xff]  }
 0x9cc   :  { %16398 = vmatprep.subr.bf16.mxu1 %v23123_v41  ;;  %v23189_v41 = vld [vmem:[#allocation4 + $0x204] ss:$40 sps:$4 sm:$0xff]  }
 0x9cd   :  { %16438 = vmatpush1.bf16.msra.mxu0 %v23118_v48  ;;  %v23184_v48 = vld [vmem:[#allocation4 + $0x750] ss:$40 sps:$4 sm:$0xff]  }
 0x9ce   :  { %16439 = vmatprep.subr.bf16.mxu0 %v23126_v13 }
 0x9cf   :  { %16399 = vmatpush1.bf16.msra.mxu1 %v23121_v30  ;;  %v23192_v30 = vld [vmem:[#allocation4 + $0x704] ss:$40 sps:$4 sm:$0xff]  }
 0x9d0   :  { %16400 = vmatprep.subr.bf16.mxu1 %v23129_v10 }
 0x9d1   :  { %16440 = vmatpush1.bf16.msra.mxu0 %v23124_v15  ;;  %v23187_v15 = vld [vmem:[#allocation4 + $0x200] ss:$40 sps:$4 sm:$0xff]  }
 0x9d2   :  { %16441 = vmatprep.subr.bf16.mxu0 %v23132_v44 }
 0x9d3   :  { %16401 = vmatpush1.bf16.msra.mxu1 %v23127_v50 }
 0x9d4   :  { %16402 = vmatprep.subr.bf16.mxu1 %v23135_v38  ;;  %v23195_v38 = vld [vmem:[#allocation4 + $0x1b4] ss:$40 sps:$4 sm:$0xff]  }
 0x9d5   :  { %16442 = vmatpush1.bf16.msra.mxu0 %v23130_v31 }
 0x9d6   :  { %16443 = vmatprep.subr.bf16.mxu0 %v23138_v60 }
 0x9d7   :  { %16403 = vmatpush2.bf16.msra.mxu1 %v23133_v53  ;;  %v23190_v53 = vld [vmem:[#allocation4 + $0x700] ss:$40 sps:$4 sm:$0xff]  }
 0x9d8   :  { %16404 = vmatprep.subr.bf16.mxu1 %v23141_v61 }
 0x9d9   :  { %16444 = vmatpush2.bf16.msra.mxu0 %v23136_v1  ;;  %v23198_v1 = vld [vmem:[#allocation4 + $0x6b4] ss:$40 sps:$4 sm:$0xff]  }
 0x9da   :  { %16445 = vmatprep.subr.bf16.mxu0 %v23144_v55 }
 0x9db   :  { %16405 = vmatpush2.bf16.msra.mxu1 %v23139_v5 }
 0x9dc   :  { %16406 = vmatprep.subr.bf16.mxu1 %v23147_v7  ;;  %v23201_v7 = vld [vmem:[#allocation4 + $0x164] ss:$40 sps:$4 sm:$0xff]  }
 0x9dd   :  { %16446 = vmatpush2.bf16.msra.mxu0 %v23142_v24 }
 0x9de   :  { %16447 = vmatprep.subr.bf16.mxu0 %v23150_v8  ;;  %v23204_v8 = vld [vmem:[#allocation4 + $0x664] ss:$40 sps:$4 sm:$0xff]  }
 0x9df   :  { %16407 = vmatpush2.bf16.msra.mxu1 %v23145_v21 }
 0x9e0   :  { %16408 = vmatprep.subr.bf16.mxu1 %v23153_v58  ;;  %v23199_v58 = vld [vmem:[#allocation4 + $0x160] ss:$40 sps:$4 sm:$0xff]  }
 0x9e1   :  { %16448 = vmatpush2.bf16.msra.mxu0 %v23148_v62  ;;  %v23202_v62 = vld [vmem:[#allocation4 + $0x660] ss:$40 sps:$4 sm:$0xff]  }
 0x9e2   :  { %16449 = vmatprep.subr.bf16.mxu0 %v23156_v11  ;;  %v23210_v11 = vld [vmem:[#allocation4 + $0x614] ss:$40 sps:$4 sm:$0xff]  }
 0x9e3   :  { %16409 = vmatpush2.bf16.msra.mxu1 %v23151_v26  ;;  %v23205_v26 = vld [vmem:[#allocation4 + $0x110] ss:$40 sps:$4 sm:$0xff]  }
 0x9e4   :  { %16410 = vmatprep.subr.bf16.mxu1 %v23159_v3  ;;  %v23213_v3 = vld [vmem:[#allocation4 + $0xc4] ss:$40 sps:$4 sm:$0xff]  }
 0x9e5   :  { %16450 = vmatpush2.bf16.msra.mxu0 %v23154_v12  ;;  %v23208_v12 = vld [vmem:[#allocation4 + $0x610] ss:$40 sps:$4 sm:$0xff]  }
 0x9e6   :  { %16451 = vmatprep.subr.bf16.mxu0 %v23162_v25  ;;  %v23216_v25 = vld [vmem:[#allocation4 + $0x5c4] ss:$40 sps:$4 sm:$0xff]  }
 0x9e7   :  { %16411 = vmatpush2.bf16.msra.mxu1 %v23157_v32  ;;  %v23211_v32 = vld [vmem:[#allocation4 + $0xc0] ss:$40 sps:$4 sm:$0xff]  }
 0x9e8   :  { %16412 = vmatprep.subr.bf16.mxu1 %v23165_v20  ;;  %v23219_v20 = vld [vmem:[#allocation4 + $0x74] ss:$40 sps:$4 sm:$0xff]  }
 0x9e9   :  { %16452 = vmatpush2.bf16.msra.mxu0 %v23160_v33  ;;  %v23214_v33 = vld [vmem:[#allocation4 + $0x5c0] ss:$40 sps:$4 sm:$0xff]  }
 0x9ea   :  { %16453 = vmatprep.subr.bf16.mxu0 %v23168_v22  ;;  %v23222_v22 = vld [vmem:[#allocation4 + $0x574] ss:$40 sps:$4 sm:$0xff]  }
 0x9eb   :  { %16413 = vmatpush2.bf16.msra.mxu1 %v23163_v23  ;;  %v23217_v23 = vld [vmem:[#allocation4 + $0x70] ss:$40 sps:$4 sm:$0xff]  }
 0x9ec   :  { %16414 = vmatprep.subr.bf16.mxu1 %v23171_v46  ;;  %v23225_v46 = vld [vmem:[#allocation4 + $0x24] ss:$40 sps:$4 sm:$0xff]  }
 0x9ed   :  { %16454 = vmatpush2.bf16.msra.mxu0 %v23166_v28  ;;  %v23220_v28 = vld [vmem:[#allocation4 + $0x570] ss:$40 sps:$4 sm:$0xff]  }
 0x9ee   :  { %16455 = vmatprep.subr.bf16.mxu0 %v23174_v0  ;;  %v23228_v0 = vld [vmem:[#allocation4 + $0x524] ss:$40 sps:$4 sm:$0xff]  }
 0x9ef   :  { %16415 = vmatpush2.bf16.msra.mxu1 %v23169_v52  ;;  %v23223_v52 = vld [vmem:[#allocation4 + $0x20] ss:$40 sps:$4 sm:$0xff]  }
 0x9f0   :  { %16416 = vmatprep.subr.bf16.mxu1 %v23177_v27  ;;  %v23231_v27 = vld [vmem:[#allocation4 + $0x4d4] ss:$40 sps:$4 sm:$0xff]  }
 0x9f1   :  { %16456 = vmatpush2.bf16.msra.mxu0 %v23172_v47  ;;  %v23226_v47 = vld [vmem:[#allocation4 + $0x520] ss:$40 sps:$4 sm:$0xff]  }
 0x9f2   :  { %16457 = vmatprep.subr.bf16.mxu0 %v23180_v45  ;;  %v23234_v45 = vld [vmem:[#allocation4 + $0x9d4] ss:$40 sps:$4 sm:$0xff]  }
 0x9f3   :  { %16417 = vmatpush2.bf16.msra.mxu1 %v23175_v34  ;;  %v23229_v34 = vld [vmem:[#allocation4 + $0x4d0] ss:$40 sps:$4 sm:$0xff]  }
 0x9f4   :  { %16468 = vmatprep.subr.bf16.mxu1 %v23183_v51  ;;  %v23237_v51 = vld [vmem:[#allocation4 + $0x484] ss:$40 sps:$4 sm:$0xff]  }
 0x9f5   :  { %16458 = vmatpush2.bf16.msra.mxu0 %v23178_v63  ;;  %v23232_v63 = vld [vmem:[#allocation4 + $0x9d0] ss:$40 sps:$4 sm:$0xff]  }
 0x9f6   :  { %v16174_v13 = vpop.f32.mrf.mxu1  ;;  %16419 = vmatmul.mubr.bf16.vlgmr.msra.gmra.mxu1 %v24047_v43  ;;  %16509 = vmatprep.subr.bf16.mxu0 %v23186_v16  ;;  %v23240_v16 = vld [vmem:[#allocation4 + $0x984] ss:$40 sps:$4 sm:$0xff]  }
 0x9f7   :  { %v16175_v10 = vadd.f32 %v16174_v13, %v24138_v14  ;;  %16469 = vmatpush1.bf16.msra.mxu1 %v23181_v57  ;;  %16500 = vmatprep.mubr.bf16.mxu1 %v23969_v6  ;;  %v23193_v6 = vld [vmem:[#allocation4 + $0x1b0] ss:$40 sps:$4 sm:$0xff]   ;;  %v23235_v57 = vld [vmem:[#allocation4 + $0x480] ss:$40 sps:$4 sm:$0xff]   ;;  %v23246_v13 = vld [vmem:[#allocation4 + $0x934] ss:$40 sps:$4 sm:$0xff]  }
 0x9f8   :  { %v16176_v44 = vpop.f32.mrf.mxu1  ;;  %v16215_v50 = vpop.f32.mrf.mxu0  ;;  %16460 = vmatmul.mubr.bf16.vlgmr.msra.gmra.mxu0 %v24053_v39  ;;  %16470 = vmatprep.subr.bf16.mxu1 %v23189_v41  ;;  %v23243_v41 = vld [vmem:[#allocation4 + $0x434] ss:$40 sps:$4 sm:$0xff]  }
 0x9f9   :  { %v16177_v31 = vadd.f32 %v16176_v44, %v24141_v4  ;;  %v24148_v60 = vadd.f32 %v16215_v50, %v16175_v10  ;;  %16510 = vmatpush1.bf16.msra.mxu0 %v23184_v48  ;;  %16541 = vmatprep.mubr.bf16.mxu0 %v23995_v54  ;;  %v23196_v4 = vld [vmem:[#allocation4 + $0x6b0] ss:$40 sps:$4 sm:$0xff]   ;;  %v23207_v54 = vld [vmem:[#allocation4 + $0x114] ss:$40 sps:$4 sm:$0xff]   ;;  %v23238_v48 = vld [vmem:[#allocation4 + $0x980] ss:$40 sps:$4 sm:$0xff]  }
 0x9fa   :  { %v16178_v61 = vpop.f32.mrf.mxu1  ;;  %v16217_v14 = vpop.f32.mrf.mxu0  ;;  %16511 = vmatprep.subr.bf16.mxu0 %v23192_v30  ;;  %v23241_v30 = vld [vmem:[#allocation4 + $0x430] ss:$40 sps:$4 sm:$0xff]   ;;  %v23249_v10 = vld [vmem:[#allocation4 + $0x3e4] ss:$40 sps:$4 sm:$0xff]   ;;  %v23247_v50 = vld [vmem:[#allocation4 + $0x3e0] ss:$40 sps:$4 sm:$0xff]  }
 0x9fb   :  { %v24151_v55 = vadd.f32 %v16217_v14, %v16177_v31  ;;  %16471 = vmatpush1.bf16.msra.mxu1 %v23187_v15  ;;  %v23244_v15 = vld [vmem:[#allocation4 + $0x930] ss:$40 sps:$4 sm:$0xff]   ;;  %v23252_v44 = vld [vmem:[#allocation4 + $0x8e4] ss:$40 sps:$4 sm:$0xff]   ;;  %v23250_v31 = vld [vmem:[#allocation4 + $0x8e0] ss:$40 sps:$4 sm:$0xff]  }
 0x9fc   :  { %v16179_v5 = vpop.f32.mrf.mxu1  ;;  %16472 = vmatprep.subr.bf16.mxu1 %v23195_v38  ;;  %v16219_v24 = vpop.f32.mrf.mxu0  ;;  %v23255_v38 = vld [vmem:[#allocation4 + $0x394] ss:$40 sps:$4 sm:$0xff]   ;;  %v23253_v61 = vld [vmem:[#allocation4 + $0x390] ss:$40 sps:$4 sm:$0xff]   ;;  %v23261_v14 = vld [vmem:[#allocation4 + $0x344] ss:$40 sps:$4 sm:$0xff]  }
 0x9fd   :  { %16512 = vmatpush1.bf16.msra.mxu0 %v23190_v53  ;;  %v23258_v53 = vld [vmem:[#allocation4 + $0x894] ss:$40 sps:$4 sm:$0xff]   ;;  %v23259_v5 = vld [vmem:[#allocation4 + $0x340] ss:$40 sps:$4 sm:$0xff]  }
 0x9fe   :  { %16513 = vmatprep.subr.bf16.mxu0 %v23198_v1  ;;  %v16220_v21 = vpop.f32.mrf.mxu0  ;;  %v23256_v1 = vld [vmem:[#allocation4 + $0x890] ss:$40 sps:$4 sm:$0xff]   ;;  %v23262_v24 = vld [vmem:[#allocation4 + $0x840] ss:$40 sps:$4 sm:$0xff]  }
 0x9ff   :  { %16473 = vmatpush1.bf16.msra.mxu1 %v23193_v6  ;;  %v23264_v6 = vld [vmem:[#allocation4 + $0x844] ss:$40 sps:$4 sm:$0xff]  }
 0xa00   :  { %16474 = vmatprep.subr.bf16.mxu1 %v23201_v7  ;;  %v23267_v7 = vld [vmem:[#allocation4 + $0x2f4] ss:$40 sps:$4 sm:$0xff]   ;;  %v23273_v21 = vld [vmem:[#allocation4 + $0x2a4] ss:$40 sps:$4 sm:$0xff]  }
 0xa01   :  { %16514 = vmatpush1.bf16.msra.mxu0 %v23196_v4  ;;  %v23270_v4 = vld [vmem:[#allocation4 + $0x7f4] ss:$40 sps:$4 sm:$0xff]  }
 0xa02   :  { %16515 = vmatprep.subr.bf16.mxu0 %v23204_v8  ;;  %v23265_v8 = vld [vmem:[#allocation4 + $0x2f0] ss:$40 sps:$4 sm:$0xff]  }
 0xa03   :  { %16475 = vmatpush1.bf16.msra.mxu1 %v23199_v58  ;;  %v23268_v58 = vld [vmem:[#allocation4 + $0x7f0] ss:$40 sps:$4 sm:$0xff]  }
 0xa04   :  { %16476 = vmatprep.subr.bf16.mxu1 %v23207_v54  ;;  %v23276_v54 = vld [vmem:[#allocation4 + $0x7a4] ss:$40 sps:$4 sm:$0xff]  }
 0xa05   :  { %16516 = vmatpush1.bf16.msra.mxu0 %v23202_v62  ;;  %v23271_v62 = vld [vmem:[#allocation4 + $0x2a0] ss:$40 sps:$4 sm:$0xff]  }
 0xa06   :  { %16517 = vmatprep.subr.bf16.mxu0 %v23210_v11  ;;  %v23279_v11 = vld [vmem:[#allocation4 + $0xc54] ss:$40 sps:$4 sm:$0xff]  }
 0xa07   :  { %16477 = vmatpush1.bf16.msra.mxu1 %v23205_v26  ;;  %v23274_v26 = vld [vmem:[#allocation4 + $0x7a0] ss:$40 sps:$4 sm:$0xff]  }
 0xa08   :  { %16478 = vmatprep.subr.bf16.mxu1 %v23213_v3  ;;  %v23282_v3 = vld [vmem:[#allocation4 + $0x1154] ss:$40 sps:$4 sm:$0xff]  }
 0xa09   :  { %16518 = vmatpush1.bf16.msra.mxu0 %v23208_v12  ;;  %v23277_v12 = vld [vmem:[#allocation4 + $0xc50] ss:$40 sps:$4 sm:$0xff]  }
 0xa0a   :  { %16519 = vmatprep.subr.bf16.mxu0 %v23216_v25  ;;  %v23285_v25 = vld [vmem:[#allocation4 + $0xc04] ss:$40 sps:$4 sm:$0xff]  }
 0xa0b   :  { %16479 = vmatpush1.bf16.msra.mxu1 %v23211_v32  ;;  %v23280_v32 = vld [vmem:[#allocation4 + $0x1150] ss:$40 sps:$4 sm:$0xff]  }
 0xa0c   :  { %16480 = vmatprep.subr.bf16.mxu1 %v23219_v20 }
 0xa0d   :  { %16520 = vmatpush1.bf16.msra.mxu0 %v23214_v33  ;;  %v23288_v33 = vld [vmem:[#allocation4 + $0x1104] ss:$40 sps:$4 sm:$0xff]  }
 0xa0e   :  { %16521 = vmatprep.subr.bf16.mxu0 %v23222_v22 }
 0xa0f   :  { %16481 = vmatpush1.bf16.msra.mxu1 %v23217_v23  ;;  %v23283_v23 = vld [vmem:[#allocation4 + $0xc00] ss:$40 sps:$4 sm:$0xff]  }
 0xa10   :  { %16482 = vmatprep.subr.bf16.mxu1 %v23225_v46 }
 0xa11   :  { %16522 = vmatpush1.bf16.msra.mxu0 %v23220_v28  ;;  %v23291_v28 = vld [vmem:[#allocation4 + $0xbb4] ss:$40 sps:$4 sm:$0xff]  }
 0xa12   :  { %16523 = vmatprep.subr.bf16.mxu0 %v23228_v0 }
 0xa13   :  { %16483 = vmatpush1.bf16.msra.mxu1 %v23223_v52 }
 0xa14   :  { %16484 = vmatprep.subr.bf16.mxu1 %v23231_v27 }
 0xa15   :  { %16524 = vmatpush1.bf16.msra.mxu0 %v23226_v47 }
 0xa16   :  { %16525 = vmatprep.subr.bf16.mxu0 %v23234_v45 }
 0xa17   :  { %16485 = vmatpush2.bf16.msra.mxu1 %v23229_v34 }
 0xa18   :  { %16486 = vmatprep.subr.bf16.mxu1 %v23237_v51 }
 0xa19   :  { %16526 = vmatpush2.bf16.msra.mxu0 %v23232_v63  ;;  %v23297_v63 = vld [vmem:[#allocation4 + $0xb64] ss:$40 sps:$4 sm:$0xff]  }
 0xa1a   :  { %16527 = vmatprep.subr.bf16.mxu0 %v23240_v16 }
 0xa1b   :  { %16487 = vmatpush2.bf16.msra.mxu1 %v23235_v57 }
 0xa1c   :  { %16488 = vmatprep.subr.bf16.mxu1 %v23243_v41 }
 0xa1d   :  { %16528 = vmatpush2.bf16.msra.mxu0 %v23238_v48  ;;  %v23295_v48 = vld [vmem:[#allocation4 + $0xb60] ss:$40 sps:$4 sm:$0xff]  }
 0xa1e   :  { %16529 = vmatprep.subr.bf16.mxu0 %v23246_v13  ;;  %v23303_v13 = vld [vmem:[#allocation4 + $0xb14] ss:$40 sps:$4 sm:$0xff]  }
 0xa1f   :  { %16489 = vmatpush2.bf16.msra.mxu1 %v23241_v30  ;;  %v23298_v30 = vld [vmem:[#allocation4 + $0x1060] ss:$40 sps:$4 sm:$0xff]  }
 0xa20   :  { %16490 = vmatprep.subr.bf16.mxu1 %v23249_v10  ;;  %v23306_v10 = vld [vmem:[#allocation4 + $0x1014] ss:$40 sps:$4 sm:$0xff]  }
 0xa21   :  { %16530 = vmatpush2.bf16.msra.mxu0 %v23244_v15  ;;  %v23301_v15 = vld [vmem:[#allocation4 + $0xb10] ss:$40 sps:$4 sm:$0xff]  }
 0xa22   :  { %16531 = vmatprep.subr.bf16.mxu0 %v23252_v44  ;;  %v23309_v44 = vld [vmem:[#allocation4 + $0xac4] ss:$40 sps:$4 sm:$0xff]  }
 0xa23   :  { %16491 = vmatpush2.bf16.msra.mxu1 %v23247_v50  ;;  %v23304_v50 = vld [vmem:[#allocation4 + $0x1010] ss:$40 sps:$4 sm:$0xff]  }
 0xa24   :  { %16492 = vmatprep.subr.bf16.mxu1 %v23255_v38  ;;  %v23312_v38 = vld [vmem:[#allocation4 + $0xfc4] ss:$40 sps:$4 sm:$0xff]  }
 0xa25   :  { %16532 = vmatpush2.bf16.msra.mxu0 %v23250_v31  ;;  %v23307_v31 = vld [vmem:[#allocation4 + $0xac0] ss:$40 sps:$4 sm:$0xff]  }
 0xa26   :  { %16533 = vmatprep.subr.bf16.mxu0 %v23258_v53  ;;  %v23315_v53 = vld [vmem:[#allocation4 + $0xa74] ss:$40 sps:$4 sm:$0xff]  }
 0xa27   :  { %16493 = vmatpush2.bf16.msra.mxu1 %v23253_v61  ;;  %v23310_v61 = vld [vmem:[#allocation4 + $0xfc0] ss:$40 sps:$4 sm:$0xff]  }
 0xa28   :  { %16494 = vmatprep.subr.bf16.mxu1 %v23261_v14  ;;  %v23318_v14 = vld [vmem:[#allocation4 + $0xf74] ss:$40 sps:$4 sm:$0xff]  }
 0xa29   :  { %16534 = vmatpush2.bf16.msra.mxu0 %v23256_v1  ;;  %v23313_v1 = vld [vmem:[#allocation4 + $0xa70] ss:$40 sps:$4 sm:$0xff]  }
 0xa2a   :  { %16535 = vmatprep.subr.bf16.mxu0 %v23264_v6  ;;  %v23321_v6 = vld [vmem:[#allocation4 + $0xa24] ss:$40 sps:$4 sm:$0xff]  }
 0xa2b   :  { %16495 = vmatpush2.bf16.msra.mxu1 %v23259_v5  ;;  %v23316_v5 = vld [vmem:[#allocation4 + $0xf70] ss:$40 sps:$4 sm:$0xff]  }
 0xa2c   :  { %16496 = vmatprep.subr.bf16.mxu1 %v23267_v7  ;;  %v23324_v7 = vld [vmem:[#allocation4 + $0xf24] ss:$40 sps:$4 sm:$0xff]  }
 0xa2d   :  { %16536 = vmatpush2.bf16.msra.mxu0 %v23262_v24  ;;  %v23319_v24 = vld [vmem:[#allocation4 + $0xa20] ss:$40 sps:$4 sm:$0xff]  }
 0xa2e   :  { %16537 = vmatprep.subr.bf16.mxu0 %v23270_v4  ;;  %v23327_v4 = vld [vmem:[#allocation4 + $0xed4] ss:$40 sps:$4 sm:$0xff]  }
 0xa2f   :  { %16497 = vmatpush2.bf16.msra.mxu1 %v23265_v8  ;;  %v23322_v8 = vld [vmem:[#allocation4 + $0xf20] ss:$40 sps:$4 sm:$0xff]  }
 0xa30   :  { %16498 = vmatprep.subr.bf16.mxu1 %v23273_v21  ;;  %v23330_v21 = vld [vmem:[#allocation4 + $0x13d4] ss:$40 sps:$4 sm:$0xff]  }
 0xa31   :  { %16538 = vmatpush2.bf16.msra.mxu0 %v23268_v58  ;;  %v23325_v58 = vld [vmem:[#allocation4 + $0xed0] ss:$40 sps:$4 sm:$0xff]  }
 0xa32   :  { %16539 = vmatprep.subr.bf16.mxu0 %v23276_v54  ;;  %v23333_v54 = vld [vmem:[#allocation4 + $0xe84] ss:$40 sps:$4 sm:$0xff]  }
 0xa33   :  { %16499 = vmatpush2.bf16.msra.mxu1 %v23271_v62  ;;  %v23328_v62 = vld [vmem:[#allocation4 + $0x13d0] ss:$40 sps:$4 sm:$0xff]  }
 0xa34   :  { %16550 = vmatprep.subr.bf16.mxu1 %v23279_v11  ;;  %v23336_v11 = vld [vmem:[#allocation4 + $0x1384] ss:$40 sps:$4 sm:$0xff]  }
 0xa35   :  { %16540 = vmatpush2.bf16.msra.mxu0 %v23274_v26  ;;  %v23331_v26 = vld [vmem:[#allocation4 + $0xe80] ss:$40 sps:$4 sm:$0xff]  }
 0xa36   :  { %v16256_v20 = vpop.f32.mrf.mxu1  ;;  %16501 = vmatmul.mubr.bf16.vlgmr.msra.gmra.mxu1 %v23967_v59  ;;  %16591 = vmatprep.subr.bf16.mxu0 %v23282_v3  ;;  %v23286_v59 = vld [vmem:[#allocation4 + $0x1100] ss:$40 sps:$4 sm:$0xff]   ;;  %v23339_v3 = vld [vmem:[#allocation4 + $0xe34] ss:$40 sps:$4 sm:$0xff]  }
 0xa37   :  { %v16257_v22 = vadd.f32 %v16256_v20, %v24148_v60  ;;  %16551 = vmatpush1.bf16.msra.mxu1 %v23277_v12  ;;  %16582 = vmatprep.mubr.bf16.mxu1 %v24031_v37  ;;  %v23294_v60 = vld [vmem:[#allocation4 + $0x10b4] ss:$40 sps:$4 sm:$0xff]   ;;  %v23334_v12 = vld [vmem:[#allocation4 + $0x1380] ss:$40 sps:$4 sm:$0xff]   ;;  %v23345_v20 = vld [vmem:[#allocation4 + $0xde4] ss:$40 sps:$4 sm:$0xff]  }
 0xa38   :  { %v16258_v46 = vpop.f32.mrf.mxu1  ;;  %16542 = vmatmul.mubr.bf16.vlgmr.msra.gmra.mxu0 %v23993_v17  ;;  %16552 = vmatprep.subr.bf16.mxu1 %v23285_v25  ;;  %v24157_v0 = vpop.f32.mrf.mxu0  ;;  %v23289_v17 = vld [vmem:[#allocation4 + $0xbb0] ss:$40 sps:$4 sm:$0xff]   ;;  %v23342_v25 = vld [vmem:[#allocation4 + $0x1334] ss:$40 sps:$4 sm:$0xff]  }
 0xa39   :  { %v16677_v52 = vmax.f32 %v16257_v22, 0.0  ;;  %v16259_v27 = vadd.f32 %v16258_v46, %v24151_v55  ;;  %16592 = vmatpush1.bf16.msra.mxu0 %v23280_v32  ;;  %16623 = vmatprep.mubr.bf16.mxu0 %v24049_v49  ;;  %v23292_v55 = vld [vmem:[#allocation4 + $0x10b0] ss:$40 sps:$4 sm:$0xff]   ;;  %v23300_v49 = vld [vmem:[#allocation4 + $0x1064] ss:$40 sps:$4 sm:$0xff]  }
 0xa3a   :  { %v16260_v47 = vpop.f32.mrf.mxu1  ;;  %16593 = vmatprep.subr.bf16.mxu0 %v23288_v33  ;;  %v24161_v45 = vpop.f32.mrf.mxu0  ;;  %v23337_v32 = vld [vmem:[#allocation4 + $0xe30] ss:$40 sps:$4 sm:$0xff]   ;;  %v23348_v22 = vld [vmem:[#allocation4 + $0x12e4] ss:$40 sps:$4 sm:$0xff]   ;;  %v23351_v46 = vld [vmem:[#allocation4 + $0xd94] ss:$40 sps:$4 sm:$0xff]  }
 0xa3b   :  { %v24163_v37 = vpack.c.bf16 %v16677_v52, %v16677_v52  ;;  %v16678_v34 = vmax.f32 %v16259_v27, 0.0  ;;  %16553 = vmatpush1.bf16.msra.mxu1 %v23283_v23  ;;  %v23340_v33 = vld [vmem:[#allocation4 + $0x1330] ss:$40 sps:$4 sm:$0xff]   ;;  %v23343_v23 = vld [vmem:[#allocation4 + $0xde0] ss:$40 sps:$4 sm:$0xff]  }
 0xa3c   :  { %v16261_v51 = vpop.f32.mrf.mxu1  ;;  %16554 = vmatprep.subr.bf16.mxu1 %v23291_v28  ;;  %v16301_v16 = vpop.f32.mrf.mxu0  ;;  %v23346_v28 = vld [vmem:[#allocation4 + $0x12e0] ss:$40 sps:$4 sm:$0xff]   ;;  %v23354_v52 = vld [vmem:[#allocation4 + $0x1294] ss:$40 sps:$4 sm:$0xff]   ;;  %v23349_v27 = vld [vmem:[#allocation4 + $0xd90] ss:$40 sps:$4 sm:$0xff]  }
 0xa3d   :  { %v24165_v57 = vpack.c.bf16 %v16678_v34, %v16678_v34  ;;  %16594 = vmatpush1.bf16.msra.mxu0 %v23286_v59  ;;  %v23357_v59 = vld [vmem:[#allocation4 + $0xd44] ss:$40 sps:$4 sm:$0xff]   ;;  %v23352_v47 = vld [vmem:[#allocation4 + $0x1290] ss:$40 sps:$4 sm:$0xff]   ;;  %v23355_v34 = vld [vmem:[#allocation4 + $0xd40] ss:$40 sps:$4 sm:$0xff]  }
 0xa3e   :  { %16595 = vmatprep.subr.bf16.mxu0 %v23294_v60  ;;  %v16302_v41 = vpop.f32.mrf.mxu0  ;;  %v23360_v60 = vld [vmem:[#allocation4 + $0x1244] ss:$40 sps:$4 sm:$0xff]   ;;  %v23358_v51 = vld [vmem:[#allocation4 + $0x1240] ss:$40 sps:$4 sm:$0xff]   ;;  %v23361_v16 = vld [vmem:[#allocation4 + $0xcf0] ss:$40 sps:$4 sm:$0xff]  }
 0xa3f   :  { %16555 = vmatpush1.bf16.msra.mxu1 %v23289_v17  ;;  %v23363_v17 = vld [vmem:[#allocation4 + $0xcf4] ss:$40 sps:$4 sm:$0xff]   ;;  %v23372_v41 = vld [vmem:[#allocation4 + $0x11a4] ss:$40 sps:$4 sm:$0xff]  }
 0xa40   :  { %16556 = vmatprep.subr.bf16.mxu1 %v23297_v63  ;;  %v23366_v63 = vld [vmem:[#allocation4 + $0x11f4] ss:$40 sps:$4 sm:$0xff]  }
 0xa41   :  { %16596 = vmatpush1.bf16.msra.mxu0 %v23292_v55  ;;  %v23369_v55 = vld [vmem:[#allocation4 + $0xca4] ss:$40 sps:$4 sm:$0xff]  }
 0xa42   :  { %16597 = vmatprep.subr.bf16.mxu0 %v23300_v49  ;;  %v23364_v49 = vld [vmem:[#allocation4 + $0x11f0] ss:$40 sps:$4 sm:$0xff]  }
 0xa43   :  { %16557 = vmatpush1.bf16.msra.mxu1 %v23295_v48  ;;  %v23422_v48 = vld [vmem:[#allocation5] sm:$0xff] }
 0xa44   :  { %16558 = vmatprep.subr.bf16.mxu1 %v23303_v13  ;;  %v11625_v13 = vrot.slane %v23422_v48, %v23886_v18 }
 0xa45   :  { %16598 = vmatpush1.bf16.msra.mxu0 %v23298_v30  ;;  %v23367_v30 = vld [vmem:[#allocation4 + $0xca0] ss:$40 sps:$4 sm:$0xff]  }
 0xa46   :  { %16599 = vmatprep.subr.bf16.mxu0 %v23306_v10  ;;  %v23375_v10 = vld [vmem:[#allocation4 + $0x1654] ss:$40 sps:$4 sm:$0xff]  }
 0xa47   :  { %16559 = vmatpush1.bf16.msra.mxu1 %v23301_v15  ;;  %v11629_v15 = vrot.slane %v23422_v48, %v23889_v19 }
 0xa48   :  { %16560 = vmatprep.subr.bf16.mxu1 %v23309_v44  ;;  %v23370_v44 = vld [vmem:[#allocation4 + $0x11a0] ss:$40 sps:$4 sm:$0xff]  }
 0xa49   :  { %16600 = vmatpush1.bf16.msra.mxu0 %v23304_v50  ;;  %v16298_v50 = vadd.f32 %v24157_v0, %v11625_v13  ;;  %v23381_v0 = vld [vmem:[#allocation4 + $0x15b4] ss:$40 sps:$4 sm:$0xff]  }
 0xa4a   :  { %16601 = vmatprep.subr.bf16.mxu0 %v23312_v38  ;;  %v23373_v38 = vld [vmem:[#allocation4 + $0x1650] ss:$40 sps:$4 sm:$0xff]  }
 0xa4b   :  { %16561 = vmatpush1.bf16.msra.mxu1 %v23307_v31  ;;  %v23378_v31 = vld [vmem:[#allocation4 + $0x1604] ss:$40 sps:$4 sm:$0xff]  }
 0xa4c   :  { %16562 = vmatprep.subr.bf16.mxu1 %v23315_v53  ;;  %v16300_v53 = vadd.f32 %v24161_v45, %v11629_v15 }
 0xa4d   :  { %16602 = vmatpush1.bf16.msra.mxu0 %v23310_v61 }
 0xa4e   :  { %16603 = vmatprep.subr.bf16.mxu0 %v23318_v14  ;;  %v23376_v14 = vld [vmem:[#allocation4 + $0x1600] ss:$40 sps:$4 sm:$0xff]  }
 0xa4f   :  { %16563 = vmatpush1.bf16.msra.mxu1 %v23313_v1 }
 0xa50   :  { %16564 = vmatprep.subr.bf16.mxu1 %v23321_v6 }
 0xa51   :  { %16604 = vmatpush1.bf16.msra.mxu0 %v23316_v5 }
 0xa52   :  { %16605 = vmatprep.subr.bf16.mxu0 %v23324_v7 }
 0xa53   :  { %16565 = vmatpush1.bf16.msra.mxu1 %v23319_v24 }
 0xa54   :  { %16566 = vmatprep.subr.bf16.mxu1 %v23327_v4 }
 0xa55   :  { %16606 = vmatpush1.bf16.msra.mxu0 %v23322_v8  ;;  %v23384_v8 = vld [vmem:[#allocation4 + $0x1564] ss:$40 sps:$4 sm:$0xff]  }
 0xa56   :  { %16607 = vmatprep.subr.bf16.mxu0 %v23330_v21 }
 0xa57   :  { %16567 = vmatpush2.bf16.msra.mxu1 %v23325_v58  ;;  %v23382_v58 = vld [vmem:[#allocation4 + $0x1560] ss:$40 sps:$4 sm:$0xff]  }
 0xa58   :  { %16568 = vmatprep.subr.bf16.mxu1 %v23333_v54  ;;  %v23385_v54 = vld [vmem:[#allocation4 + $0x1510] ss:$40 sps:$4 sm:$0xff]  }
 0xa59   :  { %16608 = vmatpush2.bf16.msra.mxu0 %v23328_v62  ;;  %v23390_v62 = vld [vmem:[#allocation4 + $0x14c4] ss:$40 sps:$4 sm:$0xff]  }
 0xa5a   :  { %16609 = vmatprep.subr.bf16.mxu0 %v23336_v11  ;;  %v23388_v11 = vld [vmem:[#allocation4 + $0x14c0] ss:$40 sps:$4 sm:$0xff]  }
 0xa5b   :  { %16569 = vmatpush2.bf16.msra.mxu1 %v23331_v26  ;;  %v23393_v26 = vld [vmem:[#allocation4 + $0x1474] ss:$40 sps:$4 sm:$0xff]  }
 0xa5c   :  { %16570 = vmatprep.subr.bf16.mxu1 %v23339_v3  ;;  %v23391_v3 = vld [vmem:[#allocation4 + $0x1470] ss:$40 sps:$4 sm:$0xff]  }
 0xa5d   :  { %16610 = vmatpush2.bf16.msra.mxu0 %v23334_v12  ;;  %v23396_v12 = vld [vmem:[#allocation4 + $0x1424] ss:$40 sps:$4 sm:$0xff]  }
 0xa5e   :  { %16611 = vmatprep.subr.bf16.mxu0 %v23342_v25  ;;  %v23394_v25 = vld [vmem:[#allocation4 + $0x1420] ss:$40 sps:$4 sm:$0xff]  }
 0xa5f   :  { %16571 = vmatpush2.bf16.msra.mxu1 %v23337_v32  ;;  %v23399_v32 = vld [vmem:[#allocation4 + $0x18d4] ss:$40 sps:$4 sm:$0xff]  }
 0xa60   :  { %16572 = vmatprep.subr.bf16.mxu1 %v23345_v20  ;;  %v23397_v20 = vld [vmem:[#allocation4 + $0x18d0] ss:$40 sps:$4 sm:$0xff]  }
 0xa61   :  { %16612 = vmatpush2.bf16.msra.mxu0 %v23340_v33  ;;  %v23402_v33 = vld [vmem:[#allocation4 + $0x1884] ss:$40 sps:$4 sm:$0xff]  }
 0xa62   :  { %16613 = vmatprep.subr.bf16.mxu0 %v23348_v22  ;;  %v23400_v22 = vld [vmem:[#allocation4 + $0x1880] ss:$40 sps:$4 sm:$0xff]  }
 0xa63   :  { %16573 = vmatpush2.bf16.msra.mxu1 %v23343_v23  ;;  %v23405_v23 = vld [vmem:[#allocation4 + $0x1834] ss:$40 sps:$4 sm:$0xff]  }
 0xa64   :  { %16574 = vmatprep.subr.bf16.mxu1 %v23351_v46  ;;  %v23403_v46 = vld [vmem:[#allocation4 + $0x1830] ss:$40 sps:$4 sm:$0xff]  }
 0xa65   :  { %16614 = vmatpush2.bf16.msra.mxu0 %v23346_v28  ;;  %v23408_v28 = vld [vmem:[#allocation4 + $0x17e4] ss:$40 sps:$4 sm:$0xff]  }
 0xa66   :  { %16615 = vmatprep.subr.bf16.mxu0 %v23354_v52  ;;  %v23406_v52 = vld [vmem:[#allocation4 + $0x17e0] ss:$40 sps:$4 sm:$0xff]  }
 0xa67   :  { %16575 = vmatpush2.bf16.msra.mxu1 %v23349_v27  ;;  %v23411_v27 = vld [vmem:[#allocation4 + $0x1794] ss:$40 sps:$4 sm:$0xff]  }
 0xa68   :  { %16576 = vmatprep.subr.bf16.mxu1 %v23357_v59  ;;  %v23409_v59 = vld [vmem:[#allocation4 + $0x1790] ss:$40 sps:$4 sm:$0xff]  }
 0xa69   :  { %16616 = vmatpush2.bf16.msra.mxu0 %v23352_v47  ;;  %v23414_v47 = vld [vmem:[#allocation4 + $0x1744] ss:$40 sps:$4 sm:$0xff]  }
 0xa6a   :  { %16617 = vmatprep.subr.bf16.mxu0 %v23360_v60  ;;  %v23412_v60 = vld [vmem:[#allocation4 + $0x1740] ss:$40 sps:$4 sm:$0xff]  }
 0xa6b   :  { %16577 = vmatpush2.bf16.msra.mxu1 %v23355_v34  ;;  %v23417_v34 = vld [vmem:[#allocation4 + $0x16f4] ss:$40 sps:$4 sm:$0xff]  }
 0xa6c   :  { %16578 = vmatprep.subr.bf16.mxu1 %v23363_v17  ;;  %v23415_v17 = vld [vmem:[#allocation4 + $0x16f0] ss:$40 sps:$4 sm:$0xff]  }
 0xa6d   :  { %16618 = vmatpush2.bf16.msra.mxu0 %v23358_v51  ;;  %v23420_v51 = vld [vmem:[#allocation4 + $0x16a4] ss:$40 sps:$4 sm:$0xff]  }
 0xa6e   :  { %16619 = vmatprep.subr.bf16.mxu0 %v23366_v63  ;;  %v23418_v63 = vld [vmem:[#allocation4 + $0x16a0] ss:$40 sps:$4 sm:$0xff]  }
 0xa6f   :  { %16579 = vmatpush2.bf16.msra.mxu1 %v23361_v16 }
 0xa70   :  { %16580 = vmatprep.subr.bf16.mxu1 %v23369_v55 }
 0xa71   :  { %16620 = vmatpush2.bf16.msra.mxu0 %v23364_v49 }
 0xa72   :  { %16621 = vmatprep.subr.bf16.mxu0 %v23372_v41 }
 0xa73   :  { %16581 = vmatpush2.bf16.msra.mxu1 %v23367_v30 }
 0xa74   :  { %16632 = vmatprep.subr.bf16.mxu1 %v23375_v10 }
 0xa75   :  { %16622 = vmatpush2.bf16.msra.mxu0 %v23370_v44 }
 0xa76   :  { %v16338_v61 = vpop.f32.mrf.mxu1  ;;  %16583 = vmatmul.mubr.bf16.vlgmr.msra.gmra.mxu1 %v24029_v36  ;;  %v23379_v36 = vld [vmem:[#allocation4 + $0x15b0] ss:$40 sps:$4 sm:$0xff]  }
 0xa77   :  { %v16339_v18 = vadd.f32 %v16338_v61, %v16298_v50  ;;  %16633 = vmatpush1.bf16.msra.mxu1 %v23373_v38  ;;  %16664 = vmatprep.mubr.bf16.mxu1 %v24055_v29 }
 0xa78   :  { %v16340_v19 = vpop.f32.mrf.mxu1  ;;  %v16379_v1 = vpop.f32.mrf.mxu0  ;;  %16624 = vmatmul.mubr.bf16.vlgmr.msra.gmra.mxu0 %v24047_v43  ;;  %16634 = vmatprep.subr.bf16.mxu1 %v23378_v31  ;;  %v23387_v43 = vld [vmem:[#allocation4 + $0x1514] ss:$40 sps:$4 sm:$0xff]  }
 0xa79   :  { %v16341_v6 = vadd.f32 %v16340_v19, %v16300_v53  ;;  %v24174_v5 = vadd.f32 %v16379_v1, %v16339_v18 }
 0xa7a   :  { %v16342_v7 = vpop.f32.mrf.mxu1  ;;  %v16381_v45 = vpop.f32.mrf.mxu0 }
 0xa7b   :  { %v24176_v24 = vadd.f32 %v16381_v45, %v16341_v6  ;;  %16635 = vmatpush1.bf16.msra.mxu1 %v23376_v14 }
 0xa7c   :  { %v16343_v4 = vpop.f32.mrf.mxu1  ;;  %16636 = vmatprep.subr.bf16.mxu1 %v23381_v0  ;;  %v16383_v21 = vpop.f32.mrf.mxu0 }
 0xa7e   :  { %v16384_v29 = vpop.f32.mrf.mxu0 }
 0xa7f   :  { %16637 = vmatpush1.bf16.msra.mxu1 %v23379_v36 }
 0xa80   :  { %16638 = vmatprep.subr.bf16.mxu1 %v23384_v8 }
 0xa83   :  { %16639 = vmatpush1.bf16.msra.mxu1 %v23382_v58 }
 0xa84   :  { %16640 = vmatprep.subr.bf16.mxu1 %v23387_v43 }
 0xa87   :  { %16641 = vmatpush1.bf16.msra.mxu1 %v23385_v54 }
 0xa88   :  { %16642 = vmatprep.subr.bf16.mxu1 %v23390_v62 }
 0xa8b   :  { %16643 = vmatpush1.bf16.msra.mxu1 %v23388_v11 }
 0xa8c   :  { %16644 = vmatprep.subr.bf16.mxu1 %v23393_v26 }
 0xa8f   :  { %16645 = vmatpush1.bf16.msra.mxu1 %v23391_v3 }
 0xa90   :  { %16646 = vmatprep.subr.bf16.mxu1 %v23396_v12 }
 0xa93   :  { %16647 = vmatpush1.bf16.msra.mxu1 %v23394_v25 }
 0xa94   :  { %16648 = vmatprep.subr.bf16.mxu1 %v23399_v32 }
 0xa97   :  { %16649 = vmatpush2.bf16.msra.mxu1 %v23397_v20 }
 0xa98   :  { %16650 = vmatprep.subr.bf16.mxu1 %v23402_v33 }
 0xa9b   :  { %16651 = vmatpush2.bf16.msra.mxu1 %v23400_v22 }
 0xa9c   :  { %16652 = vmatprep.subr.bf16.mxu1 %v23405_v23 }
 0xa9f   :  { %16653 = vmatpush2.bf16.msra.mxu1 %v23403_v46 }
 0xaa0   :  { %16654 = vmatprep.subr.bf16.mxu1 %v23408_v28 }
 0xaa3   :  { %16655 = vmatpush2.bf16.msra.mxu1 %v23406_v52 }
 0xaa4   :  { %16656 = vmatprep.subr.bf16.mxu1 %v23411_v27 }
 0xaa7   :  { %16657 = vmatpush2.bf16.msra.mxu1 %v23409_v59 }
 0xaa8   :  { %16658 = vmatprep.subr.bf16.mxu1 %v23414_v47 }
 0xaab   :  { %16659 = vmatpush2.bf16.msra.mxu1 %v23412_v60 }
 0xaac   :  { %16660 = vmatprep.subr.bf16.mxu1 %v23417_v34 }
 0xaaf   :  { %16661 = vmatpush2.bf16.msra.mxu1 %v23415_v17 }
 0xab0   :  { %16662 = vmatprep.subr.bf16.mxu1 %v23420_v51 }
 0xab3   :  { %16663 = vmatpush2.bf16.msra.mxu1 %v23418_v63 }
 0xab6   :  { %v16420_v16 = vpop.f32.mrf.mxu1  ;;  %16665 = vmatmul.mubr.bf16.vlgmr.msra.gmra.mxu1 %v24053_v39  ;;  %v11595_v39 = vld [vmem:[#allocation5 + $0x8] sm:$0x3] }
 0xab7   :  { %v16421_v55 = vadd.f32 %v16420_v16, %v24174_v5  ;;  %v11633_v14 = vrot.slane %v11595_v39, %v23802_v35  ;;  %v11637_v19 = vrot.slane %v11595_v39, %v23805_v40 }
 0xab8   :  { %v16422_v49 = vpop.f32.mrf.mxu1  ;;  %v16461_v41 = vpop.f32.mrf.mxu0 }
 0xab9   :  { %v16423_v48 = vadd.f32 %v16422_v49, %v24176_v24  ;;  %v16462_v13 = vadd.f32 %v16461_v41, %v16421_v55 }
 0xaba   :  { %v16424_v30 = vpop.f32.mrf.mxu1  ;;  %v16463_v10 = vpop.f32.mrf.mxu0 }
 0xabb   :  { %v16679_v15 = vmax.f32 %v16462_v13, 0.0  ;;  %v16464_v44 = vadd.f32 %v16463_v10, %v16423_v48 }
 0xabc   :  { %v16425_v50 = vpop.f32.mrf.mxu1  ;;  %v16465_v38 = vpop.f32.mrf.mxu0 }
 0xabd   :  { %v24181_v31 = vpack.c.bf16 %v16679_v15, %v16679_v15  ;;  %v16680_v53 = vmax.f32 %v16464_v44, 0.0 }
 0xabe   :  { %v16466_v61 = vpop.f32.mrf.mxu0 }
 0xabf   :  { %v24183_v18 = vpack.c.bf16 %v16680_v53, %v16680_v53 }
 0xaf6   :  { %v16502_v1 = vpop.f32.mrf.mxu1 }
 0xaf7   :  { %v16503_v0 = vadd.f32 %v16502_v1, %v11633_v14 }
 0xaf8   :  { %v16504_v6 = vpop.f32.mrf.mxu1  ;;  %v16543_v5 = vpop.f32.mrf.mxu0 }
 0xaf9   :  { %v16505_v7 = vadd.f32 %v16504_v6, %v11637_v19  ;;  %v16544_v45 = vadd.f32 %v16543_v5, %v16503_v0 }
 0xafa   :  { %v16506_v24 = vpop.f32.mrf.mxu1  ;;  %v16545_v36 = vpop.f32.mrf.mxu0 }
 0xafb   :  { %v16546_v4 = vadd.f32 %v16545_v36, %v16505_v7 }
 0xafc   :  { %v16507_v8 = vpop.f32.mrf.mxu1  ;;  %v16547_v21 = vpop.f32.mrf.mxu0 }
 0xafe   :  { %v16548_v29 = vpop.f32.mrf.mxu0 }
 0xb36   :  { %v16584_v58 = vpop.f32.mrf.mxu1 }
 0xb37   :  { %v16585_v3 = vadd.f32 %v16584_v58, %v16544_v45 }
 0xb38   :  { %v16586_v43 = vpop.f32.mrf.mxu1  ;;  %v16625_v54 = vpop.f32.mrf.mxu0 }
 0xb39   :  { %v16587_v12 = vadd.f32 %v16586_v43, %v16546_v4  ;;  %v16626_v25 = vadd.f32 %v16625_v54, %v16585_v3 }
 0xb3a   :  { %v16588_v62 = vpop.f32.mrf.mxu1  ;;  %v16627_v11 = vpop.f32.mrf.mxu0 }
 0xb3b   :  { %v16628_v20 = vadd.f32 %v16627_v11, %v16587_v12 }
 0xb3c   :  { %v16589_v35 = vpop.f32.mrf.mxu1  ;;  %v16629_v26 = vpop.f32.mrf.mxu0 }
 0xb3e   :  { %v16630_v40 = vpop.f32.mrf.mxu0 }
 0xb76   :  { %v16666_v32 = vpop.f32.mrf.mxu1 }
 0xb77   :  { %v16667_v33 = vadd.f32 %v16666_v32, %v16626_v25 }
 0xb78   :  { %v16668_v22 = vpop.f32.mrf.mxu1 }
 0xb79   :  { %v16681_v23 = vmax.f32 %v16667_v33, 0.0  ;;  %v16669_v46 = vadd.f32 %v16668_v22, %v16628_v20 }
 0xb7a   :  { %v16670_v28 = vpop.f32.mrf.mxu1 }
 0xb7b   :  { %v24187_v52 = vpack.c.bf16 %v16681_v23, %v16681_v23  ;;  %v16682_v27 = vmax.f32 %v16669_v46, 0.0 }
 0xb7c   :  { %v16671_v59 = vpop.f32.mrf.mxu1 }
 0xb7d   :  { %v24189_v47 = vpack.c.bf16 %v16682_v27, %v16682_v27 }
 0xb7e   :  { %23675 = dma.done.wait [#allocation8 + $0x4], 10240 }
 0xb7f   :  { %23676 = vsyncadd [#allocation8 + $0x4], 4294957056 }
 0xb80   :  { %23677 = dma.done.wait [#allocation8 + $0x5], 16 }
 0xb81   :  { %23678 = vsyncadd [#allocation8 + $0x5], 4294967280  ;;  %17378 = vmatprep.mubr.bf16.mxu0 %v24103_v2  ;;  %17418 = vmatprep.mubr.bf16.mxu1 %v24129_v42  ;;  %v23423_v60 = vld [vmem:[#allocation6 + $0x78] sm:$0xff]   ;;  %v23427_v63 = vld [vmem:[#allocation6 + $0x70] sm:$0xff]  }
 0xb82   :  { %v23424_v34 = vld [vmem:[#allocation6 + $0x38] sm:$0xff]   ;;  %19929 = vmatprep.subr.bf16.mxu0 %v23423_v60  ;;  %v23428_v16 = vld [vmem:[#allocation6 + $0x30] sm:$0xff]   ;;  %v23431_v41 = vld [vmem:[#allocation6 + $0x68] sm:$0xff]  }
 0xb83   :  { %v23425_v17 = vld [vmem:[#allocation6 + $0xf8] sm:$0xff]   ;;  %19930 = vmatpush3.bf16.msra.mxu0 %v23424_v34  ;;  %v23429_v55 = vld [vmem:[#allocation6 + $0xf0] sm:$0xff]   ;;  %v23432_v2 = vld [vmem:[#allocation6 + $0x28] sm:$0xff]  }
 0xb84   :  { %v23426_v51 = vld [vmem:[#allocation6 + $0xb8] sm:$0xff]   ;;  %19951 = vmatprep.subr.bf16.mxu1 %v23425_v17  ;;  %19931 = vmatprep.subr.bf16.mxu0 %v23427_v63  ;;  %v23430_v49 = vld [vmem:[#allocation6 + $0xb0] sm:$0xff]   ;;  %v23433_v42 = vld [vmem:[#allocation6 + $0xe8] sm:$0xff]  }
 0xb85   :  { %19952 = vmatpush3.bf16.msra.mxu1 %v23426_v51  ;;  %v23434_v48 = vld [vmem:[#allocation6 + $0xa8] sm:$0xff]   ;;  %v23435_v13 = vld [vmem:[#allocation6 + $0x60] sm:$0xff]   ;;  %v23439_v44 = vld [vmem:[#allocation6 + $0x58] sm:$0xff]  }
 0xb86   :  { %19953 = vmatprep.subr.bf16.mxu1 %v23429_v55  ;;  %v23436_v30 = vld [vmem:[#allocation6 + $0x20] sm:$0xff]   ;;  %v23440_v50 = vld [vmem:[#allocation6 + $0x18] sm:$0xff]   ;;  %v23443_v61 = vld [vmem:[#allocation6 + $0x50] sm:$0xff]  }
 0xb87   :  { %19932 = vmatpush3.bf16.msra.mxu0 %v23428_v16  ;;  %v23437_v10 = vld [vmem:[#allocation6 + $0xe0] sm:$0xff]   ;;  %v23441_v38 = vld [vmem:[#allocation6 + $0xd8] sm:$0xff]   ;;  %v23444_v39 = vld [vmem:[#allocation6 + $0x10] sm:$0xff]  }
 0xb88   :  { %19933 = vmatprep.subr.bf16.mxu0 %v23431_v41  ;;  %v23438_v15 = vld [vmem:[#allocation6 + $0xa0] sm:$0xff]   ;;  %v23442_v53 = vld [vmem:[#allocation6 + $0x98] sm:$0xff]   ;;  %v23445_v14 = vld [vmem:[#allocation6 + $0xd0] sm:$0xff]  }
 0xb89   :  { %19954 = vmatpush3.bf16.msra.mxu1 %v23430_v49  ;;  %v23446_v19 = vld [vmem:[#allocation6 + $0x90] sm:$0xff]   ;;  %v23447_v1 = vld [vmem:[#allocation6 + $0x48] sm:$0xff]   ;;  %v23451_v7 = vld [vmem:[#allocation6 + $0x40] sm:$0xff]  }
 0xb8a   :  { %19955 = vmatprep.subr.bf16.mxu1 %v23433_v42  ;;  %v23448_v0 = vld [vmem:[#allocation6 + $0x8] sm:$0xff]   ;;  %v23452_v45 = vld [vmem:[#allocation6] sm:$0xff]   ;;  %v23455_v4 = vld [vmem:[#allocation6 + $0x178] sm:$0xff]  }
 0xb8b   :  { %19934 = vmatpush3.bf16.msra.mxu0 %v23432_v2  ;;  %v23449_v6 = vld [vmem:[#allocation6 + $0xc8] sm:$0xff]   ;;  %v23453_v24 = vld [vmem:[#allocation6 + $0xc0] sm:$0xff]   ;;  %v23456_v8 = vld [vmem:[#allocation6 + $0x138] sm:$0xff]  }
 0xb8c   :  { %19935 = vmatprep.subr.bf16.mxu0 %v23435_v13  ;;  %v23450_v5 = vld [vmem:[#allocation6 + $0x88] sm:$0xff]   ;;  %v23454_v36 = vld [vmem:[#allocation6 + $0x80] sm:$0xff]   ;;  %v23457_v21 = vld [vmem:[#allocation6 + $0x1f8] sm:$0xff]  }
 0xb8d   :  { %19956 = vmatpush3.bf16.msra.mxu1 %v23434_v48  ;;  %v23458_v29 = vld [vmem:[#allocation6 + $0x1b8] sm:$0xff]   ;;  %v23459_v58 = vld [vmem:[#allocation6 + $0x170] sm:$0xff]   ;;  %v23464_v11 = vld [vmem:[#allocation6 + $0x128] sm:$0xff]  }
 0xb8e   :  { %19957 = vmatprep.subr.bf16.mxu1 %v23437_v10  ;;  %v23460_v43 = vld [vmem:[#allocation6 + $0x130] sm:$0xff]   ;;  %v23465_v35 = vld [vmem:[#allocation6 + $0x1e8] sm:$0xff]   ;;  %v23468_v26 = vld [vmem:[#allocation6 + $0x120] sm:$0xff]  }
 0xb8f   :  { %19936 = vmatpush3.bf16.msra.mxu0 %v23436_v30  ;;  %v23461_v54 = vld [vmem:[#allocation6 + $0x1f0] sm:$0xff]   ;;  %v23469_v40 = vld [vmem:[#allocation6 + $0x1e0] sm:$0xff]   ;;  %v23471_v3 = vld [vmem:[#allocation6 + $0x158] sm:$0xff]  }
 0xb90   :  { %19937 = vmatprep.subr.bf16.mxu0 %v23439_v44  ;;  %v23462_v62 = vld [vmem:[#allocation6 + $0x1b0] sm:$0xff]   ;;  %v23472_v12 = vld [vmem:[#allocation6 + $0x118] sm:$0xff]   ;;  %v23479_v46 = vld [vmem:[#allocation6 + $0x148] sm:$0xff]  }
 0xb91   :  { %19958 = vmatpush3.bf16.msra.mxu1 %v23438_v15  ;;  %v23473_v25 = vld [vmem:[#allocation6 + $0x1d8] sm:$0xff]   ;;  %v23475_v20 = vld [vmem:[#allocation6 + $0x150] sm:$0xff]   ;;  %v23480_v28 = vld [vmem:[#allocation6 + $0x108] sm:$0xff]  }
 0xb92   :  { %19959 = vmatprep.subr.bf16.mxu1 %v23441_v38  ;;  %v23474_v32 = vld [vmem:[#allocation6 + $0x198] sm:$0xff]   ;;  %v23476_v33 = vld [vmem:[#allocation6 + $0x110] sm:$0xff]   ;;  %v23481_v27 = vld [vmem:[#allocation6 + $0x1c8] sm:$0xff]  }
 0xb93   :  { %19938 = vmatpush3.bf16.msra.mxu0 %v23440_v50  ;;  %v23477_v22 = vld [vmem:[#allocation6 + $0x1d0] sm:$0xff]   ;;  %v23482_v59 = vld [vmem:[#allocation6 + $0x188] sm:$0xff]   ;;  %v23483_v60 = vld [vmem:[#allocation6 + $0x140] sm:$0xff]  }
 0xb94   :  { %19939 = vmatprep.subr.bf16.mxu0 %v23443_v61  ;;  %v23478_v23 = vld [vmem:[#allocation6 + $0x190] sm:$0xff]   ;;  %v23484_v34 = vld [vmem:[#allocation6 + $0x100] sm:$0xff]   ;;  %v23487_v63 = vld [vmem:[#allocation6 + $0x278] sm:$0xff]  }
 0xb95   :  { %19960 = vmatpush3.bf16.msra.mxu1 %v23442_v53  ;;  %v23485_v17 = vld [vmem:[#allocation6 + $0x1c0] sm:$0xff]   ;;  %v23488_v16 = vld [vmem:[#allocation6 + $0x238] sm:$0xff]   ;;  %v23489_v55 = vld [vmem:[#allocation6 + $0x270] sm:$0xff]  }
 0xb96   :  { %19961 = vmatprep.subr.bf16.mxu1 %v23445_v14  ;;  %v23486_v51 = vld [vmem:[#allocation6 + $0x180] sm:$0xff]   ;;  %v23490_v49 = vld [vmem:[#allocation6 + $0x230] sm:$0xff]   ;;  %v23491_v41 = vld [vmem:[#allocation6 + $0x268] sm:$0xff]  }
 0xb97   :  { %19940 = vmatpush3.bf16.msra.mxu0 %v23444_v39  ;;  %v23492_v2 = vld [vmem:[#allocation6 + $0x228] sm:$0xff]   ;;  %v23493_v42 = vld [vmem:[#allocation6 + $0x260] sm:$0xff]   ;;  %v23495_v13 = vld [vmem:[#allocation6 + $0x258] sm:$0xff]  }
 0xb98   :  { %19941 = vmatprep.subr.bf16.mxu0 %v23447_v1  ;;  %v23494_v48 = vld [vmem:[#allocation6 + $0x220] sm:$0xff]   ;;  %v23497_v30 = vld [vmem:[#allocation6 + $0x250] sm:$0xff]  }
 0xb99   :  { %19962 = vmatpush3.bf16.msra.mxu1 %v23446_v19  ;;  %v23498_v10 = vld [vmem:[#allocation6 + $0x210] sm:$0xff]   ;;  %v23501_v15 = vld [vmem:[#allocation6 + $0x240] sm:$0xff]  }
 0xb9a   :  { %19963 = vmatprep.subr.bf16.mxu1 %v23449_v6  ;;  %v23502_v44 = vld [vmem:[#allocation6 + $0x200] sm:$0xff]  }
 0xb9b   :  { %19942 = vmatpush3.bf16.msra.mxu0 %v23448_v0 }
 0xb9c   :  { %19943 = vmatprep.subr.bf16.mxu0 %v23451_v7 }
 0xb9d   :  { %19964 = vmatpush3.bf16.msra.mxu1 %v23450_v5 }
 0xb9e   :  { %19965 = vmatprep.subr.bf16.mxu1 %v23453_v24 }
 0xb9f   :  { %19944 = vmatpush3.bf16.msra.mxu0 %v23452_v45 }
 0xba0   :  { %19973 = vmatprep.subr.bf16.mxu0 %v23455_v4 }
 0xba1   :  { %19966 = vmatpush3.bf16.msra.mxu1 %v23454_v36 }
 0xba2   :  { %17379 = vmatmul.mubr.bf16.vlgmr.msra.gmra.mxu0 %v24101_v9  ;;  %19995 = vmatprep.subr.bf16.mxu1 %v23457_v21  ;;  %v23463_v9 = vld [vmem:[#allocation6 + $0x168] sm:$0xff]   ;;  %v19842_v21 = vld [vmem:[#allocation7] ss:$0 sm:$0xff] }
 0xba3   :  { %19974 = vmatpush3.bf16.msra.mxu0 %v23456_v8  ;;  %17458 = vmatprep.mubr.bf16.mxu0 %v24165_v57  ;;  %v23466_v57 = vld [vmem:[#allocation6 + $0x1a8] sm:$0xff]  }
 0xba4   :  { %17419 = vmatmul.mubr.bf16.vlgmr.msra.gmra.mxu1 %v24127_v56  ;;  %19975 = vmatprep.subr.bf16.mxu0 %v23459_v58  ;;  %v23467_v56 = vld [vmem:[#allocation6 + $0x160] sm:$0xff]  }
 0xba5   :  { %19996 = vmatpush3.bf16.msra.mxu1 %v23458_v29  ;;  %17498 = vmatprep.mubr.bf16.mxu1 %v24183_v18  ;;  %v23470_v18 = vld [vmem:[#allocation6 + $0x1a0] sm:$0xff]  }
 0xba6   :  { %19997 = vmatprep.subr.bf16.mxu1 %v23461_v54 }
 0xba7   :  { %19976 = vmatpush3.bf16.msra.mxu0 %v23460_v43 }
 0xba8   :  { %19977 = vmatprep.subr.bf16.mxu0 %v23463_v9 }
 0xba9   :  { %19998 = vmatpush3.bf16.msra.mxu1 %v23462_v62 }
 0xbaa   :  { %19999 = vmatprep.subr.bf16.mxu1 %v23465_v35 }
 0xbab   :  { %19978 = vmatpush3.bf16.msra.mxu0 %v23464_v11 }
 0xbac   :  { %19979 = vmatprep.subr.bf16.mxu0 %v23467_v56 }
 0xbad   :  { %20000 = vmatpush3.bf16.msra.mxu1 %v23466_v57 }
 0xbae   :  { %20001 = vmatprep.subr.bf16.mxu1 %v23469_v40 }
 0xbaf   :  { %19980 = vmatpush3.bf16.msra.mxu0 %v23468_v26 }
 0xbb0   :  { %19981 = vmatprep.subr.bf16.mxu0 %v23471_v3 }
 0xbb1   :  { %20002 = vmatpush3.bf16.msra.mxu1 %v23470_v18 }
 0xbb2   :  { %20003 = vmatprep.subr.bf16.mxu1 %v23473_v25 }
 0xbb3   :  { %19982 = vmatpush3.bf16.msra.mxu0 %v23472_v12 }
 0xbb4   :  { %19983 = vmatprep.subr.bf16.mxu0 %v23475_v20 }
 0xbb5   :  { %20004 = vmatpush3.bf16.msra.mxu1 %v23474_v32 }
 0xbb6   :  { %20005 = vmatprep.subr.bf16.mxu1 %v23477_v22 }
 0xbb7   :  { %19984 = vmatpush3.bf16.msra.mxu0 %v23476_v33 }
 0xbb8   :  { %19985 = vmatprep.subr.bf16.mxu0 %v23479_v46 }
 0xbb9   :  { %20006 = vmatpush3.bf16.msra.mxu1 %v23478_v23 }
 0xbba   :  { %20007 = vmatprep.subr.bf16.mxu1 %v23481_v27 }
 0xbbb   :  { %19986 = vmatpush3.bf16.msra.mxu0 %v23480_v28 }
 0xbbc   :  { %19987 = vmatprep.subr.bf16.mxu0 %v23483_v60 }
 0xbbd   :  { %20008 = vmatpush3.bf16.msra.mxu1 %v23482_v59 }
 0xbbe   :  { %20009 = vmatprep.subr.bf16.mxu1 %v23485_v17 }
 0xbbf   :  { %19988 = vmatpush3.bf16.msra.mxu0 %v23484_v34 }
 0xbc0   :  { %20017 = vmatprep.subr.bf16.mxu0 %v23487_v63 }
 0xbc1   :  { %20010 = vmatpush3.bf16.msra.mxu1 %v23486_v51 }
 0xbc2   :  { %17459 = vmatmul.mubr.bf16.vlgmr.msra.gmra.mxu0 %v24163_v37  ;;  %v23496_v37 = vld [vmem:[#allocation6 + $0x218] sm:$0xff]  }
 0xbc3   :  { %20018 = vmatpush3.bf16.msra.mxu0 %v23488_v16  ;;  %17538 = vmatprep.mubr.bf16.mxu0 %v24189_v47  ;;  %v23499_v47 = vld [vmem:[#allocation6 + $0x248] sm:$0xff]  }
 0xbc4   :  { %17499 = vmatmul.mubr.bf16.vlgmr.msra.gmra.mxu1 %v24181_v31  ;;  %20019 = vmatprep.subr.bf16.mxu0 %v23489_v55  ;;  %v23500_v31 = vld [vmem:[#allocation6 + $0x208] sm:$0xff]  }
 0xbc7   :  { %20020 = vmatpush3.bf16.msra.mxu0 %v23490_v49 }
 0xbc8   :  { %20021 = vmatprep.subr.bf16.mxu0 %v23491_v41 }
 0xbcb   :  { %20022 = vmatpush3.bf16.msra.mxu0 %v23492_v2 }
 0xbcc   :  { %20023 = vmatprep.subr.bf16.mxu0 %v23493_v42 }
 0xbcf   :  { %20024 = vmatpush3.bf16.msra.mxu0 %v23494_v48 }
 0xbd0   :  { %20025 = vmatprep.subr.bf16.mxu0 %v23495_v13 }
 0xbd3   :  { %20026 = vmatpush3.bf16.msra.mxu0 %v23496_v37 }
 0xbd4   :  { %20027 = vmatprep.subr.bf16.mxu0 %v23497_v30 }
 0xbd7   :  { %20028 = vmatpush3.bf16.msra.mxu0 %v23498_v10 }
 0xbd8   :  { %20029 = vmatprep.subr.bf16.mxu0 %v23499_v47 }
 0xbdb   :  { %20030 = vmatpush3.bf16.msra.mxu0 %v23500_v31 }
 0xbdc   :  { %20031 = vmatprep.subr.bf16.mxu0 %v23501_v15 }
 0xbdf   :  { %20032 = vmatpush3.bf16.msra.mxu0 %v23502_v44 }
 0xbe2   :  { %17539 = vmatmul.mubr.bf16.vlgmr.msra.gmra.mxu0 %v24187_v52 }
 0xc62   :  { %v19945_v50 = vpop.f32.mrf.mxu0 }
 0xc64   :  { %v19946_v38 = vpop.f32.mrf.mxu0  ;;  %v19967_v53 = vpop.f32.mrf.mxu1 }
 0xc65   :  { %v19947_v8 = vadd.f32 %v19946_v38, %v19945_v50 }
 0xc66   :  { %v19948_v61 = vpop.f32.mrf.mxu0  ;;  %v19968_v39 = vpop.f32.mrf.mxu1 }
 0xc67   :  { %v17381_v29 = vadd.f32 %v19947_v8, %v19842_v21  ;;  %v19969_v52 = vadd.f32 %v19968_v39, %v19967_v53 }
 0xc68   :  { %v19949_v14 = vpop.f32.mrf.mxu0  ;;  %v19970_v19 = vpop.f32.mrf.mxu1 }
 0xc69   :  { %v17421_v43 = vadd.f32 %v19969_v52, %v17381_v29 }
 0xc6a   :  { %v19971_v1 = vpop.f32.mrf.mxu1 }
 0xc82   :  { %v19989_v0 = vpop.f32.mrf.mxu0 }
 0xc84   :  { %v19990_v6 = vpop.f32.mrf.mxu0  ;;  %v20011_v5 = vpop.f32.mrf.mxu1 }
 0xc85   :  { %v19991_v58 = vadd.f32 %v19990_v6, %v19989_v0 }
 0xc86   :  { %v19992_v7 = vpop.f32.mrf.mxu0  ;;  %v20012_v45 = vpop.f32.mrf.mxu1 }
 0xc87   :  { %v17461_v54 = vadd.f32 %v19991_v58, %v17421_v43  ;;  %v20013_v62 = vadd.f32 %v20012_v45, %v20011_v5 }
 0xc88   :  { %v19993_v24 = vpop.f32.mrf.mxu0  ;;  %v20014_v36 = vpop.f32.mrf.mxu1 }
 0xc89   :  { %v17501_v35 = vadd.f32 %v20013_v62, %v17461_v54 }
 0xc8a   :  { %v20015_v4 = vpop.f32.mrf.mxu1 }
 0xca2   :  { %v20033_v9 = vpop.f32.mrf.mxu0 }
 0xca4   :  { %v20034_v11 = vpop.f32.mrf.mxu0 }
 0xca5   :  { %v20035_v57 = vadd.f32 %v20034_v11, %v20033_v9 }
 0xca6   :  { %v20036_v56 = vpop.f32.mrf.mxu0 }
 0xca7   :  { %v17541_v26 = vadd.f32 %v20035_v57, %v17501_v35 }
 0xca8   :  { %v20037_v40 = vpop.f32.mrf.mxu0 }
 0xca9   :  { %17546 = vst [vmem:[%s24213_s9] sm:$0xff] %v17541_v26 }
 0xcaa   :  { %17551 = vsyncpa [#allocation10], 1 }
 0xcab   :  { %17552 = vsyncpa [#allocation12], 1 }
 0xcac   :  { %17553 = vsyncmov [#allocation8] }
 0xcaf   :  { %s17554_s28 = vpop.sfrf %17553 }
 0xcb0   :  { %p19923_p12 = scmp.ne.s32.totalorder %s17554_s28, 0 }
 0xcb2   :  { %17558 = shalt.err (%p19923_p12)  }
 0xcb3   :  { %17560 = vsyncmov [#allocation8 + $0x1] }
 0xcb6   :  { %s17561_s29 = vpop.sfrf %17560 }
 0xcb7   :  { %p19924_p13 = scmp.ne.s32.totalorder %s17561_s29, 0 }
 0xcb9   :  { %17565 = shalt.err (%p19924_p13)  }
 0xcba   :  { %17567 = vsyncmov [#allocation8 + $0x2] }
 0xcbd   :  { %s17568_s30 = vpop.sfrf %17567 }
 0xcbe   :  { %p19925_p0 = scmp.ne.s32.totalorder %s17568_s30, 0 }
 0xcc0   :  { %17572 = shalt.err (%p19925_p0)  }
 0xcc1   :  { %17574 = vsyncmov [#allocation8 + $0x3] }
 0xcc4   :  { %s17575_s10 = vpop.sfrf %17574 }
 0xcc5   :  { %p19926_p1 = scmp.ne.s32.totalorder %s17575_s10, 0 }
 0xcc7   :  { %17579 = shalt.err (%p19926_p1)  }
 0xcc8   :  { %17581 = vsyncmov [#allocation8 + $0x4] }
 0xccb   :  { %s17582_s9 = vpop.sfrf %17581 }
 0xccc   :  { %p19927_p2 = scmp.ne.s32.totalorder %s17582_s9, 0 }
 0xcce   :  { %17586 = shalt.err (%p19927_p2)  }
 0xccf   :  { %17588 = vsyncmov [#allocation8 + $0x5] }
 0xcd2   :  { %s17589_s11 = vpop.sfrf %17588 }
 0xcd3   :  { %p19928_p3 = scmp.ne.s32.totalorder %s17589_s11, 0 }
 0xcd5   :  { %17593 = shalt.err (%p19928_p3)  }

</bundles_post_ra>
